<compile_context>
chip_gen: v7x
topology: tpu7x:2x2x1
jax: 0.10.0
libtpu: 0.0.40
codegen_flags: <defaults>
</compile_context>

<pallas_src>
import numpy as np

import jax
import jax.numpy as jnp
from jax.experimental import pallas as pl
from jax.experimental.pallas import tpu as pltpu


# Tap order matches the (3,3) kernel reshape: t = (oy+1)*3 + (ox+1).
_OFFS = ((-1, -1), (-1, 0), (-1, 1),
         (0, -1),  (0, 0),  (0, 1),
         (1, -1),  (1, 0),  (1, 1))


# --------------------------- constant helper matrices ---------------------------

def _tap_masks(Hs, Ws):
    """(9, 1, HW) f32: 1 where the tap's source pixel lies inside the image (pad=1)."""
    n = Hs * Ws
    m = np.zeros((9, 1, n), np.float32)
    for t, (oy, ox) in enumerate(_OFFS):
        for i in range(Hs):
            for j in range(Ws):
                if 0 <= i + oy < Hs and 0 <= j + ox < Ws:
                    m[t, 0, i * Ws + j] = 1.0
    return jnp.asarray(m)


def _shift_mats(Hs, Ws):
    """(9, HW, HW) bf16 one-hot right-multiply shifts: (x @ S_t)[:, p] = x[:, p+d_t]."""
    n = Hs * Ws
    m = np.zeros((9, n, n), np.float32)
    for t, (oy, ox) in enumerate(_OFFS):
        for i in range(Hs):
            for j in range(Ws):
                si, sj = i + oy, j + ox
                if 0 <= si < Hs and 0 <= sj < Ws:
                    m[t, si * Ws + sj, i * Ws + j] = 1.0
    return jnp.asarray(m, dtype=jnp.bfloat16)


def _dec_mat(Hs, Ws):
    """(HW, HW/4) bf16 one-hot decimation: (x @ D)[:, i*Wo+j] = x[:, (2i)*Ws + 2j]."""
    Ho, Wo = Hs // 2, Ws // 2
    m = np.zeros((Hs * Ws, Ho * Wo), np.float32)
    for i in range(Ho):
        for j in range(Wo):
            m[(2 * i) * Ws + 2 * j, i * Wo + j] = 1.0
    return jnp.asarray(m, dtype=jnp.bfloat16)


def _scatter_mats(Hs, Ws):
    """(4, HW, 4*HW) bf16 sub-pixel scatter: (y @ Q_k)[:, (2i+dy)*2Ws + 2j+dx] = y[:, i*Ws+j]."""
    n = Hs * Ws
    Wo = 2 * Ws
    m = np.zeros((4, n, 4 * n), np.float32)
    for dy in range(2):
        for dx in range(2):
            k = dy * 2 + dx
            for i in range(Hs):
                for j in range(Ws):
                    m[k, i * Ws + j, (2 * i + dy) * Wo + (2 * j + dx)] = 1.0
    return jnp.asarray(m, dtype=jnp.bfloat16)


def build_constants(H, W):
    return (
        _tap_masks(H, W),                 # msk0: border masks for roll-based taps @16x16
        _shift_mats(H // 2, W // 2),      # s1:   bf16 one-hot taps @8x8
        _shift_mats(H // 4, W // 4),      # s2:   bf16 one-hot taps @4x4
        _dec_mat(H, W),                   # d0:   maxpool decimation 16x16 -> 8x8
        _dec_mat(H // 2, W // 2),         # d1:   maxpool decimation 8x8  -> 4x4
        _scatter_mats(H // 4, W // 4),    # q1:   tconv scatter 4x4 -> 8x8
        _scatter_mats(H // 2, W // 2),    # q2:   tconv scatter 8x8 -> 16x16
    )


# --------------------------- fused forward kernel ---------------------------

def _make_fused_kernel(H, W):
    HW0 = H * W
    W0 = W

    def kernel(x_ref,
               msk0, s1, s2, d0, d1, q1, q2,
               wp, bp, wi, ti,
               w11, t11, w12, t12, w21, t21, w22, t22,
               wt1, bt1, wa1u, wa1s, ta1, wb1, tb1,
               wt2, bt2, wa2u, wa2s, ta2, wb2, tb2,
               wf, bfin,
               o_ref):

        # ---- per-level "shifted tap" extractors (spatial axis = lane axis) ----
        def tap0(x, t):
            # 16x16 level: XLU lane roll + VPU border mask (no MXU work).
            oy, ox = _OFFS[t]
            if oy == 0 and ox == 0:
                return x
            shift = (-(oy * W0 + ox)) % HW0
            return pltpu.roll(x, shift, axis=1) * msk0[t]

        def tap_mat(s_ref):
            # tiny 8x8 / 4x4 levels: bf16 one-hot shift matmul (negligible FLOPs).
            def tap(x, t):
                if _OFFS[t] == (0, 0):
                    return x
                return jnp.dot(x.astype(jnp.bfloat16), s_ref[t],
                               preferred_element_type=jnp.float32)
            return tap

        tap1 = tap_mat(s1)
        tap2 = tap_mat(s2)

        # ---- fused Conv3x3 (accumulate form) -> bias -> ReLU -> eval BatchNorm ----
        def conv_bn_relu(inputs, t_ref, tap):
            # inputs: list of (x, w_ref) with x (cin_i, HW) f32 and w_ref (9, cout, cin_i)
            acc = None
            for t in range(9):
                for x, w_ref in inputs:
                    xt = tap(x, t).astype(jnp.bfloat16)
                    y = jnp.dot(w_ref[t], xt, preferred_element_type=jnp.float32)
                    acc = y if acc is None else acc + y
            p = t_ref[...]                              # (cout, 3): bias / scale / shift
            y = jnp.maximum(acc + p[:, 0:1], 0.0)
            return y * p[:, 1:2] + p[:, 2:3]

        # ---- MaxPool2d(2): window max via shifts, compact via ONE bf16 dot ----
        def maxpool(x, tap, dec_ref):
            wm = jnp.maximum(x, tap(x, 5))              # neighbour (0,+1)
            wm = jnp.maximum(wm, tap(wm, 7))            # neighbour (+1,0)
            return jnp.dot(wm.astype(jnp.bfloat16), dec_ref[...],
                           preferred_element_type=jnp.float32)

        # ---- ConvTranspose2d(k=2, s=2): 4 bf16 sub-pixel dots + bf16 scatter ----
        def tconv(x, wt_ref, bt_ref, q_ref):
            xb = x.astype(jnp.bfloat16)
            out = None
            for k in range(4):
                y = jnp.dot(wt_ref[k], xb, preferred_element_type=jnp.float32)
                s = jnp.dot(y.astype(jnp.bfloat16), q_ref[k],
                            preferred_element_type=jnp.float32)
                out = s if out is None else out + s
            return out + bt_ref[...]

        # -------------------------------- forward --------------------------------
        x0 = x_ref[0]                                                # (in_dim, HW0) f32

        # Frozen unet/san stand-ins merged into one 1x1 projection (see TODO at top);
        # the channel-concat of the two predictions is the row-stacked weight.
        comb = jnp.dot(wp[...], x0.astype(jnp.bfloat16),
                       preferred_element_type=jnp.float32) + bp[...]  # (2*ncls, HW0)

        # init_conv: Conv3x3 -> ReLU -> BN
        x1 = conv_bn_relu([(comb, wi)], ti, tap0)                     # (b, HW0)

        # down1: MaxPool -> Conv/ReLU/BN -> (Dropout2d = id) -> Conv/ReLU/BN
        h = maxpool(x1, tap0, d0)                                     # (b, HW0/4)
        h = conv_bn_relu([(h, w11)], t11, tap1)                       # (2b, HW0/4)
        x2 = conv_bn_relu([(h, w12)], t12, tap1)                      # (2b, HW0/4)

        # down2
        h = maxpool(x2, tap1, d1)                                     # (2b, HW0/16)
        h = conv_bn_relu([(h, w21)], t21, tap2)                       # (4b, HW0/16)
        x3 = conv_bn_relu([(h, w22)], t22, tap2)                      # (4b, HW0/16)

        # up1: ConvTranspose -> cat([up, x2]) fused via split-weight accumulation
        u = tconv(x3, wt1, bt1, q1)                                   # (2b, HW0/4)
        h = conv_bn_relu([(u, wa1u), (x2, wa1s)], ta1, tap1)          # (2b, HW0/4)
        h = conv_bn_relu([(h, wb1)], tb1, tap1)                       # (2b, HW0/4)

        # up2: ConvTranspose -> cat([up, x1]) fused via split-weight accumulation
        u = tconv(h, wt2, bt2, q2)                                    # (b, HW0)
        h = conv_bn_relu([(u, wa2u), (x1, wa2s)], ta2, tap0)          # (b, HW0)
        h = conv_bn_relu([(h, wb2)], tb2, tap0)                       # (b, HW0)

        # final 1x1 conv
        out = jnp.dot(wf[...], h.astype(jnp.bfloat16),
                      preferred_element_type=jnp.float32) + bfin[...]  # (ncls, HW0)
        o_ref[0] = out.astype(o_ref.dtype)

    return kernel


# --------------------------- pallas_call wrapper ---------------------------

def combined_forward(x, consts, params):
    B, H, W, in_dim = x.shape
    HW = H * W
    ncls = params[-1].shape[0]                      # final bias (num_classes, 1)

    # Layout plumbing lives in the wrapper (cheap XLA ops), not in the kernel:
    x_chw = jnp.transpose(x, (0, 3, 1, 2)).reshape(B, in_dim, HW)

    inputs = (x_chw,) + tuple(consts) + tuple(params)
    in_specs = [pl.BlockSpec((1, in_dim, HW), lambda b: (b, 0, 0))]
    in_specs += [pl.BlockSpec(a.shape, (lambda b, _z=(0,) * a.ndim: _z))
                 for a in inputs[1:]]

    out = pl.pallas_call(
        _make_fused_kernel(H, W),
        out_shape=jax.ShapeDtypeStruct((B, ncls, HW), jnp.float32),
        grid=(B,),
        in_specs=in_specs,
        out_specs=pl.BlockSpec((1, ncls, HW), lambda b: (b, 0, 0)),
        compiler_params=pltpu.CompilerParams(
            dimension_semantics=("parallel",),      # batch shards across v7x's 2 TCs
            vmem_limit_bytes=16 * 1024 * 1024,      # actual footprint ~2 MiB
        ),
    )(*inputs)

    return out.reshape(B, ncls, H, W).transpose(0, 2, 3, 1)   # (B, H, W, num_classes)


# --------------------------- deterministic parameters ---------------------------

def _conv_bn_packed(key, cin, cout):
    """Conv3x3 weight packed per tap as (9, cout, cin) bf16 + (cout, 3) [bias|scale|shift]."""
    k = jax.random.split(key, 6)
    w = jax.random.normal(k[0], (3, 3, cin, cout), jnp.float32) / np.sqrt(9 * cin)
    b = 0.01 * jax.random.normal(k[1], (cout,), jnp.float32)
    gamma = 1.0 + 0.1 * jax.random.normal(k[2], (cout,), jnp.float32)
    beta = 0.1 * jax.random.normal(k[3], (cout,), jnp.float32)
    mean = 0.1 * jax.random.normal(k[4], (cout,), jnp.float32)
    var = 0.5 + jnp.abs(jax.random.normal(k[5], (cout,), jnp.float32))
    scale = gamma / jnp.sqrt(var + 1e-5)
    shift = beta - mean * scale
    w9 = jnp.transpose(w.reshape(9, cin, cout), (0, 2, 1)).astype(jnp.bfloat16)
    t = jnp.stack([b, scale, shift], axis=1)        # (cout, 3)
    return w9, t


def _conv_bn_packed_split(key, c_up, c_skip, cout):
    """Same, but cin split as [upsampled | skip] so the channel concat is fused away."""
    w9, t = _conv_bn_packed(key, c_up + c_skip, cout)
    return w9[:, :, :c_up], w9[:, :, c_up:], t


def _tconv_packed(key, cin, cout):
    """ConvTranspose2d(k=2,s=2) weight as (4, cout, cin) bf16 (tap = dy*2+dx) + (cout,1) bias."""
    k1, k2 = jax.random.split(key)
    w = jax.random.normal(k1, (2, 2, cin, cout), jnp.float32) / np.sqrt(4 * cin)
    b = 0.01 * jax.random.normal(k2, (cout,), jnp.float32)
    w4 = jnp.transpose(w.reshape(4, cin, cout), (0, 2, 1)).astype(jnp.bfloat16)
    return w4, b.reshape(cout, 1)


def init_params(key, in_dim, ncls, base):
    ks = jax.random.split(key, 16)
    # frozen U-Net / SAN stand-ins (merged 1x1 projection)
    wu = jax.random.normal(ks[0], (ncls, in_dim), jnp.float32) / np.sqrt(in_dim)
    bu = 0.01 * jax.random.normal(ks[1], (ncls,), jnp.float32)
    ws = jax.random.normal(ks[2], (ncls, in_dim), jnp.float32) / np.sqrt(in_dim)
    bs = 0.01 * jax.random.normal(ks[3], (ncls,), jnp.float32)
    wp = jnp.concatenate([wu, ws], axis=0).astype(jnp.bfloat16)     # (2*ncls, in_dim)
    bp = jnp.concatenate([bu, bs]).reshape(2 * ncls, 1)

    wi, ti = _conv_bn_packed(ks[4], 2 * ncls, base)
    w11, t11 = _conv_bn_packed(ks[5], base, 2 * base)
    w12, t12 = _conv_bn_packed(ks[6], 2 * base, 2 * base)
    w21, t21 = _conv_bn_packed(ks[7], 2 * base, 4 * base)
    w22, t22 = _conv_bn_packed(ks[8], 4 * base, 4 * base)
    wt1, bt1 = _tconv_packed(ks[9], 4 * base, 2 * base)
    wa1u, wa1s, ta1 = _conv_bn_packed_split(ks[10], 2 * base, 2 * base, 2 * base)
    wb1, tb1 = _conv_bn_packed(ks[11], 2 * base, 2 * base)
    wt2, bt2 = _tconv_packed(ks[12], 2 * base, base)
    wa2u, wa2s, ta2 = _conv_bn_packed_split(ks[13], base, base, base)
    wb2, tb2 = _conv_bn_packed(ks[14], base, base)
    wf = (jax.random.normal(ks[15], (ncls, base), jnp.float32) / np.sqrt(base)
          ).astype(jnp.bfloat16)
    bfin = jnp.zeros((ncls, 1), jnp.float32)
    return (wp, bp, wi, ti, w11, t11, w12, t12, w21, t21, w22, t22,
            wt1, bt1, wa1u, wa1s, ta1, wb1, tb1, wt2, bt2, wa2u, wa2s, ta2, wb2, tb2,
            wf, bfin)


# --------------------------- main ---------------------------

if __name__ == "__main__":
    key = jax.random.PRNGKey(0)
    k_params, k_x = jax.random.split(key)

    B, H, W, in_dim = 2, 16, 16, 4
    num_classes = 4
    base_channels = 16

    consts = build_constants(H, W)
    params = init_params(k_params, in_dim, num_classes, base_channels)
    x = jax.random.normal(k_x, (B, H, W, in_dim), jnp.float32)  # (B, H, W, C) as in the module

    out = combined_forward(x, consts, params)
    out = jax.block_until_ready(out)

    assert out.shape == (B, H, W, num_classes), out.shape
    assert bool(jnp.all(jnp.isfinite(out)))
    print("KERNEL_OK")
</pallas_src>

<mosaic_0001>
module attributes {stable_mosaic.version = 11 : i64} {
  func.func @kernel(%arg0: i32, %arg1: memref<1x4x256xf32, #tpu.memory_space<vmem>>, %arg2: memref<9x1x256xf32, #tpu.memory_space<vmem>>, %arg3: memref<9x64x64xbf16, #tpu.memory_space<vmem>>, %arg4: memref<9x16x16xbf16, #tpu.memory_space<vmem>>, %arg5: memref<256x64xbf16, #tpu.memory_space<vmem>>, %arg6: memref<64x16xbf16, #tpu.memory_space<vmem>>, %arg7: memref<4x16x64xbf16, #tpu.memory_space<vmem>>, %arg8: memref<4x64x256xbf16, #tpu.memory_space<vmem>>, %arg9: memref<8x4xbf16, #tpu.memory_space<vmem>>, %arg10: memref<8x1xf32, #tpu.memory_space<vmem>>, %arg11: memref<9x16x8xbf16, #tpu.memory_space<vmem>>, %arg12: memref<16x3xf32, #tpu.memory_space<vmem>>, %arg13: memref<9x32x16xbf16, #tpu.memory_space<vmem>>, %arg14: memref<32x3xf32, #tpu.memory_space<vmem>>, %arg15: memref<9x32x32xbf16, #tpu.memory_space<vmem>>, %arg16: memref<32x3xf32, #tpu.memory_space<vmem>>, %arg17: memref<9x64x32xbf16, #tpu.memory_space<vmem>>, %arg18: memref<64x3xf32, #tpu.memory_space<vmem>>, %arg19: memref<9x64x64xbf16, #tpu.memory_space<vmem>>, %arg20: memref<64x3xf32, #tpu.memory_space<vmem>>, %arg21: memref<4x32x64xbf16, #tpu.memory_space<vmem>>, %arg22: memref<32x1xf32, #tpu.memory_space<vmem>>, %arg23: memref<9x32x32xbf16, #tpu.memory_space<vmem>>, %arg24: memref<9x32x32xbf16, #tpu.memory_space<vmem>>, %arg25: memref<32x3xf32, #tpu.memory_space<vmem>>, %arg26: memref<9x32x32xbf16, #tpu.memory_space<vmem>>, %arg27: memref<32x3xf32, #tpu.memory_space<vmem>>, %arg28: memref<4x16x32xbf16, #tpu.memory_space<vmem>>, %arg29: memref<16x1xf32, #tpu.memory_space<vmem>>, %arg30: memref<9x16x16xbf16, #tpu.memory_space<vmem>>, %arg31: memref<9x16x16xbf16, #tpu.memory_space<vmem>>, %arg32: memref<16x3xf32, #tpu.memory_space<vmem>>, %arg33: memref<9x16x16xbf16, #tpu.memory_space<vmem>>, %arg34: memref<16x3xf32, #tpu.memory_space<vmem>>, %arg35: memref<4x16xbf16, #tpu.memory_space<vmem>>, %arg36: memref<4x1xf32, #tpu.memory_space<vmem>>, %arg37: memref<1x4x256xf32, #tpu.memory_space<vmem>>) attributes {dimension_semantics = [#tpu.dimension_semantics<parallel>], iteration_bounds = array<i64: 2>, scalar_prefetch = 0 : i64, scratch_operands = 0 : i64, tpu.core_type = #tpu.core_type<tc>, window_params = [{transform_indices = @transform_0, window_bounds = array<i64: 1, 4, 256>}, {pipeline_mode = #tpu.pipeline_mode<synchronous>, transform_indices = @transform_1, window_bounds = array<i64: 9, 1, 256>}, {pipeline_mode = #tpu.pipeline_mode<synchronous>, transform_indices = @transform_2, window_bounds = array<i64: 9, 64, 64>}, {pipeline_mode = #tpu.pipeline_mode<synchronous>, transform_indices = @transform_3, window_bounds = array<i64: 9, 16, 16>}, {pipeline_mode = #tpu.pipeline_mode<synchronous>, transform_indices = @transform_4, window_bounds = array<i64: 256, 64>}, {pipeline_mode = #tpu.pipeline_mode<synchronous>, transform_indices = @transform_5, window_bounds = array<i64: 64, 16>}, {pipeline_mode = #tpu.pipeline_mode<synchronous>, transform_indices = @transform_6, window_bounds = array<i64: 4, 16, 64>}, {pipeline_mode = #tpu.pipeline_mode<synchronous>, transform_indices = @transform_7, window_bounds = array<i64: 4, 64, 256>}, {pipeline_mode = #tpu.pipeline_mode<synchronous>, transform_indices = @transform_8, window_bounds = array<i64: 8, 4>}, {pipeline_mode = #tpu.pipeline_mode<synchronous>, transform_indices = @transform_9, window_bounds = array<i64: 8, 1>}, {pipeline_mode = #tpu.pipeline_mode<synchronous>, transform_indices = @transform_10, window_bounds = array<i64: 9, 16, 8>}, {pipeline_mode = #tpu.pipeline_mode<synchronous>, transform_indices = @transform_11, window_bounds = array<i64: 16, 3>}, {pipeline_mode = #tpu.pipeline_mode<synchronous>, transform_indices = @transform_12, window_bounds = array<i64: 9, 32, 16>}, {pipeline_mode = #tpu.pipeline_mode<synchronous>, transform_indices = @transform_13, window_bounds = array<i64: 32, 3>}, {pipeline_mode = #tpu.pipeline_mode<synchronous>, transform_indices = @transform_14, window_bounds = array<i64: 9, 32, 32>}, {pipeline_mode = #tpu.pipeline_mode<synchronous>, transform_indices = @transform_15, window_bounds = array<i64: 32, 3>}, {pipeline_mode = #tpu.pipeline_mode<synchronous>, transform_indices = @transform_16, window_bounds = array<i64: 9, 64, 32>}, {pipeline_mode = #tpu.pipeline_mode<synchronous>, transform_indices = @transform_17, window_bounds = array<i64: 64, 3>}, {pipeline_mode = #tpu.pipeline_mode<synchronous>, transform_indices = @transform_18, window_bounds = array<i64: 9, 64, 64>}, {pipeline_mode = #tpu.pipeline_mode<synchronous>, transform_indices = @transform_19, window_bounds = array<i64: 64, 3>}, {pipeline_mode = #tpu.pipeline_mode<synchronous>, transform_indices = @transform_20, window_bounds = array<i64: 4, 32, 64>}, {pipeline_mode = #tpu.pipeline_mode<synchronous>, transform_indices = @transform_21, window_bounds = array<i64: 32, 1>}, {pipeline_mode = #tpu.pipeline_mode<synchronous>, transform_indices = @transform_22, window_bounds = array<i64: 9, 32, 32>}, {pipeline_mode = #tpu.pipeline_mode<synchronous>, transform_indices = @transform_23, window_bounds = array<i64: 9, 32, 32>}, {pipeline_mode = #tpu.pipeline_mode<synchronous>, transform_indices = @transform_24, window_bounds = array<i64: 32, 3>}, {pipeline_mode = #tpu.pipeline_mode<synchronous>, transform_indices = @transform_25, window_bounds = array<i64: 9, 32, 32>}, {pipeline_mode = #tpu.pipeline_mode<synchronous>, transform_indices = @transform_26, window_bounds = array<i64: 32, 3>}, {pipeline_mode = #tpu.pipeline_mode<synchronous>, transform_indices = @transform_27, window_bounds = array<i64: 4, 16, 32>}, {pipeline_mode = #tpu.pipeline_mode<synchronous>, transform_indices = @transform_28, window_bounds = array<i64: 16, 1>}, {pipeline_mode = #tpu.pipeline_mode<synchronous>, transform_indices = @transform_29, window_bounds = array<i64: 9, 16, 16>}, {pipeline_mode = #tpu.pipeline_mode<synchronous>, transform_indices = @transform_30, window_bounds = array<i64: 9, 16, 16>}, {pipeline_mode = #tpu.pipeline_mode<synchronous>, transform_indices = @transform_31, window_bounds = array<i64: 16, 3>}, {pipeline_mode = #tpu.pipeline_mode<synchronous>, transform_indices = @transform_32, window_bounds = array<i64: 9, 16, 16>}, {pipeline_mode = #tpu.pipeline_mode<synchronous>, transform_indices = @transform_33, window_bounds = array<i64: 16, 3>}, {pipeline_mode = #tpu.pipeline_mode<synchronous>, transform_indices = @transform_34, window_bounds = array<i64: 4, 16>}, {pipeline_mode = #tpu.pipeline_mode<synchronous>, transform_indices = @transform_35, window_bounds = array<i64: 4, 1>}, {transform_indices = @transform_36, window_bounds = array<i64: 1, 4, 256>}]} {
    %c0 = arith.constant 0 : index
    %c0_0 = arith.constant 0 : index
    %c0_1 = arith.constant 0 : index
    %0 = vector.load %arg1[%c0, %c0_0, %c0_1] : memref<1x4x256xf32, #tpu.memory_space<vmem>>, vector<1x4x256xf32>
    %1 = vector.shape_cast %0 : vector<1x4x256xf32> to vector<4x256xf32>
    %c0_2 = arith.constant 0 : index
    %c0_3 = arith.constant 0 : index
    %2 = vector.load %arg9[%c0_2, %c0_3] : memref<8x4xbf16, #tpu.memory_space<vmem>>, vector<8x4xbf16>
    %3 = arith.truncf %1 : vector<4x256xf32> to vector<4x256xbf16>
    %cst = arith.constant dense<0.000000e+00> : vector<8x256xf32>
    %4 = tpu.matmul %2, %3, %cst {dimension_numbers = #tpu.dot_dimension_numbers<[1], [0], [0], [1], [0, 0, 1, 1], [], []>} : vector<8x4xbf16>, vector<4x256xbf16>, vector<8x256xf32> -> vector<8x256xf32>
    %c0_4 = arith.constant 0 : index
    %c0_5 = arith.constant 0 : index
    %5 = vector.load %arg10[%c0_4, %c0_5] : memref<8x1xf32, #tpu.memory_space<vmem>>, vector<8x1xf32>
    %6 = vector.broadcast %5 : vector<8x1xf32> to vector<8x256xf32>
    %7 = arith.addf %4, %6 : vector<8x256xf32>
    %c17_i32 = arith.constant 17 : i32
    %8 = tpu.dynamic_rotate %7 by %c17_i32 dim 1 : vector<8x256xf32>, i32 -> vector<8x256xf32>
    %c0_6 = arith.constant 0 : index
    %c0_7 = arith.constant 0 : index
    %c0_8 = arith.constant 0 : index
    %9 = vector.load %arg2[%c0_6, %c0_7, %c0_8] : memref<9x1x256xf32, #tpu.memory_space<vmem>>, vector<1x1x256xf32>
    %10 = vector.shape_cast %9 : vector<1x1x256xf32> to vector<1x256xf32>
    %11 = vector.broadcast %10 : vector<1x256xf32> to vector<8x256xf32>
    %12 = arith.mulf %8, %11 : vector<8x256xf32>
    %13 = arith.truncf %12 : vector<8x256xf32> to vector<8x256xbf16>
    %c0_9 = arith.constant 0 : index
    %c0_10 = arith.constant 0 : index
    %c0_11 = arith.constant 0 : index
    %14 = vector.load %arg11[%c0_9, %c0_10, %c0_11] : memref<9x16x8xbf16, #tpu.memory_space<vmem>>, vector<1x16x8xbf16>
    %15 = vector.shape_cast %14 : vector<1x16x8xbf16> to vector<16x8xbf16>
    %cst_12 = arith.constant dense<0.000000e+00> : vector<16x256xf32>
    %16 = tpu.matmul %15, %13, %cst_12 {dimension_numbers = #tpu.dot_dimension_numbers<[1], [0], [0], [1], [0, 0, 1, 1], [], []>} : vector<16x8xbf16>, vector<8x256xbf16>, vector<16x256xf32> -> vector<16x256xf32>
    %c16_i32 = arith.constant 16 : i32
    %17 = tpu.dynamic_rotate %7 by %c16_i32 dim 1 : vector<8x256xf32>, i32 -> vector<8x256xf32>
    %c1 = arith.constant 1 : index
    %c0_13 = arith.constant 0 : index
    %c0_14 = arith.constant 0 : index
    %18 = vector.load %arg2[%c1, %c0_13, %c0_14] : memref<9x1x256xf32, #tpu.memory_space<vmem>>, vector<1x1x256xf32>
    %19 = vector.shape_cast %18 : vector<1x1x256xf32> to vector<1x256xf32>
    %20 = vector.broadcast %19 : vector<1x256xf32> to vector<8x256xf32>
    %21 = arith.mulf %17, %20 : vector<8x256xf32>
    %22 = arith.truncf %21 : vector<8x256xf32> to vector<8x256xbf16>
    %c1_15 = arith.constant 1 : index
    %c0_16 = arith.constant 0 : index
    %c0_17 = arith.constant 0 : index
    %23 = vector.load %arg11[%c1_15, %c0_16, %c0_17] : memref<9x16x8xbf16, #tpu.memory_space<vmem>>, vector<1x16x8xbf16>
    %24 = vector.shape_cast %23 : vector<1x16x8xbf16> to vector<16x8xbf16>
    %cst_18 = arith.constant dense<0.000000e+00> : vector<16x256xf32>
    %25 = tpu.matmul %24, %22, %cst_18 {dimension_numbers = #tpu.dot_dimension_numbers<[1], [0], [0], [1], [0, 0, 1, 1], [], []>} : vector<16x8xbf16>, vector<8x256xbf16>, vector<16x256xf32> -> vector<16x256xf32>
    %26 = arith.addf %16, %25 : vector<16x256xf32>
    %c15_i32 = arith.constant 15 : i32
    %27 = tpu.dynamic_rotate %7 by %c15_i32 dim 1 : vector<8x256xf32>, i32 -> vector<8x256xf32>
    %c2 = arith.constant 2 : index
    %c0_19 = arith.constant 0 : index
    %c0_20 = arith.constant 0 : index
    %28 = vector.load %arg2[%c2, %c0_19, %c0_20] : memref<9x1x256xf32, #tpu.memory_space<vmem>>, vector<1x1x256xf32>
    %29 = vector.shape_cast %28 : vector<1x1x256xf32> to vector<1x256xf32>
    %30 = vector.broadcast %29 : vector<1x256xf32> to vector<8x256xf32>
    %31 = arith.mulf %27, %30 : vector<8x256xf32>
    %32 = arith.truncf %31 : vector<8x256xf32> to vector<8x256xbf16>
    %c2_21 = arith.constant 2 : index
    %c0_22 = arith.constant 0 : index
    %c0_23 = arith.constant 0 : index
    %33 = vector.load %arg11[%c2_21, %c0_22, %c0_23] : memref<9x16x8xbf16, #tpu.memory_space<vmem>>, vector<1x16x8xbf16>
    %34 = vector.shape_cast %33 : vector<1x16x8xbf16> to vector<16x8xbf16>
    %cst_24 = arith.constant dense<0.000000e+00> : vector<16x256xf32>
    %35 = tpu.matmul %34, %32, %cst_24 {dimension_numbers = #tpu.dot_dimension_numbers<[1], [0], [0], [1], [0, 0, 1, 1], [], []>} : vector<16x8xbf16>, vector<8x256xbf16>, vector<16x256xf32> -> vector<16x256xf32>
    %36 = arith.addf %26, %35 : vector<16x256xf32>
    %c1_i32 = arith.constant 1 : i32
    %37 = tpu.dynamic_rotate %7 by %c1_i32 dim 1 : vector<8x256xf32>, i32 -> vector<8x256xf32>
    %c3 = arith.constant 3 : index
    %c0_25 = arith.constant 0 : index
    %c0_26 = arith.constant 0 : index
    %38 = vector.load %arg2[%c3, %c0_25, %c0_26] : memref<9x1x256xf32, #tpu.memory_space<vmem>>, vector<1x1x256xf32>
    %39 = vector.shape_cast %38 : vector<1x1x256xf32> to vector<1x256xf32>
    %40 = vector.broadcast %39 : vector<1x256xf32> to vector<8x256xf32>
    %41 = arith.mulf %37, %40 : vector<8x256xf32>
    %42 = arith.truncf %41 : vector<8x256xf32> to vector<8x256xbf16>
    %c3_27 = arith.constant 3 : index
    %c0_28 = arith.constant 0 : index
    %c0_29 = arith.constant 0 : index
    %43 = vector.load %arg11[%c3_27, %c0_28, %c0_29] : memref<9x16x8xbf16, #tpu.memory_space<vmem>>, vector<1x16x8xbf16>
    %44 = vector.shape_cast %43 : vector<1x16x8xbf16> to vector<16x8xbf16>
    %cst_30 = arith.constant dense<0.000000e+00> : vector<16x256xf32>
    %45 = tpu.matmul %44, %42, %cst_30 {dimension_numbers = #tpu.dot_dimension_numbers<[1], [0], [0], [1], [0, 0, 1, 1], [], []>} : vector<16x8xbf16>, vector<8x256xbf16>, vector<16x256xf32> -> vector<16x256xf32>
    %46 = arith.addf %36, %45 : vector<16x256xf32>
    %47 = arith.truncf %7 : vector<8x256xf32> to vector<8x256xbf16>
    %c4 = arith.constant 4 : index
    %c0_31 = arith.constant 0 : index
    %c0_32 = arith.constant 0 : index
    %48 = vector.load %arg11[%c4, %c0_31, %c0_32] : memref<9x16x8xbf16, #tpu.memory_space<vmem>>, vector<1x16x8xbf16>
    %49 = vector.shape_cast %48 : vector<1x16x8xbf16> to vector<16x8xbf16>
    %cst_33 = arith.constant dense<0.000000e+00> : vector<16x256xf32>
    %50 = tpu.matmul %49, %47, %cst_33 {dimension_numbers = #tpu.dot_dimension_numbers<[1], [0], [0], [1], [0, 0, 1, 1], [], []>} : vector<16x8xbf16>, vector<8x256xbf16>, vector<16x256xf32> -> vector<16x256xf32>
    %51 = arith.addf %46, %50 : vector<16x256xf32>
    %c255_i32 = arith.constant 255 : i32
    %52 = tpu.dynamic_rotate %7 by %c255_i32 dim 1 : vector<8x256xf32>, i32 -> vector<8x256xf32>
    %c5 = arith.constant 5 : index
    %c0_34 = arith.constant 0 : index
    %c0_35 = arith.constant 0 : index
    %53 = vector.load %arg2[%c5, %c0_34, %c0_35] : memref<9x1x256xf32, #tpu.memory_space<vmem>>, vector<1x1x256xf32>
    %54 = vector.shape_cast %53 : vector<1x1x256xf32> to vector<1x256xf32>
    %55 = vector.broadcast %54 : vector<1x256xf32> to vector<8x256xf32>
    %56 = arith.mulf %52, %55 : vector<8x256xf32>
    %57 = arith.truncf %56 : vector<8x256xf32> to vector<8x256xbf16>
    %c5_36 = arith.constant 5 : index
    %c0_37 = arith.constant 0 : index
    %c0_38 = arith.constant 0 : index
    %58 = vector.load %arg11[%c5_36, %c0_37, %c0_38] : memref<9x16x8xbf16, #tpu.memory_space<vmem>>, vector<1x16x8xbf16>
    %59 = vector.shape_cast %58 : vector<1x16x8xbf16> to vector<16x8xbf16>
    %cst_39 = arith.constant dense<0.000000e+00> : vector<16x256xf32>
    %60 = tpu.matmul %59, %57, %cst_39 {dimension_numbers = #tpu.dot_dimension_numbers<[1], [0], [0], [1], [0, 0, 1, 1], [], []>} : vector<16x8xbf16>, vector<8x256xbf16>, vector<16x256xf32> -> vector<16x256xf32>
    %61 = arith.addf %51, %60 : vector<16x256xf32>
    %c241_i32 = arith.constant 241 : i32
    %62 = tpu.dynamic_rotate %7 by %c241_i32 dim 1 : vector<8x256xf32>, i32 -> vector<8x256xf32>
    %c6 = arith.constant 6 : index
    %c0_40 = arith.constant 0 : index
    %c0_41 = arith.constant 0 : index
    %63 = vector.load %arg2[%c6, %c0_40, %c0_41] : memref<9x1x256xf32, #tpu.memory_space<vmem>>, vector<1x1x256xf32>
    %64 = vector.shape_cast %63 : vector<1x1x256xf32> to vector<1x256xf32>
    %65 = vector.broadcast %64 : vector<1x256xf32> to vector<8x256xf32>
    %66 = arith.mulf %62, %65 : vector<8x256xf32>
    %67 = arith.truncf %66 : vector<8x256xf32> to vector<8x256xbf16>
    %c6_42 = arith.constant 6 : index
    %c0_43 = arith.constant 0 : index
    %c0_44 = arith.constant 0 : index
    %68 = vector.load %arg11[%c6_42, %c0_43, %c0_44] : memref<9x16x8xbf16, #tpu.memory_space<vmem>>, vector<1x16x8xbf16>
    %69 = vector.shape_cast %68 : vector<1x16x8xbf16> to vector<16x8xbf16>
    %cst_45 = arith.constant dense<0.000000e+00> : vector<16x256xf32>
    %70 = tpu.matmul %69, %67, %cst_45 {dimension_numbers = #tpu.dot_dimension_numbers<[1], [0], [0], [1], [0, 0, 1, 1], [], []>} : vector<16x8xbf16>, vector<8x256xbf16>, vector<16x256xf32> -> vector<16x256xf32>
    %71 = arith.addf %61, %70 : vector<16x256xf32>
    %c240_i32 = arith.constant 240 : i32
    %72 = tpu.dynamic_rotate %7 by %c240_i32 dim 1 : vector<8x256xf32>, i32 -> vector<8x256xf32>
    %c7 = arith.constant 7 : index
    %c0_46 = arith.constant 0 : index
    %c0_47 = arith.constant 0 : index
    %73 = vector.load %arg2[%c7, %c0_46, %c0_47] : memref<9x1x256xf32, #tpu.memory_space<vmem>>, vector<1x1x256xf32>
    %74 = vector.shape_cast %73 : vector<1x1x256xf32> to vector<1x256xf32>
    %75 = vector.broadcast %74 : vector<1x256xf32> to vector<8x256xf32>
    %76 = arith.mulf %72, %75 : vector<8x256xf32>
    %77 = arith.truncf %76 : vector<8x256xf32> to vector<8x256xbf16>
    %c7_48 = arith.constant 7 : index
    %c0_49 = arith.constant 0 : index
    %c0_50 = arith.constant 0 : index
    %78 = vector.load %arg11[%c7_48, %c0_49, %c0_50] : memref<9x16x8xbf16, #tpu.memory_space<vmem>>, vector<1x16x8xbf16>
    %79 = vector.shape_cast %78 : vector<1x16x8xbf16> to vector<16x8xbf16>
    %cst_51 = arith.constant dense<0.000000e+00> : vector<16x256xf32>
    %80 = tpu.matmul %79, %77, %cst_51 {dimension_numbers = #tpu.dot_dimension_numbers<[1], [0], [0], [1], [0, 0, 1, 1], [], []>} : vector<16x8xbf16>, vector<8x256xbf16>, vector<16x256xf32> -> vector<16x256xf32>
    %81 = arith.addf %71, %80 : vector<16x256xf32>
    %c239_i32 = arith.constant 239 : i32
    %82 = tpu.dynamic_rotate %7 by %c239_i32 dim 1 : vector<8x256xf32>, i32 -> vector<8x256xf32>
    %c8 = arith.constant 8 : index
    %c0_52 = arith.constant 0 : index
    %c0_53 = arith.constant 0 : index
    %83 = vector.load %arg2[%c8, %c0_52, %c0_53] : memref<9x1x256xf32, #tpu.memory_space<vmem>>, vector<1x1x256xf32>
    %84 = vector.shape_cast %83 : vector<1x1x256xf32> to vector<1x256xf32>
    %85 = vector.broadcast %84 : vector<1x256xf32> to vector<8x256xf32>
    %86 = arith.mulf %82, %85 : vector<8x256xf32>
    %87 = arith.truncf %86 : vector<8x256xf32> to vector<8x256xbf16>
    %c8_54 = arith.constant 8 : index
    %c0_55 = arith.constant 0 : index
    %c0_56 = arith.constant 0 : index
    %88 = vector.load %arg11[%c8_54, %c0_55, %c0_56] : memref<9x16x8xbf16, #tpu.memory_space<vmem>>, vector<1x16x8xbf16>
    %89 = vector.shape_cast %88 : vector<1x16x8xbf16> to vector<16x8xbf16>
    %cst_57 = arith.constant dense<0.000000e+00> : vector<16x256xf32>
    %90 = tpu.matmul %89, %87, %cst_57 {dimension_numbers = #tpu.dot_dimension_numbers<[1], [0], [0], [1], [0, 0, 1, 1], [], []>} : vector<16x8xbf16>, vector<8x256xbf16>, vector<16x256xf32> -> vector<16x256xf32>
    %91 = arith.addf %81, %90 : vector<16x256xf32>
    %c0_58 = arith.constant 0 : index
    %c0_59 = arith.constant 0 : index
    %92 = vector.load %arg12[%c0_58, %c0_59] : memref<16x3xf32, #tpu.memory_space<vmem>>, vector<16x3xf32>
    %93 = vector.extract_strided_slice %92 {offsets = [0, 0], sizes = [16, 1], strides = [1, 1]} : vector<16x3xf32> to vector<16x1xf32>
    %94 = vector.broadcast %93 : vector<16x1xf32> to vector<16x256xf32>
    %95 = arith.addf %91, %94 : vector<16x256xf32>
    %cst_60 = arith.constant 0.000000e+00 : f32
    %96 = vector.broadcast %cst_60 : f32 to vector<16x256xf32>
    %97 = arith.maximumf %95, %96 : vector<16x256xf32>
    %98 = vector.extract_strided_slice %92 {offsets = [0, 1], sizes = [16, 1], strides = [1, 1]} : vector<16x3xf32> to vector<16x1xf32>
    %99 = vector.broadcast %98 : vector<16x1xf32> to vector<16x256xf32>
    %100 = arith.mulf %97, %99 : vector<16x256xf32>
    %101 = vector.extract_strided_slice %92 {offsets = [0, 2], sizes = [16, 1], strides = [1, 1]} : vector<16x3xf32> to vector<16x1xf32>
    %102 = vector.broadcast %101 : vector<16x1xf32> to vector<16x256xf32>
    %103 = arith.addf %100, %102 : vector<16x256xf32>
    %c255_i32_61 = arith.constant 255 : i32
    %104 = tpu.dynamic_rotate %103 by %c255_i32_61 dim 1 : vector<16x256xf32>, i32 -> vector<16x256xf32>
    %c5_62 = arith.constant 5 : index
    %c0_63 = arith.constant 0 : index
    %c0_64 = arith.constant 0 : index
    %105 = vector.load %arg2[%c5_62, %c0_63, %c0_64] : memref<9x1x256xf32, #tpu.memory_space<vmem>>, vector<1x1x256xf32>
    %106 = vector.shape_cast %105 : vector<1x1x256xf32> to vector<1x256xf32>
    %107 = vector.broadcast %106 : vector<1x256xf32> to vector<16x256xf32>
    %108 = arith.mulf %104, %107 : vector<16x256xf32>
    %109 = arith.maximumf %103, %108 : vector<16x256xf32>
    %c240_i32_65 = arith.constant 240 : i32
    %110 = tpu.dynamic_rotate %109 by %c240_i32_65 dim 1 : vector<16x256xf32>, i32 -> vector<16x256xf32>
    %c7_66 = arith.constant 7 : index
    %c0_67 = arith.constant 0 : index
    %c0_68 = arith.constant 0 : index
    %111 = vector.load %arg2[%c7_66, %c0_67, %c0_68] : memref<9x1x256xf32, #tpu.memory_space<vmem>>, vector<1x1x256xf32>
    %112 = vector.shape_cast %111 : vector<1x1x256xf32> to vector<1x256xf32>
    %113 = vector.broadcast %112 : vector<1x256xf32> to vector<16x256xf32>
    %114 = arith.mulf %110, %113 : vector<16x256xf32>
    %115 = arith.maximumf %109, %114 : vector<16x256xf32>
    %116 = arith.truncf %115 : vector<16x256xf32> to vector<16x256xbf16>
    %c0_69 = arith.constant 0 : index
    %c0_70 = arith.constant 0 : index
    %117 = vector.load %arg5[%c0_69, %c0_70] : memref<256x64xbf16, #tpu.memory_space<vmem>>, vector<256x64xbf16>
    %cst_71 = arith.constant dense<0.000000e+00> : vector<16x64xf32>
    %118 = tpu.matmul %116, %117, %cst_71 {dimension_numbers = #tpu.dot_dimension_numbers<[1], [0], [0], [1], [0, 0, 1, 1], [], []>} : vector<16x256xbf16>, vector<256x64xbf16>, vector<16x64xf32> -> vector<16x64xf32>
    %119 = arith.truncf %118 : vector<16x64xf32> to vector<16x64xbf16>
    %c0_72 = arith.constant 0 : index
    %c0_73 = arith.constant 0 : index
    %c0_74 = arith.constant 0 : index
    %120 = vector.load %arg3[%c0_72, %c0_73, %c0_74] : memref<9x64x64xbf16, #tpu.memory_space<vmem>>, vector<1x64x64xbf16>
    %121 = vector.shape_cast %120 : vector<1x64x64xbf16> to vector<64x64xbf16>
    %cst_75 = arith.constant dense<0.000000e+00> : vector<16x64xf32>
    %122 = tpu.matmul %119, %121, %cst_75 {dimension_numbers = #tpu.dot_dimension_numbers<[1], [0], [0], [1], [0, 0, 1, 1], [], []>} : vector<16x64xbf16>, vector<64x64xbf16>, vector<16x64xf32> -> vector<16x64xf32>
    %123 = arith.truncf %122 : vector<16x64xf32> to vector<16x64xbf16>
    %c0_76 = arith.constant 0 : index
    %c0_77 = arith.constant 0 : index
    %c0_78 = arith.constant 0 : index
    %124 = vector.load %arg13[%c0_76, %c0_77, %c0_78] : memref<9x32x16xbf16, #tpu.memory_space<vmem>>, vector<1x32x16xbf16>
    %125 = vector.shape_cast %124 : vector<1x32x16xbf16> to vector<32x16xbf16>
    %cst_79 = arith.constant dense<0.000000e+00> : vector<32x64xf32>
    %126 = tpu.matmul %125, %123, %cst_79 {dimension_numbers = #tpu.dot_dimension_numbers<[1], [0], [0], [1], [0, 0, 1, 1], [], []>} : vector<32x16xbf16>, vector<16x64xbf16>, vector<32x64xf32> -> vector<32x64xf32>
    %127 = arith.truncf %118 : vector<16x64xf32> to vector<16x64xbf16>
    %c1_80 = arith.constant 1 : index
    %c0_81 = arith.constant 0 : index
    %c0_82 = arith.constant 0 : index
    %128 = vector.load %arg3[%c1_80, %c0_81, %c0_82] : memref<9x64x64xbf16, #tpu.memory_space<vmem>>, vector<1x64x64xbf16>
    %129 = vector.shape_cast %128 : vector<1x64x64xbf16> to vector<64x64xbf16>
    %cst_83 = arith.constant dense<0.000000e+00> : vector<16x64xf32>
    %130 = tpu.matmul %127, %129, %cst_83 {dimension_numbers = #tpu.dot_dimension_numbers<[1], [0], [0], [1], [0, 0, 1, 1], [], []>} : vector<16x64xbf16>, vector<64x64xbf16>, vector<16x64xf32> -> vector<16x64xf32>
    %131 = arith.truncf %130 : vector<16x64xf32> to vector<16x64xbf16>
    %c1_84 = arith.constant 1 : index
    %c0_85 = arith.constant 0 : index
    %c0_86 = arith.constant 0 : index
    %132 = vector.load %arg13[%c1_84, %c0_85, %c0_86] : memref<9x32x16xbf16, #tpu.memory_space<vmem>>, vector<1x32x16xbf16>
    %133 = vector.shape_cast %132 : vector<1x32x16xbf16> to vector<32x16xbf16>
    %cst_87 = arith.constant dense<0.000000e+00> : vector<32x64xf32>
    %134 = tpu.matmul %133, %131, %cst_87 {dimension_numbers = #tpu.dot_dimension_numbers<[1], [0], [0], [1], [0, 0, 1, 1], [], []>} : vector<32x16xbf16>, vector<16x64xbf16>, vector<32x64xf32> -> vector<32x64xf32>
    %135 = arith.addf %126, %134 : vector<32x64xf32>
    %136 = arith.truncf %118 : vector<16x64xf32> to vector<16x64xbf16>
    %c2_88 = arith.constant 2 : index
    %c0_89 = arith.constant 0 : index
    %c0_90 = arith.constant 0 : index
    %137 = vector.load %arg3[%c2_88, %c0_89, %c0_90] : memref<9x64x64xbf16, #tpu.memory_space<vmem>>, vector<1x64x64xbf16>
    %138 = vector.shape_cast %137 : vector<1x64x64xbf16> to vector<64x64xbf16>
    %cst_91 = arith.constant dense<0.000000e+00> : vector<16x64xf32>
    %139 = tpu.matmul %136, %138, %cst_91 {dimension_numbers = #tpu.dot_dimension_numbers<[1], [0], [0], [1], [0, 0, 1, 1], [], []>} : vector<16x64xbf16>, vector<64x64xbf16>, vector<16x64xf32> -> vector<16x64xf32>
    %140 = arith.truncf %139 : vector<16x64xf32> to vector<16x64xbf16>
    %c2_92 = arith.constant 2 : index
    %c0_93 = arith.constant 0 : index
    %c0_94 = arith.constant 0 : index
    %141 = vector.load %arg13[%c2_92, %c0_93, %c0_94] : memref<9x32x16xbf16, #tpu.memory_space<vmem>>, vector<1x32x16xbf16>
    %142 = vector.shape_cast %141 : vector<1x32x16xbf16> to vector<32x16xbf16>
    %cst_95 = arith.constant dense<0.000000e+00> : vector<32x64xf32>
    %143 = tpu.matmul %142, %140, %cst_95 {dimension_numbers = #tpu.dot_dimension_numbers<[1], [0], [0], [1], [0, 0, 1, 1], [], []>} : vector<32x16xbf16>, vector<16x64xbf16>, vector<32x64xf32> -> vector<32x64xf32>
    %144 = arith.addf %135, %143 : vector<32x64xf32>
    %145 = arith.truncf %118 : vector<16x64xf32> to vector<16x64xbf16>
    %c3_96 = arith.constant 3 : index
    %c0_97 = arith.constant 0 : index
    %c0_98 = arith.constant 0 : index
    %146 = vector.load %arg3[%c3_96, %c0_97, %c0_98] : memref<9x64x64xbf16, #tpu.memory_space<vmem>>, vector<1x64x64xbf16>
    %147 = vector.shape_cast %146 : vector<1x64x64xbf16> to vector<64x64xbf16>
    %cst_99 = arith.constant dense<0.000000e+00> : vector<16x64xf32>
    %148 = tpu.matmul %145, %147, %cst_99 {dimension_numbers = #tpu.dot_dimension_numbers<[1], [0], [0], [1], [0, 0, 1, 1], [], []>} : vector<16x64xbf16>, vector<64x64xbf16>, vector<16x64xf32> -> vector<16x64xf32>
    %149 = arith.truncf %148 : vector<16x64xf32> to vector<16x64xbf16>
    %c3_100 = arith.constant 3 : index
    %c0_101 = arith.constant 0 : index
    %c0_102 = arith.constant 0 : index
    %150 = vector.load %arg13[%c3_100, %c0_101, %c0_102] : memref<9x32x16xbf16, #tpu.memory_space<vmem>>, vector<1x32x16xbf16>
    %151 = vector.shape_cast %150 : vector<1x32x16xbf16> to vector<32x16xbf16>
    %cst_103 = arith.constant dense<0.000000e+00> : vector<32x64xf32>
    %152 = tpu.matmul %151, %149, %cst_103 {dimension_numbers = #tpu.dot_dimension_numbers<[1], [0], [0], [1], [0, 0, 1, 1], [], []>} : vector<32x16xbf16>, vector<16x64xbf16>, vector<32x64xf32> -> vector<32x64xf32>
    %153 = arith.addf %144, %152 : vector<32x64xf32>
    %154 = arith.truncf %118 : vector<16x64xf32> to vector<16x64xbf16>
    %c4_104 = arith.constant 4 : index
    %c0_105 = arith.constant 0 : index
    %c0_106 = arith.constant 0 : index
    %155 = vector.load %arg13[%c4_104, %c0_105, %c0_106] : memref<9x32x16xbf16, #tpu.memory_space<vmem>>, vector<1x32x16xbf16>
    %156 = vector.shape_cast %155 : vector<1x32x16xbf16> to vector<32x16xbf16>
    %cst_107 = arith.constant dense<0.000000e+00> : vector<32x64xf32>
    %157 = tpu.matmul %156, %154, %cst_107 {dimension_numbers = #tpu.dot_dimension_numbers<[1], [0], [0], [1], [0, 0, 1, 1], [], []>} : vector<32x16xbf16>, vector<16x64xbf16>, vector<32x64xf32> -> vector<32x64xf32>
    %158 = arith.addf %153, %157 : vector<32x64xf32>
    %159 = arith.truncf %118 : vector<16x64xf32> to vector<16x64xbf16>
    %c5_108 = arith.constant 5 : index
    %c0_109 = arith.constant 0 : index
    %c0_110 = arith.constant 0 : index
    %160 = vector.load %arg3[%c5_108, %c0_109, %c0_110] : memref<9x64x64xbf16, #tpu.memory_space<vmem>>, vector<1x64x64xbf16>
    %161 = vector.shape_cast %160 : vector<1x64x64xbf16> to vector<64x64xbf16>
    %cst_111 = arith.constant dense<0.000000e+00> : vector<16x64xf32>
    %162 = tpu.matmul %159, %161, %cst_111 {dimension_numbers = #tpu.dot_dimension_numbers<[1], [0], [0], [1], [0, 0, 1, 1], [], []>} : vector<16x64xbf16>, vector<64x64xbf16>, vector<16x64xf32> -> vector<16x64xf32>
    %163 = arith.truncf %162 : vector<16x64xf32> to vector<16x64xbf16>
    %c5_112 = arith.constant 5 : index
    %c0_113 = arith.constant 0 : index
    %c0_114 = arith.constant 0 : index
    %164 = vector.load %arg13[%c5_112, %c0_113, %c0_114] : memref<9x32x16xbf16, #tpu.memory_space<vmem>>, vector<1x32x16xbf16>
    %165 = vector.shape_cast %164 : vector<1x32x16xbf16> to vector<32x16xbf16>
    %cst_115 = arith.constant dense<0.000000e+00> : vector<32x64xf32>
    %166 = tpu.matmul %165, %163, %cst_115 {dimension_numbers = #tpu.dot_dimension_numbers<[1], [0], [0], [1], [0, 0, 1, 1], [], []>} : vector<32x16xbf16>, vector<16x64xbf16>, vector<32x64xf32> -> vector<32x64xf32>
    %167 = arith.addf %158, %166 : vector<32x64xf32>
    %168 = arith.truncf %118 : vector<16x64xf32> to vector<16x64xbf16>
    %c6_116 = arith.constant 6 : index
    %c0_117 = arith.constant 0 : index
    %c0_118 = arith.constant 0 : index
    %169 = vector.load %arg3[%c6_116, %c0_117, %c0_118] : memref<9x64x64xbf16, #tpu.memory_space<vmem>>, vector<1x64x64xbf16>
    %170 = vector.shape_cast %169 : vector<1x64x64xbf16> to vector<64x64xbf16>
    %cst_119 = arith.constant dense<0.000000e+00> : vector<16x64xf32>
    %171 = tpu.matmul %168, %170, %cst_119 {dimension_numbers = #tpu.dot_dimension_numbers<[1], [0], [0], [1], [0, 0, 1, 1], [], []>} : vector<16x64xbf16>, vector<64x64xbf16>, vector<16x64xf32> -> vector<16x64xf32>
    %172 = arith.truncf %171 : vector<16x64xf32> to vector<16x64xbf16>
    %c6_120 = arith.constant 6 : index
    %c0_121 = arith.constant 0 : index
    %c0_122 = arith.constant 0 : index
    %173 = vector.load %arg13[%c6_120, %c0_121, %c0_122] : memref<9x32x16xbf16, #tpu.memory_space<vmem>>, vector<1x32x16xbf16>
    %174 = vector.shape_cast %173 : vector<1x32x16xbf16> to vector<32x16xbf16>
    %cst_123 = arith.constant dense<0.000000e+00> : vector<32x64xf32>
    %175 = tpu.matmul %174, %172, %cst_123 {dimension_numbers = #tpu.dot_dimension_numbers<[1], [0], [0], [1], [0, 0, 1, 1], [], []>} : vector<32x16xbf16>, vector<16x64xbf16>, vector<32x64xf32> -> vector<32x64xf32>
    %176 = arith.addf %167, %175 : vector<32x64xf32>
    %177 = arith.truncf %118 : vector<16x64xf32> to vector<16x64xbf16>
    %c7_124 = arith.constant 7 : index
    %c0_125 = arith.constant 0 : index
    %c0_126 = arith.constant 0 : index
    %178 = vector.load %arg3[%c7_124, %c0_125, %c0_126] : memref<9x64x64xbf16, #tpu.memory_space<vmem>>, vector<1x64x64xbf16>
    %179 = vector.shape_cast %178 : vector<1x64x64xbf16> to vector<64x64xbf16>
    %cst_127 = arith.constant dense<0.000000e+00> : vector<16x64xf32>
    %180 = tpu.matmul %177, %179, %cst_127 {dimension_numbers = #tpu.dot_dimension_numbers<[1], [0], [0], [1], [0, 0, 1, 1], [], []>} : vector<16x64xbf16>, vector<64x64xbf16>, vector<16x64xf32> -> vector<16x64xf32>
    %181 = arith.truncf %180 : vector<16x64xf32> to vector<16x64xbf16>
    %c7_128 = arith.constant 7 : index
    %c0_129 = arith.constant 0 : index
    %c0_130 = arith.constant 0 : index
    %182 = vector.load %arg13[%c7_128, %c0_129, %c0_130] : memref<9x32x16xbf16, #tpu.memory_space<vmem>>, vector<1x32x16xbf16>
    %183 = vector.shape_cast %182 : vector<1x32x16xbf16> to vector<32x16xbf16>
    %cst_131 = arith.constant dense<0.000000e+00> : vector<32x64xf32>
    %184 = tpu.matmul %183, %181, %cst_131 {dimension_numbers = #tpu.dot_dimension_numbers<[1], [0], [0], [1], [0, 0, 1, 1], [], []>} : vector<32x16xbf16>, vector<16x64xbf16>, vector<32x64xf32> -> vector<32x64xf32>
    %185 = arith.addf %176, %184 : vector<32x64xf32>
    %186 = arith.truncf %118 : vector<16x64xf32> to vector<16x64xbf16>
    %c8_132 = arith.constant 8 : index
    %c0_133 = arith.constant 0 : index
    %c0_134 = arith.constant 0 : index
    %187 = vector.load %arg3[%c8_132, %c0_133, %c0_134] : memref<9x64x64xbf16, #tpu.memory_space<vmem>>, vector<1x64x64xbf16>
    %188 = vector.shape_cast %187 : vector<1x64x64xbf16> to vector<64x64xbf16>
    %cst_135 = arith.constant dense<0.000000e+00> : vector<16x64xf32>
    %189 = tpu.matmul %186, %188, %cst_135 {dimension_numbers = #tpu.dot_dimension_numbers<[1], [0], [0], [1], [0, 0, 1, 1], [], []>} : vector<16x64xbf16>, vector<64x64xbf16>, vector<16x64xf32> -> vector<16x64xf32>
    %190 = arith.truncf %189 : vector<16x64xf32> to vector<16x64xbf16>
    %c8_136 = arith.constant 8 : index
    %c0_137 = arith.constant 0 : index
    %c0_138 = arith.constant 0 : index
    %191 = vector.load %arg13[%c8_136, %c0_137, %c0_138] : memref<9x32x16xbf16, #tpu.memory_space<vmem>>, vector<1x32x16xbf16>
    %192 = vector.shape_cast %191 : vector<1x32x16xbf16> to vector<32x16xbf16>
    %cst_139 = arith.constant dense<0.000000e+00> : vector<32x64xf32>
    %193 = tpu.matmul %192, %190, %cst_139 {dimension_numbers = #tpu.dot_dimension_numbers<[1], [0], [0], [1], [0, 0, 1, 1], [], []>} : vector<32x16xbf16>, vector<16x64xbf16>, vector<32x64xf32> -> vector<32x64xf32>
    %194 = arith.addf %185, %193 : vector<32x64xf32>
    %c0_140 = arith.constant 0 : index
    %c0_141 = arith.constant 0 : index
    %195 = vector.load %arg14[%c0_140, %c0_141] : memref<32x3xf32, #tpu.memory_space<vmem>>, vector<32x3xf32>
    %196 = vector.extract_strided_slice %195 {offsets = [0, 0], sizes = [32, 1], strides = [1, 1]} : vector<32x3xf32> to vector<32x1xf32>
    %197 = vector.broadcast %196 : vector<32x1xf32> to vector<32x64xf32>
    %198 = arith.addf %194, %197 : vector<32x64xf32>
    %cst_142 = arith.constant 0.000000e+00 : f32
    %199 = vector.broadcast %cst_142 : f32 to vector<32x64xf32>
    %200 = arith.maximumf %198, %199 : vector<32x64xf32>
    %201 = vector.extract_strided_slice %195 {offsets = [0, 1], sizes = [32, 1], strides = [1, 1]} : vector<32x3xf32> to vector<32x1xf32>
    %202 = vector.broadcast %201 : vector<32x1xf32> to vector<32x64xf32>
    %203 = arith.mulf %200, %202 : vector<32x64xf32>
    %204 = vector.extract_strided_slice %195 {offsets = [0, 2], sizes = [32, 1], strides = [1, 1]} : vector<32x3xf32> to vector<32x1xf32>
    %205 = vector.broadcast %204 : vector<32x1xf32> to vector<32x64xf32>
    %206 = arith.addf %203, %205 : vector<32x64xf32>
    %207 = arith.truncf %206 : vector<32x64xf32> to vector<32x64xbf16>
    %c0_143 = arith.constant 0 : index
    %c0_144 = arith.constant 0 : index
    %c0_145 = arith.constant 0 : index
    %208 = vector.load %arg3[%c0_143, %c0_144, %c0_145] : memref<9x64x64xbf16, #tpu.memory_space<vmem>>, vector<1x64x64xbf16>
    %209 = vector.shape_cast %208 : vector<1x64x64xbf16> to vector<64x64xbf16>
    %cst_146 = arith.constant dense<0.000000e+00> : vector<32x64xf32>
    %210 = tpu.matmul %207, %209, %cst_146 {dimension_numbers = #tpu.dot_dimension_numbers<[1], [0], [0], [1], [0, 0, 1, 1], [], []>} : vector<32x64xbf16>, vector<64x64xbf16>, vector<32x64xf32> -> vector<32x64xf32>
    %211 = arith.truncf %210 : vector<32x64xf32> to vector<32x64xbf16>
    %c0_147 = arith.constant 0 : index
    %c0_148 = arith.constant 0 : index
    %c0_149 = arith.constant 0 : index
    %212 = vector.load %arg15[%c0_147, %c0_148, %c0_149] : memref<9x32x32xbf16, #tpu.memory_space<vmem>>, vector<1x32x32xbf16>
    %213 = vector.shape_cast %212 : vector<1x32x32xbf16> to vector<32x32xbf16>
    %cst_150 = arith.constant dense<0.000000e+00> : vector<32x64xf32>
    %214 = tpu.matmul %213, %211, %cst_150 {dimension_numbers = #tpu.dot_dimension_numbers<[1], [0], [0], [1], [0, 0, 1, 1], [], []>} : vector<32x32xbf16>, vector<32x64xbf16>, vector<32x64xf32> -> vector<32x64xf32>
    %215 = arith.truncf %206 : vector<32x64xf32> to vector<32x64xbf16>
    %c1_151 = arith.constant 1 : index
    %c0_152 = arith.constant 0 : index
    %c0_153 = arith.constant 0 : index
    %216 = vector.load %arg3[%c1_151, %c0_152, %c0_153] : memref<9x64x64xbf16, #tpu.memory_space<vmem>>, vector<1x64x64xbf16>
    %217 = vector.shape_cast %216 : vector<1x64x64xbf16> to vector<64x64xbf16>
    %cst_154 = arith.constant dense<0.000000e+00> : vector<32x64xf32>
    %218 = tpu.matmul %215, %217, %cst_154 {dimension_numbers = #tpu.dot_dimension_numbers<[1], [0], [0], [1], [0, 0, 1, 1], [], []>} : vector<32x64xbf16>, vector<64x64xbf16>, vector<32x64xf32> -> vector<32x64xf32>
    %219 = arith.truncf %218 : vector<32x64xf32> to vector<32x64xbf16>
    %c1_155 = arith.constant 1 : index
    %c0_156 = arith.constant 0 : index
    %c0_157 = arith.constant 0 : index
    %220 = vector.load %arg15[%c1_155, %c0_156, %c0_157] : memref<9x32x32xbf16, #tpu.memory_space<vmem>>, vector<1x32x32xbf16>
    %221 = vector.shape_cast %220 : vector<1x32x32xbf16> to vector<32x32xbf16>
    %cst_158 = arith.constant dense<0.000000e+00> : vector<32x64xf32>
    %222 = tpu.matmul %221, %219, %cst_158 {dimension_numbers = #tpu.dot_dimension_numbers<[1], [0], [0], [1], [0, 0, 1, 1], [], []>} : vector<32x32xbf16>, vector<32x64xbf16>, vector<32x64xf32> -> vector<32x64xf32>
    %223 = arith.addf %214, %222 : vector<32x64xf32>
    %224 = arith.truncf %206 : vector<32x64xf32> to vector<32x64xbf16>
    %c2_159 = arith.constant 2 : index
    %c0_160 = arith.constant 0 : index
    %c0_161 = arith.constant 0 : index
    %225 = vector.load %arg3[%c2_159, %c0_160, %c0_161] : memref<9x64x64xbf16, #tpu.memory_space<vmem>>, vector<1x64x64xbf16>
    %226 = vector.shape_cast %225 : vector<1x64x64xbf16> to vector<64x64xbf16>
    %cst_162 = arith.constant dense<0.000000e+00> : vector<32x64xf32>
    %227 = tpu.matmul %224, %226, %cst_162 {dimension_numbers = #tpu.dot_dimension_numbers<[1], [0], [0], [1], [0, 0, 1, 1], [], []>} : vector<32x64xbf16>, vector<64x64xbf16>, vector<32x64xf32> -> vector<32x64xf32>
    %228 = arith.truncf %227 : vector<32x64xf32> to vector<32x64xbf16>
    %c2_163 = arith.constant 2 : index
    %c0_164 = arith.constant 0 : index
    %c0_165 = arith.constant 0 : index
    %229 = vector.load %arg15[%c2_163, %c0_164, %c0_165] : memref<9x32x32xbf16, #tpu.memory_space<vmem>>, vector<1x32x32xbf16>
    %230 = vector.shape_cast %229 : vector<1x32x32xbf16> to vector<32x32xbf16>
    %cst_166 = arith.constant dense<0.000000e+00> : vector<32x64xf32>
    %231 = tpu.matmul %230, %228, %cst_166 {dimension_numbers = #tpu.dot_dimension_numbers<[1], [0], [0], [1], [0, 0, 1, 1], [], []>} : vector<32x32xbf16>, vector<32x64xbf16>, vector<32x64xf32> -> vector<32x64xf32>
    %232 = arith.addf %223, %231 : vector<32x64xf32>
    %233 = arith.truncf %206 : vector<32x64xf32> to vector<32x64xbf16>
    %c3_167 = arith.constant 3 : index
    %c0_168 = arith.constant 0 : index
    %c0_169 = arith.constant 0 : index
    %234 = vector.load %arg3[%c3_167, %c0_168, %c0_169] : memref<9x64x64xbf16, #tpu.memory_space<vmem>>, vector<1x64x64xbf16>
    %235 = vector.shape_cast %234 : vector<1x64x64xbf16> to vector<64x64xbf16>
    %cst_170 = arith.constant dense<0.000000e+00> : vector<32x64xf32>
    %236 = tpu.matmul %233, %235, %cst_170 {dimension_numbers = #tpu.dot_dimension_numbers<[1], [0], [0], [1], [0, 0, 1, 1], [], []>} : vector<32x64xbf16>, vector<64x64xbf16>, vector<32x64xf32> -> vector<32x64xf32>
    %237 = arith.truncf %236 : vector<32x64xf32> to vector<32x64xbf16>
    %c3_171 = arith.constant 3 : index
    %c0_172 = arith.constant 0 : index
    %c0_173 = arith.constant 0 : index
    %238 = vector.load %arg15[%c3_171, %c0_172, %c0_173] : memref<9x32x32xbf16, #tpu.memory_space<vmem>>, vector<1x32x32xbf16>
    %239 = vector.shape_cast %238 : vector<1x32x32xbf16> to vector<32x32xbf16>
    %cst_174 = arith.constant dense<0.000000e+00> : vector<32x64xf32>
    %240 = tpu.matmul %239, %237, %cst_174 {dimension_numbers = #tpu.dot_dimension_numbers<[1], [0], [0], [1], [0, 0, 1, 1], [], []>} : vector<32x32xbf16>, vector<32x64xbf16>, vector<32x64xf32> -> vector<32x64xf32>
    %241 = arith.addf %232, %240 : vector<32x64xf32>
    %242 = arith.truncf %206 : vector<32x64xf32> to vector<32x64xbf16>
    %c4_175 = arith.constant 4 : index
    %c0_176 = arith.constant 0 : index
    %c0_177 = arith.constant 0 : index
    %243 = vector.load %arg15[%c4_175, %c0_176, %c0_177] : memref<9x32x32xbf16, #tpu.memory_space<vmem>>, vector<1x32x32xbf16>
    %244 = vector.shape_cast %243 : vector<1x32x32xbf16> to vector<32x32xbf16>
    %cst_178 = arith.constant dense<0.000000e+00> : vector<32x64xf32>
    %245 = tpu.matmul %244, %242, %cst_178 {dimension_numbers = #tpu.dot_dimension_numbers<[1], [0], [0], [1], [0, 0, 1, 1], [], []>} : vector<32x32xbf16>, vector<32x64xbf16>, vector<32x64xf32> -> vector<32x64xf32>
    %246 = arith.addf %241, %245 : vector<32x64xf32>
    %247 = arith.truncf %206 : vector<32x64xf32> to vector<32x64xbf16>
    %c5_179 = arith.constant 5 : index
    %c0_180 = arith.constant 0 : index
    %c0_181 = arith.constant 0 : index
    %248 = vector.load %arg3[%c5_179, %c0_180, %c0_181] : memref<9x64x64xbf16, #tpu.memory_space<vmem>>, vector<1x64x64xbf16>
    %249 = vector.shape_cast %248 : vector<1x64x64xbf16> to vector<64x64xbf16>
    %cst_182 = arith.constant dense<0.000000e+00> : vector<32x64xf32>
    %250 = tpu.matmul %247, %249, %cst_182 {dimension_numbers = #tpu.dot_dimension_numbers<[1], [0], [0], [1], [0, 0, 1, 1], [], []>} : vector<32x64xbf16>, vector<64x64xbf16>, vector<32x64xf32> -> vector<32x64xf32>
    %251 = arith.truncf %250 : vector<32x64xf32> to vector<32x64xbf16>
    %c5_183 = arith.constant 5 : index
    %c0_184 = arith.constant 0 : index
    %c0_185 = arith.constant 0 : index
    %252 = vector.load %arg15[%c5_183, %c0_184, %c0_185] : memref<9x32x32xbf16, #tpu.memory_space<vmem>>, vector<1x32x32xbf16>
    %253 = vector.shape_cast %252 : vector<1x32x32xbf16> to vector<32x32xbf16>
    %cst_186 = arith.constant dense<0.000000e+00> : vector<32x64xf32>
    %254 = tpu.matmul %253, %251, %cst_186 {dimension_numbers = #tpu.dot_dimension_numbers<[1], [0], [0], [1], [0, 0, 1, 1], [], []>} : vector<32x32xbf16>, vector<32x64xbf16>, vector<32x64xf32> -> vector<32x64xf32>
    %255 = arith.addf %246, %254 : vector<32x64xf32>
    %256 = arith.truncf %206 : vector<32x64xf32> to vector<32x64xbf16>
    %c6_187 = arith.constant 6 : index
    %c0_188 = arith.constant 0 : index
    %c0_189 = arith.constant 0 : index
    %257 = vector.load %arg3[%c6_187, %c0_188, %c0_189] : memref<9x64x64xbf16, #tpu.memory_space<vmem>>, vector<1x64x64xbf16>
    %258 = vector.shape_cast %257 : vector<1x64x64xbf16> to vector<64x64xbf16>
    %cst_190 = arith.constant dense<0.000000e+00> : vector<32x64xf32>
    %259 = tpu.matmul %256, %258, %cst_190 {dimension_numbers = #tpu.dot_dimension_numbers<[1], [0], [0], [1], [0, 0, 1, 1], [], []>} : vector<32x64xbf16>, vector<64x64xbf16>, vector<32x64xf32> -> vector<32x64xf32>
    %260 = arith.truncf %259 : vector<32x64xf32> to vector<32x64xbf16>
    %c6_191 = arith.constant 6 : index
    %c0_192 = arith.constant 0 : index
    %c0_193 = arith.constant 0 : index
    %261 = vector.load %arg15[%c6_191, %c0_192, %c0_193] : memref<9x32x32xbf16, #tpu.memory_space<vmem>>, vector<1x32x32xbf16>
    %262 = vector.shape_cast %261 : vector<1x32x32xbf16> to vector<32x32xbf16>
    %cst_194 = arith.constant dense<0.000000e+00> : vector<32x64xf32>
    %263 = tpu.matmul %262, %260, %cst_194 {dimension_numbers = #tpu.dot_dimension_numbers<[1], [0], [0], [1], [0, 0, 1, 1], [], []>} : vector<32x32xbf16>, vector<32x64xbf16>, vector<32x64xf32> -> vector<32x64xf32>
    %264 = arith.addf %255, %263 : vector<32x64xf32>
    %265 = arith.truncf %206 : vector<32x64xf32> to vector<32x64xbf16>
    %c7_195 = arith.constant 7 : index
    %c0_196 = arith.constant 0 : index
    %c0_197 = arith.constant 0 : index
    %266 = vector.load %arg3[%c7_195, %c0_196, %c0_197] : memref<9x64x64xbf16, #tpu.memory_space<vmem>>, vector<1x64x64xbf16>
    %267 = vector.shape_cast %266 : vector<1x64x64xbf16> to vector<64x64xbf16>
    %cst_198 = arith.constant dense<0.000000e+00> : vector<32x64xf32>
    %268 = tpu.matmul %265, %267, %cst_198 {dimension_numbers = #tpu.dot_dimension_numbers<[1], [0], [0], [1], [0, 0, 1, 1], [], []>} : vector<32x64xbf16>, vector<64x64xbf16>, vector<32x64xf32> -> vector<32x64xf32>
    %269 = arith.truncf %268 : vector<32x64xf32> to vector<32x64xbf16>
    %c7_199 = arith.constant 7 : index
    %c0_200 = arith.constant 0 : index
    %c0_201 = arith.constant 0 : index
    %270 = vector.load %arg15[%c7_199, %c0_200, %c0_201] : memref<9x32x32xbf16, #tpu.memory_space<vmem>>, vector<1x32x32xbf16>
    %271 = vector.shape_cast %270 : vector<1x32x32xbf16> to vector<32x32xbf16>
    %cst_202 = arith.constant dense<0.000000e+00> : vector<32x64xf32>
    %272 = tpu.matmul %271, %269, %cst_202 {dimension_numbers = #tpu.dot_dimension_numbers<[1], [0], [0], [1], [0, 0, 1, 1], [], []>} : vector<32x32xbf16>, vector<32x64xbf16>, vector<32x64xf32> -> vector<32x64xf32>
    %273 = arith.addf %264, %272 : vector<32x64xf32>
    %274 = arith.truncf %206 : vector<32x64xf32> to vector<32x64xbf16>
    %c8_203 = arith.constant 8 : index
    %c0_204 = arith.constant 0 : index
    %c0_205 = arith.constant 0 : index
    %275 = vector.load %arg3[%c8_203, %c0_204, %c0_205] : memref<9x64x64xbf16, #tpu.memory_space<vmem>>, vector<1x64x64xbf16>
    %276 = vector.shape_cast %275 : vector<1x64x64xbf16> to vector<64x64xbf16>
    %cst_206 = arith.constant dense<0.000000e+00> : vector<32x64xf32>
    %277 = tpu.matmul %274, %276, %cst_206 {dimension_numbers = #tpu.dot_dimension_numbers<[1], [0], [0], [1], [0, 0, 1, 1], [], []>} : vector<32x64xbf16>, vector<64x64xbf16>, vector<32x64xf32> -> vector<32x64xf32>
    %278 = arith.truncf %277 : vector<32x64xf32> to vector<32x64xbf16>
    %c8_207 = arith.constant 8 : index
    %c0_208 = arith.constant 0 : index
    %c0_209 = arith.constant 0 : index
    %279 = vector.load %arg15[%c8_207, %c0_208, %c0_209] : memref<9x32x32xbf16, #tpu.memory_space<vmem>>, vector<1x32x32xbf16>
    %280 = vector.shape_cast %279 : vector<1x32x32xbf16> to vector<32x32xbf16>
    %cst_210 = arith.constant dense<0.000000e+00> : vector<32x64xf32>
    %281 = tpu.matmul %280, %278, %cst_210 {dimension_numbers = #tpu.dot_dimension_numbers<[1], [0], [0], [1], [0, 0, 1, 1], [], []>} : vector<32x32xbf16>, vector<32x64xbf16>, vector<32x64xf32> -> vector<32x64xf32>
    %282 = arith.addf %273, %281 : vector<32x64xf32>
    %c0_211 = arith.constant 0 : index
    %c0_212 = arith.constant 0 : index
    %283 = vector.load %arg16[%c0_211, %c0_212] : memref<32x3xf32, #tpu.memory_space<vmem>>, vector<32x3xf32>
    %284 = vector.extract_strided_slice %283 {offsets = [0, 0], sizes = [32, 1], strides = [1, 1]} : vector<32x3xf32> to vector<32x1xf32>
    %285 = vector.broadcast %284 : vector<32x1xf32> to vector<32x64xf32>
    %286 = arith.addf %282, %285 : vector<32x64xf32>
    %cst_213 = arith.constant 0.000000e+00 : f32
    %287 = vector.broadcast %cst_213 : f32 to vector<32x64xf32>
    %288 = arith.maximumf %286, %287 : vector<32x64xf32>
    %289 = vector.extract_strided_slice %283 {offsets = [0, 1], sizes = [32, 1], strides = [1, 1]} : vector<32x3xf32> to vector<32x1xf32>
    %290 = vector.broadcast %289 : vector<32x1xf32> to vector<32x64xf32>
    %291 = arith.mulf %288, %290 : vector<32x64xf32>
    %292 = vector.extract_strided_slice %283 {offsets = [0, 2], sizes = [32, 1], strides = [1, 1]} : vector<32x3xf32> to vector<32x1xf32>
    %293 = vector.broadcast %292 : vector<32x1xf32> to vector<32x64xf32>
    %294 = arith.addf %291, %293 : vector<32x64xf32>
    %295 = arith.truncf %294 : vector<32x64xf32> to vector<32x64xbf16>
    %c5_214 = arith.constant 5 : index
    %c0_215 = arith.constant 0 : index
    %c0_216 = arith.constant 0 : index
    %296 = vector.load %arg3[%c5_214, %c0_215, %c0_216] : memref<9x64x64xbf16, #tpu.memory_space<vmem>>, vector<1x64x64xbf16>
    %297 = vector.shape_cast %296 : vector<1x64x64xbf16> to vector<64x64xbf16>
    %cst_217 = arith.constant dense<0.000000e+00> : vector<32x64xf32>
    %298 = tpu.matmul %295, %297, %cst_217 {dimension_numbers = #tpu.dot_dimension_numbers<[1], [0], [0], [1], [0, 0, 1, 1], [], []>} : vector<32x64xbf16>, vector<64x64xbf16>, vector<32x64xf32> -> vector<32x64xf32>
    %299 = arith.maximumf %294, %298 : vector<32x64xf32>
    %300 = arith.truncf %299 : vector<32x64xf32> to vector<32x64xbf16>
    %c7_218 = arith.constant 7 : index
    %c0_219 = arith.constant 0 : index
    %c0_220 = arith.constant 0 : index
    %301 = vector.load %arg3[%c7_218, %c0_219, %c0_220] : memref<9x64x64xbf16, #tpu.memory_space<vmem>>, vector<1x64x64xbf16>
    %302 = vector.shape_cast %301 : vector<1x64x64xbf16> to vector<64x64xbf16>
    %cst_221 = arith.constant dense<0.000000e+00> : vector<32x64xf32>
    %303 = tpu.matmul %300, %302, %cst_221 {dimension_numbers = #tpu.dot_dimension_numbers<[1], [0], [0], [1], [0, 0, 1, 1], [], []>} : vector<32x64xbf16>, vector<64x64xbf16>, vector<32x64xf32> -> vector<32x64xf32>
    %304 = arith.maximumf %299, %303 : vector<32x64xf32>
    %305 = arith.truncf %304 : vector<32x64xf32> to vector<32x64xbf16>
    %c0_222 = arith.constant 0 : index
    %c0_223 = arith.constant 0 : index
    %306 = vector.load %arg6[%c0_222, %c0_223] : memref<64x16xbf16, #tpu.memory_space<vmem>>, vector<64x16xbf16>
    %cst_224 = arith.constant dense<0.000000e+00> : vector<32x16xf32>
    %307 = tpu.matmul %305, %306, %cst_224 {dimension_numbers = #tpu.dot_dimension_numbers<[1], [0], [0], [1], [0, 0, 1, 1], [], []>} : vector<32x64xbf16>, vector<64x16xbf16>, vector<32x16xf32> -> vector<32x16xf32>
    %308 = arith.truncf %307 : vector<32x16xf32> to vector<32x16xbf16>
    %c0_225 = arith.constant 0 : index
    %c0_226 = arith.constant 0 : index
    %c0_227 = arith.constant 0 : index
    %309 = vector.load %arg4[%c0_225, %c0_226, %c0_227] : memref<9x16x16xbf16, #tpu.memory_space<vmem>>, vector<1x16x16xbf16>
    %310 = vector.shape_cast %309 : vector<1x16x16xbf16> to vector<16x16xbf16>
    %cst_228 = arith.constant dense<0.000000e+00> : vector<32x16xf32>
    %311 = tpu.matmul %308, %310, %cst_228 {dimension_numbers = #tpu.dot_dimension_numbers<[1], [0], [0], [1], [0, 0, 1, 1], [], []>} : vector<32x16xbf16>, vector<16x16xbf16>, vector<32x16xf32> -> vector<32x16xf32>
    %312 = arith.truncf %311 : vector<32x16xf32> to vector<32x16xbf16>
    %c0_229 = arith.constant 0 : index
    %c0_230 = arith.constant 0 : index
    %c0_231 = arith.constant 0 : index
    %313 = vector.load %arg17[%c0_229, %c0_230, %c0_231] : memref<9x64x32xbf16, #tpu.memory_space<vmem>>, vector<1x64x32xbf16>
    %314 = vector.shape_cast %313 : vector<1x64x32xbf16> to vector<64x32xbf16>
    %cst_232 = arith.constant dense<0.000000e+00> : vector<64x16xf32>
    %315 = tpu.matmul %314, %312, %cst_232 {dimension_numbers = #tpu.dot_dimension_numbers<[1], [0], [0], [1], [0, 0, 1, 1], [], []>} : vector<64x32xbf16>, vector<32x16xbf16>, vector<64x16xf32> -> vector<64x16xf32>
    %316 = arith.truncf %307 : vector<32x16xf32> to vector<32x16xbf16>
    %c1_233 = arith.constant 1 : index
    %c0_234 = arith.constant 0 : index
    %c0_235 = arith.constant 0 : index
    %317 = vector.load %arg4[%c1_233, %c0_234, %c0_235] : memref<9x16x16xbf16, #tpu.memory_space<vmem>>, vector<1x16x16xbf16>
    %318 = vector.shape_cast %317 : vector<1x16x16xbf16> to vector<16x16xbf16>
    %cst_236 = arith.constant dense<0.000000e+00> : vector<32x16xf32>
    %319 = tpu.matmul %316, %318, %cst_236 {dimension_numbers = #tpu.dot_dimension_numbers<[1], [0], [0], [1], [0, 0, 1, 1], [], []>} : vector<32x16xbf16>, vector<16x16xbf16>, vector<32x16xf32> -> vector<32x16xf32>
    %320 = arith.truncf %319 : vector<32x16xf32> to vector<32x16xbf16>
    %c1_237 = arith.constant 1 : index
    %c0_238 = arith.constant 0 : index
    %c0_239 = arith.constant 0 : index
    %321 = vector.load %arg17[%c1_237, %c0_238, %c0_239] : memref<9x64x32xbf16, #tpu.memory_space<vmem>>, vector<1x64x32xbf16>
    %322 = vector.shape_cast %321 : vector<1x64x32xbf16> to vector<64x32xbf16>
    %cst_240 = arith.constant dense<0.000000e+00> : vector<64x16xf32>
    %323 = tpu.matmul %322, %320, %cst_240 {dimension_numbers = #tpu.dot_dimension_numbers<[1], [0], [0], [1], [0, 0, 1, 1], [], []>} : vector<64x32xbf16>, vector<32x16xbf16>, vector<64x16xf32> -> vector<64x16xf32>
    %324 = arith.addf %315, %323 : vector<64x16xf32>
    %325 = arith.truncf %307 : vector<32x16xf32> to vector<32x16xbf16>
    %c2_241 = arith.constant 2 : index
    %c0_242 = arith.constant 0 : index
    %c0_243 = arith.constant 0 : index
    %326 = vector.load %arg4[%c2_241, %c0_242, %c0_243] : memref<9x16x16xbf16, #tpu.memory_space<vmem>>, vector<1x16x16xbf16>
    %327 = vector.shape_cast %326 : vector<1x16x16xbf16> to vector<16x16xbf16>
    %cst_244 = arith.constant dense<0.000000e+00> : vector<32x16xf32>
    %328 = tpu.matmul %325, %327, %cst_244 {dimension_numbers = #tpu.dot_dimension_numbers<[1], [0], [0], [1], [0, 0, 1, 1], [], []>} : vector<32x16xbf16>, vector<16x16xbf16>, vector<32x16xf32> -> vector<32x16xf32>
    %329 = arith.truncf %328 : vector<32x16xf32> to vector<32x16xbf16>
    %c2_245 = arith.constant 2 : index
    %c0_246 = arith.constant 0 : index
    %c0_247 = arith.constant 0 : index
    %330 = vector.load %arg17[%c2_245, %c0_246, %c0_247] : memref<9x64x32xbf16, #tpu.memory_space<vmem>>, vector<1x64x32xbf16>
    %331 = vector.shape_cast %330 : vector<1x64x32xbf16> to vector<64x32xbf16>
    %cst_248 = arith.constant dense<0.000000e+00> : vector<64x16xf32>
    %332 = tpu.matmul %331, %329, %cst_248 {dimension_numbers = #tpu.dot_dimension_numbers<[1], [0], [0], [1], [0, 0, 1, 1], [], []>} : vector<64x32xbf16>, vector<32x16xbf16>, vector<64x16xf32> -> vector<64x16xf32>
    %333 = arith.addf %324, %332 : vector<64x16xf32>
    %334 = arith.truncf %307 : vector<32x16xf32> to vector<32x16xbf16>
    %c3_249 = arith.constant 3 : index
    %c0_250 = arith.constant 0 : index
    %c0_251 = arith.constant 0 : index
    %335 = vector.load %arg4[%c3_249, %c0_250, %c0_251] : memref<9x16x16xbf16, #tpu.memory_space<vmem>>, vector<1x16x16xbf16>
    %336 = vector.shape_cast %335 : vector<1x16x16xbf16> to vector<16x16xbf16>
    %cst_252 = arith.constant dense<0.000000e+00> : vector<32x16xf32>
    %337 = tpu.matmul %334, %336, %cst_252 {dimension_numbers = #tpu.dot_dimension_numbers<[1], [0], [0], [1], [0, 0, 1, 1], [], []>} : vector<32x16xbf16>, vector<16x16xbf16>, vector<32x16xf32> -> vector<32x16xf32>
    %338 = arith.truncf %337 : vector<32x16xf32> to vector<32x16xbf16>
    %c3_253 = arith.constant 3 : index
    %c0_254 = arith.constant 0 : index
    %c0_255 = arith.constant 0 : index
    %339 = vector.load %arg17[%c3_253, %c0_254, %c0_255] : memref<9x64x32xbf16, #tpu.memory_space<vmem>>, vector<1x64x32xbf16>
    %340 = vector.shape_cast %339 : vector<1x64x32xbf16> to vector<64x32xbf16>
    %cst_256 = arith.constant dense<0.000000e+00> : vector<64x16xf32>
    %341 = tpu.matmul %340, %338, %cst_256 {dimension_numbers = #tpu.dot_dimension_numbers<[1], [0], [0], [1], [0, 0, 1, 1], [], []>} : vector<64x32xbf16>, vector<32x16xbf16>, vector<64x16xf32> -> vector<64x16xf32>
    %342 = arith.addf %333, %341 : vector<64x16xf32>
    %343 = arith.truncf %307 : vector<32x16xf32> to vector<32x16xbf16>
    %c4_257 = arith.constant 4 : index
    %c0_258 = arith.constant 0 : index
    %c0_259 = arith.constant 0 : index
    %344 = vector.load %arg17[%c4_257, %c0_258, %c0_259] : memref<9x64x32xbf16, #tpu.memory_space<vmem>>, vector<1x64x32xbf16>
    %345 = vector.shape_cast %344 : vector<1x64x32xbf16> to vector<64x32xbf16>
    %cst_260 = arith.constant dense<0.000000e+00> : vector<64x16xf32>
    %346 = tpu.matmul %345, %343, %cst_260 {dimension_numbers = #tpu.dot_dimension_numbers<[1], [0], [0], [1], [0, 0, 1, 1], [], []>} : vector<64x32xbf16>, vector<32x16xbf16>, vector<64x16xf32> -> vector<64x16xf32>
    %347 = arith.addf %342, %346 : vector<64x16xf32>
    %348 = arith.truncf %307 : vector<32x16xf32> to vector<32x16xbf16>
    %c5_261 = arith.constant 5 : index
    %c0_262 = arith.constant 0 : index
    %c0_263 = arith.constant 0 : index
    %349 = vector.load %arg4[%c5_261, %c0_262, %c0_263] : memref<9x16x16xbf16, #tpu.memory_space<vmem>>, vector<1x16x16xbf16>
    %350 = vector.shape_cast %349 : vector<1x16x16xbf16> to vector<16x16xbf16>
    %cst_264 = arith.constant dense<0.000000e+00> : vector<32x16xf32>
    %351 = tpu.matmul %348, %350, %cst_264 {dimension_numbers = #tpu.dot_dimension_numbers<[1], [0], [0], [1], [0, 0, 1, 1], [], []>} : vector<32x16xbf16>, vector<16x16xbf16>, vector<32x16xf32> -> vector<32x16xf32>
    %352 = arith.truncf %351 : vector<32x16xf32> to vector<32x16xbf16>
    %c5_265 = arith.constant 5 : index
    %c0_266 = arith.constant 0 : index
    %c0_267 = arith.constant 0 : index
    %353 = vector.load %arg17[%c5_265, %c0_266, %c0_267] : memref<9x64x32xbf16, #tpu.memory_space<vmem>>, vector<1x64x32xbf16>
    %354 = vector.shape_cast %353 : vector<1x64x32xbf16> to vector<64x32xbf16>
    %cst_268 = arith.constant dense<0.000000e+00> : vector<64x16xf32>
    %355 = tpu.matmul %354, %352, %cst_268 {dimension_numbers = #tpu.dot_dimension_numbers<[1], [0], [0], [1], [0, 0, 1, 1], [], []>} : vector<64x32xbf16>, vector<32x16xbf16>, vector<64x16xf32> -> vector<64x16xf32>
    %356 = arith.addf %347, %355 : vector<64x16xf32>
    %357 = arith.truncf %307 : vector<32x16xf32> to vector<32x16xbf16>
    %c6_269 = arith.constant 6 : index
    %c0_270 = arith.constant 0 : index
    %c0_271 = arith.constant 0 : index
    %358 = vector.load %arg4[%c6_269, %c0_270, %c0_271] : memref<9x16x16xbf16, #tpu.memory_space<vmem>>, vector<1x16x16xbf16>
    %359 = vector.shape_cast %358 : vector<1x16x16xbf16> to vector<16x16xbf16>
    %cst_272 = arith.constant dense<0.000000e+00> : vector<32x16xf32>
    %360 = tpu.matmul %357, %359, %cst_272 {dimension_numbers = #tpu.dot_dimension_numbers<[1], [0], [0], [1], [0, 0, 1, 1], [], []>} : vector<32x16xbf16>, vector<16x16xbf16>, vector<32x16xf32> -> vector<32x16xf32>
    %361 = arith.truncf %360 : vector<32x16xf32> to vector<32x16xbf16>
    %c6_273 = arith.constant 6 : index
    %c0_274 = arith.constant 0 : index
    %c0_275 = arith.constant 0 : index
    %362 = vector.load %arg17[%c6_273, %c0_274, %c0_275] : memref<9x64x32xbf16, #tpu.memory_space<vmem>>, vector<1x64x32xbf16>
    %363 = vector.shape_cast %362 : vector<1x64x32xbf16> to vector<64x32xbf16>
    %cst_276 = arith.constant dense<0.000000e+00> : vector<64x16xf32>
    %364 = tpu.matmul %363, %361, %cst_276 {dimension_numbers = #tpu.dot_dimension_numbers<[1], [0], [0], [1], [0, 0, 1, 1], [], []>} : vector<64x32xbf16>, vector<32x16xbf16>, vector<64x16xf32> -> vector<64x16xf32>
    %365 = arith.addf %356, %364 : vector<64x16xf32>
    %366 = arith.truncf %307 : vector<32x16xf32> to vector<32x16xbf16>
    %c7_277 = arith.constant 7 : index
    %c0_278 = arith.constant 0 : index
    %c0_279 = arith.constant 0 : index
    %367 = vector.load %arg4[%c7_277, %c0_278, %c0_279] : memref<9x16x16xbf16, #tpu.memory_space<vmem>>, vector<1x16x16xbf16>
    %368 = vector.shape_cast %367 : vector<1x16x16xbf16> to vector<16x16xbf16>
    %cst_280 = arith.constant dense<0.000000e+00> : vector<32x16xf32>
    %369 = tpu.matmul %366, %368, %cst_280 {dimension_numbers = #tpu.dot_dimension_numbers<[1], [0], [0], [1], [0, 0, 1, 1], [], []>} : vector<32x16xbf16>, vector<16x16xbf16>, vector<32x16xf32> -> vector<32x16xf32>
    %370 = arith.truncf %369 : vector<32x16xf32> to vector<32x16xbf16>
    %c7_281 = arith.constant 7 : index
    %c0_282 = arith.constant 0 : index
    %c0_283 = arith.constant 0 : index
    %371 = vector.load %arg17[%c7_281, %c0_282, %c0_283] : memref<9x64x32xbf16, #tpu.memory_space<vmem>>, vector<1x64x32xbf16>
    %372 = vector.shape_cast %371 : vector<1x64x32xbf16> to vector<64x32xbf16>
    %cst_284 = arith.constant dense<0.000000e+00> : vector<64x16xf32>
    %373 = tpu.matmul %372, %370, %cst_284 {dimension_numbers = #tpu.dot_dimension_numbers<[1], [0], [0], [1], [0, 0, 1, 1], [], []>} : vector<64x32xbf16>, vector<32x16xbf16>, vector<64x16xf32> -> vector<64x16xf32>
    %374 = arith.addf %365, %373 : vector<64x16xf32>
    %375 = arith.truncf %307 : vector<32x16xf32> to vector<32x16xbf16>
    %c8_285 = arith.constant 8 : index
    %c0_286 = arith.constant 0 : index
    %c0_287 = arith.constant 0 : index
    %376 = vector.load %arg4[%c8_285, %c0_286, %c0_287] : memref<9x16x16xbf16, #tpu.memory_space<vmem>>, vector<1x16x16xbf16>
    %377 = vector.shape_cast %376 : vector<1x16x16xbf16> to vector<16x16xbf16>
    %cst_288 = arith.constant dense<0.000000e+00> : vector<32x16xf32>
    %378 = tpu.matmul %375, %377, %cst_288 {dimension_numbers = #tpu.dot_dimension_numbers<[1], [0], [0], [1], [0, 0, 1, 1], [], []>} : vector<32x16xbf16>, vector<16x16xbf16>, vector<32x16xf32> -> vector<32x16xf32>
    %379 = arith.truncf %378 : vector<32x16xf32> to vector<32x16xbf16>
    %c8_289 = arith.constant 8 : index
    %c0_290 = arith.constant 0 : index
    %c0_291 = arith.constant 0 : index
    %380 = vector.load %arg17[%c8_289, %c0_290, %c0_291] : memref<9x64x32xbf16, #tpu.memory_space<vmem>>, vector<1x64x32xbf16>
    %381 = vector.shape_cast %380 : vector<1x64x32xbf16> to vector<64x32xbf16>
    %cst_292 = arith.constant dense<0.000000e+00> : vector<64x16xf32>
    %382 = tpu.matmul %381, %379, %cst_292 {dimension_numbers = #tpu.dot_dimension_numbers<[1], [0], [0], [1], [0, 0, 1, 1], [], []>} : vector<64x32xbf16>, vector<32x16xbf16>, vector<64x16xf32> -> vector<64x16xf32>
    %383 = arith.addf %374, %382 : vector<64x16xf32>
    %c0_293 = arith.constant 0 : index
    %c0_294 = arith.constant 0 : index
    %384 = vector.load %arg18[%c0_293, %c0_294] : memref<64x3xf32, #tpu.memory_space<vmem>>, vector<64x3xf32>
    %385 = vector.extract_strided_slice %384 {offsets = [0, 0], sizes = [64, 1], strides = [1, 1]} : vector<64x3xf32> to vector<64x1xf32>
    %386 = vector.broadcast %385 : vector<64x1xf32> to vector<64x16xf32>
    %387 = arith.addf %383, %386 : vector<64x16xf32>
    %cst_295 = arith.constant 0.000000e+00 : f32
    %388 = vector.broadcast %cst_295 : f32 to vector<64x16xf32>
    %389 = arith.maximumf %387, %388 : vector<64x16xf32>
    %390 = vector.extract_strided_slice %384 {offsets = [0, 1], sizes = [64, 1], strides = [1, 1]} : vector<64x3xf32> to vector<64x1xf32>
    %391 = vector.broadcast %390 : vector<64x1xf32> to vector<64x16xf32>
    %392 = arith.mulf %389, %391 : vector<64x16xf32>
    %393 = vector.extract_strided_slice %384 {offsets = [0, 2], sizes = [64, 1], strides = [1, 1]} : vector<64x3xf32> to vector<64x1xf32>
    %394 = vector.broadcast %393 : vector<64x1xf32> to vector<64x16xf32>
    %395 = arith.addf %392, %394 : vector<64x16xf32>
    %396 = arith.truncf %395 : vector<64x16xf32> to vector<64x16xbf16>
    %c0_296 = arith.constant 0 : index
    %c0_297 = arith.constant 0 : index
    %c0_298 = arith.constant 0 : index
    %397 = vector.load %arg4[%c0_296, %c0_297, %c0_298] : memref<9x16x16xbf16, #tpu.memory_space<vmem>>, vector<1x16x16xbf16>
    %398 = vector.shape_cast %397 : vector<1x16x16xbf16> to vector<16x16xbf16>
    %cst_299 = arith.constant dense<0.000000e+00> : vector<64x16xf32>
    %399 = tpu.matmul %396, %398, %cst_299 {dimension_numbers = #tpu.dot_dimension_numbers<[1], [0], [0], [1], [0, 0, 1, 1], [], []>} : vector<64x16xbf16>, vector<16x16xbf16>, vector<64x16xf32> -> vector<64x16xf32>
    %400 = arith.truncf %399 : vector<64x16xf32> to vector<64x16xbf16>
    %c0_300 = arith.constant 0 : index
    %c0_301 = arith.constant 0 : index
    %c0_302 = arith.constant 0 : index
    %401 = vector.load %arg19[%c0_300, %c0_301, %c0_302] : memref<9x64x64xbf16, #tpu.memory_space<vmem>>, vector<1x64x64xbf16>
    %402 = vector.shape_cast %401 : vector<1x64x64xbf16> to vector<64x64xbf16>
    %cst_303 = arith.constant dense<0.000000e+00> : vector<64x16xf32>
    %403 = tpu.matmul %402, %400, %cst_303 {dimension_numbers = #tpu.dot_dimension_numbers<[1], [0], [0], [1], [0, 0, 1, 1], [], []>} : vector<64x64xbf16>, vector<64x16xbf16>, vector<64x16xf32> -> vector<64x16xf32>
    %404 = arith.truncf %395 : vector<64x16xf32> to vector<64x16xbf16>
    %c1_304 = arith.constant 1 : index
    %c0_305 = arith.constant 0 : index
    %c0_306 = arith.constant 0 : index
    %405 = vector.load %arg4[%c1_304, %c0_305, %c0_306] : memref<9x16x16xbf16, #tpu.memory_space<vmem>>, vector<1x16x16xbf16>
    %406 = vector.shape_cast %405 : vector<1x16x16xbf16> to vector<16x16xbf16>
    %cst_307 = arith.constant dense<0.000000e+00> : vector<64x16xf32>
    %407 = tpu.matmul %404, %406, %cst_307 {dimension_numbers = #tpu.dot_dimension_numbers<[1], [0], [0], [1], [0, 0, 1, 1], [], []>} : vector<64x16xbf16>, vector<16x16xbf16>, vector<64x16xf32> -> vector<64x16xf32>
    %408 = arith.truncf %407 : vector<64x16xf32> to vector<64x16xbf16>
    %c1_308 = arith.constant 1 : index
    %c0_309 = arith.constant 0 : index
    %c0_310 = arith.constant 0 : index
    %409 = vector.load %arg19[%c1_308, %c0_309, %c0_310] : memref<9x64x64xbf16, #tpu.memory_space<vmem>>, vector<1x64x64xbf16>
    %410 = vector.shape_cast %409 : vector<1x64x64xbf16> to vector<64x64xbf16>
    %cst_311 = arith.constant dense<0.000000e+00> : vector<64x16xf32>
    %411 = tpu.matmul %410, %408, %cst_311 {dimension_numbers = #tpu.dot_dimension_numbers<[1], [0], [0], [1], [0, 0, 1, 1], [], []>} : vector<64x64xbf16>, vector<64x16xbf16>, vector<64x16xf32> -> vector<64x16xf32>
    %412 = arith.addf %403, %411 : vector<64x16xf32>
    %413 = arith.truncf %395 : vector<64x16xf32> to vector<64x16xbf16>
    %c2_312 = arith.constant 2 : index
    %c0_313 = arith.constant 0 : index
    %c0_314 = arith.constant 0 : index
    %414 = vector.load %arg4[%c2_312, %c0_313, %c0_314] : memref<9x16x16xbf16, #tpu.memory_space<vmem>>, vector<1x16x16xbf16>
    %415 = vector.shape_cast %414 : vector<1x16x16xbf16> to vector<16x16xbf16>
    %cst_315 = arith.constant dense<0.000000e+00> : vector<64x16xf32>
    %416 = tpu.matmul %413, %415, %cst_315 {dimension_numbers = #tpu.dot_dimension_numbers<[1], [0], [0], [1], [0, 0, 1, 1], [], []>} : vector<64x16xbf16>, vector<16x16xbf16>, vector<64x16xf32> -> vector<64x16xf32>
    %417 = arith.truncf %416 : vector<64x16xf32> to vector<64x16xbf16>
    %c2_316 = arith.constant 2 : index
    %c0_317 = arith.constant 0 : index
    %c0_318 = arith.constant 0 : index
    %418 = vector.load %arg19[%c2_316, %c0_317, %c0_318] : memref<9x64x64xbf16, #tpu.memory_space<vmem>>, vector<1x64x64xbf16>
    %419 = vector.shape_cast %418 : vector<1x64x64xbf16> to vector<64x64xbf16>
    %cst_319 = arith.constant dense<0.000000e+00> : vector<64x16xf32>
    %420 = tpu.matmul %419, %417, %cst_319 {dimension_numbers = #tpu.dot_dimension_numbers<[1], [0], [0], [1], [0, 0, 1, 1], [], []>} : vector<64x64xbf16>, vector<64x16xbf16>, vector<64x16xf32> -> vector<64x16xf32>
    %421 = arith.addf %412, %420 : vector<64x16xf32>
    %422 = arith.truncf %395 : vector<64x16xf32> to vector<64x16xbf16>
    %c3_320 = arith.constant 3 : index
    %c0_321 = arith.constant 0 : index
    %c0_322 = arith.constant 0 : index
    %423 = vector.load %arg4[%c3_320, %c0_321, %c0_322] : memref<9x16x16xbf16, #tpu.memory_space<vmem>>, vector<1x16x16xbf16>
    %424 = vector.shape_cast %423 : vector<1x16x16xbf16> to vector<16x16xbf16>
    %cst_323 = arith.constant dense<0.000000e+00> : vector<64x16xf32>
    %425 = tpu.matmul %422, %424, %cst_323 {dimension_numbers = #tpu.dot_dimension_numbers<[1], [0], [0], [1], [0, 0, 1, 1], [], []>} : vector<64x16xbf16>, vector<16x16xbf16>, vector<64x16xf32> -> vector<64x16xf32>
    %426 = arith.truncf %425 : vector<64x16xf32> to vector<64x16xbf16>
    %c3_324 = arith.constant 3 : index
    %c0_325 = arith.constant 0 : index
    %c0_326 = arith.constant 0 : index
    %427 = vector.load %arg19[%c3_324, %c0_325, %c0_326] : memref<9x64x64xbf16, #tpu.memory_space<vmem>>, vector<1x64x64xbf16>
    %428 = vector.shape_cast %427 : vector<1x64x64xbf16> to vector<64x64xbf16>
    %cst_327 = arith.constant dense<0.000000e+00> : vector<64x16xf32>
    %429 = tpu.matmul %428, %426, %cst_327 {dimension_numbers = #tpu.dot_dimension_numbers<[1], [0], [0], [1], [0, 0, 1, 1], [], []>} : vector<64x64xbf16>, vector<64x16xbf16>, vector<64x16xf32> -> vector<64x16xf32>
    %430 = arith.addf %421, %429 : vector<64x16xf32>
    %431 = arith.truncf %395 : vector<64x16xf32> to vector<64x16xbf16>
    %c4_328 = arith.constant 4 : index
    %c0_329 = arith.constant 0 : index
    %c0_330 = arith.constant 0 : index
    %432 = vector.load %arg19[%c4_328, %c0_329, %c0_330] : memref<9x64x64xbf16, #tpu.memory_space<vmem>>, vector<1x64x64xbf16>
    %433 = vector.shape_cast %432 : vector<1x64x64xbf16> to vector<64x64xbf16>
    %cst_331 = arith.constant dense<0.000000e+00> : vector<64x16xf32>
    %434 = tpu.matmul %433, %431, %cst_331 {dimension_numbers = #tpu.dot_dimension_numbers<[1], [0], [0], [1], [0, 0, 1, 1], [], []>} : vector<64x64xbf16>, vector<64x16xbf16>, vector<64x16xf32> -> vector<64x16xf32>
    %435 = arith.addf %430, %434 : vector<64x16xf32>
    %436 = arith.truncf %395 : vector<64x16xf32> to vector<64x16xbf16>
    %c5_332 = arith.constant 5 : index
    %c0_333 = arith.constant 0 : index
    %c0_334 = arith.constant 0 : index
    %437 = vector.load %arg4[%c5_332, %c0_333, %c0_334] : memref<9x16x16xbf16, #tpu.memory_space<vmem>>, vector<1x16x16xbf16>
    %438 = vector.shape_cast %437 : vector<1x16x16xbf16> to vector<16x16xbf16>
    %cst_335 = arith.constant dense<0.000000e+00> : vector<64x16xf32>
    %439 = tpu.matmul %436, %438, %cst_335 {dimension_numbers = #tpu.dot_dimension_numbers<[1], [0], [0], [1], [0, 0, 1, 1], [], []>} : vector<64x16xbf16>, vector<16x16xbf16>, vector<64x16xf32> -> vector<64x16xf32>
    %440 = arith.truncf %439 : vector<64x16xf32> to vector<64x16xbf16>
    %c5_336 = arith.constant 5 : index
    %c0_337 = arith.constant 0 : index
    %c0_338 = arith.constant 0 : index
    %441 = vector.load %arg19[%c5_336, %c0_337, %c0_338] : memref<9x64x64xbf16, #tpu.memory_space<vmem>>, vector<1x64x64xbf16>
    %442 = vector.shape_cast %441 : vector<1x64x64xbf16> to vector<64x64xbf16>
    %cst_339 = arith.constant dense<0.000000e+00> : vector<64x16xf32>
    %443 = tpu.matmul %442, %440, %cst_339 {dimension_numbers = #tpu.dot_dimension_numbers<[1], [0], [0], [1], [0, 0, 1, 1], [], []>} : vector<64x64xbf16>, vector<64x16xbf16>, vector<64x16xf32> -> vector<64x16xf32>
    %444 = arith.addf %435, %443 : vector<64x16xf32>
    %445 = arith.truncf %395 : vector<64x16xf32> to vector<64x16xbf16>
    %c6_340 = arith.constant 6 : index
    %c0_341 = arith.constant 0 : index
    %c0_342 = arith.constant 0 : index
    %446 = vector.load %arg4[%c6_340, %c0_341, %c0_342] : memref<9x16x16xbf16, #tpu.memory_space<vmem>>, vector<1x16x16xbf16>
    %447 = vector.shape_cast %446 : vector<1x16x16xbf16> to vector<16x16xbf16>
    %cst_343 = arith.constant dense<0.000000e+00> : vector<64x16xf32>
    %448 = tpu.matmul %445, %447, %cst_343 {dimension_numbers = #tpu.dot_dimension_numbers<[1], [0], [0], [1], [0, 0, 1, 1], [], []>} : vector<64x16xbf16>, vector<16x16xbf16>, vector<64x16xf32> -> vector<64x16xf32>
    %449 = arith.truncf %448 : vector<64x16xf32> to vector<64x16xbf16>
    %c6_344 = arith.constant 6 : index
    %c0_345 = arith.constant 0 : index
    %c0_346 = arith.constant 0 : index
    %450 = vector.load %arg19[%c6_344, %c0_345, %c0_346] : memref<9x64x64xbf16, #tpu.memory_space<vmem>>, vector<1x64x64xbf16>
    %451 = vector.shape_cast %450 : vector<1x64x64xbf16> to vector<64x64xbf16>
    %cst_347 = arith.constant dense<0.000000e+00> : vector<64x16xf32>
    %452 = tpu.matmul %451, %449, %cst_347 {dimension_numbers = #tpu.dot_dimension_numbers<[1], [0], [0], [1], [0, 0, 1, 1], [], []>} : vector<64x64xbf16>, vector<64x16xbf16>, vector<64x16xf32> -> vector<64x16xf32>
    %453 = arith.addf %444, %452 : vector<64x16xf32>
    %454 = arith.truncf %395 : vector<64x16xf32> to vector<64x16xbf16>
    %c7_348 = arith.constant 7 : index
    %c0_349 = arith.constant 0 : index
    %c0_350 = arith.constant 0 : index
    %455 = vector.load %arg4[%c7_348, %c0_349, %c0_350] : memref<9x16x16xbf16, #tpu.memory_space<vmem>>, vector<1x16x16xbf16>
    %456 = vector.shape_cast %455 : vector<1x16x16xbf16> to vector<16x16xbf16>
    %cst_351 = arith.constant dense<0.000000e+00> : vector<64x16xf32>
    %457 = tpu.matmul %454, %456, %cst_351 {dimension_numbers = #tpu.dot_dimension_numbers<[1], [0], [0], [1], [0, 0, 1, 1], [], []>} : vector<64x16xbf16>, vector<16x16xbf16>, vector<64x16xf32> -> vector<64x16xf32>
    %458 = arith.truncf %457 : vector<64x16xf32> to vector<64x16xbf16>
    %c7_352 = arith.constant 7 : index
    %c0_353 = arith.constant 0 : index
    %c0_354 = arith.constant 0 : index
    %459 = vector.load %arg19[%c7_352, %c0_353, %c0_354] : memref<9x64x64xbf16, #tpu.memory_space<vmem>>, vector<1x64x64xbf16>
    %460 = vector.shape_cast %459 : vector<1x64x64xbf16> to vector<64x64xbf16>
    %cst_355 = arith.constant dense<0.000000e+00> : vector<64x16xf32>
    %461 = tpu.matmul %460, %458, %cst_355 {dimension_numbers = #tpu.dot_dimension_numbers<[1], [0], [0], [1], [0, 0, 1, 1], [], []>} : vector<64x64xbf16>, vector<64x16xbf16>, vector<64x16xf32> -> vector<64x16xf32>
    %462 = arith.addf %453, %461 : vector<64x16xf32>
    %463 = arith.truncf %395 : vector<64x16xf32> to vector<64x16xbf16>
    %c8_356 = arith.constant 8 : index
    %c0_357 = arith.constant 0 : index
    %c0_358 = arith.constant 0 : index
    %464 = vector.load %arg4[%c8_356, %c0_357, %c0_358] : memref<9x16x16xbf16, #tpu.memory_space<vmem>>, vector<1x16x16xbf16>
    %465 = vector.shape_cast %464 : vector<1x16x16xbf16> to vector<16x16xbf16>
    %cst_359 = arith.constant dense<0.000000e+00> : vector<64x16xf32>
    %466 = tpu.matmul %463, %465, %cst_359 {dimension_numbers = #tpu.dot_dimension_numbers<[1], [0], [0], [1], [0, 0, 1, 1], [], []>} : vector<64x16xbf16>, vector<16x16xbf16>, vector<64x16xf32> -> vector<64x16xf32>
    %467 = arith.truncf %466 : vector<64x16xf32> to vector<64x16xbf16>
    %c8_360 = arith.constant 8 : index
    %c0_361 = arith.constant 0 : index
    %c0_362 = arith.constant 0 : index
    %468 = vector.load %arg19[%c8_360, %c0_361, %c0_362] : memref<9x64x64xbf16, #tpu.memory_space<vmem>>, vector<1x64x64xbf16>
    %469 = vector.shape_cast %468 : vector<1x64x64xbf16> to vector<64x64xbf16>
    %cst_363 = arith.constant dense<0.000000e+00> : vector<64x16xf32>
    %470 = tpu.matmul %469, %467, %cst_363 {dimension_numbers = #tpu.dot_dimension_numbers<[1], [0], [0], [1], [0, 0, 1, 1], [], []>} : vector<64x64xbf16>, vector<64x16xbf16>, vector<64x16xf32> -> vector<64x16xf32>
    %471 = arith.addf %462, %470 : vector<64x16xf32>
    %c0_364 = arith.constant 0 : index
    %c0_365 = arith.constant 0 : index
    %472 = vector.load %arg20[%c0_364, %c0_365] : memref<64x3xf32, #tpu.memory_space<vmem>>, vector<64x3xf32>
    %473 = vector.extract_strided_slice %472 {offsets = [0, 0], sizes = [64, 1], strides = [1, 1]} : vector<64x3xf32> to vector<64x1xf32>
    %474 = vector.broadcast %473 : vector<64x1xf32> to vector<64x16xf32>
    %475 = arith.addf %471, %474 : vector<64x16xf32>
    %cst_366 = arith.constant 0.000000e+00 : f32
    %476 = vector.broadcast %cst_366 : f32 to vector<64x16xf32>
    %477 = arith.maximumf %475, %476 : vector<64x16xf32>
    %478 = vector.extract_strided_slice %472 {offsets = [0, 1], sizes = [64, 1], strides = [1, 1]} : vector<64x3xf32> to vector<64x1xf32>
    %479 = vector.broadcast %478 : vector<64x1xf32> to vector<64x16xf32>
    %480 = arith.mulf %477, %479 : vector<64x16xf32>
    %481 = vector.extract_strided_slice %472 {offsets = [0, 2], sizes = [64, 1], strides = [1, 1]} : vector<64x3xf32> to vector<64x1xf32>
    %482 = vector.broadcast %481 : vector<64x1xf32> to vector<64x16xf32>
    %483 = arith.addf %480, %482 : vector<64x16xf32>
    %484 = arith.truncf %483 : vector<64x16xf32> to vector<64x16xbf16>
    %c0_367 = arith.constant 0 : index
    %c0_368 = arith.constant 0 : index
    %c0_369 = arith.constant 0 : index
    %485 = vector.load %arg21[%c0_367, %c0_368, %c0_369] : memref<4x32x64xbf16, #tpu.memory_space<vmem>>, vector<1x32x64xbf16>
    %486 = vector.shape_cast %485 : vector<1x32x64xbf16> to vector<32x64xbf16>
    %cst_370 = arith.constant dense<0.000000e+00> : vector<32x16xf32>
    %487 = tpu.matmul %486, %484, %cst_370 {dimension_numbers = #tpu.dot_dimension_numbers<[1], [0], [0], [1], [0, 0, 1, 1], [], []>} : vector<32x64xbf16>, vector<64x16xbf16>, vector<32x16xf32> -> vector<32x16xf32>
    %488 = arith.truncf %487 : vector<32x16xf32> to vector<32x16xbf16>
    %c0_371 = arith.constant 0 : index
    %c0_372 = arith.constant 0 : index
    %c0_373 = arith.constant 0 : index
    %489 = vector.load %arg7[%c0_371, %c0_372, %c0_373] : memref<4x16x64xbf16, #tpu.memory_space<vmem>>, vector<1x16x64xbf16>
    %490 = vector.shape_cast %489 : vector<1x16x64xbf16> to vector<16x64xbf16>
    %cst_374 = arith.constant dense<0.000000e+00> : vector<32x64xf32>
    %491 = tpu.matmul %488, %490, %cst_374 {dimension_numbers = #tpu.dot_dimension_numbers<[1], [0], [0], [1], [0, 0, 1, 1], [], []>} : vector<32x16xbf16>, vector<16x64xbf16>, vector<32x64xf32> -> vector<32x64xf32>
    %c1_375 = arith.constant 1 : index
    %c0_376 = arith.constant 0 : index
    %c0_377 = arith.constant 0 : index
    %492 = vector.load %arg21[%c1_375, %c0_376, %c0_377] : memref<4x32x64xbf16, #tpu.memory_space<vmem>>, vector<1x32x64xbf16>
    %493 = vector.shape_cast %492 : vector<1x32x64xbf16> to vector<32x64xbf16>
    %cst_378 = arith.constant dense<0.000000e+00> : vector<32x16xf32>
    %494 = tpu.matmul %493, %484, %cst_378 {dimension_numbers = #tpu.dot_dimension_numbers<[1], [0], [0], [1], [0, 0, 1, 1], [], []>} : vector<32x64xbf16>, vector<64x16xbf16>, vector<32x16xf32> -> vector<32x16xf32>
    %495 = arith.truncf %494 : vector<32x16xf32> to vector<32x16xbf16>
    %c1_379 = arith.constant 1 : index
    %c0_380 = arith.constant 0 : index
    %c0_381 = arith.constant 0 : index
    %496 = vector.load %arg7[%c1_379, %c0_380, %c0_381] : memref<4x16x64xbf16, #tpu.memory_space<vmem>>, vector<1x16x64xbf16>
    %497 = vector.shape_cast %496 : vector<1x16x64xbf16> to vector<16x64xbf16>
    %cst_382 = arith.constant dense<0.000000e+00> : vector<32x64xf32>
    %498 = tpu.matmul %495, %497, %cst_382 {dimension_numbers = #tpu.dot_dimension_numbers<[1], [0], [0], [1], [0, 0, 1, 1], [], []>} : vector<32x16xbf16>, vector<16x64xbf16>, vector<32x64xf32> -> vector<32x64xf32>
    %499 = arith.addf %491, %498 : vector<32x64xf32>
    %c2_383 = arith.constant 2 : index
    %c0_384 = arith.constant 0 : index
    %c0_385 = arith.constant 0 : index
    %500 = vector.load %arg21[%c2_383, %c0_384, %c0_385] : memref<4x32x64xbf16, #tpu.memory_space<vmem>>, vector<1x32x64xbf16>
    %501 = vector.shape_cast %500 : vector<1x32x64xbf16> to vector<32x64xbf16>
    %cst_386 = arith.constant dense<0.000000e+00> : vector<32x16xf32>
    %502 = tpu.matmul %501, %484, %cst_386 {dimension_numbers = #tpu.dot_dimension_numbers<[1], [0], [0], [1], [0, 0, 1, 1], [], []>} : vector<32x64xbf16>, vector<64x16xbf16>, vector<32x16xf32> -> vector<32x16xf32>
    %503 = arith.truncf %502 : vector<32x16xf32> to vector<32x16xbf16>
    %c2_387 = arith.constant 2 : index
    %c0_388 = arith.constant 0 : index
    %c0_389 = arith.constant 0 : index
    %504 = vector.load %arg7[%c2_387, %c0_388, %c0_389] : memref<4x16x64xbf16, #tpu.memory_space<vmem>>, vector<1x16x64xbf16>
    %505 = vector.shape_cast %504 : vector<1x16x64xbf16> to vector<16x64xbf16>
    %cst_390 = arith.constant dense<0.000000e+00> : vector<32x64xf32>
    %506 = tpu.matmul %503, %505, %cst_390 {dimension_numbers = #tpu.dot_dimension_numbers<[1], [0], [0], [1], [0, 0, 1, 1], [], []>} : vector<32x16xbf16>, vector<16x64xbf16>, vector<32x64xf32> -> vector<32x64xf32>
    %507 = arith.addf %499, %506 : vector<32x64xf32>
    %c3_391 = arith.constant 3 : index
    %c0_392 = arith.constant 0 : index
    %c0_393 = arith.constant 0 : index
    %508 = vector.load %arg21[%c3_391, %c0_392, %c0_393] : memref<4x32x64xbf16, #tpu.memory_space<vmem>>, vector<1x32x64xbf16>
    %509 = vector.shape_cast %508 : vector<1x32x64xbf16> to vector<32x64xbf16>
    %cst_394 = arith.constant dense<0.000000e+00> : vector<32x16xf32>
    %510 = tpu.matmul %509, %484, %cst_394 {dimension_numbers = #tpu.dot_dimension_numbers<[1], [0], [0], [1], [0, 0, 1, 1], [], []>} : vector<32x64xbf16>, vector<64x16xbf16>, vector<32x16xf32> -> vector<32x16xf32>
    %511 = arith.truncf %510 : vector<32x16xf32> to vector<32x16xbf16>
    %c3_395 = arith.constant 3 : index
    %c0_396 = arith.constant 0 : index
    %c0_397 = arith.constant 0 : index
    %512 = vector.load %arg7[%c3_395, %c0_396, %c0_397] : memref<4x16x64xbf16, #tpu.memory_space<vmem>>, vector<1x16x64xbf16>
    %513 = vector.shape_cast %512 : vector<1x16x64xbf16> to vector<16x64xbf16>
    %cst_398 = arith.constant dense<0.000000e+00> : vector<32x64xf32>
    %514 = tpu.matmul %511, %513, %cst_398 {dimension_numbers = #tpu.dot_dimension_numbers<[1], [0], [0], [1], [0, 0, 1, 1], [], []>} : vector<32x16xbf16>, vector<16x64xbf16>, vector<32x64xf32> -> vector<32x64xf32>
    %515 = arith.addf %507, %514 : vector<32x64xf32>
    %c0_399 = arith.constant 0 : index
    %c0_400 = arith.constant 0 : index
    %516 = vector.load %arg22[%c0_399, %c0_400] : memref<32x1xf32, #tpu.memory_space<vmem>>, vector<32x1xf32>
    %517 = vector.broadcast %516 : vector<32x1xf32> to vector<32x64xf32>
    %518 = arith.addf %515, %517 : vector<32x64xf32>
    %519 = arith.truncf %518 : vector<32x64xf32> to vector<32x64xbf16>
    %c0_401 = arith.constant 0 : index
    %c0_402 = arith.constant 0 : index
    %c0_403 = arith.constant 0 : index
    %520 = vector.load %arg3[%c0_401, %c0_402, %c0_403] : memref<9x64x64xbf16, #tpu.memory_space<vmem>>, vector<1x64x64xbf16>
    %521 = vector.shape_cast %520 : vector<1x64x64xbf16> to vector<64x64xbf16>
    %cst_404 = arith.constant dense<0.000000e+00> : vector<32x64xf32>
    %522 = tpu.matmul %519, %521, %cst_404 {dimension_numbers = #tpu.dot_dimension_numbers<[1], [0], [0], [1], [0, 0, 1, 1], [], []>} : vector<32x64xbf16>, vector<64x64xbf16>, vector<32x64xf32> -> vector<32x64xf32>
    %523 = arith.truncf %522 : vector<32x64xf32> to vector<32x64xbf16>
    %c0_405 = arith.constant 0 : index
    %c0_406 = arith.constant 0 : index
    %c0_407 = arith.constant 0 : index
    %524 = vector.load %arg23[%c0_405, %c0_406, %c0_407] : memref<9x32x32xbf16, #tpu.memory_space<vmem>>, vector<1x32x32xbf16>
    %525 = vector.shape_cast %524 : vector<1x32x32xbf16> to vector<32x32xbf16>
    %cst_408 = arith.constant dense<0.000000e+00> : vector<32x64xf32>
    %526 = tpu.matmul %525, %523, %cst_408 {dimension_numbers = #tpu.dot_dimension_numbers<[1], [0], [0], [1], [0, 0, 1, 1], [], []>} : vector<32x32xbf16>, vector<32x64xbf16>, vector<32x64xf32> -> vector<32x64xf32>
    %527 = arith.truncf %294 : vector<32x64xf32> to vector<32x64xbf16>
    %c0_409 = arith.constant 0 : index
    %c0_410 = arith.constant 0 : index
    %c0_411 = arith.constant 0 : index
    %528 = vector.load %arg3[%c0_409, %c0_410, %c0_411] : memref<9x64x64xbf16, #tpu.memory_space<vmem>>, vector<1x64x64xbf16>
    %529 = vector.shape_cast %528 : vector<1x64x64xbf16> to vector<64x64xbf16>
    %cst_412 = arith.constant dense<0.000000e+00> : vector<32x64xf32>
    %530 = tpu.matmul %527, %529, %cst_412 {dimension_numbers = #tpu.dot_dimension_numbers<[1], [0], [0], [1], [0, 0, 1, 1], [], []>} : vector<32x64xbf16>, vector<64x64xbf16>, vector<32x64xf32> -> vector<32x64xf32>
    %531 = arith.truncf %530 : vector<32x64xf32> to vector<32x64xbf16>
    %c0_413 = arith.constant 0 : index
    %c0_414 = arith.constant 0 : index
    %c0_415 = arith.constant 0 : index
    %532 = vector.load %arg24[%c0_413, %c0_414, %c0_415] : memref<9x32x32xbf16, #tpu.memory_space<vmem>>, vector<1x32x32xbf16>
    %533 = vector.shape_cast %532 : vector<1x32x32xbf16> to vector<32x32xbf16>
    %cst_416 = arith.constant dense<0.000000e+00> : vector<32x64xf32>
    %534 = tpu.matmul %533, %531, %cst_416 {dimension_numbers = #tpu.dot_dimension_numbers<[1], [0], [0], [1], [0, 0, 1, 1], [], []>} : vector<32x32xbf16>, vector<32x64xbf16>, vector<32x64xf32> -> vector<32x64xf32>
    %535 = arith.addf %526, %534 : vector<32x64xf32>
    %536 = arith.truncf %518 : vector<32x64xf32> to vector<32x64xbf16>
    %c1_417 = arith.constant 1 : index
    %c0_418 = arith.constant 0 : index
    %c0_419 = arith.constant 0 : index
    %537 = vector.load %arg3[%c1_417, %c0_418, %c0_419] : memref<9x64x64xbf16, #tpu.memory_space<vmem>>, vector<1x64x64xbf16>
    %538 = vector.shape_cast %537 : vector<1x64x64xbf16> to vector<64x64xbf16>
    %cst_420 = arith.constant dense<0.000000e+00> : vector<32x64xf32>
    %539 = tpu.matmul %536, %538, %cst_420 {dimension_numbers = #tpu.dot_dimension_numbers<[1], [0], [0], [1], [0, 0, 1, 1], [], []>} : vector<32x64xbf16>, vector<64x64xbf16>, vector<32x64xf32> -> vector<32x64xf32>
    %540 = arith.truncf %539 : vector<32x64xf32> to vector<32x64xbf16>
    %c1_421 = arith.constant 1 : index
    %c0_422 = arith.constant 0 : index
    %c0_423 = arith.constant 0 : index
    %541 = vector.load %arg23[%c1_421, %c0_422, %c0_423] : memref<9x32x32xbf16, #tpu.memory_space<vmem>>, vector<1x32x32xbf16>
    %542 = vector.shape_cast %541 : vector<1x32x32xbf16> to vector<32x32xbf16>
    %cst_424 = arith.constant dense<0.000000e+00> : vector<32x64xf32>
    %543 = tpu.matmul %542, %540, %cst_424 {dimension_numbers = #tpu.dot_dimension_numbers<[1], [0], [0], [1], [0, 0, 1, 1], [], []>} : vector<32x32xbf16>, vector<32x64xbf16>, vector<32x64xf32> -> vector<32x64xf32>
    %544 = arith.addf %535, %543 : vector<32x64xf32>
    %545 = arith.truncf %294 : vector<32x64xf32> to vector<32x64xbf16>
    %c1_425 = arith.constant 1 : index
    %c0_426 = arith.constant 0 : index
    %c0_427 = arith.constant 0 : index
    %546 = vector.load %arg3[%c1_425, %c0_426, %c0_427] : memref<9x64x64xbf16, #tpu.memory_space<vmem>>, vector<1x64x64xbf16>
    %547 = vector.shape_cast %546 : vector<1x64x64xbf16> to vector<64x64xbf16>
    %cst_428 = arith.constant dense<0.000000e+00> : vector<32x64xf32>
    %548 = tpu.matmul %545, %547, %cst_428 {dimension_numbers = #tpu.dot_dimension_numbers<[1], [0], [0], [1], [0, 0, 1, 1], [], []>} : vector<32x64xbf16>, vector<64x64xbf16>, vector<32x64xf32> -> vector<32x64xf32>
    %549 = arith.truncf %548 : vector<32x64xf32> to vector<32x64xbf16>
    %c1_429 = arith.constant 1 : index
    %c0_430 = arith.constant 0 : index
    %c0_431 = arith.constant 0 : index
    %550 = vector.load %arg24[%c1_429, %c0_430, %c0_431] : memref<9x32x32xbf16, #tpu.memory_space<vmem>>, vector<1x32x32xbf16>
    %551 = vector.shape_cast %550 : vector<1x32x32xbf16> to vector<32x32xbf16>
    %cst_432 = arith.constant dense<0.000000e+00> : vector<32x64xf32>
    %552 = tpu.matmul %551, %549, %cst_432 {dimension_numbers = #tpu.dot_dimension_numbers<[1], [0], [0], [1], [0, 0, 1, 1], [], []>} : vector<32x32xbf16>, vector<32x64xbf16>, vector<32x64xf32> -> vector<32x64xf32>
    %553 = arith.addf %544, %552 : vector<32x64xf32>
    %554 = arith.truncf %518 : vector<32x64xf32> to vector<32x64xbf16>
    %c2_433 = arith.constant 2 : index
    %c0_434 = arith.constant 0 : index
    %c0_435 = arith.constant 0 : index
    %555 = vector.load %arg3[%c2_433, %c0_434, %c0_435] : memref<9x64x64xbf16, #tpu.memory_space<vmem>>, vector<1x64x64xbf16>
    %556 = vector.shape_cast %555 : vector<1x64x64xbf16> to vector<64x64xbf16>
    %cst_436 = arith.constant dense<0.000000e+00> : vector<32x64xf32>
    %557 = tpu.matmul %554, %556, %cst_436 {dimension_numbers = #tpu.dot_dimension_numbers<[1], [0], [0], [1], [0, 0, 1, 1], [], []>} : vector<32x64xbf16>, vector<64x64xbf16>, vector<32x64xf32> -> vector<32x64xf32>
    %558 = arith.truncf %557 : vector<32x64xf32> to vector<32x64xbf16>
    %c2_437 = arith.constant 2 : index
    %c0_438 = arith.constant 0 : index
    %c0_439 = arith.constant 0 : index
    %559 = vector.load %arg23[%c2_437, %c0_438, %c0_439] : memref<9x32x32xbf16, #tpu.memory_space<vmem>>, vector<1x32x32xbf16>
    %560 = vector.shape_cast %559 : vector<1x32x32xbf16> to vector<32x32xbf16>
    %cst_440 = arith.constant dense<0.000000e+00> : vector<32x64xf32>
    %561 = tpu.matmul %560, %558, %cst_440 {dimension_numbers = #tpu.dot_dimension_numbers<[1], [0], [0], [1], [0, 0, 1, 1], [], []>} : vector<32x32xbf16>, vector<32x64xbf16>, vector<32x64xf32> -> vector<32x64xf32>
    %562 = arith.addf %553, %561 : vector<32x64xf32>
    %563 = arith.truncf %294 : vector<32x64xf32> to vector<32x64xbf16>
    %c2_441 = arith.constant 2 : index
    %c0_442 = arith.constant 0 : index
    %c0_443 = arith.constant 0 : index
    %564 = vector.load %arg3[%c2_441, %c0_442, %c0_443] : memref<9x64x64xbf16, #tpu.memory_space<vmem>>, vector<1x64x64xbf16>
    %565 = vector.shape_cast %564 : vector<1x64x64xbf16> to vector<64x64xbf16>
    %cst_444 = arith.constant dense<0.000000e+00> : vector<32x64xf32>
    %566 = tpu.matmul %563, %565, %cst_444 {dimension_numbers = #tpu.dot_dimension_numbers<[1], [0], [0], [1], [0, 0, 1, 1], [], []>} : vector<32x64xbf16>, vector<64x64xbf16>, vector<32x64xf32> -> vector<32x64xf32>
    %567 = arith.truncf %566 : vector<32x64xf32> to vector<32x64xbf16>
    %c2_445 = arith.constant 2 : index
    %c0_446 = arith.constant 0 : index
    %c0_447 = arith.constant 0 : index
    %568 = vector.load %arg24[%c2_445, %c0_446, %c0_447] : memref<9x32x32xbf16, #tpu.memory_space<vmem>>, vector<1x32x32xbf16>
    %569 = vector.shape_cast %568 : vector<1x32x32xbf16> to vector<32x32xbf16>
    %cst_448 = arith.constant dense<0.000000e+00> : vector<32x64xf32>
    %570 = tpu.matmul %569, %567, %cst_448 {dimension_numbers = #tpu.dot_dimension_numbers<[1], [0], [0], [1], [0, 0, 1, 1], [], []>} : vector<32x32xbf16>, vector<32x64xbf16>, vector<32x64xf32> -> vector<32x64xf32>
    %571 = arith.addf %562, %570 : vector<32x64xf32>
    %572 = arith.truncf %518 : vector<32x64xf32> to vector<32x64xbf16>
    %c3_449 = arith.constant 3 : index
    %c0_450 = arith.constant 0 : index
    %c0_451 = arith.constant 0 : index
    %573 = vector.load %arg3[%c3_449, %c0_450, %c0_451] : memref<9x64x64xbf16, #tpu.memory_space<vmem>>, vector<1x64x64xbf16>
    %574 = vector.shape_cast %573 : vector<1x64x64xbf16> to vector<64x64xbf16>
    %cst_452 = arith.constant dense<0.000000e+00> : vector<32x64xf32>
    %575 = tpu.matmul %572, %574, %cst_452 {dimension_numbers = #tpu.dot_dimension_numbers<[1], [0], [0], [1], [0, 0, 1, 1], [], []>} : vector<32x64xbf16>, vector<64x64xbf16>, vector<32x64xf32> -> vector<32x64xf32>
    %576 = arith.truncf %575 : vector<32x64xf32> to vector<32x64xbf16>
    %c3_453 = arith.constant 3 : index
    %c0_454 = arith.constant 0 : index
    %c0_455 = arith.constant 0 : index
    %577 = vector.load %arg23[%c3_453, %c0_454, %c0_455] : memref<9x32x32xbf16, #tpu.memory_space<vmem>>, vector<1x32x32xbf16>
    %578 = vector.shape_cast %577 : vector<1x32x32xbf16> to vector<32x32xbf16>
    %cst_456 = arith.constant dense<0.000000e+00> : vector<32x64xf32>
    %579 = tpu.matmul %578, %576, %cst_456 {dimension_numbers = #tpu.dot_dimension_numbers<[1], [0], [0], [1], [0, 0, 1, 1], [], []>} : vector<32x32xbf16>, vector<32x64xbf16>, vector<32x64xf32> -> vector<32x64xf32>
    %580 = arith.addf %571, %579 : vector<32x64xf32>
    %581 = arith.truncf %294 : vector<32x64xf32> to vector<32x64xbf16>
    %c3_457 = arith.constant 3 : index
    %c0_458 = arith.constant 0 : index
    %c0_459 = arith.constant 0 : index
    %582 = vector.load %arg3[%c3_457, %c0_458, %c0_459] : memref<9x64x64xbf16, #tpu.memory_space<vmem>>, vector<1x64x64xbf16>
    %583 = vector.shape_cast %582 : vector<1x64x64xbf16> to vector<64x64xbf16>
    %cst_460 = arith.constant dense<0.000000e+00> : vector<32x64xf32>
    %584 = tpu.matmul %581, %583, %cst_460 {dimension_numbers = #tpu.dot_dimension_numbers<[1], [0], [0], [1], [0, 0, 1, 1], [], []>} : vector<32x64xbf16>, vector<64x64xbf16>, vector<32x64xf32> -> vector<32x64xf32>
    %585 = arith.truncf %584 : vector<32x64xf32> to vector<32x64xbf16>
    %c3_461 = arith.constant 3 : index
    %c0_462 = arith.constant 0 : index
    %c0_463 = arith.constant 0 : index
    %586 = vector.load %arg24[%c3_461, %c0_462, %c0_463] : memref<9x32x32xbf16, #tpu.memory_space<vmem>>, vector<1x32x32xbf16>
    %587 = vector.shape_cast %586 : vector<1x32x32xbf16> to vector<32x32xbf16>
    %cst_464 = arith.constant dense<0.000000e+00> : vector<32x64xf32>
    %588 = tpu.matmul %587, %585, %cst_464 {dimension_numbers = #tpu.dot_dimension_numbers<[1], [0], [0], [1], [0, 0, 1, 1], [], []>} : vector<32x32xbf16>, vector<32x64xbf16>, vector<32x64xf32> -> vector<32x64xf32>
    %589 = arith.addf %580, %588 : vector<32x64xf32>
    %590 = arith.truncf %518 : vector<32x64xf32> to vector<32x64xbf16>
    %c4_465 = arith.constant 4 : index
    %c0_466 = arith.constant 0 : index
    %c0_467 = arith.constant 0 : index
    %591 = vector.load %arg23[%c4_465, %c0_466, %c0_467] : memref<9x32x32xbf16, #tpu.memory_space<vmem>>, vector<1x32x32xbf16>
    %592 = vector.shape_cast %591 : vector<1x32x32xbf16> to vector<32x32xbf16>
    %cst_468 = arith.constant dense<0.000000e+00> : vector<32x64xf32>
    %593 = tpu.matmul %592, %590, %cst_468 {dimension_numbers = #tpu.dot_dimension_numbers<[1], [0], [0], [1], [0, 0, 1, 1], [], []>} : vector<32x32xbf16>, vector<32x64xbf16>, vector<32x64xf32> -> vector<32x64xf32>
    %594 = arith.addf %589, %593 : vector<32x64xf32>
    %595 = arith.truncf %294 : vector<32x64xf32> to vector<32x64xbf16>
    %c4_469 = arith.constant 4 : index
    %c0_470 = arith.constant 0 : index
    %c0_471 = arith.constant 0 : index
    %596 = vector.load %arg24[%c4_469, %c0_470, %c0_471] : memref<9x32x32xbf16, #tpu.memory_space<vmem>>, vector<1x32x32xbf16>
    %597 = vector.shape_cast %596 : vector<1x32x32xbf16> to vector<32x32xbf16>
    %cst_472 = arith.constant dense<0.000000e+00> : vector<32x64xf32>
    %598 = tpu.matmul %597, %595, %cst_472 {dimension_numbers = #tpu.dot_dimension_numbers<[1], [0], [0], [1], [0, 0, 1, 1], [], []>} : vector<32x32xbf16>, vector<32x64xbf16>, vector<32x64xf32> -> vector<32x64xf32>
    %599 = arith.addf %594, %598 : vector<32x64xf32>
    %600 = arith.truncf %518 : vector<32x64xf32> to vector<32x64xbf16>
    %c5_473 = arith.constant 5 : index
    %c0_474 = arith.constant 0 : index
    %c0_475 = arith.constant 0 : index
    %601 = vector.load %arg3[%c5_473, %c0_474, %c0_475] : memref<9x64x64xbf16, #tpu.memory_space<vmem>>, vector<1x64x64xbf16>
    %602 = vector.shape_cast %601 : vector<1x64x64xbf16> to vector<64x64xbf16>
    %cst_476 = arith.constant dense<0.000000e+00> : vector<32x64xf32>
    %603 = tpu.matmul %600, %602, %cst_476 {dimension_numbers = #tpu.dot_dimension_numbers<[1], [0], [0], [1], [0, 0, 1, 1], [], []>} : vector<32x64xbf16>, vector<64x64xbf16>, vector<32x64xf32> -> vector<32x64xf32>
    %604 = arith.truncf %603 : vector<32x64xf32> to vector<32x64xbf16>
    %c5_477 = arith.constant 5 : index
    %c0_478 = arith.constant 0 : index
    %c0_479 = arith.constant 0 : index
    %605 = vector.load %arg23[%c5_477, %c0_478, %c0_479] : memref<9x32x32xbf16, #tpu.memory_space<vmem>>, vector<1x32x32xbf16>
    %606 = vector.shape_cast %605 : vector<1x32x32xbf16> to vector<32x32xbf16>
    %cst_480 = arith.constant dense<0.000000e+00> : vector<32x64xf32>
    %607 = tpu.matmul %606, %604, %cst_480 {dimension_numbers = #tpu.dot_dimension_numbers<[1], [0], [0], [1], [0, 0, 1, 1], [], []>} : vector<32x32xbf16>, vector<32x64xbf16>, vector<32x64xf32> -> vector<32x64xf32>
    %608 = arith.addf %599, %607 : vector<32x64xf32>
    %609 = arith.truncf %294 : vector<32x64xf32> to vector<32x64xbf16>
    %c5_481 = arith.constant 5 : index
    %c0_482 = arith.constant 0 : index
    %c0_483 = arith.constant 0 : index
    %610 = vector.load %arg3[%c5_481, %c0_482, %c0_483] : memref<9x64x64xbf16, #tpu.memory_space<vmem>>, vector<1x64x64xbf16>
    %611 = vector.shape_cast %610 : vector<1x64x64xbf16> to vector<64x64xbf16>
    %cst_484 = arith.constant dense<0.000000e+00> : vector<32x64xf32>
    %612 = tpu.matmul %609, %611, %cst_484 {dimension_numbers = #tpu.dot_dimension_numbers<[1], [0], [0], [1], [0, 0, 1, 1], [], []>} : vector<32x64xbf16>, vector<64x64xbf16>, vector<32x64xf32> -> vector<32x64xf32>
    %613 = arith.truncf %612 : vector<32x64xf32> to vector<32x64xbf16>
    %c5_485 = arith.constant 5 : index
    %c0_486 = arith.constant 0 : index
    %c0_487 = arith.constant 0 : index
    %614 = vector.load %arg24[%c5_485, %c0_486, %c0_487] : memref<9x32x32xbf16, #tpu.memory_space<vmem>>, vector<1x32x32xbf16>
    %615 = vector.shape_cast %614 : vector<1x32x32xbf16> to vector<32x32xbf16>
    %cst_488 = arith.constant dense<0.000000e+00> : vector<32x64xf32>
    %616 = tpu.matmul %615, %613, %cst_488 {dimension_numbers = #tpu.dot_dimension_numbers<[1], [0], [0], [1], [0, 0, 1, 1], [], []>} : vector<32x32xbf16>, vector<32x64xbf16>, vector<32x64xf32> -> vector<32x64xf32>
    %617 = arith.addf %608, %616 : vector<32x64xf32>
    %618 = arith.truncf %518 : vector<32x64xf32> to vector<32x64xbf16>
    %c6_489 = arith.constant 6 : index
    %c0_490 = arith.constant 0 : index
    %c0_491 = arith.constant 0 : index
    %619 = vector.load %arg3[%c6_489, %c0_490, %c0_491] : memref<9x64x64xbf16, #tpu.memory_space<vmem>>, vector<1x64x64xbf16>
    %620 = vector.shape_cast %619 : vector<1x64x64xbf16> to vector<64x64xbf16>
    %cst_492 = arith.constant dense<0.000000e+00> : vector<32x64xf32>
    %621 = tpu.matmul %618, %620, %cst_492 {dimension_numbers = #tpu.dot_dimension_numbers<[1], [0], [0], [1], [0, 0, 1, 1], [], []>} : vector<32x64xbf16>, vector<64x64xbf16>, vector<32x64xf32> -> vector<32x64xf32>
    %622 = arith.truncf %621 : vector<32x64xf32> to vector<32x64xbf16>
    %c6_493 = arith.constant 6 : index
    %c0_494 = arith.constant 0 : index
    %c0_495 = arith.constant 0 : index
    %623 = vector.load %arg23[%c6_493, %c0_494, %c0_495] : memref<9x32x32xbf16, #tpu.memory_space<vmem>>, vector<1x32x32xbf16>
    %624 = vector.shape_cast %623 : vector<1x32x32xbf16> to vector<32x32xbf16>
    %cst_496 = arith.constant dense<0.000000e+00> : vector<32x64xf32>
    %625 = tpu.matmul %624, %622, %cst_496 {dimension_numbers = #tpu.dot_dimension_numbers<[1], [0], [0], [1], [0, 0, 1, 1], [], []>} : vector<32x32xbf16>, vector<32x64xbf16>, vector<32x64xf32> -> vector<32x64xf32>
    %626 = arith.addf %617, %625 : vector<32x64xf32>
    %627 = arith.truncf %294 : vector<32x64xf32> to vector<32x64xbf16>
    %c6_497 = arith.constant 6 : index
    %c0_498 = arith.constant 0 : index
    %c0_499 = arith.constant 0 : index
    %628 = vector.load %arg3[%c6_497, %c0_498, %c0_499] : memref<9x64x64xbf16, #tpu.memory_space<vmem>>, vector<1x64x64xbf16>
    %629 = vector.shape_cast %628 : vector<1x64x64xbf16> to vector<64x64xbf16>
    %cst_500 = arith.constant dense<0.000000e+00> : vector<32x64xf32>
    %630 = tpu.matmul %627, %629, %cst_500 {dimension_numbers = #tpu.dot_dimension_numbers<[1], [0], [0], [1], [0, 0, 1, 1], [], []>} : vector<32x64xbf16>, vector<64x64xbf16>, vector<32x64xf32> -> vector<32x64xf32>
    %631 = arith.truncf %630 : vector<32x64xf32> to vector<32x64xbf16>
    %c6_501 = arith.constant 6 : index
    %c0_502 = arith.constant 0 : index
    %c0_503 = arith.constant 0 : index
    %632 = vector.load %arg24[%c6_501, %c0_502, %c0_503] : memref<9x32x32xbf16, #tpu.memory_space<vmem>>, vector<1x32x32xbf16>
    %633 = vector.shape_cast %632 : vector<1x32x32xbf16> to vector<32x32xbf16>
    %cst_504 = arith.constant dense<0.000000e+00> : vector<32x64xf32>
    %634 = tpu.matmul %633, %631, %cst_504 {dimension_numbers = #tpu.dot_dimension_numbers<[1], [0], [0], [1], [0, 0, 1, 1], [], []>} : vector<32x32xbf16>, vector<32x64xbf16>, vector<32x64xf32> -> vector<32x64xf32>
    %635 = arith.addf %626, %634 : vector<32x64xf32>
    %636 = arith.truncf %518 : vector<32x64xf32> to vector<32x64xbf16>
    %c7_505 = arith.constant 7 : index
    %c0_506 = arith.constant 0 : index
    %c0_507 = arith.constant 0 : index
    %637 = vector.load %arg3[%c7_505, %c0_506, %c0_507] : memref<9x64x64xbf16, #tpu.memory_space<vmem>>, vector<1x64x64xbf16>
    %638 = vector.shape_cast %637 : vector<1x64x64xbf16> to vector<64x64xbf16>
    %cst_508 = arith.constant dense<0.000000e+00> : vector<32x64xf32>
    %639 = tpu.matmul %636, %638, %cst_508 {dimension_numbers = #tpu.dot_dimension_numbers<[1], [0], [0], [1], [0, 0, 1, 1], [], []>} : vector<32x64xbf16>, vector<64x64xbf16>, vector<32x64xf32> -> vector<32x64xf32>
    %640 = arith.truncf %639 : vector<32x64xf32> to vector<32x64xbf16>
    %c7_509 = arith.constant 7 : index
    %c0_510 = arith.constant 0 : index
    %c0_511 = arith.constant 0 : index
    %641 = vector.load %arg23[%c7_509, %c0_510, %c0_511] : memref<9x32x32xbf16, #tpu.memory_space<vmem>>, vector<1x32x32xbf16>
    %642 = vector.shape_cast %641 : vector<1x32x32xbf16> to vector<32x32xbf16>
    %cst_512 = arith.constant dense<0.000000e+00> : vector<32x64xf32>
    %643 = tpu.matmul %642, %640, %cst_512 {dimension_numbers = #tpu.dot_dimension_numbers<[1], [0], [0], [1], [0, 0, 1, 1], [], []>} : vector<32x32xbf16>, vector<32x64xbf16>, vector<32x64xf32> -> vector<32x64xf32>
    %644 = arith.addf %635, %643 : vector<32x64xf32>
    %645 = arith.truncf %294 : vector<32x64xf32> to vector<32x64xbf16>
    %c7_513 = arith.constant 7 : index
    %c0_514 = arith.constant 0 : index
    %c0_515 = arith.constant 0 : index
    %646 = vector.load %arg3[%c7_513, %c0_514, %c0_515] : memref<9x64x64xbf16, #tpu.memory_space<vmem>>, vector<1x64x64xbf16>
    %647 = vector.shape_cast %646 : vector<1x64x64xbf16> to vector<64x64xbf16>
    %cst_516 = arith.constant dense<0.000000e+00> : vector<32x64xf32>
    %648 = tpu.matmul %645, %647, %cst_516 {dimension_numbers = #tpu.dot_dimension_numbers<[1], [0], [0], [1], [0, 0, 1, 1], [], []>} : vector<32x64xbf16>, vector<64x64xbf16>, vector<32x64xf32> -> vector<32x64xf32>
    %649 = arith.truncf %648 : vector<32x64xf32> to vector<32x64xbf16>
    %c7_517 = arith.constant 7 : index
    %c0_518 = arith.constant 0 : index
    %c0_519 = arith.constant 0 : index
    %650 = vector.load %arg24[%c7_517, %c0_518, %c0_519] : memref<9x32x32xbf16, #tpu.memory_space<vmem>>, vector<1x32x32xbf16>
    %651 = vector.shape_cast %650 : vector<1x32x32xbf16> to vector<32x32xbf16>
    %cst_520 = arith.constant dense<0.000000e+00> : vector<32x64xf32>
    %652 = tpu.matmul %651, %649, %cst_520 {dimension_numbers = #tpu.dot_dimension_numbers<[1], [0], [0], [1], [0, 0, 1, 1], [], []>} : vector<32x32xbf16>, vector<32x64xbf16>, vector<32x64xf32> -> vector<32x64xf32>
    %653 = arith.addf %644, %652 : vector<32x64xf32>
    %654 = arith.truncf %518 : vector<32x64xf32> to vector<32x64xbf16>
    %c8_521 = arith.constant 8 : index
    %c0_522 = arith.constant 0 : index
    %c0_523 = arith.constant 0 : index
    %655 = vector.load %arg3[%c8_521, %c0_522, %c0_523] : memref<9x64x64xbf16, #tpu.memory_space<vmem>>, vector<1x64x64xbf16>
    %656 = vector.shape_cast %655 : vector<1x64x64xbf16> to vector<64x64xbf16>
    %cst_524 = arith.constant dense<0.000000e+00> : vector<32x64xf32>
    %657 = tpu.matmul %654, %656, %cst_524 {dimension_numbers = #tpu.dot_dimension_numbers<[1], [0], [0], [1], [0, 0, 1, 1], [], []>} : vector<32x64xbf16>, vector<64x64xbf16>, vector<32x64xf32> -> vector<32x64xf32>
    %658 = arith.truncf %657 : vector<32x64xf32> to vector<32x64xbf16>
    %c8_525 = arith.constant 8 : index
    %c0_526 = arith.constant 0 : index
    %c0_527 = arith.constant 0 : index
    %659 = vector.load %arg23[%c8_525, %c0_526, %c0_527] : memref<9x32x32xbf16, #tpu.memory_space<vmem>>, vector<1x32x32xbf16>
    %660 = vector.shape_cast %659 : vector<1x32x32xbf16> to vector<32x32xbf16>
    %cst_528 = arith.constant dense<0.000000e+00> : vector<32x64xf32>
    %661 = tpu.matmul %660, %658, %cst_528 {dimension_numbers = #tpu.dot_dimension_numbers<[1], [0], [0], [1], [0, 0, 1, 1], [], []>} : vector<32x32xbf16>, vector<32x64xbf16>, vector<32x64xf32> -> vector<32x64xf32>
    %662 = arith.addf %653, %661 : vector<32x64xf32>
    %663 = arith.truncf %294 : vector<32x64xf32> to vector<32x64xbf16>
    %c8_529 = arith.constant 8 : index
    %c0_530 = arith.constant 0 : index
    %c0_531 = arith.constant 0 : index
    %664 = vector.load %arg3[%c8_529, %c0_530, %c0_531] : memref<9x64x64xbf16, #tpu.memory_space<vmem>>, vector<1x64x64xbf16>
    %665 = vector.shape_cast %664 : vector<1x64x64xbf16> to vector<64x64xbf16>
    %cst_532 = arith.constant dense<0.000000e+00> : vector<32x64xf32>
    %666 = tpu.matmul %663, %665, %cst_532 {dimension_numbers = #tpu.dot_dimension_numbers<[1], [0], [0], [1], [0, 0, 1, 1], [], []>} : vector<32x64xbf16>, vector<64x64xbf16>, vector<32x64xf32> -> vector<32x64xf32>
    %667 = arith.truncf %666 : vector<32x64xf32> to vector<32x64xbf16>
    %c8_533 = arith.constant 8 : index
    %c0_534 = arith.constant 0 : index
    %c0_535 = arith.constant 0 : index
    %668 = vector.load %arg24[%c8_533, %c0_534, %c0_535] : memref<9x32x32xbf16, #tpu.memory_space<vmem>>, vector<1x32x32xbf16>
    %669 = vector.shape_cast %668 : vector<1x32x32xbf16> to vector<32x32xbf16>
    %cst_536 = arith.constant dense<0.000000e+00> : vector<32x64xf32>
    %670 = tpu.matmul %669, %667, %cst_536 {dimension_numbers = #tpu.dot_dimension_numbers<[1], [0], [0], [1], [0, 0, 1, 1], [], []>} : vector<32x32xbf16>, vector<32x64xbf16>, vector<32x64xf32> -> vector<32x64xf32>
    %671 = arith.addf %662, %670 : vector<32x64xf32>
    %c0_537 = arith.constant 0 : index
    %c0_538 = arith.constant 0 : index
    %672 = vector.load %arg25[%c0_537, %c0_538] : memref<32x3xf32, #tpu.memory_space<vmem>>, vector<32x3xf32>
    %673 = vector.extract_strided_slice %672 {offsets = [0, 0], sizes = [32, 1], strides = [1, 1]} : vector<32x3xf32> to vector<32x1xf32>
    %674 = vector.broadcast %673 : vector<32x1xf32> to vector<32x64xf32>
    %675 = arith.addf %671, %674 : vector<32x64xf32>
    %cst_539 = arith.constant 0.000000e+00 : f32
    %676 = vector.broadcast %cst_539 : f32 to vector<32x64xf32>
    %677 = arith.maximumf %675, %676 : vector<32x64xf32>
    %678 = vector.extract_strided_slice %672 {offsets = [0, 1], sizes = [32, 1], strides = [1, 1]} : vector<32x3xf32> to vector<32x1xf32>
    %679 = vector.broadcast %678 : vector<32x1xf32> to vector<32x64xf32>
    %680 = arith.mulf %677, %679 : vector<32x64xf32>
    %681 = vector.extract_strided_slice %672 {offsets = [0, 2], sizes = [32, 1], strides = [1, 1]} : vector<32x3xf32> to vector<32x1xf32>
    %682 = vector.broadcast %681 : vector<32x1xf32> to vector<32x64xf32>
    %683 = arith.addf %680, %682 : vector<32x64xf32>
    %684 = arith.truncf %683 : vector<32x64xf32> to vector<32x64xbf16>
    %c0_540 = arith.constant 0 : index
    %c0_541 = arith.constant 0 : index
    %c0_542 = arith.constant 0 : index
    %685 = vector.load %arg3[%c0_540, %c0_541, %c0_542] : memref<9x64x64xbf16, #tpu.memory_space<vmem>>, vector<1x64x64xbf16>
    %686 = vector.shape_cast %685 : vector<1x64x64xbf16> to vector<64x64xbf16>
    %cst_543 = arith.constant dense<0.000000e+00> : vector<32x64xf32>
    %687 = tpu.matmul %684, %686, %cst_543 {dimension_numbers = #tpu.dot_dimension_numbers<[1], [0], [0], [1], [0, 0, 1, 1], [], []>} : vector<32x64xbf16>, vector<64x64xbf16>, vector<32x64xf32> -> vector<32x64xf32>
    %688 = arith.truncf %687 : vector<32x64xf32> to vector<32x64xbf16>
    %c0_544 = arith.constant 0 : index
    %c0_545 = arith.constant 0 : index
    %c0_546 = arith.constant 0 : index
    %689 = vector.load %arg26[%c0_544, %c0_545, %c0_546] : memref<9x32x32xbf16, #tpu.memory_space<vmem>>, vector<1x32x32xbf16>
    %690 = vector.shape_cast %689 : vector<1x32x32xbf16> to vector<32x32xbf16>
    %cst_547 = arith.constant dense<0.000000e+00> : vector<32x64xf32>
    %691 = tpu.matmul %690, %688, %cst_547 {dimension_numbers = #tpu.dot_dimension_numbers<[1], [0], [0], [1], [0, 0, 1, 1], [], []>} : vector<32x32xbf16>, vector<32x64xbf16>, vector<32x64xf32> -> vector<32x64xf32>
    %692 = arith.truncf %683 : vector<32x64xf32> to vector<32x64xbf16>
    %c1_548 = arith.constant 1 : index
    %c0_549 = arith.constant 0 : index
    %c0_550 = arith.constant 0 : index
    %693 = vector.load %arg3[%c1_548, %c0_549, %c0_550] : memref<9x64x64xbf16, #tpu.memory_space<vmem>>, vector<1x64x64xbf16>
    %694 = vector.shape_cast %693 : vector<1x64x64xbf16> to vector<64x64xbf16>
    %cst_551 = arith.constant dense<0.000000e+00> : vector<32x64xf32>
    %695 = tpu.matmul %692, %694, %cst_551 {dimension_numbers = #tpu.dot_dimension_numbers<[1], [0], [0], [1], [0, 0, 1, 1], [], []>} : vector<32x64xbf16>, vector<64x64xbf16>, vector<32x64xf32> -> vector<32x64xf32>
    %696 = arith.truncf %695 : vector<32x64xf32> to vector<32x64xbf16>
    %c1_552 = arith.constant 1 : index
    %c0_553 = arith.constant 0 : index
    %c0_554 = arith.constant 0 : index
    %697 = vector.load %arg26[%c1_552, %c0_553, %c0_554] : memref<9x32x32xbf16, #tpu.memory_space<vmem>>, vector<1x32x32xbf16>
    %698 = vector.shape_cast %697 : vector<1x32x32xbf16> to vector<32x32xbf16>
    %cst_555 = arith.constant dense<0.000000e+00> : vector<32x64xf32>
    %699 = tpu.matmul %698, %696, %cst_555 {dimension_numbers = #tpu.dot_dimension_numbers<[1], [0], [0], [1], [0, 0, 1, 1], [], []>} : vector<32x32xbf16>, vector<32x64xbf16>, vector<32x64xf32> -> vector<32x64xf32>
    %700 = arith.addf %691, %699 : vector<32x64xf32>
    %701 = arith.truncf %683 : vector<32x64xf32> to vector<32x64xbf16>
    %c2_556 = arith.constant 2 : index
    %c0_557 = arith.constant 0 : index
    %c0_558 = arith.constant 0 : index
    %702 = vector.load %arg3[%c2_556, %c0_557, %c0_558] : memref<9x64x64xbf16, #tpu.memory_space<vmem>>, vector<1x64x64xbf16>
    %703 = vector.shape_cast %702 : vector<1x64x64xbf16> to vector<64x64xbf16>
    %cst_559 = arith.constant dense<0.000000e+00> : vector<32x64xf32>
    %704 = tpu.matmul %701, %703, %cst_559 {dimension_numbers = #tpu.dot_dimension_numbers<[1], [0], [0], [1], [0, 0, 1, 1], [], []>} : vector<32x64xbf16>, vector<64x64xbf16>, vector<32x64xf32> -> vector<32x64xf32>
    %705 = arith.truncf %704 : vector<32x64xf32> to vector<32x64xbf16>
    %c2_560 = arith.constant 2 : index
    %c0_561 = arith.constant 0 : index
    %c0_562 = arith.constant 0 : index
    %706 = vector.load %arg26[%c2_560, %c0_561, %c0_562] : memref<9x32x32xbf16, #tpu.memory_space<vmem>>, vector<1x32x32xbf16>
    %707 = vector.shape_cast %706 : vector<1x32x32xbf16> to vector<32x32xbf16>
    %cst_563 = arith.constant dense<0.000000e+00> : vector<32x64xf32>
    %708 = tpu.matmul %707, %705, %cst_563 {dimension_numbers = #tpu.dot_dimension_numbers<[1], [0], [0], [1], [0, 0, 1, 1], [], []>} : vector<32x32xbf16>, vector<32x64xbf16>, vector<32x64xf32> -> vector<32x64xf32>
    %709 = arith.addf %700, %708 : vector<32x64xf32>
    %710 = arith.truncf %683 : vector<32x64xf32> to vector<32x64xbf16>
    %c3_564 = arith.constant 3 : index
    %c0_565 = arith.constant 0 : index
    %c0_566 = arith.constant 0 : index
    %711 = vector.load %arg3[%c3_564, %c0_565, %c0_566] : memref<9x64x64xbf16, #tpu.memory_space<vmem>>, vector<1x64x64xbf16>
    %712 = vector.shape_cast %711 : vector<1x64x64xbf16> to vector<64x64xbf16>
    %cst_567 = arith.constant dense<0.000000e+00> : vector<32x64xf32>
    %713 = tpu.matmul %710, %712, %cst_567 {dimension_numbers = #tpu.dot_dimension_numbers<[1], [0], [0], [1], [0, 0, 1, 1], [], []>} : vector<32x64xbf16>, vector<64x64xbf16>, vector<32x64xf32> -> vector<32x64xf32>
    %714 = arith.truncf %713 : vector<32x64xf32> to vector<32x64xbf16>
    %c3_568 = arith.constant 3 : index
    %c0_569 = arith.constant 0 : index
    %c0_570 = arith.constant 0 : index
    %715 = vector.load %arg26[%c3_568, %c0_569, %c0_570] : memref<9x32x32xbf16, #tpu.memory_space<vmem>>, vector<1x32x32xbf16>
    %716 = vector.shape_cast %715 : vector<1x32x32xbf16> to vector<32x32xbf16>
    %cst_571 = arith.constant dense<0.000000e+00> : vector<32x64xf32>
    %717 = tpu.matmul %716, %714, %cst_571 {dimension_numbers = #tpu.dot_dimension_numbers<[1], [0], [0], [1], [0, 0, 1, 1], [], []>} : vector<32x32xbf16>, vector<32x64xbf16>, vector<32x64xf32> -> vector<32x64xf32>
    %718 = arith.addf %709, %717 : vector<32x64xf32>
    %719 = arith.truncf %683 : vector<32x64xf32> to vector<32x64xbf16>
    %c4_572 = arith.constant 4 : index
    %c0_573 = arith.constant 0 : index
    %c0_574 = arith.constant 0 : index
    %720 = vector.load %arg26[%c4_572, %c0_573, %c0_574] : memref<9x32x32xbf16, #tpu.memory_space<vmem>>, vector<1x32x32xbf16>
    %721 = vector.shape_cast %720 : vector<1x32x32xbf16> to vector<32x32xbf16>
    %cst_575 = arith.constant dense<0.000000e+00> : vector<32x64xf32>
    %722 = tpu.matmul %721, %719, %cst_575 {dimension_numbers = #tpu.dot_dimension_numbers<[1], [0], [0], [1], [0, 0, 1, 1], [], []>} : vector<32x32xbf16>, vector<32x64xbf16>, vector<32x64xf32> -> vector<32x64xf32>
    %723 = arith.addf %718, %722 : vector<32x64xf32>
    %724 = arith.truncf %683 : vector<32x64xf32> to vector<32x64xbf16>
    %c5_576 = arith.constant 5 : index
    %c0_577 = arith.constant 0 : index
    %c0_578 = arith.constant 0 : index
    %725 = vector.load %arg3[%c5_576, %c0_577, %c0_578] : memref<9x64x64xbf16, #tpu.memory_space<vmem>>, vector<1x64x64xbf16>
    %726 = vector.shape_cast %725 : vector<1x64x64xbf16> to vector<64x64xbf16>
    %cst_579 = arith.constant dense<0.000000e+00> : vector<32x64xf32>
    %727 = tpu.matmul %724, %726, %cst_579 {dimension_numbers = #tpu.dot_dimension_numbers<[1], [0], [0], [1], [0, 0, 1, 1], [], []>} : vector<32x64xbf16>, vector<64x64xbf16>, vector<32x64xf32> -> vector<32x64xf32>
    %728 = arith.truncf %727 : vector<32x64xf32> to vector<32x64xbf16>
    %c5_580 = arith.constant 5 : index
    %c0_581 = arith.constant 0 : index
    %c0_582 = arith.constant 0 : index
    %729 = vector.load %arg26[%c5_580, %c0_581, %c0_582] : memref<9x32x32xbf16, #tpu.memory_space<vmem>>, vector<1x32x32xbf16>
    %730 = vector.shape_cast %729 : vector<1x32x32xbf16> to vector<32x32xbf16>
    %cst_583 = arith.constant dense<0.000000e+00> : vector<32x64xf32>
    %731 = tpu.matmul %730, %728, %cst_583 {dimension_numbers = #tpu.dot_dimension_numbers<[1], [0], [0], [1], [0, 0, 1, 1], [], []>} : vector<32x32xbf16>, vector<32x64xbf16>, vector<32x64xf32> -> vector<32x64xf32>
    %732 = arith.addf %723, %731 : vector<32x64xf32>
    %733 = arith.truncf %683 : vector<32x64xf32> to vector<32x64xbf16>
    %c6_584 = arith.constant 6 : index
    %c0_585 = arith.constant 0 : index
    %c0_586 = arith.constant 0 : index
    %734 = vector.load %arg3[%c6_584, %c0_585, %c0_586] : memref<9x64x64xbf16, #tpu.memory_space<vmem>>, vector<1x64x64xbf16>
    %735 = vector.shape_cast %734 : vector<1x64x64xbf16> to vector<64x64xbf16>
    %cst_587 = arith.constant dense<0.000000e+00> : vector<32x64xf32>
    %736 = tpu.matmul %733, %735, %cst_587 {dimension_numbers = #tpu.dot_dimension_numbers<[1], [0], [0], [1], [0, 0, 1, 1], [], []>} : vector<32x64xbf16>, vector<64x64xbf16>, vector<32x64xf32> -> vector<32x64xf32>
    %737 = arith.truncf %736 : vector<32x64xf32> to vector<32x64xbf16>
    %c6_588 = arith.constant 6 : index
    %c0_589 = arith.constant 0 : index
    %c0_590 = arith.constant 0 : index
    %738 = vector.load %arg26[%c6_588, %c0_589, %c0_590] : memref<9x32x32xbf16, #tpu.memory_space<vmem>>, vector<1x32x32xbf16>
    %739 = vector.shape_cast %738 : vector<1x32x32xbf16> to vector<32x32xbf16>
    %cst_591 = arith.constant dense<0.000000e+00> : vector<32x64xf32>
    %740 = tpu.matmul %739, %737, %cst_591 {dimension_numbers = #tpu.dot_dimension_numbers<[1], [0], [0], [1], [0, 0, 1, 1], [], []>} : vector<32x32xbf16>, vector<32x64xbf16>, vector<32x64xf32> -> vector<32x64xf32>
    %741 = arith.addf %732, %740 : vector<32x64xf32>
    %742 = arith.truncf %683 : vector<32x64xf32> to vector<32x64xbf16>
    %c7_592 = arith.constant 7 : index
    %c0_593 = arith.constant 0 : index
    %c0_594 = arith.constant 0 : index
    %743 = vector.load %arg3[%c7_592, %c0_593, %c0_594] : memref<9x64x64xbf16, #tpu.memory_space<vmem>>, vector<1x64x64xbf16>
    %744 = vector.shape_cast %743 : vector<1x64x64xbf16> to vector<64x64xbf16>
    %cst_595 = arith.constant dense<0.000000e+00> : vector<32x64xf32>
    %745 = tpu.matmul %742, %744, %cst_595 {dimension_numbers = #tpu.dot_dimension_numbers<[1], [0], [0], [1], [0, 0, 1, 1], [], []>} : vector<32x64xbf16>, vector<64x64xbf16>, vector<32x64xf32> -> vector<32x64xf32>
    %746 = arith.truncf %745 : vector<32x64xf32> to vector<32x64xbf16>
    %c7_596 = arith.constant 7 : index
    %c0_597 = arith.constant 0 : index
    %c0_598 = arith.constant 0 : index
    %747 = vector.load %arg26[%c7_596, %c0_597, %c0_598] : memref<9x32x32xbf16, #tpu.memory_space<vmem>>, vector<1x32x32xbf16>
    %748 = vector.shape_cast %747 : vector<1x32x32xbf16> to vector<32x32xbf16>
    %cst_599 = arith.constant dense<0.000000e+00> : vector<32x64xf32>
    %749 = tpu.matmul %748, %746, %cst_599 {dimension_numbers = #tpu.dot_dimension_numbers<[1], [0], [0], [1], [0, 0, 1, 1], [], []>} : vector<32x32xbf16>, vector<32x64xbf16>, vector<32x64xf32> -> vector<32x64xf32>
    %750 = arith.addf %741, %749 : vector<32x64xf32>
    %751 = arith.truncf %683 : vector<32x64xf32> to vector<32x64xbf16>
    %c8_600 = arith.constant 8 : index
    %c0_601 = arith.constant 0 : index
    %c0_602 = arith.constant 0 : index
    %752 = vector.load %arg3[%c8_600, %c0_601, %c0_602] : memref<9x64x64xbf16, #tpu.memory_space<vmem>>, vector<1x64x64xbf16>
    %753 = vector.shape_cast %752 : vector<1x64x64xbf16> to vector<64x64xbf16>
    %cst_603 = arith.constant dense<0.000000e+00> : vector<32x64xf32>
    %754 = tpu.matmul %751, %753, %cst_603 {dimension_numbers = #tpu.dot_dimension_numbers<[1], [0], [0], [1], [0, 0, 1, 1], [], []>} : vector<32x64xbf16>, vector<64x64xbf16>, vector<32x64xf32> -> vector<32x64xf32>
    %755 = arith.truncf %754 : vector<32x64xf32> to vector<32x64xbf16>
    %c8_604 = arith.constant 8 : index
    %c0_605 = arith.constant 0 : index
    %c0_606 = arith.constant 0 : index
    %756 = vector.load %arg26[%c8_604, %c0_605, %c0_606] : memref<9x32x32xbf16, #tpu.memory_space<vmem>>, vector<1x32x32xbf16>
    %757 = vector.shape_cast %756 : vector<1x32x32xbf16> to vector<32x32xbf16>
    %cst_607 = arith.constant dense<0.000000e+00> : vector<32x64xf32>
    %758 = tpu.matmul %757, %755, %cst_607 {dimension_numbers = #tpu.dot_dimension_numbers<[1], [0], [0], [1], [0, 0, 1, 1], [], []>} : vector<32x32xbf16>, vector<32x64xbf16>, vector<32x64xf32> -> vector<32x64xf32>
    %759 = arith.addf %750, %758 : vector<32x64xf32>
    %c0_608 = arith.constant 0 : index
    %c0_609 = arith.constant 0 : index
    %760 = vector.load %arg27[%c0_608, %c0_609] : memref<32x3xf32, #tpu.memory_space<vmem>>, vector<32x3xf32>
    %761 = vector.extract_strided_slice %760 {offsets = [0, 0], sizes = [32, 1], strides = [1, 1]} : vector<32x3xf32> to vector<32x1xf32>
    %762 = vector.broadcast %761 : vector<32x1xf32> to vector<32x64xf32>
    %763 = arith.addf %759, %762 : vector<32x64xf32>
    %cst_610 = arith.constant 0.000000e+00 : f32
    %764 = vector.broadcast %cst_610 : f32 to vector<32x64xf32>
    %765 = arith.maximumf %763, %764 : vector<32x64xf32>
    %766 = vector.extract_strided_slice %760 {offsets = [0, 1], sizes = [32, 1], strides = [1, 1]} : vector<32x3xf32> to vector<32x1xf32>
    %767 = vector.broadcast %766 : vector<32x1xf32> to vector<32x64xf32>
    %768 = arith.mulf %765, %767 : vector<32x64xf32>
    %769 = vector.extract_strided_slice %760 {offsets = [0, 2], sizes = [32, 1], strides = [1, 1]} : vector<32x3xf32> to vector<32x1xf32>
    %770 = vector.broadcast %769 : vector<32x1xf32> to vector<32x64xf32>
    %771 = arith.addf %768, %770 : vector<32x64xf32>
    %772 = arith.truncf %771 : vector<32x64xf32> to vector<32x64xbf16>
    %c0_611 = arith.constant 0 : index
    %c0_612 = arith.constant 0 : index
    %c0_613 = arith.constant 0 : index
    %773 = vector.load %arg28[%c0_611, %c0_612, %c0_613] : memref<4x16x32xbf16, #tpu.memory_space<vmem>>, vector<1x16x32xbf16>
    %774 = vector.shape_cast %773 : vector<1x16x32xbf16> to vector<16x32xbf16>
    %cst_614 = arith.constant dense<0.000000e+00> : vector<16x64xf32>
    %775 = tpu.matmul %774, %772, %cst_614 {dimension_numbers = #tpu.dot_dimension_numbers<[1], [0], [0], [1], [0, 0, 1, 1], [], []>} : vector<16x32xbf16>, vector<32x64xbf16>, vector<16x64xf32> -> vector<16x64xf32>
    %776 = arith.truncf %775 : vector<16x64xf32> to vector<16x64xbf16>
    %c0_615 = arith.constant 0 : index
    %c0_616 = arith.constant 0 : index
    %c0_617 = arith.constant 0 : index
    %777 = vector.load %arg8[%c0_615, %c0_616, %c0_617] : memref<4x64x256xbf16, #tpu.memory_space<vmem>>, vector<1x64x256xbf16>
    %778 = vector.shape_cast %777 : vector<1x64x256xbf16> to vector<64x256xbf16>
    %cst_618 = arith.constant dense<0.000000e+00> : vector<16x256xf32>
    %779 = tpu.matmul %776, %778, %cst_618 {dimension_numbers = #tpu.dot_dimension_numbers<[1], [0], [0], [1], [0, 0, 1, 1], [], []>} : vector<16x64xbf16>, vector<64x256xbf16>, vector<16x256xf32> -> vector<16x256xf32>
    %c1_619 = arith.constant 1 : index
    %c0_620 = arith.constant 0 : index
    %c0_621 = arith.constant 0 : index
    %780 = vector.load %arg28[%c1_619, %c0_620, %c0_621] : memref<4x16x32xbf16, #tpu.memory_space<vmem>>, vector<1x16x32xbf16>
    %781 = vector.shape_cast %780 : vector<1x16x32xbf16> to vector<16x32xbf16>
    %cst_622 = arith.constant dense<0.000000e+00> : vector<16x64xf32>
    %782 = tpu.matmul %781, %772, %cst_622 {dimension_numbers = #tpu.dot_dimension_numbers<[1], [0], [0], [1], [0, 0, 1, 1], [], []>} : vector<16x32xbf16>, vector<32x64xbf16>, vector<16x64xf32> -> vector<16x64xf32>
    %783 = arith.truncf %782 : vector<16x64xf32> to vector<16x64xbf16>
    %c1_623 = arith.constant 1 : index
    %c0_624 = arith.constant 0 : index
    %c0_625 = arith.constant 0 : index
    %784 = vector.load %arg8[%c1_623, %c0_624, %c0_625] : memref<4x64x256xbf16, #tpu.memory_space<vmem>>, vector<1x64x256xbf16>
    %785 = vector.shape_cast %784 : vector<1x64x256xbf16> to vector<64x256xbf16>
    %cst_626 = arith.constant dense<0.000000e+00> : vector<16x256xf32>
    %786 = tpu.matmul %783, %785, %cst_626 {dimension_numbers = #tpu.dot_dimension_numbers<[1], [0], [0], [1], [0, 0, 1, 1], [], []>} : vector<16x64xbf16>, vector<64x256xbf16>, vector<16x256xf32> -> vector<16x256xf32>
    %787 = arith.addf %779, %786 : vector<16x256xf32>
    %c2_627 = arith.constant 2 : index
    %c0_628 = arith.constant 0 : index
    %c0_629 = arith.constant 0 : index
    %788 = vector.load %arg28[%c2_627, %c0_628, %c0_629] : memref<4x16x32xbf16, #tpu.memory_space<vmem>>, vector<1x16x32xbf16>
    %789 = vector.shape_cast %788 : vector<1x16x32xbf16> to vector<16x32xbf16>
    %cst_630 = arith.constant dense<0.000000e+00> : vector<16x64xf32>
    %790 = tpu.matmul %789, %772, %cst_630 {dimension_numbers = #tpu.dot_dimension_numbers<[1], [0], [0], [1], [0, 0, 1, 1], [], []>} : vector<16x32xbf16>, vector<32x64xbf16>, vector<16x64xf32> -> vector<16x64xf32>
    %791 = arith.truncf %790 : vector<16x64xf32> to vector<16x64xbf16>
    %c2_631 = arith.constant 2 : index
    %c0_632 = arith.constant 0 : index
    %c0_633 = arith.constant 0 : index
    %792 = vector.load %arg8[%c2_631, %c0_632, %c0_633] : memref<4x64x256xbf16, #tpu.memory_space<vmem>>, vector<1x64x256xbf16>
    %793 = vector.shape_cast %792 : vector<1x64x256xbf16> to vector<64x256xbf16>
    %cst_634 = arith.constant dense<0.000000e+00> : vector<16x256xf32>
    %794 = tpu.matmul %791, %793, %cst_634 {dimension_numbers = #tpu.dot_dimension_numbers<[1], [0], [0], [1], [0, 0, 1, 1], [], []>} : vector<16x64xbf16>, vector<64x256xbf16>, vector<16x256xf32> -> vector<16x256xf32>
    %795 = arith.addf %787, %794 : vector<16x256xf32>
    %c3_635 = arith.constant 3 : index
    %c0_636 = arith.constant 0 : index
    %c0_637 = arith.constant 0 : index
    %796 = vector.load %arg28[%c3_635, %c0_636, %c0_637] : memref<4x16x32xbf16, #tpu.memory_space<vmem>>, vector<1x16x32xbf16>
    %797 = vector.shape_cast %796 : vector<1x16x32xbf16> to vector<16x32xbf16>
    %cst_638 = arith.constant dense<0.000000e+00> : vector<16x64xf32>
    %798 = tpu.matmul %797, %772, %cst_638 {dimension_numbers = #tpu.dot_dimension_numbers<[1], [0], [0], [1], [0, 0, 1, 1], [], []>} : vector<16x32xbf16>, vector<32x64xbf16>, vector<16x64xf32> -> vector<16x64xf32>
    %799 = arith.truncf %798 : vector<16x64xf32> to vector<16x64xbf16>
    %c3_639 = arith.constant 3 : index
    %c0_640 = arith.constant 0 : index
    %c0_641 = arith.constant 0 : index
    %800 = vector.load %arg8[%c3_639, %c0_640, %c0_641] : memref<4x64x256xbf16, #tpu.memory_space<vmem>>, vector<1x64x256xbf16>
    %801 = vector.shape_cast %800 : vector<1x64x256xbf16> to vector<64x256xbf16>
    %cst_642 = arith.constant dense<0.000000e+00> : vector<16x256xf32>
    %802 = tpu.matmul %799, %801, %cst_642 {dimension_numbers = #tpu.dot_dimension_numbers<[1], [0], [0], [1], [0, 0, 1, 1], [], []>} : vector<16x64xbf16>, vector<64x256xbf16>, vector<16x256xf32> -> vector<16x256xf32>
    %803 = arith.addf %795, %802 : vector<16x256xf32>
    %c0_643 = arith.constant 0 : index
    %c0_644 = arith.constant 0 : index
    %804 = vector.load %arg29[%c0_643, %c0_644] : memref<16x1xf32, #tpu.memory_space<vmem>>, vector<16x1xf32>
    %805 = vector.broadcast %804 : vector<16x1xf32> to vector<16x256xf32>
    %806 = arith.addf %803, %805 : vector<16x256xf32>
    %c17_i32_645 = arith.constant 17 : i32
    %807 = tpu.dynamic_rotate %806 by %c17_i32_645 dim 1 : vector<16x256xf32>, i32 -> vector<16x256xf32>
    %c0_646 = arith.constant 0 : index
    %c0_647 = arith.constant 0 : index
    %c0_648 = arith.constant 0 : index
    %808 = vector.load %arg2[%c0_646, %c0_647, %c0_648] : memref<9x1x256xf32, #tpu.memory_space<vmem>>, vector<1x1x256xf32>
    %809 = vector.shape_cast %808 : vector<1x1x256xf32> to vector<1x256xf32>
    %810 = vector.broadcast %809 : vector<1x256xf32> to vector<16x256xf32>
    %811 = arith.mulf %807, %810 : vector<16x256xf32>
    %812 = arith.truncf %811 : vector<16x256xf32> to vector<16x256xbf16>
    %c0_649 = arith.constant 0 : index
    %c0_650 = arith.constant 0 : index
    %c0_651 = arith.constant 0 : index
    %813 = vector.load %arg30[%c0_649, %c0_650, %c0_651] : memref<9x16x16xbf16, #tpu.memory_space<vmem>>, vector<1x16x16xbf16>
    %814 = vector.shape_cast %813 : vector<1x16x16xbf16> to vector<16x16xbf16>
    %cst_652 = arith.constant dense<0.000000e+00> : vector<16x256xf32>
    %815 = tpu.matmul %814, %812, %cst_652 {dimension_numbers = #tpu.dot_dimension_numbers<[1], [0], [0], [1], [0, 0, 1, 1], [], []>} : vector<16x16xbf16>, vector<16x256xbf16>, vector<16x256xf32> -> vector<16x256xf32>
    %c17_i32_653 = arith.constant 17 : i32
    %816 = tpu.dynamic_rotate %103 by %c17_i32_653 dim 1 : vector<16x256xf32>, i32 -> vector<16x256xf32>
    %c0_654 = arith.constant 0 : index
    %c0_655 = arith.constant 0 : index
    %c0_656 = arith.constant 0 : index
    %817 = vector.load %arg2[%c0_654, %c0_655, %c0_656] : memref<9x1x256xf32, #tpu.memory_space<vmem>>, vector<1x1x256xf32>
    %818 = vector.shape_cast %817 : vector<1x1x256xf32> to vector<1x256xf32>
    %819 = vector.broadcast %818 : vector<1x256xf32> to vector<16x256xf32>
    %820 = arith.mulf %816, %819 : vector<16x256xf32>
    %821 = arith.truncf %820 : vector<16x256xf32> to vector<16x256xbf16>
    %c0_657 = arith.constant 0 : index
    %c0_658 = arith.constant 0 : index
    %c0_659 = arith.constant 0 : index
    %822 = vector.load %arg31[%c0_657, %c0_658, %c0_659] : memref<9x16x16xbf16, #tpu.memory_space<vmem>>, vector<1x16x16xbf16>
    %823 = vector.shape_cast %822 : vector<1x16x16xbf16> to vector<16x16xbf16>
    %cst_660 = arith.constant dense<0.000000e+00> : vector<16x256xf32>
    %824 = tpu.matmul %823, %821, %cst_660 {dimension_numbers = #tpu.dot_dimension_numbers<[1], [0], [0], [1], [0, 0, 1, 1], [], []>} : vector<16x16xbf16>, vector<16x256xbf16>, vector<16x256xf32> -> vector<16x256xf32>
    %825 = arith.addf %815, %824 : vector<16x256xf32>
    %c16_i32_661 = arith.constant 16 : i32
    %826 = tpu.dynamic_rotate %806 by %c16_i32_661 dim 1 : vector<16x256xf32>, i32 -> vector<16x256xf32>
    %c1_662 = arith.constant 1 : index
    %c0_663 = arith.constant 0 : index
    %c0_664 = arith.constant 0 : index
    %827 = vector.load %arg2[%c1_662, %c0_663, %c0_664] : memref<9x1x256xf32, #tpu.memory_space<vmem>>, vector<1x1x256xf32>
    %828 = vector.shape_cast %827 : vector<1x1x256xf32> to vector<1x256xf32>
    %829 = vector.broadcast %828 : vector<1x256xf32> to vector<16x256xf32>
    %830 = arith.mulf %826, %829 : vector<16x256xf32>
    %831 = arith.truncf %830 : vector<16x256xf32> to vector<16x256xbf16>
    %c1_665 = arith.constant 1 : index
    %c0_666 = arith.constant 0 : index
    %c0_667 = arith.constant 0 : index
    %832 = vector.load %arg30[%c1_665, %c0_666, %c0_667] : memref<9x16x16xbf16, #tpu.memory_space<vmem>>, vector<1x16x16xbf16>
    %833 = vector.shape_cast %832 : vector<1x16x16xbf16> to vector<16x16xbf16>
    %cst_668 = arith.constant dense<0.000000e+00> : vector<16x256xf32>
    %834 = tpu.matmul %833, %831, %cst_668 {dimension_numbers = #tpu.dot_dimension_numbers<[1], [0], [0], [1], [0, 0, 1, 1], [], []>} : vector<16x16xbf16>, vector<16x256xbf16>, vector<16x256xf32> -> vector<16x256xf32>
    %835 = arith.addf %825, %834 : vector<16x256xf32>
    %c16_i32_669 = arith.constant 16 : i32
    %836 = tpu.dynamic_rotate %103 by %c16_i32_669 dim 1 : vector<16x256xf32>, i32 -> vector<16x256xf32>
    %c1_670 = arith.constant 1 : index
    %c0_671 = arith.constant 0 : index
    %c0_672 = arith.constant 0 : index
    %837 = vector.load %arg2[%c1_670, %c0_671, %c0_672] : memref<9x1x256xf32, #tpu.memory_space<vmem>>, vector<1x1x256xf32>
    %838 = vector.shape_cast %837 : vector<1x1x256xf32> to vector<1x256xf32>
    %839 = vector.broadcast %838 : vector<1x256xf32> to vector<16x256xf32>
    %840 = arith.mulf %836, %839 : vector<16x256xf32>
    %841 = arith.truncf %840 : vector<16x256xf32> to vector<16x256xbf16>
    %c1_673 = arith.constant 1 : index
    %c0_674 = arith.constant 0 : index
    %c0_675 = arith.constant 0 : index
    %842 = vector.load %arg31[%c1_673, %c0_674, %c0_675] : memref<9x16x16xbf16, #tpu.memory_space<vmem>>, vector<1x16x16xbf16>
    %843 = vector.shape_cast %842 : vector<1x16x16xbf16> to vector<16x16xbf16>
    %cst_676 = arith.constant dense<0.000000e+00> : vector<16x256xf32>
    %844 = tpu.matmul %843, %841, %cst_676 {dimension_numbers = #tpu.dot_dimension_numbers<[1], [0], [0], [1], [0, 0, 1, 1], [], []>} : vector<16x16xbf16>, vector<16x256xbf16>, vector<16x256xf32> -> vector<16x256xf32>
    %845 = arith.addf %835, %844 : vector<16x256xf32>
    %c15_i32_677 = arith.constant 15 : i32
    %846 = tpu.dynamic_rotate %806 by %c15_i32_677 dim 1 : vector<16x256xf32>, i32 -> vector<16x256xf32>
    %c2_678 = arith.constant 2 : index
    %c0_679 = arith.constant 0 : index
    %c0_680 = arith.constant 0 : index
    %847 = vector.load %arg2[%c2_678, %c0_679, %c0_680] : memref<9x1x256xf32, #tpu.memory_space<vmem>>, vector<1x1x256xf32>
    %848 = vector.shape_cast %847 : vector<1x1x256xf32> to vector<1x256xf32>
    %849 = vector.broadcast %848 : vector<1x256xf32> to vector<16x256xf32>
    %850 = arith.mulf %846, %849 : vector<16x256xf32>
    %851 = arith.truncf %850 : vector<16x256xf32> to vector<16x256xbf16>
    %c2_681 = arith.constant 2 : index
    %c0_682 = arith.constant 0 : index
    %c0_683 = arith.constant 0 : index
    %852 = vector.load %arg30[%c2_681, %c0_682, %c0_683] : memref<9x16x16xbf16, #tpu.memory_space<vmem>>, vector<1x16x16xbf16>
    %853 = vector.shape_cast %852 : vector<1x16x16xbf16> to vector<16x16xbf16>
    %cst_684 = arith.constant dense<0.000000e+00> : vector<16x256xf32>
    %854 = tpu.matmul %853, %851, %cst_684 {dimension_numbers = #tpu.dot_dimension_numbers<[1], [0], [0], [1], [0, 0, 1, 1], [], []>} : vector<16x16xbf16>, vector<16x256xbf16>, vector<16x256xf32> -> vector<16x256xf32>
    %855 = arith.addf %845, %854 : vector<16x256xf32>
    %c15_i32_685 = arith.constant 15 : i32
    %856 = tpu.dynamic_rotate %103 by %c15_i32_685 dim 1 : vector<16x256xf32>, i32 -> vector<16x256xf32>
    %c2_686 = arith.constant 2 : index
    %c0_687 = arith.constant 0 : index
    %c0_688 = arith.constant 0 : index
    %857 = vector.load %arg2[%c2_686, %c0_687, %c0_688] : memref<9x1x256xf32, #tpu.memory_space<vmem>>, vector<1x1x256xf32>
    %858 = vector.shape_cast %857 : vector<1x1x256xf32> to vector<1x256xf32>
    %859 = vector.broadcast %858 : vector<1x256xf32> to vector<16x256xf32>
    %860 = arith.mulf %856, %859 : vector<16x256xf32>
    %861 = arith.truncf %860 : vector<16x256xf32> to vector<16x256xbf16>
    %c2_689 = arith.constant 2 : index
    %c0_690 = arith.constant 0 : index
    %c0_691 = arith.constant 0 : index
    %862 = vector.load %arg31[%c2_689, %c0_690, %c0_691] : memref<9x16x16xbf16, #tpu.memory_space<vmem>>, vector<1x16x16xbf16>
    %863 = vector.shape_cast %862 : vector<1x16x16xbf16> to vector<16x16xbf16>
    %cst_692 = arith.constant dense<0.000000e+00> : vector<16x256xf32>
    %864 = tpu.matmul %863, %861, %cst_692 {dimension_numbers = #tpu.dot_dimension_numbers<[1], [0], [0], [1], [0, 0, 1, 1], [], []>} : vector<16x16xbf16>, vector<16x256xbf16>, vector<16x256xf32> -> vector<16x256xf32>
    %865 = arith.addf %855, %864 : vector<16x256xf32>
    %c1_i32_693 = arith.constant 1 : i32
    %866 = tpu.dynamic_rotate %806 by %c1_i32_693 dim 1 : vector<16x256xf32>, i32 -> vector<16x256xf32>
    %c3_694 = arith.constant 3 : index
    %c0_695 = arith.constant 0 : index
    %c0_696 = arith.constant 0 : index
    %867 = vector.load %arg2[%c3_694, %c0_695, %c0_696] : memref<9x1x256xf32, #tpu.memory_space<vmem>>, vector<1x1x256xf32>
    %868 = vector.shape_cast %867 : vector<1x1x256xf32> to vector<1x256xf32>
    %869 = vector.broadcast %868 : vector<1x256xf32> to vector<16x256xf32>
    %870 = arith.mulf %866, %869 : vector<16x256xf32>
    %871 = arith.truncf %870 : vector<16x256xf32> to vector<16x256xbf16>
    %c3_697 = arith.constant 3 : index
    %c0_698 = arith.constant 0 : index
    %c0_699 = arith.constant 0 : index
    %872 = vector.load %arg30[%c3_697, %c0_698, %c0_699] : memref<9x16x16xbf16, #tpu.memory_space<vmem>>, vector<1x16x16xbf16>
    %873 = vector.shape_cast %872 : vector<1x16x16xbf16> to vector<16x16xbf16>
    %cst_700 = arith.constant dense<0.000000e+00> : vector<16x256xf32>
    %874 = tpu.matmul %873, %871, %cst_700 {dimension_numbers = #tpu.dot_dimension_numbers<[1], [0], [0], [1], [0, 0, 1, 1], [], []>} : vector<16x16xbf16>, vector<16x256xbf16>, vector<16x256xf32> -> vector<16x256xf32>
    %875 = arith.addf %865, %874 : vector<16x256xf32>
    %c1_i32_701 = arith.constant 1 : i32
    %876 = tpu.dynamic_rotate %103 by %c1_i32_701 dim 1 : vector<16x256xf32>, i32 -> vector<16x256xf32>
    %c3_702 = arith.constant 3 : index
    %c0_703 = arith.constant 0 : index
    %c0_704 = arith.constant 0 : index
    %877 = vector.load %arg2[%c3_702, %c0_703, %c0_704] : memref<9x1x256xf32, #tpu.memory_space<vmem>>, vector<1x1x256xf32>
    %878 = vector.shape_cast %877 : vector<1x1x256xf32> to vector<1x256xf32>
    %879 = vector.broadcast %878 : vector<1x256xf32> to vector<16x256xf32>
    %880 = arith.mulf %876, %879 : vector<16x256xf32>
    %881 = arith.truncf %880 : vector<16x256xf32> to vector<16x256xbf16>
    %c3_705 = arith.constant 3 : index
    %c0_706 = arith.constant 0 : index
    %c0_707 = arith.constant 0 : index
    %882 = vector.load %arg31[%c3_705, %c0_706, %c0_707] : memref<9x16x16xbf16, #tpu.memory_space<vmem>>, vector<1x16x16xbf16>
    %883 = vector.shape_cast %882 : vector<1x16x16xbf16> to vector<16x16xbf16>
    %cst_708 = arith.constant dense<0.000000e+00> : vector<16x256xf32>
    %884 = tpu.matmul %883, %881, %cst_708 {dimension_numbers = #tpu.dot_dimension_numbers<[1], [0], [0], [1], [0, 0, 1, 1], [], []>} : vector<16x16xbf16>, vector<16x256xbf16>, vector<16x256xf32> -> vector<16x256xf32>
    %885 = arith.addf %875, %884 : vector<16x256xf32>
    %886 = arith.truncf %806 : vector<16x256xf32> to vector<16x256xbf16>
    %c4_709 = arith.constant 4 : index
    %c0_710 = arith.constant 0 : index
    %c0_711 = arith.constant 0 : index
    %887 = vector.load %arg30[%c4_709, %c0_710, %c0_711] : memref<9x16x16xbf16, #tpu.memory_space<vmem>>, vector<1x16x16xbf16>
    %888 = vector.shape_cast %887 : vector<1x16x16xbf16> to vector<16x16xbf16>
    %cst_712 = arith.constant dense<0.000000e+00> : vector<16x256xf32>
    %889 = tpu.matmul %888, %886, %cst_712 {dimension_numbers = #tpu.dot_dimension_numbers<[1], [0], [0], [1], [0, 0, 1, 1], [], []>} : vector<16x16xbf16>, vector<16x256xbf16>, vector<16x256xf32> -> vector<16x256xf32>
    %890 = arith.addf %885, %889 : vector<16x256xf32>
    %891 = arith.truncf %103 : vector<16x256xf32> to vector<16x256xbf16>
    %c4_713 = arith.constant 4 : index
    %c0_714 = arith.constant 0 : index
    %c0_715 = arith.constant 0 : index
    %892 = vector.load %arg31[%c4_713, %c0_714, %c0_715] : memref<9x16x16xbf16, #tpu.memory_space<vmem>>, vector<1x16x16xbf16>
    %893 = vector.shape_cast %892 : vector<1x16x16xbf16> to vector<16x16xbf16>
    %cst_716 = arith.constant dense<0.000000e+00> : vector<16x256xf32>
    %894 = tpu.matmul %893, %891, %cst_716 {dimension_numbers = #tpu.dot_dimension_numbers<[1], [0], [0], [1], [0, 0, 1, 1], [], []>} : vector<16x16xbf16>, vector<16x256xbf16>, vector<16x256xf32> -> vector<16x256xf32>
    %895 = arith.addf %890, %894 : vector<16x256xf32>
    %c255_i32_717 = arith.constant 255 : i32
    %896 = tpu.dynamic_rotate %806 by %c255_i32_717 dim 1 : vector<16x256xf32>, i32 -> vector<16x256xf32>
    %c5_718 = arith.constant 5 : index
    %c0_719 = arith.constant 0 : index
    %c0_720 = arith.constant 0 : index
    %897 = vector.load %arg2[%c5_718, %c0_719, %c0_720] : memref<9x1x256xf32, #tpu.memory_space<vmem>>, vector<1x1x256xf32>
    %898 = vector.shape_cast %897 : vector<1x1x256xf32> to vector<1x256xf32>
    %899 = vector.broadcast %898 : vector<1x256xf32> to vector<16x256xf32>
    %900 = arith.mulf %896, %899 : vector<16x256xf32>
    %901 = arith.truncf %900 : vector<16x256xf32> to vector<16x256xbf16>
    %c5_721 = arith.constant 5 : index
    %c0_722 = arith.constant 0 : index
    %c0_723 = arith.constant 0 : index
    %902 = vector.load %arg30[%c5_721, %c0_722, %c0_723] : memref<9x16x16xbf16, #tpu.memory_space<vmem>>, vector<1x16x16xbf16>
    %903 = vector.shape_cast %902 : vector<1x16x16xbf16> to vector<16x16xbf16>
    %cst_724 = arith.constant dense<0.000000e+00> : vector<16x256xf32>
    %904 = tpu.matmul %903, %901, %cst_724 {dimension_numbers = #tpu.dot_dimension_numbers<[1], [0], [0], [1], [0, 0, 1, 1], [], []>} : vector<16x16xbf16>, vector<16x256xbf16>, vector<16x256xf32> -> vector<16x256xf32>
    %905 = arith.addf %895, %904 : vector<16x256xf32>
    %c255_i32_725 = arith.constant 255 : i32
    %906 = tpu.dynamic_rotate %103 by %c255_i32_725 dim 1 : vector<16x256xf32>, i32 -> vector<16x256xf32>
    %c5_726 = arith.constant 5 : index
    %c0_727 = arith.constant 0 : index
    %c0_728 = arith.constant 0 : index
    %907 = vector.load %arg2[%c5_726, %c0_727, %c0_728] : memref<9x1x256xf32, #tpu.memory_space<vmem>>, vector<1x1x256xf32>
    %908 = vector.shape_cast %907 : vector<1x1x256xf32> to vector<1x256xf32>
    %909 = vector.broadcast %908 : vector<1x256xf32> to vector<16x256xf32>
    %910 = arith.mulf %906, %909 : vector<16x256xf32>
    %911 = arith.truncf %910 : vector<16x256xf32> to vector<16x256xbf16>
    %c5_729 = arith.constant 5 : index
    %c0_730 = arith.constant 0 : index
    %c0_731 = arith.constant 0 : index
    %912 = vector.load %arg31[%c5_729, %c0_730, %c0_731] : memref<9x16x16xbf16, #tpu.memory_space<vmem>>, vector<1x16x16xbf16>
    %913 = vector.shape_cast %912 : vector<1x16x16xbf16> to vector<16x16xbf16>
    %cst_732 = arith.constant dense<0.000000e+00> : vector<16x256xf32>
    %914 = tpu.matmul %913, %911, %cst_732 {dimension_numbers = #tpu.dot_dimension_numbers<[1], [0], [0], [1], [0, 0, 1, 1], [], []>} : vector<16x16xbf16>, vector<16x256xbf16>, vector<16x256xf32> -> vector<16x256xf32>
    %915 = arith.addf %905, %914 : vector<16x256xf32>
    %c241_i32_733 = arith.constant 241 : i32
    %916 = tpu.dynamic_rotate %806 by %c241_i32_733 dim 1 : vector<16x256xf32>, i32 -> vector<16x256xf32>
    %c6_734 = arith.constant 6 : index
    %c0_735 = arith.constant 0 : index
    %c0_736 = arith.constant 0 : index
    %917 = vector.load %arg2[%c6_734, %c0_735, %c0_736] : memref<9x1x256xf32, #tpu.memory_space<vmem>>, vector<1x1x256xf32>
    %918 = vector.shape_cast %917 : vector<1x1x256xf32> to vector<1x256xf32>
    %919 = vector.broadcast %918 : vector<1x256xf32> to vector<16x256xf32>
    %920 = arith.mulf %916, %919 : vector<16x256xf32>
    %921 = arith.truncf %920 : vector<16x256xf32> to vector<16x256xbf16>
    %c6_737 = arith.constant 6 : index
    %c0_738 = arith.constant 0 : index
    %c0_739 = arith.constant 0 : index
    %922 = vector.load %arg30[%c6_737, %c0_738, %c0_739] : memref<9x16x16xbf16, #tpu.memory_space<vmem>>, vector<1x16x16xbf16>
    %923 = vector.shape_cast %922 : vector<1x16x16xbf16> to vector<16x16xbf16>
    %cst_740 = arith.constant dense<0.000000e+00> : vector<16x256xf32>
    %924 = tpu.matmul %923, %921, %cst_740 {dimension_numbers = #tpu.dot_dimension_numbers<[1], [0], [0], [1], [0, 0, 1, 1], [], []>} : vector<16x16xbf16>, vector<16x256xbf16>, vector<16x256xf32> -> vector<16x256xf32>
    %925 = arith.addf %915, %924 : vector<16x256xf32>
    %c241_i32_741 = arith.constant 241 : i32
    %926 = tpu.dynamic_rotate %103 by %c241_i32_741 dim 1 : vector<16x256xf32>, i32 -> vector<16x256xf32>
    %c6_742 = arith.constant 6 : index
    %c0_743 = arith.constant 0 : index
    %c0_744 = arith.constant 0 : index
    %927 = vector.load %arg2[%c6_742, %c0_743, %c0_744] : memref<9x1x256xf32, #tpu.memory_space<vmem>>, vector<1x1x256xf32>
    %928 = vector.shape_cast %927 : vector<1x1x256xf32> to vector<1x256xf32>
    %929 = vector.broadcast %928 : vector<1x256xf32> to vector<16x256xf32>
    %930 = arith.mulf %926, %929 : vector<16x256xf32>
    %931 = arith.truncf %930 : vector<16x256xf32> to vector<16x256xbf16>
    %c6_745 = arith.constant 6 : index
    %c0_746 = arith.constant 0 : index
    %c0_747 = arith.constant 0 : index
    %932 = vector.load %arg31[%c6_745, %c0_746, %c0_747] : memref<9x16x16xbf16, #tpu.memory_space<vmem>>, vector<1x16x16xbf16>
    %933 = vector.shape_cast %932 : vector<1x16x16xbf16> to vector<16x16xbf16>
    %cst_748 = arith.constant dense<0.000000e+00> : vector<16x256xf32>
    %934 = tpu.matmul %933, %931, %cst_748 {dimension_numbers = #tpu.dot_dimension_numbers<[1], [0], [0], [1], [0, 0, 1, 1], [], []>} : vector<16x16xbf16>, vector<16x256xbf16>, vector<16x256xf32> -> vector<16x256xf32>
    %935 = arith.addf %925, %934 : vector<16x256xf32>
    %c240_i32_749 = arith.constant 240 : i32
    %936 = tpu.dynamic_rotate %806 by %c240_i32_749 dim 1 : vector<16x256xf32>, i32 -> vector<16x256xf32>
    %c7_750 = arith.constant 7 : index
    %c0_751 = arith.constant 0 : index
    %c0_752 = arith.constant 0 : index
    %937 = vector.load %arg2[%c7_750, %c0_751, %c0_752] : memref<9x1x256xf32, #tpu.memory_space<vmem>>, vector<1x1x256xf32>
    %938 = vector.shape_cast %937 : vector<1x1x256xf32> to vector<1x256xf32>
    %939 = vector.broadcast %938 : vector<1x256xf32> to vector<16x256xf32>
    %940 = arith.mulf %936, %939 : vector<16x256xf32>
    %941 = arith.truncf %940 : vector<16x256xf32> to vector<16x256xbf16>
    %c7_753 = arith.constant 7 : index
    %c0_754 = arith.constant 0 : index
    %c0_755 = arith.constant 0 : index
    %942 = vector.load %arg30[%c7_753, %c0_754, %c0_755] : memref<9x16x16xbf16, #tpu.memory_space<vmem>>, vector<1x16x16xbf16>
    %943 = vector.shape_cast %942 : vector<1x16x16xbf16> to vector<16x16xbf16>
    %cst_756 = arith.constant dense<0.000000e+00> : vector<16x256xf32>
    %944 = tpu.matmul %943, %941, %cst_756 {dimension_numbers = #tpu.dot_dimension_numbers<[1], [0], [0], [1], [0, 0, 1, 1], [], []>} : vector<16x16xbf16>, vector<16x256xbf16>, vector<16x256xf32> -> vector<16x256xf32>
    %945 = arith.addf %935, %944 : vector<16x256xf32>
    %c240_i32_757 = arith.constant 240 : i32
    %946 = tpu.dynamic_rotate %103 by %c240_i32_757 dim 1 : vector<16x256xf32>, i32 -> vector<16x256xf32>
    %c7_758 = arith.constant 7 : index
    %c0_759 = arith.constant 0 : index
    %c0_760 = arith.constant 0 : index
    %947 = vector.load %arg2[%c7_758, %c0_759, %c0_760] : memref<9x1x256xf32, #tpu.memory_space<vmem>>, vector<1x1x256xf32>
    %948 = vector.shape_cast %947 : vector<1x1x256xf32> to vector<1x256xf32>
    %949 = vector.broadcast %948 : vector<1x256xf32> to vector<16x256xf32>
    %950 = arith.mulf %946, %949 : vector<16x256xf32>
    %951 = arith.truncf %950 : vector<16x256xf32> to vector<16x256xbf16>
    %c7_761 = arith.constant 7 : index
    %c0_762 = arith.constant 0 : index
    %c0_763 = arith.constant 0 : index
    %952 = vector.load %arg31[%c7_761, %c0_762, %c0_763] : memref<9x16x16xbf16, #tpu.memory_space<vmem>>, vector<1x16x16xbf16>
    %953 = vector.shape_cast %952 : vector<1x16x16xbf16> to vector<16x16xbf16>
    %cst_764 = arith.constant dense<0.000000e+00> : vector<16x256xf32>
    %954 = tpu.matmul %953, %951, %cst_764 {dimension_numbers = #tpu.dot_dimension_numbers<[1], [0], [0], [1], [0, 0, 1, 1], [], []>} : vector<16x16xbf16>, vector<16x256xbf16>, vector<16x256xf32> -> vector<16x256xf32>
    %955 = arith.addf %945, %954 : vector<16x256xf32>
    %c239_i32_765 = arith.constant 239 : i32
    %956 = tpu.dynamic_rotate %806 by %c239_i32_765 dim 1 : vector<16x256xf32>, i32 -> vector<16x256xf32>
    %c8_766 = arith.constant 8 : index
    %c0_767 = arith.constant 0 : index
    %c0_768 = arith.constant 0 : index
    %957 = vector.load %arg2[%c8_766, %c0_767, %c0_768] : memref<9x1x256xf32, #tpu.memory_space<vmem>>, vector<1x1x256xf32>
    %958 = vector.shape_cast %957 : vector<1x1x256xf32> to vector<1x256xf32>
    %959 = vector.broadcast %958 : vector<1x256xf32> to vector<16x256xf32>
    %960 = arith.mulf %956, %959 : vector<16x256xf32>
    %961 = arith.truncf %960 : vector<16x256xf32> to vector<16x256xbf16>
    %c8_769 = arith.constant 8 : index
    %c0_770 = arith.constant 0 : index
    %c0_771 = arith.constant 0 : index
    %962 = vector.load %arg30[%c8_769, %c0_770, %c0_771] : memref<9x16x16xbf16, #tpu.memory_space<vmem>>, vector<1x16x16xbf16>
    %963 = vector.shape_cast %962 : vector<1x16x16xbf16> to vector<16x16xbf16>
    %cst_772 = arith.constant dense<0.000000e+00> : vector<16x256xf32>
    %964 = tpu.matmul %963, %961, %cst_772 {dimension_numbers = #tpu.dot_dimension_numbers<[1], [0], [0], [1], [0, 0, 1, 1], [], []>} : vector<16x16xbf16>, vector<16x256xbf16>, vector<16x256xf32> -> vector<16x256xf32>
    %965 = arith.addf %955, %964 : vector<16x256xf32>
    %c239_i32_773 = arith.constant 239 : i32
    %966 = tpu.dynamic_rotate %103 by %c239_i32_773 dim 1 : vector<16x256xf32>, i32 -> vector<16x256xf32>
    %c8_774 = arith.constant 8 : index
    %c0_775 = arith.constant 0 : index
    %c0_776 = arith.constant 0 : index
    %967 = vector.load %arg2[%c8_774, %c0_775, %c0_776] : memref<9x1x256xf32, #tpu.memory_space<vmem>>, vector<1x1x256xf32>
    %968 = vector.shape_cast %967 : vector<1x1x256xf32> to vector<1x256xf32>
    %969 = vector.broadcast %968 : vector<1x256xf32> to vector<16x256xf32>
    %970 = arith.mulf %966, %969 : vector<16x256xf32>
    %971 = arith.truncf %970 : vector<16x256xf32> to vector<16x256xbf16>
    %c8_777 = arith.constant 8 : index
    %c0_778 = arith.constant 0 : index
    %c0_779 = arith.constant 0 : index
    %972 = vector.load %arg31[%c8_777, %c0_778, %c0_779] : memref<9x16x16xbf16, #tpu.memory_space<vmem>>, vector<1x16x16xbf16>
    %973 = vector.shape_cast %972 : vector<1x16x16xbf16> to vector<16x16xbf16>
    %cst_780 = arith.constant dense<0.000000e+00> : vector<16x256xf32>
    %974 = tpu.matmul %973, %971, %cst_780 {dimension_numbers = #tpu.dot_dimension_numbers<[1], [0], [0], [1], [0, 0, 1, 1], [], []>} : vector<16x16xbf16>, vector<16x256xbf16>, vector<16x256xf32> -> vector<16x256xf32>
    %975 = arith.addf %965, %974 : vector<16x256xf32>
    %c0_781 = arith.constant 0 : index
    %c0_782 = arith.constant 0 : index
    %976 = vector.load %arg32[%c0_781, %c0_782] : memref<16x3xf32, #tpu.memory_space<vmem>>, vector<16x3xf32>
    %977 = vector.extract_strided_slice %976 {offsets = [0, 0], sizes = [16, 1], strides = [1, 1]} : vector<16x3xf32> to vector<16x1xf32>
    %978 = vector.broadcast %977 : vector<16x1xf32> to vector<16x256xf32>
    %979 = arith.addf %975, %978 : vector<16x256xf32>
    %cst_783 = arith.constant 0.000000e+00 : f32
    %980 = vector.broadcast %cst_783 : f32 to vector<16x256xf32>
    %981 = arith.maximumf %979, %980 : vector<16x256xf32>
    %982 = vector.extract_strided_slice %976 {offsets = [0, 1], sizes = [16, 1], strides = [1, 1]} : vector<16x3xf32> to vector<16x1xf32>
    %983 = vector.broadcast %982 : vector<16x1xf32> to vector<16x256xf32>
    %984 = arith.mulf %981, %983 : vector<16x256xf32>
    %985 = vector.extract_strided_slice %976 {offsets = [0, 2], sizes = [16, 1], strides = [1, 1]} : vector<16x3xf32> to vector<16x1xf32>
    %986 = vector.broadcast %985 : vector<16x1xf32> to vector<16x256xf32>
    %987 = arith.addf %984, %986 : vector<16x256xf32>
    %c17_i32_784 = arith.constant 17 : i32
    %988 = tpu.dynamic_rotate %987 by %c17_i32_784 dim 1 : vector<16x256xf32>, i32 -> vector<16x256xf32>
    %c0_785 = arith.constant 0 : index
    %c0_786 = arith.constant 0 : index
    %c0_787 = arith.constant 0 : index
    %989 = vector.load %arg2[%c0_785, %c0_786, %c0_787] : memref<9x1x256xf32, #tpu.memory_space<vmem>>, vector<1x1x256xf32>
    %990 = vector.shape_cast %989 : vector<1x1x256xf32> to vector<1x256xf32>
    %991 = vector.broadcast %990 : vector<1x256xf32> to vector<16x256xf32>
    %992 = arith.mulf %988, %991 : vector<16x256xf32>
    %993 = arith.truncf %992 : vector<16x256xf32> to vector<16x256xbf16>
    %c0_788 = arith.constant 0 : index
    %c0_789 = arith.constant 0 : index
    %c0_790 = arith.constant 0 : index
    %994 = vector.load %arg33[%c0_788, %c0_789, %c0_790] : memref<9x16x16xbf16, #tpu.memory_space<vmem>>, vector<1x16x16xbf16>
    %995 = vector.shape_cast %994 : vector<1x16x16xbf16> to vector<16x16xbf16>
    %cst_791 = arith.constant dense<0.000000e+00> : vector<16x256xf32>
    %996 = tpu.matmul %995, %993, %cst_791 {dimension_numbers = #tpu.dot_dimension_numbers<[1], [0], [0], [1], [0, 0, 1, 1], [], []>} : vector<16x16xbf16>, vector<16x256xbf16>, vector<16x256xf32> -> vector<16x256xf32>
    %c16_i32_792 = arith.constant 16 : i32
    %997 = tpu.dynamic_rotate %987 by %c16_i32_792 dim 1 : vector<16x256xf32>, i32 -> vector<16x256xf32>
    %c1_793 = arith.constant 1 : index
    %c0_794 = arith.constant 0 : index
    %c0_795 = arith.constant 0 : index
    %998 = vector.load %arg2[%c1_793, %c0_794, %c0_795] : memref<9x1x256xf32, #tpu.memory_space<vmem>>, vector<1x1x256xf32>
    %999 = vector.shape_cast %998 : vector<1x1x256xf32> to vector<1x256xf32>
    %1000 = vector.broadcast %999 : vector<1x256xf32> to vector<16x256xf32>
    %1001 = arith.mulf %997, %1000 : vector<16x256xf32>
    %1002 = arith.truncf %1001 : vector<16x256xf32> to vector<16x256xbf16>
    %c1_796 = arith.constant 1 : index
    %c0_797 = arith.constant 0 : index
    %c0_798 = arith.constant 0 : index
    %1003 = vector.load %arg33[%c1_796, %c0_797, %c0_798] : memref<9x16x16xbf16, #tpu.memory_space<vmem>>, vector<1x16x16xbf16>
    %1004 = vector.shape_cast %1003 : vector<1x16x16xbf16> to vector<16x16xbf16>
    %cst_799 = arith.constant dense<0.000000e+00> : vector<16x256xf32>
    %1005 = tpu.matmul %1004, %1002, %cst_799 {dimension_numbers = #tpu.dot_dimension_numbers<[1], [0], [0], [1], [0, 0, 1, 1], [], []>} : vector<16x16xbf16>, vector<16x256xbf16>, vector<16x256xf32> -> vector<16x256xf32>
    %1006 = arith.addf %996, %1005 : vector<16x256xf32>
    %c15_i32_800 = arith.constant 15 : i32
    %1007 = tpu.dynamic_rotate %987 by %c15_i32_800 dim 1 : vector<16x256xf32>, i32 -> vector<16x256xf32>
    %c2_801 = arith.constant 2 : index
    %c0_802 = arith.constant 0 : index
    %c0_803 = arith.constant 0 : index
    %1008 = vector.load %arg2[%c2_801, %c0_802, %c0_803] : memref<9x1x256xf32, #tpu.memory_space<vmem>>, vector<1x1x256xf32>
    %1009 = vector.shape_cast %1008 : vector<1x1x256xf32> to vector<1x256xf32>
    %1010 = vector.broadcast %1009 : vector<1x256xf32> to vector<16x256xf32>
    %1011 = arith.mulf %1007, %1010 : vector<16x256xf32>
    %1012 = arith.truncf %1011 : vector<16x256xf32> to vector<16x256xbf16>
    %c2_804 = arith.constant 2 : index
    %c0_805 = arith.constant 0 : index
    %c0_806 = arith.constant 0 : index
    %1013 = vector.load %arg33[%c2_804, %c0_805, %c0_806] : memref<9x16x16xbf16, #tpu.memory_space<vmem>>, vector<1x16x16xbf16>
    %1014 = vector.shape_cast %1013 : vector<1x16x16xbf16> to vector<16x16xbf16>
    %cst_807 = arith.constant dense<0.000000e+00> : vector<16x256xf32>
    %1015 = tpu.matmul %1014, %1012, %cst_807 {dimension_numbers = #tpu.dot_dimension_numbers<[1], [0], [0], [1], [0, 0, 1, 1], [], []>} : vector<16x16xbf16>, vector<16x256xbf16>, vector<16x256xf32> -> vector<16x256xf32>
    %1016 = arith.addf %1006, %1015 : vector<16x256xf32>
    %c1_i32_808 = arith.constant 1 : i32
    %1017 = tpu.dynamic_rotate %987 by %c1_i32_808 dim 1 : vector<16x256xf32>, i32 -> vector<16x256xf32>
    %c3_809 = arith.constant 3 : index
    %c0_810 = arith.constant 0 : index
    %c0_811 = arith.constant 0 : index
    %1018 = vector.load %arg2[%c3_809, %c0_810, %c0_811] : memref<9x1x256xf32, #tpu.memory_space<vmem>>, vector<1x1x256xf32>
    %1019 = vector.shape_cast %1018 : vector<1x1x256xf32> to vector<1x256xf32>
    %1020 = vector.broadcast %1019 : vector<1x256xf32> to vector<16x256xf32>
    %1021 = arith.mulf %1017, %1020 : vector<16x256xf32>
    %1022 = arith.truncf %1021 : vector<16x256xf32> to vector<16x256xbf16>
    %c3_812 = arith.constant 3 : index
    %c0_813 = arith.constant 0 : index
    %c0_814 = arith.constant 0 : index
    %1023 = vector.load %arg33[%c3_812, %c0_813, %c0_814] : memref<9x16x16xbf16, #tpu.memory_space<vmem>>, vector<1x16x16xbf16>
    %1024 = vector.shape_cast %1023 : vector<1x16x16xbf16> to vector<16x16xbf16>
    %cst_815 = arith.constant dense<0.000000e+00> : vector<16x256xf32>
    %1025 = tpu.matmul %1024, %1022, %cst_815 {dimension_numbers = #tpu.dot_dimension_numbers<[1], [0], [0], [1], [0, 0, 1, 1], [], []>} : vector<16x16xbf16>, vector<16x256xbf16>, vector<16x256xf32> -> vector<16x256xf32>
    %1026 = arith.addf %1016, %1025 : vector<16x256xf32>
    %1027 = arith.truncf %987 : vector<16x256xf32> to vector<16x256xbf16>
    %c4_816 = arith.constant 4 : index
    %c0_817 = arith.constant 0 : index
    %c0_818 = arith.constant 0 : index
    %1028 = vector.load %arg33[%c4_816, %c0_817, %c0_818] : memref<9x16x16xbf16, #tpu.memory_space<vmem>>, vector<1x16x16xbf16>
    %1029 = vector.shape_cast %1028 : vector<1x16x16xbf16> to vector<16x16xbf16>
    %cst_819 = arith.constant dense<0.000000e+00> : vector<16x256xf32>
    %1030 = tpu.matmul %1029, %1027, %cst_819 {dimension_numbers = #tpu.dot_dimension_numbers<[1], [0], [0], [1], [0, 0, 1, 1], [], []>} : vector<16x16xbf16>, vector<16x256xbf16>, vector<16x256xf32> -> vector<16x256xf32>
    %1031 = arith.addf %1026, %1030 : vector<16x256xf32>
    %c255_i32_820 = arith.constant 255 : i32
    %1032 = tpu.dynamic_rotate %987 by %c255_i32_820 dim 1 : vector<16x256xf32>, i32 -> vector<16x256xf32>
    %c5_821 = arith.constant 5 : index
    %c0_822 = arith.constant 0 : index
    %c0_823 = arith.constant 0 : index
    %1033 = vector.load %arg2[%c5_821, %c0_822, %c0_823] : memref<9x1x256xf32, #tpu.memory_space<vmem>>, vector<1x1x256xf32>
    %1034 = vector.shape_cast %1033 : vector<1x1x256xf32> to vector<1x256xf32>
    %1035 = vector.broadcast %1034 : vector<1x256xf32> to vector<16x256xf32>
    %1036 = arith.mulf %1032, %1035 : vector<16x256xf32>
    %1037 = arith.truncf %1036 : vector<16x256xf32> to vector<16x256xbf16>
    %c5_824 = arith.constant 5 : index
    %c0_825 = arith.constant 0 : index
    %c0_826 = arith.constant 0 : index
    %1038 = vector.load %arg33[%c5_824, %c0_825, %c0_826] : memref<9x16x16xbf16, #tpu.memory_space<vmem>>, vector<1x16x16xbf16>
    %1039 = vector.shape_cast %1038 : vector<1x16x16xbf16> to vector<16x16xbf16>
    %cst_827 = arith.constant dense<0.000000e+00> : vector<16x256xf32>
    %1040 = tpu.matmul %1039, %1037, %cst_827 {dimension_numbers = #tpu.dot_dimension_numbers<[1], [0], [0], [1], [0, 0, 1, 1], [], []>} : vector<16x16xbf16>, vector<16x256xbf16>, vector<16x256xf32> -> vector<16x256xf32>
    %1041 = arith.addf %1031, %1040 : vector<16x256xf32>
    %c241_i32_828 = arith.constant 241 : i32
    %1042 = tpu.dynamic_rotate %987 by %c241_i32_828 dim 1 : vector<16x256xf32>, i32 -> vector<16x256xf32>
    %c6_829 = arith.constant 6 : index
    %c0_830 = arith.constant 0 : index
    %c0_831 = arith.constant 0 : index
    %1043 = vector.load %arg2[%c6_829, %c0_830, %c0_831] : memref<9x1x256xf32, #tpu.memory_space<vmem>>, vector<1x1x256xf32>
    %1044 = vector.shape_cast %1043 : vector<1x1x256xf32> to vector<1x256xf32>
    %1045 = vector.broadcast %1044 : vector<1x256xf32> to vector<16x256xf32>
    %1046 = arith.mulf %1042, %1045 : vector<16x256xf32>
    %1047 = arith.truncf %1046 : vector<16x256xf32> to vector<16x256xbf16>
    %c6_832 = arith.constant 6 : index
    %c0_833 = arith.constant 0 : index
    %c0_834 = arith.constant 0 : index
    %1048 = vector.load %arg33[%c6_832, %c0_833, %c0_834] : memref<9x16x16xbf16, #tpu.memory_space<vmem>>, vector<1x16x16xbf16>
    %1049 = vector.shape_cast %1048 : vector<1x16x16xbf16> to vector<16x16xbf16>
    %cst_835 = arith.constant dense<0.000000e+00> : vector<16x256xf32>
    %1050 = tpu.matmul %1049, %1047, %cst_835 {dimension_numbers = #tpu.dot_dimension_numbers<[1], [0], [0], [1], [0, 0, 1, 1], [], []>} : vector<16x16xbf16>, vector<16x256xbf16>, vector<16x256xf32> -> vector<16x256xf32>
    %1051 = arith.addf %1041, %1050 : vector<16x256xf32>
    %c240_i32_836 = arith.constant 240 : i32
    %1052 = tpu.dynamic_rotate %987 by %c240_i32_836 dim 1 : vector<16x256xf32>, i32 -> vector<16x256xf32>
    %c7_837 = arith.constant 7 : index
    %c0_838 = arith.constant 0 : index
    %c0_839 = arith.constant 0 : index
    %1053 = vector.load %arg2[%c7_837, %c0_838, %c0_839] : memref<9x1x256xf32, #tpu.memory_space<vmem>>, vector<1x1x256xf32>
    %1054 = vector.shape_cast %1053 : vector<1x1x256xf32> to vector<1x256xf32>
    %1055 = vector.broadcast %1054 : vector<1x256xf32> to vector<16x256xf32>
    %1056 = arith.mulf %1052, %1055 : vector<16x256xf32>
    %1057 = arith.truncf %1056 : vector<16x256xf32> to vector<16x256xbf16>
    %c7_840 = arith.constant 7 : index
    %c0_841 = arith.constant 0 : index
    %c0_842 = arith.constant 0 : index
    %1058 = vector.load %arg33[%c7_840, %c0_841, %c0_842] : memref<9x16x16xbf16, #tpu.memory_space<vmem>>, vector<1x16x16xbf16>
    %1059 = vector.shape_cast %1058 : vector<1x16x16xbf16> to vector<16x16xbf16>
    %cst_843 = arith.constant dense<0.000000e+00> : vector<16x256xf32>
    %1060 = tpu.matmul %1059, %1057, %cst_843 {dimension_numbers = #tpu.dot_dimension_numbers<[1], [0], [0], [1], [0, 0, 1, 1], [], []>} : vector<16x16xbf16>, vector<16x256xbf16>, vector<16x256xf32> -> vector<16x256xf32>
    %1061 = arith.addf %1051, %1060 : vector<16x256xf32>
    %c239_i32_844 = arith.constant 239 : i32
    %1062 = tpu.dynamic_rotate %987 by %c239_i32_844 dim 1 : vector<16x256xf32>, i32 -> vector<16x256xf32>
    %c8_845 = arith.constant 8 : index
    %c0_846 = arith.constant 0 : index
    %c0_847 = arith.constant 0 : index
    %1063 = vector.load %arg2[%c8_845, %c0_846, %c0_847] : memref<9x1x256xf32, #tpu.memory_space<vmem>>, vector<1x1x256xf32>
    %1064 = vector.shape_cast %1063 : vector<1x1x256xf32> to vector<1x256xf32>
    %1065 = vector.broadcast %1064 : vector<1x256xf32> to vector<16x256xf32>
    %1066 = arith.mulf %1062, %1065 : vector<16x256xf32>
    %1067 = arith.truncf %1066 : vector<16x256xf32> to vector<16x256xbf16>
    %c8_848 = arith.constant 8 : index
    %c0_849 = arith.constant 0 : index
    %c0_850 = arith.constant 0 : index
    %1068 = vector.load %arg33[%c8_848, %c0_849, %c0_850] : memref<9x16x16xbf16, #tpu.memory_space<vmem>>, vector<1x16x16xbf16>
    %1069 = vector.shape_cast %1068 : vector<1x16x16xbf16> to vector<16x16xbf16>
    %cst_851 = arith.constant dense<0.000000e+00> : vector<16x256xf32>
    %1070 = tpu.matmul %1069, %1067, %cst_851 {dimension_numbers = #tpu.dot_dimension_numbers<[1], [0], [0], [1], [0, 0, 1, 1], [], []>} : vector<16x16xbf16>, vector<16x256xbf16>, vector<16x256xf32> -> vector<16x256xf32>
    %1071 = arith.addf %1061, %1070 : vector<16x256xf32>
    %c0_852 = arith.constant 0 : index
    %c0_853 = arith.constant 0 : index
    %1072 = vector.load %arg34[%c0_852, %c0_853] : memref<16x3xf32, #tpu.memory_space<vmem>>, vector<16x3xf32>
    %1073 = vector.extract_strided_slice %1072 {offsets = [0, 0], sizes = [16, 1], strides = [1, 1]} : vector<16x3xf32> to vector<16x1xf32>
    %1074 = vector.broadcast %1073 : vector<16x1xf32> to vector<16x256xf32>
    %1075 = arith.addf %1071, %1074 : vector<16x256xf32>
    %cst_854 = arith.constant 0.000000e+00 : f32
    %1076 = vector.broadcast %cst_854 : f32 to vector<16x256xf32>
    %1077 = arith.maximumf %1075, %1076 : vector<16x256xf32>
    %1078 = vector.extract_strided_slice %1072 {offsets = [0, 1], sizes = [16, 1], strides = [1, 1]} : vector<16x3xf32> to vector<16x1xf32>
    %1079 = vector.broadcast %1078 : vector<16x1xf32> to vector<16x256xf32>
    %1080 = arith.mulf %1077, %1079 : vector<16x256xf32>
    %1081 = vector.extract_strided_slice %1072 {offsets = [0, 2], sizes = [16, 1], strides = [1, 1]} : vector<16x3xf32> to vector<16x1xf32>
    %1082 = vector.broadcast %1081 : vector<16x1xf32> to vector<16x256xf32>
    %1083 = arith.addf %1080, %1082 : vector<16x256xf32>
    %c0_855 = arith.constant 0 : index
    %c0_856 = arith.constant 0 : index
    %1084 = vector.load %arg35[%c0_855, %c0_856] : memref<4x16xbf16, #tpu.memory_space<vmem>>, vector<4x16xbf16>
    %1085 = arith.truncf %1083 : vector<16x256xf32> to vector<16x256xbf16>
    %cst_857 = arith.constant dense<0.000000e+00> : vector<4x256xf32>
    %1086 = tpu.matmul %1084, %1085, %cst_857 {dimension_numbers = #tpu.dot_dimension_numbers<[1], [0], [0], [1], [0, 0, 1, 1], [], []>} : vector<4x16xbf16>, vector<16x256xbf16>, vector<4x256xf32> -> vector<4x256xf32>
    %c0_858 = arith.constant 0 : index
    %c0_859 = arith.constant 0 : index
    %1087 = vector.load %arg36[%c0_858, %c0_859] : memref<4x1xf32, #tpu.memory_space<vmem>>, vector<4x1xf32>
    %1088 = vector.broadcast %1087 : vector<4x1xf32> to vector<4x256xf32>
    %1089 = arith.addf %1086, %1088 : vector<4x256xf32>
    %c0_860 = arith.constant 0 : index
    %c0_861 = arith.constant 0 : index
    %c0_862 = arith.constant 0 : index
    %1090 = vector.load %arg37[%c0_860, %c0_861, %c0_862] : memref<1x4x256xf32, #tpu.memory_space<vmem>>, vector<1x4x256xf32>
    %1091 = vector.shape_cast %1090 : vector<1x4x256xf32> to vector<4x256xf32>
    %1092 = vector.shape_cast %1089 : vector<4x256xf32> to vector<1x4x256xf32>
    tpu.vector_store %arg37[%c0_860, %c0_861, %c0_862], %1092 {strides = array<i32>} : memref<1x4x256xf32, #tpu.memory_space<vmem>>, vector<1x4x256xf32>,
    return
  }
  func.func @transform_0(%arg0: i32) -> (i32, i32, i32) {
    %c0_i32 = arith.constant 0 : i32
    %c0_i32_0 = arith.constant 0 : i32
    %c0_i32_1 = arith.constant 0 : i32
    return %arg0, %c0_i32, %c0_i32_0 : i32, i32, i32
  }
  func.func @transform_1(%arg0: i32) -> (i32, i32, i32) {
    %c0_i32 = arith.constant 0 : i32
    %c0_i32_0 = arith.constant 0 : i32
    %c0_i32_1 = arith.constant 0 : i32
    %c0_i32_2 = arith.constant 0 : i32
    return %c0_i32, %c0_i32_0, %c0_i32_1 : i32, i32, i32
  }
  func.func @transform_2(%arg0: i32) -> (i32, i32, i32) {
    %c0_i32 = arith.constant 0 : i32
    %c0_i32_0 = arith.constant 0 : i32
    %c0_i32_1 = arith.constant 0 : i32
    %c0_i32_2 = arith.constant 0 : i32
    return %c0_i32, %c0_i32_0, %c0_i32_1 : i32, i32, i32
  }
  func.func @transform_3(%arg0: i32) -> (i32, i32, i32) {
    %c0_i32 = arith.constant 0 : i32
    %c0_i32_0 = arith.constant 0 : i32
    %c0_i32_1 = arith.constant 0 : i32
    %c0_i32_2 = arith.constant 0 : i32
    return %c0_i32, %c0_i32_0, %c0_i32_1 : i32, i32, i32
  }
  func.func @transform_4(%arg0: i32) -> (i32, i32) {
    %c0_i32 = arith.constant 0 : i32
    %c0_i32_0 = arith.constant 0 : i32
    %c0_i32_1 = arith.constant 0 : i32
    return %c0_i32, %c0_i32_0 : i32, i32
  }
  func.func @transform_5(%arg0: i32) -> (i32, i32) {
    %c0_i32 = arith.constant 0 : i32
    %c0_i32_0 = arith.constant 0 : i32
    %c0_i32_1 = arith.constant 0 : i32
    return %c0_i32, %c0_i32_0 : i32, i32
  }
  func.func @transform_6(%arg0: i32) -> (i32, i32, i32) {
    %c0_i32 = arith.constant 0 : i32
    %c0_i32_0 = arith.constant 0 : i32
    %c0_i32_1 = arith.constant 0 : i32
    %c0_i32_2 = arith.constant 0 : i32
    return %c0_i32, %c0_i32_0, %c0_i32_1 : i32, i32, i32
  }
  func.func @transform_7(%arg0: i32) -> (i32, i32, i32) {
    %c0_i32 = arith.constant 0 : i32
    %c0_i32_0 = arith.constant 0 : i32
    %c0_i32_1 = arith.constant 0 : i32
    %c0_i32_2 = arith.constant 0 : i32
    return %c0_i32, %c0_i32_0, %c0_i32_1 : i32, i32, i32
  }
  func.func @transform_8(%arg0: i32) -> (i32, i32) {
    %c0_i32 = arith.constant 0 : i32
    %c0_i32_0 = arith.constant 0 : i32
    %c0_i32_1 = arith.constant 0 : i32
    return %c0_i32, %c0_i32_0 : i32, i32
  }
  func.func @transform_9(%arg0: i32) -> (i32, i32) {
    %c0_i32 = arith.constant 0 : i32
    %c0_i32_0 = arith.constant 0 : i32
    %c0_i32_1 = arith.constant 0 : i32
    return %c0_i32, %c0_i32_0 : i32, i32
  }
  func.func @transform_10(%arg0: i32) -> (i32, i32, i32) {
    %c0_i32 = arith.constant 0 : i32
    %c0_i32_0 = arith.constant 0 : i32
    %c0_i32_1 = arith.constant 0 : i32
    %c0_i32_2 = arith.constant 0 : i32
    return %c0_i32, %c0_i32_0, %c0_i32_1 : i32, i32, i32
  }
  func.func @transform_11(%arg0: i32) -> (i32, i32) {
    %c0_i32 = arith.constant 0 : i32
    %c0_i32_0 = arith.constant 0 : i32
    %c0_i32_1 = arith.constant 0 : i32
    return %c0_i32, %c0_i32_0 : i32, i32
  }
  func.func @transform_12(%arg0: i32) -> (i32, i32, i32) {
    %c0_i32 = arith.constant 0 : i32
    %c0_i32_0 = arith.constant 0 : i32
    %c0_i32_1 = arith.constant 0 : i32
    %c0_i32_2 = arith.constant 0 : i32
    return %c0_i32, %c0_i32_0, %c0_i32_1 : i32, i32, i32
  }
  func.func @transform_13(%arg0: i32) -> (i32, i32) {
    %c0_i32 = arith.constant 0 : i32
    %c0_i32_0 = arith.constant 0 : i32
    %c0_i32_1 = arith.constant 0 : i32
    return %c0_i32, %c0_i32_0 : i32, i32
  }
  func.func @transform_14(%arg0: i32) -> (i32, i32, i32) {
    %c0_i32 = arith.constant 0 : i32
    %c0_i32_0 = arith.constant 0 : i32
    %c0_i32_1 = arith.constant 0 : i32
    %c0_i32_2 = arith.constant 0 : i32
    return %c0_i32, %c0_i32_0, %c0_i32_1 : i32, i32, i32
  }
  func.func @transform_15(%arg0: i32) -> (i32, i32) {
    %c0_i32 = arith.constant 0 : i32
    %c0_i32_0 = arith.constant 0 : i32
    %c0_i32_1 = arith.constant 0 : i32
    return %c0_i32, %c0_i32_0 : i32, i32
  }
  func.func @transform_16(%arg0: i32) -> (i32, i32, i32) {
    %c0_i32 = arith.constant 0 : i32
    %c0_i32_0 = arith.constant 0 : i32
    %c0_i32_1 = arith.constant 0 : i32
    %c0_i32_2 = arith.constant 0 : i32
    return %c0_i32, %c0_i32_0, %c0_i32_1 : i32, i32, i32
  }
  func.func @transform_17(%arg0: i32) -> (i32, i32) {
    %c0_i32 = arith.constant 0 : i32
    %c0_i32_0 = arith.constant 0 : i32
    %c0_i32_1 = arith.constant 0 : i32
    return %c0_i32, %c0_i32_0 : i32, i32
  }
  func.func @transform_18(%arg0: i32) -> (i32, i32, i32) {
    %c0_i32 = arith.constant 0 : i32
    %c0_i32_0 = arith.constant 0 : i32
    %c0_i32_1 = arith.constant 0 : i32
    %c0_i32_2 = arith.constant 0 : i32
    return %c0_i32, %c0_i32_0, %c0_i32_1 : i32, i32, i32
  }
  func.func @transform_19(%arg0: i32) -> (i32, i32) {
    %c0_i32 = arith.constant 0 : i32
    %c0_i32_0 = arith.constant 0 : i32
    %c0_i32_1 = arith.constant 0 : i32
    return %c0_i32, %c0_i32_0 : i32, i32
  }
  func.func @transform_20(%arg0: i32) -> (i32, i32, i32) {
    %c0_i32 = arith.constant 0 : i32
    %c0_i32_0 = arith.constant 0 : i32
    %c0_i32_1 = arith.constant 0 : i32
    %c0_i32_2 = arith.constant 0 : i32
    return %c0_i32, %c0_i32_0, %c0_i32_1 : i32, i32, i32
  }
  func.func @transform_21(%arg0: i32) -> (i32, i32) {
    %c0_i32 = arith.constant 0 : i32
    %c0_i32_0 = arith.constant 0 : i32
    %c0_i32_1 = arith.constant 0 : i32
    return %c0_i32, %c0_i32_0 : i32, i32
  }
  func.func @transform_22(%arg0: i32) -> (i32, i32, i32) {
    %c0_i32 = arith.constant 0 : i32
    %c0_i32_0 = arith.constant 0 : i32
    %c0_i32_1 = arith.constant 0 : i32
    %c0_i32_2 = arith.constant 0 : i32
    return %c0_i32, %c0_i32_0, %c0_i32_1 : i32, i32, i32
  }
  func.func @transform_23(%arg0: i32) -> (i32, i32, i32) {
    %c0_i32 = arith.constant 0 : i32
    %c0_i32_0 = arith.constant 0 : i32
    %c0_i32_1 = arith.constant 0 : i32
    %c0_i32_2 = arith.constant 0 : i32
    return %c0_i32, %c0_i32_0, %c0_i32_1 : i32, i32, i32
  }
  func.func @transform_24(%arg0: i32) -> (i32, i32) {
    %c0_i32 = arith.constant 0 : i32
    %c0_i32_0 = arith.constant 0 : i32
    %c0_i32_1 = arith.constant 0 : i32
    return %c0_i32, %c0_i32_0 : i32, i32
  }
  func.func @transform_25(%arg0: i32) -> (i32, i32, i32) {
    %c0_i32 = arith.constant 0 : i32
    %c0_i32_0 = arith.constant 0 : i32
    %c0_i32_1 = arith.constant 0 : i32
    %c0_i32_2 = arith.constant 0 : i32
    return %c0_i32, %c0_i32_0, %c0_i32_1 : i32, i32, i32
  }
  func.func @transform_26(%arg0: i32) -> (i32, i32) {
    %c0_i32 = arith.constant 0 : i32
    %c0_i32_0 = arith.constant 0 : i32
    %c0_i32_1 = arith.constant 0 : i32
    return %c0_i32, %c0_i32_0 : i32, i32
  }
  func.func @transform_27(%arg0: i32) -> (i32, i32, i32) {
    %c0_i32 = arith.constant 0 : i32
    %c0_i32_0 = arith.constant 0 : i32
    %c0_i32_1 = arith.constant 0 : i32
    %c0_i32_2 = arith.constant 0 : i32
    return %c0_i32, %c0_i32_0, %c0_i32_1 : i32, i32, i32
  }
  func.func @transform_28(%arg0: i32) -> (i32, i32) {
    %c0_i32 = arith.constant 0 : i32
    %c0_i32_0 = arith.constant 0 : i32
    %c0_i32_1 = arith.constant 0 : i32
    return %c0_i32, %c0_i32_0 : i32, i32
  }
  func.func @transform_29(%arg0: i32) -> (i32, i32, i32) {
    %c0_i32 = arith.constant 0 : i32
    %c0_i32_0 = arith.constant 0 : i32
    %c0_i32_1 = arith.constant 0 : i32
    %c0_i32_2 = arith.constant 0 : i32
    return %c0_i32, %c0_i32_0, %c0_i32_1 : i32, i32, i32
  }
  func.func @transform_30(%arg0: i32) -> (i32, i32, i32) {
    %c0_i32 = arith.constant 0 : i32
    %c0_i32_0 = arith.constant 0 : i32
    %c0_i32_1 = arith.constant 0 : i32
    %c0_i32_2 = arith.constant 0 : i32
    return %c0_i32, %c0_i32_0, %c0_i32_1 : i32, i32, i32
  }
  func.func @transform_31(%arg0: i32) -> (i32, i32) {
    %c0_i32 = arith.constant 0 : i32
    %c0_i32_0 = arith.constant 0 : i32
    %c0_i32_1 = arith.constant 0 : i32
    return %c0_i32, %c0_i32_0 : i32, i32
  }
  func.func @transform_32(%arg0: i32) -> (i32, i32, i32) {
    %c0_i32 = arith.constant 0 : i32
    %c0_i32_0 = arith.constant 0 : i32
    %c0_i32_1 = arith.constant 0 : i32
    %c0_i32_2 = arith.constant 0 : i32
    return %c0_i32, %c0_i32_0, %c0_i32_1 : i32, i32, i32
  }
  func.func @transform_33(%arg0: i32) -> (i32, i32) {
    %c0_i32 = arith.constant 0 : i32
    %c0_i32_0 = arith.constant 0 : i32
    %c0_i32_1 = arith.constant 0 : i32
    return %c0_i32, %c0_i32_0 : i32, i32
  }
  func.func @transform_34(%arg0: i32) -> (i32, i32) {
    %c0_i32 = arith.constant 0 : i32
    %c0_i32_0 = arith.constant 0 : i32
    %c0_i32_1 = arith.constant 0 : i32
    return %c0_i32, %c0_i32_0 : i32, i32
  }
  func.func @transform_35(%arg0: i32) -> (i32, i32) {
    %c0_i32 = arith.constant 0 : i32
    %c0_i32_0 = arith.constant 0 : i32
    %c0_i32_1 = arith.constant 0 : i32
    return %c0_i32, %c0_i32_0 : i32, i32
  }
  func.func @transform_36(%arg0: i32) -> (i32, i32, i32) {
    %c0_i32 = arith.constant 0 : i32
    %c0_i32_0 = arith.constant 0 : i32
    %c0_i32_1 = arith.constant 0 : i32
    return %arg0, %c0_i32, %c0_i32_0 : i32, i32, i32
  }
}

</mosaic_0001>

<bundles_post_ra>
// kernel: tpu_custom_call.1
= control target key start
LH: loop header
LB: loop body
LE: loop exit
PB: predicated region body
PF: predicated region fallthrough
CT: control target
= control target key end

     0   :  { %s19617_s6 = smov 1   ;;  %s19618_s10 = smov 2   ;;  %s22722_s0 = inlined_call_operand.smem [shape: u32[37], index: -1, kind: input, shape index: {}] }
   0x1   :  { %s19687_s5 = sld [smem:[%s22722_s0]]   ;;  %s19619_s14 = smov 3  }
   0x2   :  { %s19692_s9 = sld [smem:[%s22722_s0 + %s19617_s6]]   ;;  %s19620_s18 = smov 4  }
   0x3   :  { %s19697_s13 = sld [smem:[%s22722_s0 + %s19618_s10]]   ;;  %s19621_s22 = smov 5  }
   0x4   :  { %s19702_s17 = sld [smem:[%s22722_s0 + %s19619_s14]]   ;;  %s19622_s26 = smov 6  }
   0x5   :  { %s19707_s21 = sld [smem:[%s22722_s0 + %s19620_s18]]   ;;  %s19623_s30 = smov 7  }
   0x6   :  { %s19712_s25 = sld [smem:[%s22722_s0 + %s19621_s22]]   ;;  %s19624_s4 = smov 8  }
   0x7   :  { %22841 = sst [smem:[#allocation23_spill]] %s19687_s5  ;;  %s19625_s10 = smov 9  }
   0x8   :  { %22842 = sst [smem:[#allocation24_spill]] %s19692_s9  ;;  %s19626_s15 = smov 10  }
   0x9   :  { %22843 = sst [smem:[#allocation25_spill]] %s19697_s13  ;;  %s19627_s20 = smov 11  }
   0xa   :  { %22844 = sst [smem:[#allocation26_spill]] %s19702_s17  ;;  %s19629_s1 = smov 13  }
   0xb   :  { %s19717_s29 = sld [smem:[%s22722_s0 + %s19622_s26]]   ;;  %s19628_s26 = smov 12  }
   0xc   :  { %22845 = sst [smem:[#allocation27_spill]] %s19712_s25  ;;  %s19630_s7 = smov 14  }
   0xd   :  { %s19722_s3 = sld [smem:[%s22722_s0 + %s19623_s30]]   ;;  %s19632_s22 = smov 16  }
   0xe   :  { %s19727_s8 = sld [smem:[%s22722_s0 + %s19624_s4]]   ;;  %s19633_s28 = smov 17  }
   0xf   :  { %s19732_s14 = sld [smem:[%s22722_s0 + %s19625_s10]]  }
  0x10   :  { %s19737_s19 = sld [smem:[%s22722_s0 + %s19626_s15]]   ;;  %s19631_s15 = smov 15  }
  0x11   :  { %22846 = sst [smem:[#allocation28_spill]] %s19717_s29 }
  0x12   :  { %s19742_s24 = sld [smem:[%s22722_s0 + %s19627_s20]]  }
  0x13   :  { %22847 = sst [smem:[#allocation29_spill]] %s19722_s3 }
  0x14   :  { %22848 = sst [smem:[#allocation30_spill]] %s19727_s8 }
  0x15   :  { %22849 = sst [smem:[#allocation31_spill]] %s19732_s14 }
  0x16   :  { %s19747_s30 = sld [smem:[%s22722_s0 + %s19628_s26]]  }
  0x17   :  { %s19752_s6 = sld [smem:[%s22722_s0 + %s19629_s1]]  }
  0x18   :  { %s19757_s12 = sld [smem:[%s22722_s0 + %s19630_s7]]   ;;  %s19634_s7 = smov 18  }
  0x19   :  { %s19762_s20 = sld [smem:[%s22722_s0 + %s19631_s15]]   ;;  %s19635_s15 = smov 19  }
  0x1a   :  { %s19767_s27 = sld [smem:[%s22722_s0 + %s19632_s22]]   ;;  %s19636_s22 = smov 20  }
  0x1b   :  { %s19772_s4 = sld [smem:[%s22722_s0 + %s19633_s28]]   ;;  %s19637_s28 = smov 21  }
  0x1c   :  { %22850 = sst [smem:[#allocation32_spill]] %s19747_s30 }
  0x1d   :  { %22851 = sst [smem:[#allocation33_spill]] %s19752_s6 }
  0x1e   :  { %22852 = sst [smem:[#allocation34_spill]] %s19757_s12 }
  0x1f   :  { %22853 = sst [smem:[#allocation35_spill]] %s19762_s20 }
  0x20   :  { %22854 = sst [smem:[#allocation36_spill]] %s19767_s27 }
  0x21   :  { %22855 = sst [smem:[#allocation37_spill]] %s19772_s4 }
  0x22   :  { %s19777_s3 = sld [smem:[%s22722_s0 + %s19634_s7]]   ;;  %s19638_s7 = smov 22  }
  0x23   :  { %s19782_s25 = sld [smem:[%s22722_s0 + %s19635_s15]]   ;;  %s19639_s15 = smov 23  }
  0x24   :  { %s19787_s27 = sld [smem:[%s22722_s0 + %s19636_s22]]   ;;  %s19640_s22 = smov 24  }
  0x25   :  { %s19792_s12 = sld [smem:[%s22722_s0 + %s19637_s28]]   ;;  %s19641_s28 = smov 25  }
  0x26   :  { %s19802_s30 = sld [smem:[%s22722_s0 + %s19639_s15]]   ;;  %s19643_s15 = smov 27  }
  0x27   :  { %s19807_s13 = sld [smem:[%s22722_s0 + %s19640_s22]]   ;;  %s19644_s22 = smov 28  }
  0x28   :  { %22856 = sst [smem:[#allocation38_spill]] %s19777_s3 }
  0x29   :  { %22857 = sst [smem:[#allocation39_spill]] %s19782_s25 }
  0x2a   :  { %s19797_s3 = sld [smem:[%s22722_s0 + %s19638_s7]]   ;;  %s19642_s7 = smov 26  }
  0x2b   :  { %22858 = sst [smem:[#allocation40_spill]] %s19792_s12 }
  0x2c   :  { %22860 = sst [smem:[#allocation42_spill]] %s19802_s30 }
  0x2d   :  { %22861 = sst [smem:[#allocation43_spill]] %s19807_s13 }
  0x2e   :  { %s19812_s12 = sld [smem:[%s22722_s0 + %s19641_s28]]   ;;  %s19645_s28 = smov 29  }
  0x2f   :  { %s19822_s30 = sld [smem:[%s22722_s0 + %s19643_s15]]   ;;  %s19647_s15 = smov 31  }
  0x30   :  { %22859 = sst [smem:[#allocation41_spill]] %s19797_s3 }
  0x31   :  { %s19817_s3 = sld [smem:[%s22722_s0 + %s19642_s7]]   ;;  %s19646_s7 = smov 30  }
  0x32   :  { %s19827_s13 = sld [smem:[%s22722_s0 + %s19644_s22]]   ;;  %s19648_s22 = smov 32  }
  0x33   :  { %s19842_s25 = sld [smem:[%s22722_s0 + %s19647_s15]]   ;;  %s19651_s15 = smov 35  }
  0x34   :  { %22862 = sst [smem:[#allocation44_spill]] %s19812_s12 }
  0x35   :  { %s19832_s12 = sld [smem:[%s22722_s0 + %s19645_s28]]   ;;  %s19649_s28 = smov 33  }
  0x37   :  { %22863 = sst [smem:[#allocation45_spill]] %s19817_s3 }
  0x38   :  { %22864 = sst [smem:[#allocation46_spill]] %s19827_s13 }
  0x39   :  { %s19837_s3 = sld [smem:[%s22722_s0 + %s19646_s7]]   ;;  %s19650_s7 = smov 34  }
  0x3a   :  { %22867 = sst [smem:[#allocation49_spill]] %s19842_s25 }
  0x3b   :  { %22865 = sst [smem:[#allocation47_spill]] %s19832_s12 }
  0x3c   :  { %s19847_s13 = sld [smem:[%s22722_s0 + %s19648_s22]]   ;;  %s19652_s22 = smov 36  }
  0x3d   :  { %s19852_s12 = sld [smem:[%s22722_s0 + %s19649_s28]]  }
  0x3e   :  { %s19857_s4 = sld [smem:[%s22722_s0 + %s19650_s7]]  }
  0x3f   :  { %22866 = sst [smem:[#allocation48_spill]] %s19837_s3 }
  0x40   :  { %s19862_s25 = sld [smem:[%s22722_s0 + %s19651_s15]]  }
  0x41   :  { %s19867_s20 = sld [smem:[%s22722_s0 + %s19652_s22]]  }
  0x42   :  { %22868 = sst [smem:[#allocation50_spill]] %s19847_s13 }
  0x43   :  { %22869 = sst [smem:[#allocation51_spill]] %s19852_s12 }
  0x44   :  { %22870 = sst [smem:[#allocation52_spill]] %s19857_s4 }
  0x47   :  { %22871 = sst [smem:[#allocation53_spill]] %s19867_s20 }
  0x48   :  { %78 = vsyncpa [#allocation3], 0 }
  0x49   :  { %80 = vsyncpa [#allocation3 + $0x1], 0 }
  0x4a   :  { %81 = vsyncpa [#allocation6], 0 }
  0x4b   :  { %82 = vsyncpa [#allocation9], 0 }
  0x4c   :  { %83 = vsyncpa [#allocation12], 0 }
  0x4d   :  { %84 = vsyncpa [#allocation15], 0 }
  0x4e   :  { %85 = vsyncpa [#allocation4], 0 }
  0x4f   :  { %87 = vsyncpa [#allocation4 + $0x1], 0  ;;  %s19869_s28 = smov 0   ;;  %s19871_s1 = smov 0  }
  0x50   :  { %s19873_s2 = smov 0   ;;  %s19875_s7 = smov 0  }
  0x51 LB: > { %s22872_s12 = sld [smem:[#allocation51_spill]]  ;;  %s22873_s6 = sld [smem:[#allocation33_spill]]  ;;  %s19615_s7 = sphi %s19875_s7, %s22994_s7   ;;  %s19611_s2 = sphi %s19873_s2, %s22993_s2   ;;  %s19607_s1 = sphi %s19871_s1, %s22992_s1   ;;  %s19603_s28 = sphi %s19869_s28, %s22991_s28  }
  0x52   : > { %s22874_s5 = sld [smem:[#allocation23_spill]]  ;;  %s22875_s17 = sld [smem:[#allocation26_spill]] }
  0x53   : > { %s22876_s13 = sld [smem:[#allocation50_spill]]  ;;  %s22877_s3 = sld [smem:[#allocation48_spill]] }
  0x54   : > { %s22878_s29 = sld [smem:[#allocation28_spill]]  ;;  %s22879_s9 = sld [smem:[#allocation24_spill]] }
  0x55   : > { %s19653_s0 = smov [#allocation5]   ;;  %s19890_s11 = sadd.s32 4294967295, %s19615_s7  }
  0x56   : > { %s897_s10 = sshll.u32 %s19653_s0, 4  ;;  %p15170_p0 = scmp.ge.s32.totalorder %s19615_s7, 1  ;;  %s19895_s10 = int_to_ptr.vmem [resolvable:$true] %s897_s10 }
  0x57   : > { %p22743_p1 = scmp.eq.s32.totalorder %s19890_s11, 0  ;;  %p885_p2 = scmp.lt.s32.totalorder %s19615_s7, 3 }
  0x58   : > { %s19654_s18 = smov [#allocation8]   ;;  %s19655_s23 = smov [#allocation11]  }
  0x59   : > { %p19897_p3 = pnand %p15170_p0, %p885_p2  ;;  %s932_s22 = sshll.u32 %s19654_s18, 4  ;;  %s19910_s22 = int_to_ptr.vmem [resolvable:$true] %s932_s22 }
  0x5a   : > { %s19912_s26 = sshll.u32 %s19655_s23, 4  ;;  %s19307_s0 = scalar_lea.hbm %s22879_s9, 288  ;;  %s1016_s26 = int_to_ptr.vmem [resolvable:$true] %s19912_s26 }
  0x5b   : > { %s22880_s15 = scalar_select %p19897_p3, 1, 0 }
  0x5c   : > { %p18748_p5 = pneg %p19897_p3  ;;  %p19308_p7 = scmp.ne.s32.totalorder %s22879_s9, %s19307_s0 }
  0x5d   : > { %p19314_p11 = scmp.lt.u32.totalorder %s19307_s0, %s22879_s9 }
  0x5e   : > { %p19906_p6 = pnand %p18748_p5, %p22743_p1 }
  0x60   : > { %p19918_p8 = pneg %p19906_p6 }
  0x62   : > { %p19310_p9 = pnand %p19918_p8, %p19308_p7 }
  0x64   : > { %p19311_p10 = pneg %p19310_p9 }
  0x66   : > { %p19316_p12 = pnand %p19314_p11, %p19311_p10 }
  0x68   : > { %19319 = shalt.err (!%p19316_p12)
}
  0x69   : > { %s19320_s18 = scalar_lea.vmem %s19895_s10, 288  ;;  %p19328_p5 = scmp.lt.s32.totalorder %s19895_s10, %s19895_s10 }
  0x6a   : > { %p19321_p13 = scmp.ne.s32.totalorder %s19895_s10, %s19320_s18  ;;  %p19329_p4 = scmp.lt.s32.totalorder %s19320_s18, %s19320_s18 }
  0x6c   : > { %p19323_p0 = pnand %p19321_p13, %p19918_p8  ;;  %p19330_p1 = por %p19329_p4, %p19328_p5 }
  0x6e   : > { %p19324_p2 = pneg %p19323_p0 }
  0x70   : > { %p19331_p3 = pnand %p19330_p1, %p19324_p2 }
  0x72   : > { %19334 = shalt.err (!%p19331_p3)
}
  0x73   : > { %s19656_s23 = smov 32   ;;  %s19657_s0 = smov 2  }
  0x74   : > { %18751 = dma.hbm_to_vmem [thread:$0]  (!%p19906_p6), %s22879_s9, 288, %s19895_s10, [#allocation6], %s19656_s23, %s19656_s23, %s19657_s0  }
  0x75   : > { %s19335_s4 = scalar_lea.hbm %s22878_s29, 512 }
  0x76   : > { %p19336_p7 = scmp.ne.s32.totalorder %s22878_s29, %s19335_s4  ;;  %p19342_p11 = scmp.lt.u32.totalorder %s19335_s4, %s22878_s29 }
  0x78   : > { %p19338_p9 = pnand %p19336_p7, %p19918_p8 }
  0x7a   : > { %p19339_p10 = pneg %p19338_p9 }
  0x7c   : > { %p19344_p4 = pnand %p19342_p11, %p19339_p10 }
  0x7e   : > { %19347 = shalt.err (!%p19344_p4)
}
  0x7f   : > { %s19348_s18 = scalar_lea.vmem %s19910_s22, 512  ;;  %p19356_p13 = scmp.lt.s32.totalorder %s19910_s22, %s19910_s22 }
  0x80   : > { %p19349_p1 = scmp.ne.s32.totalorder %s19910_s22, %s19348_s18  ;;  %p19357_p0 = scmp.lt.s32.totalorder %s19348_s18, %s19348_s18 }
  0x82   : > { %p19351_p3 = pnand %p19349_p1, %p19918_p8  ;;  %p19358_p2 = por %p19357_p0, %p19356_p13 }
  0x84   : > { %p19352_p12 = pneg %p19351_p3 }
  0x86   : > { %p19359_p5 = pnand %p19358_p2, %p19352_p12 }
  0x88   : > { %19362 = shalt.err (!%p19359_p5)
}
  0x89   : > { %s19658_s10 = smov 64   ;;  %s19659_s4 = smov 4  }
  0x8a   : > { %18757 = dma.hbm_to_vmem [thread:$0]  (!%p19906_p6), %s22878_s29, 512, %s19910_s22, [#allocation9], %s19658_s10, %s19658_s10, %s19659_s4  }
  0x8b   : > { %s19363_s23 = scalar_lea.hbm %s19822_s30, 512 }
  0x8c   : > { %p19364_p7 = scmp.ne.s32.totalorder %s19822_s30, %s19363_s23  ;;  %p19370_p11 = scmp.lt.u32.totalorder %s19363_s23, %s19822_s30 }
  0x8e   : > { %p19366_p9 = pnand %p19364_p7, %p19918_p8 }
  0x90   : > { %p19367_p10 = pneg %p19366_p9 }
  0x92   : > { %p19372_p4 = pnand %p19370_p11, %p19367_p10 }
  0x94   : > { %19375 = shalt.err (!%p19372_p4)
}
  0x95   : > { %s19376_s0 = scalar_lea.vmem %s1016_s26, 512  ;;  %p19384_p13 = scmp.lt.s32.totalorder %s1016_s26, %s1016_s26 }
  0x96   : > { %p19377_p1 = scmp.ne.s32.totalorder %s1016_s26, %s19376_s0  ;;  %p19385_p0 = scmp.lt.s32.totalorder %s19376_s0, %s19376_s0 }
  0x98   : > { %p19379_p3 = pnand %p19377_p1, %p19918_p8  ;;  %p19386_p2 = por %p19385_p0, %p19384_p13 }
  0x9a   : > { %p19380_p12 = pneg %p19379_p3 }
  0x9c   : > { %p19387_p5 = pnand %p19386_p2, %p19380_p12 }
  0x9e   : > { %19390 = shalt.err (!%p19387_p5)
}
  0x9f   : > { %18763 = dma.hbm_to_vmem [thread:$0]  (!%p19906_p6), %s19822_s30, 512, %s1016_s26, [#allocation12], %s19658_s10, %s19658_s10, %s19659_s4  }
  0xa0   : > { %s19660_s22 = smov [#allocation7]   ;;  %s19661_s23 = smov [#allocation10]  }
  0xa1   : > { %s913_s18 = sshll.u32 %s19660_s22, 4  ;;  %s984_s9 = sshll.u32 %s19661_s23, 4  ;;  %s914_s18 = int_to_ptr.vmem [resolvable:$true] %s913_s18  ;;  %s985_s9 = int_to_ptr.vmem [resolvable:$true] %s984_s9 }
  0xa2   : > { %s19391_s0 = scalar_lea.hbm %s22875_s17, 1152 }
  0xa3   : > { %p19392_p7 = scmp.ne.s32.totalorder %s22875_s17, %s19391_s0  ;;  %p19398_p11 = scmp.lt.u32.totalorder %s19391_s0, %s22875_s17 }
  0xa5   : > { %p19394_p9 = pnand %p19392_p7, %p19918_p8 }
  0xa7   : > { %p19395_p10 = pneg %p19394_p9 }
  0xa9   : > { %p19400_p4 = pnand %p19398_p11, %p19395_p10 }
  0xab   : > { %19403 = shalt.err (!%p19400_p4)
}
  0xac   : > { %s19404_s29 = scalar_lea.vmem %s914_s18, 1152  ;;  %p19412_p13 = scmp.lt.s32.totalorder %s914_s18, %s914_s18 }
  0xad   : > { %p19405_p1 = scmp.ne.s32.totalorder %s914_s18, %s19404_s29  ;;  %p19413_p0 = scmp.lt.s32.totalorder %s19404_s29, %s19404_s29 }
  0xaf   : > { %p19407_p3 = pnand %p19405_p1, %p19918_p8  ;;  %p19414_p2 = por %p19413_p0, %p19412_p13 }
  0xb1   : > { %p19408_p12 = pneg %p19407_p3 }
  0xb3   : > { %p19415_p5 = pnand %p19414_p2, %p19408_p12 }
  0xb5   : > { %19418 = shalt.err (!%p19415_p5)
}
  0xb6   : > { %18754 = dma.hbm_to_vmem [thread:$0]  (!%p19906_p6), %s22875_s17, 1152, %s914_s18, [#allocation6], %s19658_s10, %s19658_s10, %s19659_s4  }
  0xb7   : > { %s19419_s26 = scalar_lea.hbm %s19787_s27, 1024 }
  0xb8   : > { %p19420_p7 = scmp.ne.s32.totalorder %s19787_s27, %s19419_s26  ;;  %p19426_p11 = scmp.lt.u32.totalorder %s19419_s26, %s19787_s27 }
  0xba   : > { %p19422_p9 = pnand %p19420_p7, %p19918_p8 }
  0xbc   : > { %p19423_p10 = pneg %p19422_p9 }
  0xbe   : > { %p19428_p4 = pnand %p19426_p11, %p19423_p10 }
  0xc0   : > { %19431 = shalt.err (!%p19428_p4)
}
  0xc1   : > { %s19432_s29 = scalar_lea.vmem %s985_s9, 1024  ;;  %p19440_p13 = scmp.lt.s32.totalorder %s985_s9, %s985_s9 }
  0xc2   : > { %p19433_p1 = scmp.ne.s32.totalorder %s985_s9, %s19432_s29  ;;  %p19441_p0 = scmp.lt.s32.totalorder %s19432_s29, %s19432_s29 }
  0xc4   : > { %p19435_p3 = pnand %p19433_p1, %p19918_p8  ;;  %p19442_p2 = por %p19441_p0, %p19440_p13 }
  0xc6   : > { %p19436_p12 = pneg %p19435_p3 }
  0xc8   : > { %p19443_p5 = pnand %p19442_p2, %p19436_p12 }
  0xca   : > { %19446 = shalt.err (!%p19443_p5)
}
  0xcb   : > { %18760 = dma.hbm_to_vmem [thread:$0]  (!%p19906_p6), %s19787_s27, 1024, %s985_s9, [#allocation9], %s19658_s10, %s19658_s10, %s19659_s4  }
  0xcc   : > { %s19662_s22 = smov [#allocation13]   ;;  %s19663_s23 = smov [#allocation14]  }
  0xcd   : > { %s1034_s18 = sshll.u32 %s19662_s22, 4  ;;  %s1050_s0 = sshll.u32 %s19663_s23, 4  ;;  %s1035_s18 = int_to_ptr.vmem [resolvable:$true] %s1034_s18  ;;  %s1051_s0 = int_to_ptr.vmem [resolvable:$true] %s1050_s0 }
  0xce   : > { %s19447_s26 = scalar_lea.hbm %s22877_s3, 1152 }
  0xcf   : > { %p19448_p7 = scmp.ne.s32.totalorder %s22877_s3, %s19447_s26  ;;  %p19454_p11 = scmp.lt.u32.totalorder %s19447_s26, %s22877_s3 }
  0xd1   : > { %p19450_p9 = pnand %p19448_p7, %p19918_p8 }
  0xd3   : > { %p19451_p10 = pneg %p19450_p9 }
  0xd5   : > { %p19456_p4 = pnand %p19454_p11, %p19451_p10 }
  0xd7   : > { %19459 = shalt.err (!%p19456_p4)
}
  0xd8   : > { %s19460_s29 = scalar_lea.vmem %s1035_s18, 1152  ;;  %p19468_p13 = scmp.lt.s32.totalorder %s1035_s18, %s1035_s18 }
  0xd9   : > { %p19461_p1 = scmp.ne.s32.totalorder %s1035_s18, %s19460_s29  ;;  %p19469_p0 = scmp.lt.s32.totalorder %s19460_s29, %s19460_s29 }
  0xdb   : > { %p19463_p3 = pnand %p19461_p1, %p19918_p8  ;;  %p19470_p2 = por %p19469_p0, %p19468_p13 }
  0xdd   : > { %p19464_p12 = pneg %p19463_p3 }
  0xdf   : > { %p19471_p5 = pnand %p19470_p2, %p19464_p12 }
  0xe1   : > { %19474 = shalt.err (!%p19471_p5)
}
  0xe2   : > { %18766 = dma.hbm_to_vmem [thread:$0]  (!%p19906_p6), %s22877_s3, 1152, %s1035_s18, [#allocation12], %s19658_s10, %s19658_s10, %s19659_s4  }
  0xe3   : > { %s19475_s9 = scalar_lea.hbm %s22876_s13, 1152 }
  0xe4   : > { %p19476_p7 = scmp.ne.s32.totalorder %s22876_s13, %s19475_s9  ;;  %p19482_p11 = scmp.lt.u32.totalorder %s19475_s9, %s22876_s13 }
  0xe6   : > { %p19478_p9 = pnand %p19476_p7, %p19918_p8 }
  0xe8   : > { %p19479_p10 = pneg %p19478_p9 }
  0xea   : > { %p19484_p4 = pnand %p19482_p11, %p19479_p10 }
  0xec   : > { %19487 = shalt.err (!%p19484_p4)
}
  0xed   : > { %s19488_s22 = scalar_lea.vmem %s1051_s0, 1152  ;;  %p19496_p13 = scmp.lt.s32.totalorder %s1051_s0, %s1051_s0 }
  0xee   : > { %p19489_p1 = scmp.ne.s32.totalorder %s1051_s0, %s19488_s22  ;;  %p19497_p0 = scmp.lt.s32.totalorder %s19488_s22, %s19488_s22 }
  0xf0   : > { %p19491_p3 = pnand %p19489_p1, %p19918_p8  ;;  %p19498_p2 = por %p19497_p0, %p19496_p13 }
  0xf2   : > { %p19492_p12 = pneg %p19491_p3 }
  0xf4   : > { %p19499_p5 = pnand %p19498_p2, %p19492_p12 }
  0xf6   : > { %19502 = shalt.err (!%p19499_p5)
}
  0xf7   : > { %18769 = dma.hbm_to_vmem [thread:$0]  (!%p19906_p6), %s22876_s13, 1152, %s1051_s0, [#allocation15], %s19658_s10, %s19658_s10, %s19659_s4  }
  0xf8   : > { %s15169_s20 = sadd.s32 4294967294, %s19615_s7   ;;  %s20021_s16 = sadd.s32 1, %s19615_s7  }
  0xf9   : > { %s100_s18 = sadd.s32 1, %s19611_s2  ;;  %s97_s23 = ssub.s32 %s19615_s7, %s20021_s16 }
  0xfa   : > { %p107_p8 = scmp.ne.s32.totalorder %s19611_s2, %s19607_s1  ;;  %p98_p7 = scmp.eq.s32.totalorder %s97_s23, 0 }
  0xfb   : > { %p108_p9 = scmp.eq.s32.totalorder %s19615_s7, 0  ;;  %p113_p10 = scmp.ne.s32.totalorder %s19607_s1, %s19603_s28 }
  0xfc   : > { %p872_p11 = scmp.eq.s32.totalorder %s19890_s11, 1  ;;  %p22883_p1 = scmp.eq.s32.totalorder %s19890_s11, 0 }
  0xfd   : > { %s20033_s26 = scalar_select %p98_p7, %s19611_s2, %s100_s18  }
  0xfe   : > { %p109_p4 = por %p108_p9, %p107_p8  ;;  %p20037_p3 = por %p22883_p1, %p113_p10 }
  0xff   : > { %p20041_p6 = por %p872_p11, %p107_p8  ;;  %p878_p12 = scmp.eq.s32.totalorder %s15169_s20, 1 }
 0x100   : > { %s22884_s10 = scalar_select %p20037_p3, 1, 0 }
 0x101   : > { %s22885_s4 = scalar_select %p20041_p6, 1, 0 }
 0x102   : > { %p18785_p13 = scmp.lt.s32.totalorder %s19615_s7, 2  ;;  %s1073_s0 = sand.u32 1, %s19611_s2  }
 0x103   : > { %p20047_p0 = por %p878_p12, %p113_p10  ;;  %s15179_s9 = sshll.u32 %s1073_s0, 3 }
 0x104   : > { %s16261_s22 = sshll.u32 %s19615_s7, 7  ;;  %s1077_s23 = scalar_lea.vmem [#allocation2], %s15179_s9 }
 0x105   : > { %s22886_s29 = scalar_select %p20047_p0, 1, 0 }
 0x106   : > { %s20053_s18 = scalar_lea.hbm %s22874_s5, %s16261_s22  ;;  %s1085_s3 = sshll.u32 %s1077_s23, 4  ;;  %s20059_s3 = int_to_ptr.vmem [resolvable:$true] %s1085_s3 }
 0x107   : > { %p20055_p2 = pnand %p18785_p13, %p109_p4  ;;  %s1074_s13 = scalar_lea.sflag [#allocation3], %s1073_s0 }
 0x108   : > { %s19503_s17 = scalar_lea.hbm %s20053_s18, 128  ;;  %s19508_s22 = scalar_lea.hbm %s22874_s5, 256 }
 0x109   : > { %p19504_p5 = scmp.ne.s32.totalorder %s20053_s18, %s19503_s17  ;;  %p19505_p8 = pneg %p20055_p2 }
 0x10a   : > { %p19509_p10 = scmp.lt.u32.totalorder %s20053_s18, %s22874_s5  ;;  %p19510_p11 = scmp.lt.u32.totalorder %s19508_s22, %s19503_s17 }
 0x10b   : > { %p19506_p7 = pnand %p19505_p8, %p19504_p5  ;;  %p19512_p1 = scmp.lt.u32.totalorder %s19503_s17, %s20053_s18 }
 0x10c   : > { %p19511_p4 = por %p19510_p11, %p19509_p10 }
 0x10d   : > { %p19507_p9 = pneg %p19506_p7 }
 0x10e   : > { %p19513_p12 = por %p19512_p1, %p19511_p4 }
 0x110   : > { %p19514_p13 = pnand %p19513_p12, %p19507_p9 }
 0x112   : > { %19517 = shalt.err (!%p19514_p13)
}
 0x113   : > { %s19518_s0 = scalar_lea.vmem %s20059_s3, 128  ;;  %s19664_s9 = smov [#allocation2]  }
 0x114   : > { %p19519_p0 = scmp.ne.s32.totalorder %s20059_s3, %s19518_s0  ;;  %s19523_s23 = sshll.u32 %s19664_s9, 4  ;;  %s19524_s23 = int_to_ptr.vmem [resolvable:$false] %s19523_s23 }
 0x115   : > { %s19525_s5 = scalar_lea.vmem %s19524_s23, 256  ;;  %p19526_p5 = scmp.lt.s32.totalorder %s20059_s3, %s19524_s23 }
 0x116   : > { %p19521_p6 = pnand %p19519_p0, %p19505_p8  ;;  %p19527_p7 = scmp.lt.s32.totalorder %s19525_s5, %s19518_s0 }
 0x118   : > { %p19522_p3 = pneg %p19521_p6  ;;  %p19528_p10 = por %p19527_p7, %p19526_p5 }
 0x11a   : > { %p19529_p11 = pnand %p19528_p10, %p19522_p3 }
 0x11c   : > { %19532 = shalt.err (!%p19529_p11)
}
 0x11d   : > { %18773 = dma.hbm_to_vmem [thread:$0]  (!%p20055_p2), %s20053_s18, 128, %s20059_s3, %s1074_s13  }
 0x11e   : > { %p22888_p9 = scmp.ne.s32.totalorder %s22880_s15, 0 }
 0x120   : > { %1094 = sbr.rel (%p22888_p9) target bundleno = 9174 (0x23d6), region = 164 }
 0x127   : > { %s20085_s17 = sand.u32 1, %s19607_s1   ;;  %p22889_p3 = scmp.ne.s32.totalorder %s22884_s10, 0 }
 0x128   : > { %s22753_s22 = sshll.u32 %s20085_s17, 3  ;;  %s1097_s5 = scalar_lea.sflag [#allocation3], %s20085_s17 }
 0x129   : > { %s1100_s0 = scalar_lea.vmem [#allocation2], %s22753_s22 }
 0x12a   : > { %19578 = dma.done.wait (%p22889_p3), %s1097_s5, 128  }
 0x12b   : > { %19580 = vsyncadd (%p22889_p3), %s1097_s5, 4294967168  ;;  %p22890_p6 = scmp.eq.s32.totalorder %s19890_s11, 0 }
 0x12d   : > { %19582 = dma.done.wait (%p22890_p6), [#allocation6], 1440   ;;  %p22891_p0 = pmov %p22890_p6 }
 0x12f   : > { %19584 = vsyncadd (%p22891_p0), [#allocation6], 4294965856  ;;  %p22892_p2 = pmov %p22891_p0 }
 0x130   : > { %p22893_p8 = pmov %p22891_p0 }
 0x131   : > { %19586 = dma.done.wait (%p22892_p2), [#allocation9], 1536  }
 0x132   : > { %19588 = vsyncadd (%p22893_p8), [#allocation9], 4294965760  ;;  %p22894_p4 = pmov %p22891_p0 }
 0x133   : > { %p22895_p1 = pmov %p22891_p0 }
 0x134   : > { %19590 = dma.done.wait (%p22894_p4), [#allocation12], 1664  }
 0x135   : > { %19592 = vsyncadd (%p22895_p1), [#allocation12], 4294965632  ;;  %p22896_p12 = pmov %p22891_p0 }
 0x136   : > { %p22897_p13 = pmov %p22891_p0 }
 0x137   : > { %19594 = dma.done.wait (%p22896_p12), [#allocation15], 1152  }
 0x138   : > { %19596 = vsyncadd (%p22897_p13), [#allocation15], 4294966144  ;;  %s22898_s14 = sld [smem:[#allocation31_spill]]  ;;  %s22899_s8 = sld [smem:[#allocation30_spill]]  ;;  %v22768_v0 = vmov 0   ;;  %v1218_v1 = vld [vmem:[%s1100_s0] sm:$0xff]  ;;  %v1287_v19 = vlaneseq }
 0x139   : > { %1274 = vmatprep.mubr.bf16.mxu0 %v22768_v0  ;;  %18886 = vset.pattern.permute.xlu0 %v22768_v0  ;;  %vm1235_vm0 = vcmask 1041408   ;;  %vm1231_vm1 = vcmask 31744   ;;  %v1221_v3 = vcombine.high %v1218_v1, %v1218_v1  ;;  %v1223_v4 = vpack.c.bf16 %v1218_v1, %v1218_v1  ;;  %s22818_s13 = smov 17   ;;  %s22781_s3 = smov 15   ;;  %v2048_v15 = vld [vmem:[%s19742_s24 + $0x8] sm:$0xff]  ;;  %v2047_v16 = vld [vmem:[%s19742_s24] sm:$0xff] }
 0x13a   : > { %1442 = vmatprep.mubr.bf16.mxu1 %v22768_v0  ;;  %18887 = vset.pattern.permute.xlu1 %v22768_v0  ;;  %s22762_s15 = smov 1   ;;  %s22760_s10 = smov 127   ;;  %v22766_v17 = vmov 1   ;;  %v22764_v18 = vmov 2   ;;  %v1295_v20 = vshrl.u32 %v1287_v19, 7  ;;  %v20161_v21 = vand.u32 127, %v1287_v19 }
 0x13b   : > { %v1224_v5 = vpack.c.bf16 %v1221_v3, %v1221_v3  ;;  %v1237_v6 = vsel %vm1235_vm0, %v1223_v4, 0  ;;  %s22758_s18 = smov 113   ;;  %s22756_s20 = smov 112   ;;  %v1292_v24 = vld [vmem:[#allocation5] sm:$0x3]  ;;  %vm1346_vm4 = vcmask 1043456  }
 0x13c   : > { %s22816_s9 = smov 16   ;;  %s22754_s23 = smov 111   ;;  %22900 = vst [vmem:[#allocation54_spill] sm:$0xff] %v20161_v21  ;;  %v20163_v22 = vsub.s32 0, %v1295_v20  ;;  %v20165_v23 = vsub.s32 1, %v1295_v20  ;;  %vm1289_vm2 = vcmp.lt.s32.totalorder %v20161_v21, 17 }
 0x13d   : > { %15192 = vmatprep.subr.msk.bf16.mxu0 %vm1235_vm0, %v1224_v5  ;;  %v1461_v28 = vld [vmem:[#allocation5 + $0x4] sm:$0x3]  ;;  %vm1457_vm3 = vcmp.lt.s32.totalorder %v20161_v21, 15  ;;  %v1549_v37 = vld [vmem:[#allocation5 + $0x6] sm:$0x3]  ;;  %vm1545_vm5 = vcmp.lt.s32.totalorder %v20161_v21, 1 }
 0x13e   : > { %v1225_v2 = vld [vmem:[%s22898_s14] sm:$0xff]  ;;  %1243 = vmatpush1.bf16.msra.mxu0 %v1237_v6  ;;  %v20169_v25 = vrot.slane %v1292_v24, %v20165_v23  ;;  %v20172_v26 = vrot.slane %v1292_v24, %v20163_v22  ;;  %v20180_v32 = vrot.slane %v1461_v28, %v20163_v22  ;;  %v20183_v33 = vrot.slane %v1461_v28, %v20165_v23  ;;  %v18954_v1 = vld [vmem:[%s19737_s19 + $0x10] sm:$0xff]   ;;  %s22925_s5 = sld [smem:[#allocation35_spill]]  ;;  %s22926_s0 = sld [smem:[#allocation37_spill]] }
 0x13f   : > { %1228 = vperm.xlu0 %18886, %v1225_v2   ;;  %v1219_v7 = vld [vmem:[%s22899_s8] sm:$0xf]  ;;  %v20197_v46 = vrot.slane %v1549_v37, %v20165_v23  ;;  %vm1342_vm6 = vcmask 64512   ;;  %v20203_v53 = vrot.slane %v1549_v37, %v20163_v22  ;;  %v1318_v3 = vld [vmem:[#allocation5 + $0x2] sm:$0x3]  ;;  %vm1314_vm7 = vcmp.lt.s32.totalorder %v20161_v21, 16 }
 0x140   : > { %22901 = vst [vmem:[#allocation55_spill] sm:$0xff] %v20169_v25  ;;  %22902 = vst [vmem:[#allocation56_spill] sm:$0xff] %v20172_v26  ;;  %v18953_v47 = vld [vmem:[%s19737_s19] sm:$0xff]   ;;  %vm1699_vm8 = vcmp.lt.s32.totalorder %v20161_v21, 127  ;;  %vm1787_vm9 = vcmp.lt.s32.totalorder %v20161_v21, 113  ;;  %vm1875_vm10 = vcmp.lt.s32.totalorder %v20161_v21, 112 }
 0x141   : > { %15193 = vmatmul.mubr.msk.bf16.vlgmr.msra.gmra.mrb[0].mxu0 %vm1231_vm1, %v1219_v7  ;;  %22903 = vst [vmem:[#allocation57_spill] sm:$0xff] %v20180_v32  ;;  %22904 = vst [vmem:[#allocation58_spill] sm:$0xff] %v20183_v33  ;;  %v20225_v7 = vrot.slane %v1318_v3, %v20163_v22  ;;  %vm1963_vm11 = vcmp.lt.s32.totalorder %v20161_v21, 111  ;;  %s22927_s22 = sld [smem:[#allocation39_spill]]  ;;  %vm19677_vm12 = vmmov 0   ;;  %vm2335_vm13 = vcmask 523264  }
 0x142   : > { %1385 = vmatprep.mubr.bf16.mxu0 %v22768_v0  ;;  %22905 = vst [vmem:[#allocation59_spill] sm:$0xff] %v20197_v46  ;;  %22906 = vst [vmem:[#allocation60_spill] sm:$0xff] %v20203_v53  ;;  %vm2475_vm14 = vcmask 130048   ;;  %vm3765_vm15 = vcmask 261120   ;;  %s22957_s8 = smov 127   ;;  %s22961_s14 = smov 111  }
 0x143   : > { %22907 = vst [vmem:[#allocation61_spill] sm:$0xff] %v20225_v7  ;;  %p22988_p7 = scmp.ne.s32.totalorder %s22885_s4, 0 }
 0x1be   : > { %v1229_v8 = vpop.permute.xlu0 %1228 }
 0x214   : > { %v1276_v9 = vpop.f32.mrb[0].mxu0 }
 0x215   : > { %v20118_v10 = vadd.f32 %v1276_v9, %v1229_v8  ;;  %v1278_v11 = vpop.f32.mrb[1].mxu0  ;;  %v1703_v9 = vld [vmem:[#allocation5 + $0xa] sm:$0x3] }
 0x216   : > { %v20120_v12 = vadd.f32 %v1278_v11, %v1229_v8  ;;  %v1280_v13 = vpop.f32.mrb[2].mxu0  ;;  %v20228_v8 = vrot.slane %v1318_v3, %v20165_v23 }
 0x217   : > { %v1281_v14 = vpop.f32.mrb[3].mxu0  ;;  %1283 = vrot.lane.b32.xlu0 %v20118_v10, %s22818_s13 }
 0x218   : > { %1285 = vrot.lane.b32.xlu1 %v20120_v12, %s22818_s13  ;;  %v1630_v5 = vpack.c.bf16 %v20120_v12, %v20120_v12  ;;  %22908 = vst [vmem:[#allocation62_spill] sm:$0xff] %v20228_v8 }
 0x21b   : > { %1455 = vrot.lane.b32.xlu0 %v20120_v12, %s22781_s3 }
 0x21c   : > { %1453 = vrot.lane.b32.xlu1 %v20118_v10, %s22781_s3  ;;  %s22933_s3 = sld [smem:[#allocation32_spill]] }
 0x21f   : > { %1543 = vrot.lane.b32.xlu0 %v20120_v12, %s22762_s15 }
 0x220   : > { %1541 = vrot.lane.b32.xlu1 %v20118_v10, %s22762_s15  ;;  %s22932_s15 = sld [smem:[#allocation25_spill]] }
 0x223   : > { %1697 = vrot.lane.b32.xlu0 %v20120_v12, %s22760_s10 }
 0x224   : > { %1695 = vrot.lane.b32.xlu1 %v20118_v10, %s22760_s10 }
 0x227   : > { %1785 = vrot.lane.b32.xlu0 %v20120_v12, %s22758_s18 }
 0x228   : > { %1783 = vrot.lane.b32.xlu1 %v20118_v10, %s22758_s18  ;;  %s22930_s18 = sld [smem:[#allocation45_spill]] }
 0x22b   : > { %1873 = vrot.lane.b32.xlu0 %v20120_v12, %s22756_s20 }
 0x22c   : > { %1871 = vrot.lane.b32.xlu1 %v20118_v10, %s22756_s20 }
 0x22f   : > { %1312 = vrot.lane.b32.xlu0 %v20120_v12, %s22816_s9 }
 0x230   : > { %1310 = vrot.lane.b32.xlu1 %v20118_v10, %s22816_s9  ;;  %s22935_s9 = sld [smem:[#allocation34_spill]] }
 0x233   : > { %1961 = vrot.lane.b32.xlu0 %v20120_v12, %s22754_s23 }
 0x234   : > { %1959 = vrot.lane.b32.xlu1 %v20118_v10, %s22754_s23  ;;  %s22928_s23 = sld [smem:[#allocation40_spill]] }
 0x237   : > { %2056 = vperm.xlu0 %18886, %v2048_v15  }
 0x238   : > { %2051 = vperm.xlu1 %18887, %v2047_v16  }
 0x23b   : > { %18889 = vset.pattern.permute.xlu0 %v22766_v17 }
 0x23c   : > { %2072 = vperm.xlu0 %18889, %v2048_v15   ;;  %18888 = vset.pattern.permute.xlu1 %v22766_v17 }
 0x23d   : > { %2068 = vperm.xlu1 %18888, %v2047_v16  }
 0x240   : > { %18891 = vset.pattern.permute.xlu0 %v22768_v0 }
 0x241   : > { %18890 = vset.pattern.permute.xlu1 %v22764_v18 }
 0x242   : > { %2080 = vperm.xlu1 %18890, %v2047_v16  }
 0x246   : > { %2084 = vperm.xlu1 %18890, %v2048_v15   ;;  %v20238_v15 = vrot.slane %v1703_v9, %v20165_v23 }
 0x248   : > { %22909 = vst [vmem:[#allocation63_spill] sm:$0xff] %v20238_v15 }
 0x24a   : > { %18892 = vset.pattern.permute.xlu1 %v22768_v0 }
 0x289   : > { %v1284_v27 = vpop.permute.xlu0 %1283 }
 0x28a   : > { %v1286_v29 = vpop.permute.xlu1 %1285 }
 0x28b   : > { %v1291_v30 = vsel %vm1289_vm2, %v1286_v29, %v1284_v27  ;;  %v1290_v31 = vsel %vm1289_vm2, %v1284_v27, %v1286_v29 }
 0x28c   : > { %v1305_v34 = vmul.f32 %v20169_v25, %v1290_v31  ;;  %v1304_v35 = vmul.f32 %v20172_v26, %v1291_v30  ;;  %v18955_v30 = vld [vmem:[%s19737_s19 + $0x18] sm:$0xff]   ;;  %v1629_v31 = vpack.c.bf16 %v20118_v10, %v20118_v10 }
 0x28d   : > { %v1456_v36 = vpop.permute.xlu0 %1455 }
 0x28e   : > { %v1454_v38 = vpop.permute.xlu1 %1453  ;;  %v1307_v39 = vpack.c.bf16 %v1305_v34, %v1305_v34  ;;  %v1306_v40 = vpack.c.bf16 %v1304_v35, %v1304_v35  ;;  %v18960_v34 = vld [vmem:[%s19737_s19 + $0x8] sm:$0xff]   ;;  %v20252_v35 = vrot.slane %v1703_v9, %v20163_v22  ;;  %v1643_v37 = vsel %vm1346_vm4, %v1629_v31, 0  ;;  %v18958_v9 = vld [vmem:[%s19737_s19 + $0x30] sm:$0xff]  }
 0x28f   : > { %v1458_v41 = vsel %vm1457_vm3, %v1454_v38, %v1456_v36  ;;  %v1459_v42 = vsel %vm1457_vm3, %v1456_v36, %v1454_v38 }
 0x290   : > { %v1473_v43 = vmul.f32 %v20180_v32, %v1459_v42  ;;  %v1474_v44 = vmul.f32 %v20183_v33, %v1458_v41  ;;  %15200 = vmatprep.subr.msk.bf16.mxu1 %vm1346_vm4, %v1307_v39  ;;  %v1405_v45 = vsel %vm1346_vm4, %v1306_v40, 0  ;;  %22910 = vst [vmem:[#allocation64_spill] sm:$0xff] %v20252_v35  ;;  %v1791_v39 = vld [vmem:[#allocation5 + $0xc] sm:$0x3] }
 0x291   : > { %1411 = vmatpush1.bf16.msra.mxu1 %v1405_v45  ;;  %v1544_v48 = vpop.permute.xlu0 %1543  ;;  %v20264_v40 = vrot.slane %v1791_v39, %v20165_v23  ;;  %v20271_v45 = vrot.slane %v1791_v39, %v20163_v22 }
 0x292   : > { %v1475_v49 = vpack.c.bf16 %v1473_v43, %v1473_v43  ;;  %v1476_v50 = vpack.c.bf16 %v1474_v44, %v1474_v44  ;;  %v1542_v51 = vpop.permute.xlu1 %1541  ;;  %v18956_v44 = vld [vmem:[%s19737_s19 + $0x20] sm:$0xff]  }
 0x293   : > { %v1546_v52 = vsel %vm1545_vm5, %v1542_v51, %v1544_v48  ;;  %v1547_v56 = vsel %vm1545_vm5, %v1544_v48, %v1542_v51  ;;  %22911 = vst [vmem:[#allocation65_spill] sm:$0xff] %v20264_v40  ;;  %22912 = vst [vmem:[#allocation66_spill] sm:$0xff] %v20271_v45 }
 0x294   : > { %v1562_v54 = vmul.f32 %v20197_v46, %v1546_v52  ;;  %15201 = vmatmul.mubr.msk.bf16.vlgmr.msra.gmra.mrb[0].mxu1 %vm1342_vm6, %v18953_v47  ;;  %15205 = vmatprep.subr.msk.bf16.mxu1 %vm1346_vm4, %v1476_v50  ;;  %v1489_v55 = vsel %vm1346_vm4, %v1475_v49, 0  ;;  %v1561_v60 = vmul.f32 %v20203_v53, %v1547_v56  ;;  %v1879_v50 = vld [vmem:[#allocation5 + $0xe] sm:$0x3] }
 0x295   : > { %1495 = vmatpush1.bf16.msra.mxu1 %v1489_v55  ;;  %v1698_v57 = vpop.permute.xlu0 %1697  ;;  %1526 = vmatprep.mubr.bf16.mxu1 %v22768_v0  ;;  %v20282_v52 = vrot.slane %v1879_v50, %v20165_v23 }
 0x296   : > { %v1564_v58 = vpack.c.bf16 %v1562_v54, %v1562_v54  ;;  %v1696_v59 = vpop.permute.xlu1 %1695  ;;  %v1563_v63 = vpack.c.bf16 %v1561_v60, %v1561_v60 }
 0x297   : > { %v1701_v20 = vsel %vm1699_vm8, %v1698_v57, %v1696_v59  ;;  %v1700_v38 = vsel %vm1699_vm8, %v1696_v59, %v1698_v57  ;;  %22913 = vst [vmem:[#allocation67_spill] sm:$0xff] %v20282_v52  ;;  %v18957_v57 = vld [vmem:[%s19737_s19 + $0x28] sm:$0xff]  }
 0x298   : > { %15210 = vmatprep.subr.msk.bf16.mxu1 %vm1346_vm4, %v1564_v58  ;;  %v1577_v6 = vsel %vm1346_vm4, %v1563_v63, 0  ;;  %v1716_v28 = vmul.f32 %v20238_v15, %v1701_v20  ;;  %v1715_v10 = vmul.f32 %v20252_v35, %v1700_v38  ;;  %v20291_v58 = vrot.slane %v1879_v50, %v20163_v22  ;;  %v18961_v20 = vld [vmem:[%s19737_s19 + $0x40] sm:$0xff]  }
 0x299   : > { %v1786_v61 = vpop.permute.xlu0 %1785 }
 0x29a   : > { %v1784_v62 = vpop.permute.xlu1 %1783  ;;  %v1718_v36 = vpack.c.bf16 %v1716_v28, %v1716_v28  ;;  %v1717_v42 = vpack.c.bf16 %v1715_v10, %v1715_v10  ;;  %22914 = vst [vmem:[#allocation68_spill] sm:$0xff] %v20291_v58 }
 0x29b   : > { %v1789_v41 = vsel %vm1787_vm9, %v1786_v61, %v1784_v62  ;;  %v1788_v49 = vsel %vm1787_vm9, %v1784_v62, %v1786_v61  ;;  %v1967_v62 = vld [vmem:[#allocation5 + $0x10] sm:$0x3] }
 0x29c   : > { %v1804_v43 = vmul.f32 %v20264_v40, %v1789_v41  ;;  %v1731_v48 = vsel %vm1346_vm4, %v1717_v42, 0  ;;  %v1803_v51 = vmul.f32 %v20271_v45, %v1788_v49  ;;  %v20771_v45 = vld [vmem:[%s22932_s15 + $0x100] sm:$0xff]   ;;  %v20790_v40 = vld [vmem:[%s22932_s15 + $0x118] sm:$0xff]  }
 0x29d   : > { %v20215_v2 = vpop.permute.xlu0 %1873 }
 0x29e   : > { %v20217_v4 = vpop.permute.xlu1 %1871  ;;  %v1806_v47 = vpack.c.bf16 %v1804_v43, %v1804_v43  ;;  %v1805_v55 = vpack.c.bf16 %v1803_v51, %v1803_v51 }
 0x29f   : > { %v1877_v54 = vsel %vm1875_vm10, %v20215_v2, %v20217_v4  ;;  %v1876_v61 = vsel %vm1875_vm10, %v20217_v4, %v20215_v2 }
 0x2a0   : > { %15206 = vmatmul.mubr.msk.bf16.vlgmr.msra.gmra.mrb[0].mxu1 %vm1342_vm6, %v18954_v1  ;;  %v1892_v56 = vmul.f32 %v20282_v52, %v1877_v54  ;;  %v1819_v60 = vsel %vm1346_vm4, %v1805_v55, 0  ;;  %v1891_v3 = vmul.f32 %v20291_v58, %v1876_v61 }
 0x2a1   : > { %1583 = vmatpush1.bf16.msra.mxu1 %v1577_v6  ;;  %v1313_v11 = vpop.permute.xlu0 %1312  ;;  %1614 = vmatprep.mubr.bf16.mxu1 %v22768_v0 }
 0x2a2   : > { %15215 = vmatprep.subr.msk.bf16.mxu1 %vm1346_vm4, %v1630_v5  ;;  %v1311_v12 = vpop.permute.xlu1 %1310  ;;  %v1894_v59 = vpack.c.bf16 %v1892_v56, %v1892_v56  ;;  %v20304_v5 = vrot.slane %v1967_v62, %v20165_v23  ;;  %v1893_v2 = vpack.c.bf16 %v1891_v3, %v1891_v3 }
 0x2a3   : > { %v1315_v13 = vsel %vm1314_vm7, %v1311_v12, %v1313_v11  ;;  %v1316_v14 = vsel %vm1314_vm7, %v1313_v11, %v1311_v12  ;;  %v20311_v11 = vrot.slane %v1967_v62, %v20163_v22 }
 0x2a4   : > { %v1330_v16 = vmul.f32 %v20225_v7, %v1316_v14  ;;  %v1331_v19 = vmul.f32 %v20228_v8, %v1315_v13  ;;  %22915 = vst [vmem:[#allocation69_spill] sm:$0xff] %v20304_v5  ;;  %v1907_v13 = vsel %vm1346_vm4, %v1893_v2, 0 }
 0x2a5   : > { %v1962_v63 = vpop.permute.xlu0 %1961  ;;  %22916 = vst [vmem:[#allocation70_spill] sm:$0xff] %v20311_v11 }
 0x2a6   : > { %v1332_v24 = vpack.c.bf16 %v1330_v16, %v1330_v16  ;;  %v1333_v27 = vpack.c.bf16 %v1331_v19, %v1331_v19  ;;  %v1960_v1 = vpop.permute.xlu1 %1959  ;;  %v18959_v19 = vld [vmem:[%s19737_s19 + $0x38] sm:$0xff]  }
 0x2a7   : > { %v1965_v6 = vsel %vm1963_vm11, %v1962_v63, %v1960_v1  ;;  %v1964_v23 = vsel %vm1963_vm11, %v1960_v1, %v1962_v63 }
 0x2a8   : > { %15197 = vmatprep.subr.msk.bf16.mxu0 %vm1346_vm4, %v1333_v27  ;;  %v1348_v29 = vsel %vm1346_vm4, %v1332_v24, 0  ;;  %v1980_v4 = vmul.f32 %v20304_v5, %v1965_v6  ;;  %v1979_v14 = vmul.f32 %v20311_v11, %v1964_v23  ;;  %v18966_v23 = vld [vmem:[%s19707_s21 + $0x50] sm:$0xff]   ;;  %v20747_v11 = vld [vmem:[%s22932_s15 + $0xe0] sm:$0xff]   ;;  %v20754_v5 = vld [vmem:[%s22932_s15 + $0xe8] sm:$0xff]  }
 0x2a9   : > { %1354 = vmatpush1.bf16.msra.mxu0 %v1348_v29 }
 0x2aa   : > { %v1982_v12 = vpack.c.bf16 %v1980_v4, %v1980_v4  ;;  %v1981_v16 = vpack.c.bf16 %v1979_v14, %v1979_v14  ;;  %v18962_v4 = vld [vmem:[%s19707_s21 + $0x40] sm:$0xff]   ;;  %v18967_v14 = vld [vmem:[%s19707_s21 + $0x10] sm:$0xff]  }
 0x2ab   : > { %16263 = vmatprep.subr.bf16.mxu0 %v18962_v4  ;;  %v4713_v4 = vld [vmem:[%s22925_s5 + $0x18] sm:$0xff] }
 0x2ac   : > { %15211 = vmatmul.mubr.msk.bf16.vlgmr.msra.gmra.mrb[0].mxu1 %vm1342_vm6, %v18955_v30  ;;  %15198 = vmatmul.mubr.msk.bf16.vlgmr.msra.gmra.mrb[4].mxu0 %vm1342_vm6, %v18960_v34  ;;  %v1995_v22 = vsel %vm1346_vm4, %v1981_v16, 0  ;;  %v18968_v16 = vld [vmem:[%s19707_s21 + $0x58] sm:$0xff]  }
 0x2ad   : > { %1649 = vmatpush1.bf16.msra.mxu1 %v1643_v37  ;;  %1680 = vmatprep.mubr.bf16.mxu1 %v22768_v0 }
 0x2ae   : > { %15220 = vmatprep.subr.msk.bf16.mxu1 %vm1346_vm4, %v1718_v36 }
 0x2b6   : > { %v2057_v38 = vpop.permute.xlu0 %2056 }
 0x2b7   : > { %v2052_v30 = vpop.permute.xlu1 %2051 }
 0x2b8   : > { %15216 = vmatmul.mubr.msk.bf16.vlgmr.msra.gmra.mrb[0].mxu1 %vm1342_vm6, %v18956_v44 }
 0x2b9   : > { %1737 = vmatpush1.bf16.msra.mxu1 %v1731_v48  ;;  %1768 = vmatprep.mubr.bf16.mxu1 %v22768_v0 }
 0x2ba   : > { %15225 = vmatprep.subr.msk.bf16.mxu1 %vm1346_vm4, %v1806_v47 }
 0x2bb   : > { %v2073_v55 = vpop.permute.xlu0 %2072 }
 0x2bc   : > { %v2069_v31 = vpop.permute.xlu1 %2068 }
 0x2c1   : > { %v2081_v47 = vpop.permute.xlu1 %2080 }
 0x2c4   : > { %15221 = vmatmul.mubr.msk.bf16.vlgmr.msra.gmra.mrb[0].mxu1 %vm1342_vm6, %v18957_v57 }
 0x2c5   : > { %1825 = vmatpush1.bf16.msra.mxu1 %v1819_v60  ;;  %1856 = vmatprep.mubr.bf16.mxu1 %v22768_v0  ;;  %v2085_v63 = vpop.permute.xlu1 %2084 }
 0x2c6   : > { %15230 = vmatprep.subr.msk.bf16.mxu1 %vm1346_vm4, %v1894_v59 }
 0x2d0   : > { %15226 = vmatmul.mubr.msk.bf16.vlgmr.msra.gmra.mrb[0].mxu1 %vm1342_vm6, %v18958_v9  ;;  %v18963_v9 = vld [vmem:[%s19707_s21] sm:$0xff]  }
 0x2d1   : > { %1913 = vmatpush1.bf16.msra.mxu1 %v1907_v13  ;;  %1944 = vmatprep.mubr.bf16.mxu1 %v22768_v0  ;;  %v18965_v13 = vld [vmem:[%s19707_s21 + $0x8] sm:$0xff]  }
 0x2d2   : > { %15235 = vmatprep.subr.msk.bf16.mxu1 %vm1346_vm4, %v1982_v12  ;;  %v18964_v12 = vld [vmem:[%s19707_s21 + $0x48] sm:$0xff]   ;;  %16264 = vmatpush3.bf16.msra.mxu0 %v18963_v9  ;;  %v4712_v9 = vld [vmem:[%s22925_s5 + $0x10] sm:$0xff] }
 0x2d3   : > { %16265 = vmatprep.subr.bf16.mxu0 %v18964_v12  ;;  %v6489_v12 = vld [vmem:[%s22926_s0] sm:$0xff] }
 0x2d6   : > { %16266 = vmatpush3.bf16.msra.mxu0 %v18965_v13  ;;  %v6492_v13 = vld [vmem:[%s22926_s0 + $0x18] sm:$0xff] }
 0x2d7   : > { %16267 = vmatprep.subr.bf16.mxu0 %v18966_v23  ;;  %v6494_v23 = vld [vmem:[%s22926_s0 + $0x28] sm:$0xff] }
 0x2da   : > { %16268 = vmatpush3.bf16.msra.mxu0 %v18967_v14  ;;  %v6490_v14 = vld [vmem:[%s22926_s0 + $0x8] sm:$0xff] }
 0x2db   : > { %16269 = vmatprep.subr.bf16.mxu0 %v18968_v16  ;;  %v20431_v16 = vld [vmem:[%s22926_s0 + $0x20] sm:$0xff] }
 0x2dc   : > { %15231 = vmatmul.mubr.msk.bf16.vlgmr.msra.gmra.mrb[0].mxu1 %vm1342_vm6, %v18959_v19  ;;  %v18969_v19 = vld [vmem:[%s19707_s21 + $0x18] sm:$0xff]  }
 0x2dd   : > { %2001 = vmatpush1.bf16.msra.mxu1 %v1995_v22  ;;  %2032 = vmatprep.mubr.bf16.mxu1 %v22768_v0  ;;  %v18970_v22 = vld [vmem:[%s19707_s21 + $0x60] sm:$0xff]  }
 0x2de   : > { %16270 = vmatpush3.bf16.msra.mxu0 %v18969_v19  ;;  %v20436_v19 = vld [vmem:[%s22926_s0 + $0x38] sm:$0xff] }
 0x2df   : > { %16271 = vmatprep.subr.bf16.mxu0 %v18970_v22  ;;  %v6491_v22 = vld [vmem:[%s22926_s0 + $0x10] sm:$0xff] }
 0x2e8   : > { %15236 = vmatmul.mubr.msk.bf16.vlgmr.msra.gmra.mrb[0].mxu1 %vm1342_vm6, %v18961_v20  ;;  %v18971_v20 = vld [vmem:[%s19707_s21 + $0x20] sm:$0xff]  }
 0x2e9   : > { %16272 = vmatpush3.bf16.msra.mxu0 %v18971_v20  ;;  %v20443_v20 = vld [vmem:[%s22927_s22] sm:$0xff] }
 0x37f   : > { %v1387_v24 = vpop.f32.mrb[4].mxu0 }
 0x380   : > { %v1389_v27 = vpop.f32.mrb[5].mxu0 }
 0x381   : > { %v1391_v28 = vpop.f32.mrb[6].mxu0 }
 0x382   : > { %v1393_v29 = vpop.f32.mrb[7].mxu0 }
 0x3bb   : > { %v2034_v34 = vpop.f32.mrb[0].mxu1 }
 0x3bc   : > { %v18268_v36 = vadd.f32 %v2034_v34, %v1387_v24  ;;  %v2036_v37 = vpop.f32.mrb[1].mxu1  ;;  %v18972_v24 = vld [vmem:[%s19707_s21 + $0x68] sm:$0xff]  }
 0x3bd   : > { %v18269_v39 = vadd.f32 %v2036_v37, %v1389_v27  ;;  %v2038_v10 = vpop.f32.mrb[2].mxu1  ;;  %v18973_v27 = vld [vmem:[%s19707_s21 + $0x28] sm:$0xff]   ;;  %16273 = vmatprep.subr.bf16.mxu0 %v18972_v24  ;;  %v20448_v24 = vld [vmem:[%s22927_s22 + $0x18] sm:$0xff] }
 0x3be   : > { %v2059_v41 = vadd.f32 %v18268_v36, %v2052_v30  ;;  %v18270_v42 = vadd.f32 %v2038_v10, %v1391_v28  ;;  %v2040_v43 = vpop.f32.mrb[3].mxu1  ;;  %16274 = vmatpush3.bf16.msra.mxu0 %v18973_v27  ;;  %v18976_v10 = vld [vmem:[%s19707_s21 + $0x78] sm:$0xff]   ;;  %v20452_v27 = vld [vmem:[%s22927_s22 + $0x20] sm:$0xff] }
 0x3bf   : > { %v2060_v44 = vadd.f32 %v18269_v39, %v2052_v30  ;;  %v18271_v48 = vadd.f32 %v2040_v43, %v1393_v29  ;;  %v18974_v30 = vld [vmem:[%s19707_s21 + $0x70] sm:$0xff]  }
 0x3c0   : > { %v2063_v49 = vmax.f32 %v2059_v41, 0.0  ;;  %v2061_v50 = vadd.f32 %v18270_v42, %v2057_v38  ;;  %16275 = vmatprep.subr.bf16.mxu0 %v18974_v30  ;;  %v18977_v41 = vld [vmem:[%s19707_s21 + $0x38] sm:$0xff]   ;;  %v6495_v30 = vld [vmem:[%s22926_s0 + $0x30] sm:$0xff]  ;;  %s22937_s0 = sld [smem:[#allocation36_spill]] }
 0x3c1   : > { %v2064_v51 = vmax.f32 %v2060_v44, 0.0  ;;  %v2062_v54 = vadd.f32 %v18271_v48, %v2057_v38 }
 0x3c2   : > { %v2075_v56 = vmul.f32 %v2069_v31, %v2063_v49  ;;  %v2065_v57 = vmax.f32 %v2061_v50, 0.0 }
 0x3c3   : > { %v2066_v59 = vmax.f32 %v2062_v54, 0.0  ;;  %v2076_v60 = vmul.f32 %v2069_v31, %v2064_v51  ;;  %v18975_v31 = vld [vmem:[%s19707_s21 + $0x30] sm:$0xff]   ;;  %v20721_v54 = vld [vmem:[%s22932_s15 + $0xa0] sm:$0xff]  }
 0x3c4   : > { %v20326_v61 = vadd.f32 %v2081_v47, %v2075_v56  ;;  %v2077_v62 = vmul.f32 %v2073_v55, %v2065_v57  ;;  %16276 = vmatpush3.bf16.msra.mxu0 %v18975_v31  ;;  %v3564_v57 = vld [vmem:[%s22873_s6] sm:$0xff]  ;;  %v20467_v31 = vld [vmem:[%s22927_s22 + $0x28] sm:$0xff] }
 0x3c5   : > { %v2078_v1 = vmul.f32 %v2073_v55, %v2066_v59  ;;  %v20332_v6 = vadd.f32 %v2081_v47, %v2076_v60  ;;  %16277 = vmatprep.subr.bf16.mxu0 %v18976_v10  ;;  %v3565_v59 = vld [vmem:[%s22873_s6 + $0x8] sm:$0xff]  ;;  %v3567_v60 = vld [vmem:[%s22873_s6 + $0x18] sm:$0xff] }
 0x3c6   : > { %22917 = vst [vmem:[#allocation71_spill] sm:$0xff] %v20326_v61  ;;  %v20328_v3 = vadd.f32 %v2085_v63, %v2077_v62  ;;  %2091 = vrot.lane.b32.xlu0 %v20326_v61, %s22760_s10  ;;  %v3566_v62 = vld [vmem:[%s22873_s6 + $0x10] sm:$0xff]  ;;  %s22956_s6 = smov 1  }
 0x3c7   : > { %22919 = vst [vmem:[#allocation73_spill] sm:$0xff] %v20332_v6  ;;  %v20336_v2 = vadd.f32 %v2085_v63, %v2078_v1  ;;  %v4711_v63 = vld [vmem:[%s22925_s5 + $0x8] sm:$0xff]  ;;  %v4710_v1 = vld [vmem:[%s22925_s5] sm:$0xff]  ;;  %s22955_s5 = smov 15  }
 0x3c8   : > { %22918 = vst [vmem:[#allocation72_spill] sm:$0xff] %v20328_v3  ;;  %2093 = vrot.lane.b32.xlu1 %v20328_v3, %s22760_s10  ;;  %16278 = vmatpush3.bf16.msra.mxu0 %v18977_v41 }
 0x3c9   : > { %22920 = vst [vmem:[#allocation74_spill] sm:$0xff] %v20336_v2 }
 0x3ca   : > { %2095 = vrot.lane.b32.xlu0 %v20332_v6, %s22760_s10 }
 0x3cc   : > { %2097 = vrot.lane.b32.xlu1 %v20336_v2, %s22760_s10  ;;  %s22931_s10 = sld [smem:[#allocation46_spill]] }
 0x438   : > { %v2092_v28 = vpop.permute.xlu0 %2091 }
 0x43a   : > { %v2094_v29 = vpop.permute.xlu1 %2093 }
 0x43c   : > { %v2096_v34 = vpop.permute.xlu0 %2095 }
 0x43d   : > { %v2099_v36 = vsel %vm1699_vm8, %v2092_v28, %v2096_v34  ;;  %v2101_v37 = vsel %vm1699_vm8, %v2096_v34, %v2092_v28  ;;  %v8216_v28 = vld [vmem:[%s22927_s22 + $0x30] sm:$0xff] }
 0x43e   : > { %v20361_v38 = vmul.f32 %v2099_v36, %v20252_v35  ;;  %v2098_v39 = vpop.permute.xlu1 %2097  ;;  %v20370_v44 = vmul.f32 %v2101_v37, %v20238_v15 }
 0x43f   : > { %v2100_v42 = vsel %vm1699_vm8, %v2094_v29, %v2098_v39  ;;  %v2102_v43 = vsel %vm1699_vm8, %v2098_v39, %v2094_v29  ;;  %v20458_v29 = vld [vmem:[%s22927_s22 + $0x8] sm:$0xff] }
 0x440   : > { %22921 = vst [vmem:[#allocation75_spill] sm:$0xff] %v20361_v38  ;;  %22922 = vst [vmem:[#allocation76_spill] sm:$0xff] %v20370_v44  ;;  %v20373_v47 = vmul.f32 %v2100_v42, %v20252_v35  ;;  %v20376_v48 = vmul.f32 %v2102_v43, %v20238_v15  ;;  %v20380_v49 = vmax.f32 %v20326_v61, %v20361_v38  ;;  %v20778_v38 = vld [vmem:[%s22932_s15 + $0x108] sm:$0xff]  }
 0x441   : > { %v20396_v55 = vmax.f32 %v20332_v6, %v20370_v44 }
 0x442   : > { %22923 = vst [vmem:[#allocation77_spill] sm:$0xff] %v20373_v47  ;;  %22924 = vst [vmem:[#allocation78_spill] sm:$0xff] %v20376_v48  ;;  %2111 = vrot.lane.b32.xlu0 %v20380_v49, %s22756_s20  ;;  %v20388_v51 = vmax.f32 %v20328_v3, %v20373_v47  ;;  %v20402_v56 = vmax.f32 %v20336_v2, %v20376_v48  ;;  %v20785_v47 = vld [vmem:[%s22932_s15 + $0x110] sm:$0xff]  }
 0x444   : > { %2113 = vrot.lane.b32.xlu1 %v20388_v51, %s22756_s20 }
 0x446   : > { %2115 = vrot.lane.b32.xlu0 %v20396_v55, %s22756_s20 }
 0x448   : > { %2117 = vrot.lane.b32.xlu1 %v20402_v56, %s22756_s20  ;;  %s22929_s20 = sld [smem:[#allocation43_spill]] }
 0x44a   : > { %3570 = vperm.xlu0 %18891, %v3564_v57  }
 0x44c   : > { %3575 = vperm.xlu1 %18892, %v3565_v59  }
 0x44e   : > { %3585 = vperm.xlu0 %18891, %v3567_v60  }
 0x450   : > { %3580 = vperm.xlu1 %18892, %v3566_v62  }
 0x452   : > { %18894 = vset.pattern.permute.xlu0 %v22766_v17 }
 0x453   : > { %3601 = vperm.xlu0 %18894, %v3565_v59  }
 0x454   : > { %18893 = vset.pattern.permute.xlu1 %v22766_v17 }
 0x455   : > { %3597 = vperm.xlu1 %18893, %v3564_v57  }
 0x457   : > { %18895 = vset.pattern.permute.xlu0 %v22764_v18 }
 0x458   : > { %3617 = vperm.xlu0 %18895, %v3564_v57  }
 0x459   : > { %3605 = vperm.xlu1 %18893, %v3566_v62  }
 0x45c   : > { %3629 = vperm.xlu0 %18895, %v3567_v60  }
 0x45d   : > { %3609 = vperm.xlu1 %18893, %v3567_v60  }
 0x460   : > { %18898 = vset.pattern.permute.xlu0 %v22768_v0 }
 0x461   : > { %4721 = vperm.xlu0 %18898, %v4711_v63   ;;  %18896 = vset.pattern.permute.xlu1 %v22764_v18 }
 0x462   : > { %3621 = vperm.xlu1 %18896, %v3565_v59  }
 0x465   : > { %18899 = vset.pattern.permute.xlu0 %v22766_v17 }
 0x466   : > { %4743 = vperm.xlu0 %18899, %v4710_v1   ;;  %3625 = vperm.xlu1 %18896, %v3566_v62  }
 0x46a   : > { %4755 = vperm.xlu0 %18899, %v4713_v4   ;;  %18897 = vset.pattern.permute.xlu1 %v22768_v0 }
 0x46b   : > { %4716 = vperm.xlu1 %18897, %v4710_v1  }
 0x46e   : > { %18902 = vset.pattern.permute.xlu0 %v22764_v18 }
 0x46f   : > { %4767 = vperm.xlu0 %18902, %v4711_v63   ;;  %4726 = vperm.xlu1 %18897, %v4712_v9  }
 0x473   : > { %6594 = vperm.xlu0 %18902, %v6489_v12   ;;  %4731 = vperm.xlu1 %18897, %v4713_v4  }
 0x477   : > { %6606 = vperm.xlu0 %18902, %v6492_v13   ;;  %18900 = vset.pattern.permute.xlu1 %v22766_v17 }
 0x478   : > { %4747 = vperm.xlu1 %18900, %v4711_v63  }
 0x47b   : > { %18906 = vset.pattern.permute.xlu0 %v22768_v0 }
 0x47c   : > { %6499 = vperm.xlu0 %18906, %v6489_v12   ;;  %4751 = vperm.xlu1 %18900, %v4712_v9  }
 0x480   : > { %6514 = vperm.xlu0 %18906, %v6492_v13   ;;  %18901 = vset.pattern.permute.xlu1 %v22764_v18 }
 0x481   : > { %4763 = vperm.xlu1 %18901, %v4710_v1  }
 0x484   : > { %6524 = vperm.xlu0 %18906, %v6494_v23  }
 0x485   : > { %4771 = vperm.xlu1 %18901, %v4712_v9  }
 0x488   : > { %18908 = vset.pattern.permute.xlu0 %v22766_v17 }
 0x489   : > { %6558 = vperm.xlu0 %18908, %v6490_v14   ;;  %4775 = vperm.xlu1 %18901, %v4713_v4  }
 0x48d   : > { %6570 = vperm.xlu0 %18908, %v20431_v16   ;;  %18903 = vset.pattern.permute.xlu1 %v22768_v0 }
 0x48e   : > { %6504 = vperm.xlu1 %18903, %v6490_v14  }
 0x491   : > { %6582 = vperm.xlu0 %18908, %v20436_v19  }
 0x492   : > { %6509 = vperm.xlu1 %18903, %v6491_v22  }
 0x495   : > { %18911 = vset.pattern.permute.xlu0 %v22764_v18 }
 0x496   : > { %6614 = vperm.xlu0 %18911, %v6494_v23   ;;  %18904 = vset.pattern.permute.xlu1 %v22766_v17 }
 0x497   : > { %6554 = vperm.xlu1 %18904, %v6489_v12   ;;  %v8909_v12 = vld [vmem:[%s22928_s23 + $0x8] sm:$0xff] }
 0x49a   : > { %18912 = vset.pattern.permute.xlu0 %v22768_v0 }
 0x49b   : > { %8220 = vperm.xlu0 %18912, %v20443_v20   ;;  %6562 = vperm.xlu1 %18904, %v6491_v22  }
 0x49f   : > { %8235 = vperm.xlu0 %18912, %v20448_v24   ;;  %6566 = vperm.xlu1 %18904, %v6492_v13  }
 0x4a3   : > { %8240 = vperm.xlu0 %18912, %v20452_v27   ;;  %18905 = vset.pattern.permute.xlu1 %v22764_v18 }
 0x4a4   : > { %6598 = vperm.xlu1 %18905, %v6490_v14   ;;  %v20512_v14 = vld [vmem:[%s22929_s20 + $0x8] sm:$0xff] }
 0x4a7   : > { %8250 = vperm.xlu0 %18912, %v8216_v28  }
 0x4a8   : > { %6602 = vperm.xlu1 %18905, %v6491_v22   ;;  %v20531_v22 = vld [vmem:[%s22930_s18 + $0x8] sm:$0xff] }
 0x4ab   : > { %18919 = vset.pattern.permute.xlu0 %v22766_v17 }
 0x4ac   : > { %8279 = vperm.xlu0 %18919, %v20458_v29   ;;  %18907 = vset.pattern.permute.xlu1 %v22768_v0 }
 0x4ad   : > { %6519 = vperm.xlu1 %18907, %v20431_v16  }
 0x4b0   : > { %8287 = vperm.xlu0 %18919, %v20448_v24  }
 0x4b1   : > { %6529 = vperm.xlu1 %18907, %v6495_v30  }
 0x4b4   : > { %8295 = vperm.xlu0 %18919, %v20467_v31   ;;  %v2112_v34 = vpop.permute.xlu0 %2111 }
 0x4b5   : > { %6534 = vperm.xlu1 %18907, %v20436_v19  }
 0x4b6   : > { %v2114_v36 = vpop.permute.xlu1 %2113 }
 0x4b8   : > { %8299 = vperm.xlu0 %18919, %v8216_v28   ;;  %v2116_v37 = vpop.permute.xlu0 %2115 }
 0x4b9   : > { %v2119_v39 = vsel %vm1875_vm10, %v2112_v34, %v2116_v37  ;;  %v2121_v10 = vsel %vm1875_vm10, %v2116_v37, %v2112_v34  ;;  %18909 = vset.pattern.permute.xlu1 %v22766_v17  ;;  %v20557_v34 = vld [vmem:[%s22932_s15 + $0x40] sm:$0xff]   ;;  %v20571_v37 = vld [vmem:[%s22932_s15 + $0x48] sm:$0xff]  }
 0x4ba   : > { %v2123_v41 = vmul.f32 %v2119_v39, %v20291_v58  ;;  %v2124_v42 = vmul.f32 %v2121_v10, %v20282_v52  ;;  %6574 = vperm.xlu1 %18909, %v6494_v23   ;;  %v2118_v43 = vpop.permute.xlu1 %2117 }
 0x4bb   : > { %v2120_v57 = vsel %vm1875_vm10, %v2114_v36, %v2118_v43  ;;  %v2122_v59 = vsel %vm1875_vm10, %v2118_v43, %v2114_v36  ;;  %v22786_v36 = vmov 0.0   ;;  %v20599_v43 = vld [vmem:[%s22932_s15 + $0x18] sm:$0xff]  }
 0x4bc   : > { %v2125_v60 = vmul.f32 %v2120_v57, %v20291_v58  ;;  %v2126_v62 = vmul.f32 %v2122_v59, %v20282_v52  ;;  %18924 = vset.pattern.permute.xlu0 %v22764_v18  ;;  %v2127_v63 = vmax.f32 %v20380_v49, %v2123_v41  ;;  %v2128_v4 = vmax.f32 %v20396_v55, %v2124_v42  ;;  %v20494_v49 = vld [vmem:[%s22929_s20] sm:$0xff]  ;;  %v20507_v55 = vld [vmem:[%s22929_s20 + $0x18] sm:$0xff]  ;;  %v20587_v41 = vld [vmem:[%s22932_s15 + $0x10] sm:$0xff]  }
 0x4bd   : > { %8339 = vperm.xlu0 %18924, %v8216_v28   ;;  %v20538_v28 = vld [vmem:[%s22930_s18 + $0x10] sm:$0xff]  ;;  %16938 = vmatprep.subr.bf16.mxu0 %v22786_v36  ;;  %v20602_v57 = vld [vmem:[%s22932_s15 + $0x58] sm:$0xff]  }
 0x4be   : > { %v2129_v1 = vmax.f32 %v20388_v51, %v2125_v60  ;;  %6578 = vperm.xlu1 %18909, %v6495_v30   ;;  %v2130_v9 = vmax.f32 %v20402_v56, %v2126_v62  ;;  %v20498_v51 = vld [vmem:[%s22929_s20 + $0x10] sm:$0xff]  ;;  %16974 = vmatprep.subr.bf16.mxu1 %v22786_v36  ;;  %v8911_v60 = vld [vmem:[%s22928_s23 + $0x18] sm:$0xff] }
 0x4bf   : > { %v8212_v56 = vld [vmem:[%s22927_s22 + $0x10] sm:$0xff]  ;;  %16975 = vmatpush3.bf16.msra.mxu1 %v20557_v34  ;;  %16982 = vmatprep.mubr.msk.bf16.mxu1 %vm19677_vm12, %v22786_v36  ;;  %v20766_v52 = vld [vmem:[%s22932_s15 + $0xf8] sm:$0xff]  }
 0x4c0   : > { %v2132_v13 = vpack.c.bf16 %v2130_v9, %v2128_v4  ;;  %v2131_v23 = vpack.c.bf16 %v2129_v1, %v2127_v63  ;;  %16976 = vmatprep.subr.bf16.mxu1 %v22786_v36  ;;  %v20590_v42 = vld [vmem:[%s22932_s15 + $0x50] sm:$0xff]  }
 0x4c1   : > { %18927 = vset.pattern.permute.xlu0 %v22768_v0  ;;  %v20761_v58 = vld [vmem:[%s22932_s15 + $0xf0] sm:$0xff]  }
 0x4c2   : > { %8919 = vperm.xlu0 %18927, %v8909_v12   ;;  %18910 = vset.pattern.permute.xlu1 %v22764_v18 }
 0x4c3   : > { %2293 = vmatprep.mubr.bf16.mxu0 %v2132_v13  ;;  %6610 = vperm.xlu1 %18910, %v20431_v16   ;;  %v20519_v16 = vld [vmem:[%s22930_s18] sm:$0xff] }
 0x4c4   : > { %2294 = vmatmul.mubr.bf16.vlgmr.msra.gmra.mrb[8].mxu0 %v2131_v23  ;;  %16977 = vmatpush3.bf16.msra.mxu1 %v20571_v37 }
 0x4c5   : > { %16978 = vmatprep.subr.bf16.mxu1 %v22786_v36  ;;  %16946 = vmatprep.mubr.msk.bf16.mxu0 %vm19677_vm12, %v22786_v36 }
 0x4c6   : > { %11039 = vperm.xlu0 %18927, %v20494_v49  }
 0x4c7   : > { %6618 = vperm.xlu1 %18910, %v6495_v30   ;;  %v20554_v30 = vld [vmem:[%s22932_s15] sm:$0xff]  }
 0x4c8   : > { %16939 = vmatpush3.bf16.msra.mxu0 %v20554_v30  ;;  %16979 = vmatpush3.bf16.msra.mxu1 %v20590_v42 }
 0x4c9   : > { %16940 = vmatprep.subr.bf16.mxu0 %v22786_v36  ;;  %16980 = vmatprep.subr.bf16.mxu1 %v22786_v36 }
 0x4ca   : > { %11049 = vperm.xlu0 %18927, %v20498_v51  }
 0x4cb   : > { %6622 = vperm.xlu1 %18910, %v20436_v19   ;;  %v20526_v19 = vld [vmem:[%s22930_s18 + $0x18] sm:$0xff]  ;;  %v20580_v39 = vpop.permute.xlu1 %3575 }
 0x4cc   : > { %16981 = vmatpush3.bf16.msra.mxu1 %v20602_v57 }
 0x4cd   : > { %16992 = vmatprep.subr.bf16.mxu1 %v22786_v36 }
 0x4ce   : > { %18928 = vset.pattern.permute.xlu0 %v22766_v17 }
 0x4cf   : > { %11066 = vperm.xlu0 %18928, %v20494_v49   ;;  %18913 = vset.pattern.permute.xlu1 %v22768_v0  ;;  %v20584_v10 = vpop.permute.xlu1 %3580 }
 0x4d0   : > { %8225 = vperm.xlu1 %18913, %v20458_v29  }
 0x4d3   : > { %11078 = vperm.xlu0 %18928, %v20507_v55  }
 0x4d4   : > { %8230 = vperm.xlu1 %18913, %v8212_v56   ;;  %v20604_v59 = vpop.permute.xlu1 %3597 }
 0x4d7   : > { %18931 = vset.pattern.permute.xlu0 %v22764_v18 }
 0x4d8   : > { %11090 = vperm.xlu0 %18931, %v20512_v14   ;;  %18914 = vset.pattern.permute.xlu1 %v22766_v17  ;;  %v20615_v62 = vpop.permute.xlu1 %3605 }
 0x4d9   : > { %8275 = vperm.xlu1 %18914, %v20443_v20  }
 0x4dc   : > { %18932 = vset.pattern.permute.xlu0 %v22768_v0  ;;  %v20618_v63 = vpop.permute.xlu1 %3609 }
 0x4dd   : > { %12184 = vperm.xlu0 %18932, %v20519_v16   ;;  %18915 = vset.pattern.permute.xlu1 %v22764_v18 }
 0x4de   : > { %8315 = vperm.xlu1 %18915, %v20443_v20   ;;  %v12851_v20 = vld [vmem:[%s22931_s10 + $0x8] sm:$0xff] }
 0x4e1   : > { %12199 = vperm.xlu0 %18932, %v20526_v19   ;;  %v20623_v1 = vpop.permute.xlu1 %3621 }
 0x4e2   : > { %8319 = vperm.xlu1 %18915, %v20458_v29   ;;  %v8217_v29 = vld [vmem:[%s22927_s22 + $0x38] sm:$0xff] }
 0x4e5   : > { %18935 = vset.pattern.permute.xlu0 %v22766_v17  ;;  %v20626_v4 = vpop.permute.xlu1 %3625 }
 0x4e6   : > { %12215 = vperm.xlu0 %18935, %v20531_v22   ;;  %18916 = vset.pattern.permute.xlu1 %v22768_v0 }
 0x4e7   : > { %8245 = vperm.xlu1 %18916, %v20467_v31  }
 0x4ea   : > { %12219 = vperm.xlu0 %18935, %v20538_v28   ;;  %v20630_v9 = vpop.permute.xlu1 %4716 }
 0x4eb   : > { %18917 = vset.pattern.permute.xlu1 %v22766_v17 }
 0x4ec   : > { %8283 = vperm.xlu1 %18917, %v8212_v56  }
 0x4ee   : > { %18938 = vset.pattern.permute.xlu0 %v22764_v18  ;;  %v20634_v12 = vpop.permute.xlu1 %4726 }
 0x4ef   : > { %12239 = vperm.xlu0 %18938, %v20538_v28  }
 0x4f0   : > { %18918 = vset.pattern.permute.xlu1 %v22764_v18 }
 0x4f1   : > { %8323 = vperm.xlu1 %18918, %v8212_v56   ;;  %v12850_v56 = vld [vmem:[%s22931_s10] sm:$0xff]  ;;  %s22959_s10 = smov 112  }
 0x4f2   : > { %v20638_v13 = vpop.permute.xlu1 %4731 }
 0x4f3   : > { %18941 = vset.pattern.permute.xlu0 %v22768_v0 }
 0x4f4   : > { %12859 = vperm.xlu0 %18941, %v12851_v20  }
 0x4f5   : > { %8327 = vperm.xlu1 %18918, %v20448_v24   ;;  %v20568_v24 = vld [vmem:[%s22932_s15 + $0x8] sm:$0xff]  }
 0x4f6   : > { %16941 = vmatpush3.bf16.msra.mxu0 %v20568_v24 }
 0x4f7   : > { %16942 = vmatprep.subr.bf16.mxu0 %v22786_v36  ;;  %v20642_v23 = vpop.permute.xlu1 %4747 }
 0x4f8   : > { %12890 = vrot.lane.b32.xlu0 %v20332_v6, %s22818_s13 }
 0x4f9   : > { %18920 = vset.pattern.permute.xlu1 %v22768_v0 }
 0x4fa   : > { %8255 = vperm.xlu1 %18920, %v8217_v29   ;;  %16943 = vmatpush3.bf16.msra.mxu0 %v20587_v41 }
 0x4fb   : > { %16944 = vmatprep.subr.bf16.mxu0 %v22786_v36 }
 0x4fe   : > { %18921 = vset.pattern.permute.xlu1 %v22766_v17  ;;  %16945 = vmatpush3.bf16.msra.mxu0 %v20599_v43 }
 0x4ff   : > { %8291 = vperm.xlu1 %18921, %v20452_v27   ;;  %16950 = vmatprep.subr.bf16.mxu0 %v22786_v36 }
 0x503   : > { %18922 = vset.pattern.permute.xlu1 %v22764_v18 }
 0x504   : > { %8331 = vperm.xlu1 %18922, %v20452_v27   ;;  %v8908_v27 = vld [vmem:[%s22928_s23] sm:$0xff] }
 0x508   : > { %8335 = vperm.xlu1 %18922, %v20467_v31   ;;  %v8910_v31 = vld [vmem:[%s22928_s23 + $0x10] sm:$0xff] }
 0x50c   : > { %18923 = vset.pattern.permute.xlu1 %v22766_v17 }
 0x50d   : > { %8303 = vperm.xlu1 %18923, %v8217_v29  }
 0x511   : > { %18925 = vset.pattern.permute.xlu1 %v22764_v18 }
 0x512   : > { %8343 = vperm.xlu1 %18925, %v8217_v29  }
 0x516   : > { %18926 = vset.pattern.permute.xlu1 %v22768_v0 }
 0x517   : > { %8914 = vperm.xlu1 %18926, %v8908_v27  }
 0x51b   : > { %8924 = vperm.xlu1 %18926, %v8910_v31  }
 0x51f   : > { %8929 = vperm.xlu1 %18926, %v8911_v60   ;;  %v20673_v60 = vld [vmem:[%s22932_s15 + $0x20] sm:$0xff]  }
 0x523   : > { %11044 = vperm.xlu1 %18926, %v20512_v14  }
 0x527   : > { %11054 = vperm.xlu1 %18926, %v20507_v55  }
 0x52b   : > { %18929 = vset.pattern.permute.xlu1 %v22766_v17 }
 0x52c   : > { %11070 = vperm.xlu1 %18929, %v20512_v14  }
 0x530   : > { %11074 = vperm.xlu1 %18929, %v20498_v51  }
 0x534   : > { %18930 = vset.pattern.permute.xlu1 %v22764_v18 }
 0x535   : > { %11086 = vperm.xlu1 %18930, %v20494_v49   ;;  %v20647_v49 = vpop.permute.xlu1 %4751 }
 0x539   : > { %11094 = vperm.xlu1 %18930, %v20498_v51   ;;  %v20650_v51 = vpop.permute.xlu1 %4763 }
 0x53d   : > { %11098 = vperm.xlu1 %18930, %v20507_v55   ;;  %v20654_v55 = vpop.permute.xlu1 %4771 }
 0x541   : > { %18933 = vset.pattern.permute.xlu1 %v22768_v0  ;;  %v20660_v14 = vpop.permute.xlu1 %4775 }
 0x542   : > { %12189 = vperm.xlu1 %18933, %v20531_v22  }
 0x546   : > { %12194 = vperm.xlu1 %18933, %v20538_v28  }
 0x54a   : > { %18934 = vset.pattern.permute.xlu1 %v22766_v17 }
 0x54b   : > { %12211 = vperm.xlu1 %18934, %v20519_v16  }
 0x54f   : > { %18936 = vset.pattern.permute.xlu1 %v22764_v18 }
 0x550   : > { %12231 = vperm.xlu1 %18936, %v20519_v16   ;;  %v20664_v16 = vpop.permute.xlu1 %6504 }
 0x554   : > { %12235 = vperm.xlu1 %18936, %v20531_v22   ;;  %v20668_v22 = vpop.permute.xlu1 %6509 }
 0x558   : > { %18937 = vset.pattern.permute.xlu1 %v22766_v17  ;;  %v20737_v17 = vld [vmem:[%s22932_s15 + $0xb0] sm:$0xff]  }
 0x559   : > { %12223 = vperm.xlu1 %18937, %v20526_v19  }
 0x55d   : > { %18939 = vset.pattern.permute.xlu1 %v22764_v18  ;;  %v20730_v18 = vld [vmem:[%s22932_s15 + $0xa8] sm:$0xff]  }
 0x55e   : > { %12243 = vperm.xlu1 %18939, %v20526_v19  }
 0x562   : > { %18940 = vset.pattern.permute.xlu1 %v22768_v0  ;;  %v20742_v0 = vld [vmem:[%s22932_s15 + $0xb8] sm:$0xff]  }
 0x563   : > { %12854 = vperm.xlu1 %18940, %v12850_v56   ;;  %v20676_v56 = vld [vmem:[%s22932_s15 + $0x60] sm:$0xff]  }
 0x567   : > { %12886 = vrot.lane.b32.xlu1 %v20326_v61, %s22818_s13  ;;  %v19007_v61 = vld [vmem:[%s22933_s3 + $0x18] sm:$0xff]  }
 0x56b   : > { %12888 = vrot.lane.b32.xlu1 %v20328_v3, %s22818_s13 }
 0x56f   : > { %12892 = vrot.lane.b32.xlu1 %v20336_v2, %s22818_s13  ;;  %s22936_s13 = sld [smem:[#allocation27_spill]] }
 0x597   : > { %v16279_v19 = vpop.f32.mrb[8].mxu0 }
 0x598   : > { %v16280_v28 = vpop.f32.mrb[9].mxu0 }
 0x599   : > { %v16281_v20 = vadd.f32 %v16280_v28, %v16279_v19  ;;  %v16282_v29 = vpop.f32.mrb[10].mxu0  ;;  %v20687_v19 = vld [vmem:[%s22932_s15 + $0x28] sm:$0xff]  }
 0x59a   : > { %v16283_v27 = vpop.f32.mrb[11].mxu0  ;;  %v20690_v28 = vld [vmem:[%s22932_s15 + $0x68] sm:$0xff]  }
 0x59b   : > { %v16284_v31 = vadd.f32 %v16283_v27, %v16282_v29  ;;  %v20704_v29 = vld [vmem:[%s22932_s15 + $0x70] sm:$0xff]   ;;  %v20711_v27 = vld [vmem:[%s22932_s15 + $0x38] sm:$0xff]  }
 0x59d   : > { %v20678_v50 = vpack.c.bf16 %v16284_v31, %v16281_v20  ;;  %v20701_v20 = vld [vmem:[%s22932_s15 + $0x30] sm:$0xff]   ;;  %v20714_v31 = vld [vmem:[%s22932_s15 + $0x78] sm:$0xff]  }
 0x59f   : > { %16947 = vmatmul.mubr.msk.bf16.vlgmr.msra.gmra.mrb[12].mxu0 %vm2335_vm13, %v20678_v50  ;;  %16983 = vmatmul.mubr.msk.bf16.vlgmr.msra.gmra.mrb[4].mxu1 %vm2335_vm13, %v20678_v50 }
 0x5a0   : > { %16951 = vmatpush3.bf16.msra.mxu0 %v20673_v60  ;;  %16993 = vmatpush3.bf16.msra.mxu1 %v20676_v56 }
 0x5a1   : > { %16952 = vmatprep.subr.bf16.mxu0 %v22786_v36  ;;  %16994 = vmatprep.subr.bf16.mxu1 %v22786_v36 }
 0x5a2   : > { %16958 = vmatprep.mubr.msk.bf16.mxu0 %vm19677_vm12, %v22786_v36  ;;  %17000 = vmatprep.mubr.msk.bf16.mxu1 %vm19677_vm12, %v22786_v36 }
 0x5a4   : > { %16953 = vmatpush3.bf16.msra.mxu0 %v20687_v19  ;;  %16995 = vmatpush3.bf16.msra.mxu1 %v20690_v28 }
 0x5a5   : > { %16954 = vmatprep.subr.bf16.mxu0 %v22786_v36  ;;  %16996 = vmatprep.subr.bf16.mxu1 %v22786_v36 }
 0x5a8   : > { %16955 = vmatpush3.bf16.msra.mxu0 %v20701_v20  ;;  %16997 = vmatpush3.bf16.msra.mxu1 %v20704_v29 }
 0x5a9   : > { %16956 = vmatprep.subr.bf16.mxu0 %v22786_v36  ;;  %16998 = vmatprep.subr.bf16.mxu1 %v22786_v36 }
 0x5ac   : > { %16957 = vmatpush3.bf16.msra.mxu0 %v20711_v27  ;;  %16999 = vmatpush3.bf16.msra.mxu1 %v20714_v31 }
 0x5ad   : > { %17016 = vmatprep.subr.bf16.mxu1 %v22786_v36 }
 0x5af   : > { %16959 = vmatmul.mubr.msk.bf16.vlgmr.msra.gmra.mrb[16].mxu0 %vm2335_vm13, %v20678_v50  ;;  %17001 = vmatmul.mubr.msk.bf16.vlgmr.msra.gmra.mrb[8].mxu1 %vm2335_vm13, %v20678_v50 }
 0x5b0   : > { %17017 = vmatpush3.bf16.msra.mxu1 %v20721_v54  ;;  %17024 = vmatprep.mubr.msk.bf16.mxu1 %vm19677_vm12, %v22786_v36 }
 0x5b1   : > { %17018 = vmatprep.subr.bf16.mxu1 %v22786_v36 }
 0x5b4   : > { %17019 = vmatpush3.bf16.msra.mxu1 %v20730_v18 }
 0x5b5   : > { %17020 = vmatprep.subr.bf16.mxu1 %v22786_v36 }
 0x5b8   : > { %17021 = vmatpush3.bf16.msra.mxu1 %v20737_v17 }
 0x5b9   : > { %17022 = vmatprep.subr.bf16.mxu1 %v22786_v36 }
 0x5bc   : > { %17023 = vmatpush3.bf16.msra.mxu1 %v20742_v0 }
 0x5bd   : > { %17052 = vmatprep.subr.bf16.mxu1 %v22786_v36 }
 0x5bf   : > { %17025 = vmatmul.mubr.msk.bf16.vlgmr.msra.gmra.mrb[12].mxu1 %vm2335_vm13, %v20678_v50 }
 0x5c0   : > { %17053 = vmatpush3.bf16.msra.mxu1 %v20747_v11  ;;  %17060 = vmatprep.mubr.msk.bf16.mxu1 %vm19677_vm12, %v22786_v36 }
 0x5c1   : > { %17054 = vmatprep.subr.bf16.mxu1 %v22786_v36 }
 0x5c4   : > { %17055 = vmatpush3.bf16.msra.mxu1 %v20754_v5 }
 0x5c5   : > { %17056 = vmatprep.subr.bf16.mxu1 %v22786_v36 }
 0x5c8   : > { %17057 = vmatpush3.bf16.msra.mxu1 %v20761_v58 }
 0x5c9   : > { %17058 = vmatprep.subr.bf16.mxu1 %v22786_v36 }
 0x5cc   : > { %17059 = vmatpush3.bf16.msra.mxu1 %v20766_v52 }
 0x5cd   : > { %17070 = vmatprep.subr.bf16.mxu1 %v22786_v36 }
 0x5cf   : > { %17061 = vmatmul.mubr.msk.bf16.vlgmr.msra.gmra.mrb[16].mxu1 %vm2335_vm13, %v20678_v50 }
 0x5d0   : > { %17071 = vmatpush3.bf16.msra.mxu1 %v20771_v45  ;;  %17078 = vmatprep.mubr.msk.bf16.mxu1 %vm19677_vm12, %v22786_v36 }
 0x5d1   : > { %17072 = vmatprep.subr.bf16.mxu1 %v22786_v36 }
 0x5d4   : > { %17073 = vmatpush3.bf16.msra.mxu1 %v20778_v38 }
 0x5d5   : > { %17074 = vmatprep.subr.bf16.mxu1 %v22786_v36 }
 0x5d8   : > { %17075 = vmatpush3.bf16.msra.mxu1 %v20785_v47 }
 0x5d9   : > { %17076 = vmatprep.subr.bf16.mxu1 %v22786_v36  ;;  %v19006_v36 = vld [vmem:[%s22933_s3 + $0x10] sm:$0xff]  }
 0x5da   : > { %16964 = vmatprep.mubr.msk.bf16.mxu0 %vm2475_vm14, %v19006_v36 }
 0x5dc   : > { %17077 = vmatpush3.bf16.msra.mxu1 %v20790_v40 }
 0x5dd   : > { %17088 = vmatprep.subr.bf16.mxu1 %v20554_v30 }
 0x5df   : > { %17079 = vmatmul.mubr.msk.bf16.vlgmr.msra.gmra.mrb[20].mxu1 %vm2335_vm13, %v20678_v50 }
 0x5e0   : > { %17089 = vmatpush3.bf16.msra.mxu1 %v20554_v30 }
 0x5e1   : > { %17090 = vmatprep.subr.bf16.mxu1 %v20568_v24 }
 0x5e4   : > { %17091 = vmatpush3.bf16.msra.mxu1 %v20568_v24 }
 0x5e5   : > { %17092 = vmatprep.subr.bf16.mxu1 %v20587_v41 }
 0x5e8   : > { %17093 = vmatpush3.bf16.msra.mxu1 %v20587_v41 }
 0x5e9   : > { %17094 = vmatprep.subr.bf16.mxu1 %v20599_v43 }
 0x5ec   : > { %17095 = vmatpush3.bf16.msra.mxu1 %v20599_v43 }
 0x672   : > { %v2373_v44 = vpop.f32.mrb[12].mxu0  ;;  %v2663_v48 = vpop.f32.mrb[4].mxu1 }
 0x673   : > { %v16948_v35 = vpop.f32.mrb[13].mxu0  ;;  %v16984_v30 = vpop.f32.mrb[5].mxu1 }
 0x674   : > { %v2376_v15 = vpop.f32.mrb[14].mxu0  ;;  %v2666_v53 = vpop.f32.mrb[6].mxu1 }
 0x675   : > { %v2380_v24 = vpack.c.bf16 %v2376_v15, %v2373_v44  ;;  %v2670_v46 = vpack.c.bf16 %v2666_v53, %v2663_v48  ;;  %v16949_v32 = vpop.f32.mrb[15].mxu0  ;;  %v16985_v41 = vpop.f32.mrb[7].mxu1  ;;  %v19008_v15 = vld [vmem:[%s22933_s3] sm:$0xff]   ;;  %v19012_v44 = vld [vmem:[%s22933_s3 + $0x30] sm:$0xff]  }
 0x682   : > { %v2452_v33 = vpop.f32.mrb[16].mxu0  ;;  %v2812_v8 = vpop.f32.mrb[8].mxu1 }
 0x683   : > { %v16960_v7 = vpop.f32.mrb[17].mxu0  ;;  %v17002_v43 = vpop.f32.mrb[9].mxu1 }
 0x684   : > { %v2455_v2 = vpop.f32.mrb[18].mxu0  ;;  %v2815_v6 = vpop.f32.mrb[10].mxu1 }
 0x685   : > { %v2459_v36 = vpack.c.bf16 %v2455_v2, %v2452_v33  ;;  %v2819_v3 = vpack.c.bf16 %v2815_v6, %v2812_v8  ;;  %v16961_v35 = vpop.f32.mrb[19].mxu0  ;;  %v17003_v30 = vpop.f32.mrb[11].mxu1  ;;  %v19009_v33 = vld [vmem:[%s22933_s3 + $0x8] sm:$0xff]   ;;  %v19010_v8 = vld [vmem:[%s22933_s3 + $0x20] sm:$0xff]  }
 0x686   : > { %v19014_v35 = vld [vmem:[%s22933_s3 + $0x40] sm:$0xff]  }
 0x687   : > { %16962 = vmatprep.subr.bf16.mxu0 %v2459_v36 }
 0x688   : > { %16963 = vmatpush3.bf16.msra.mxu0 %v2459_v36 }
 0x689   : > { %16968 = vmatprep.subr.bf16.mxu0 %v2380_v24 }
 0x68b   : > { %16965 = vmatmul.mubr.msk.bf16.vlgmr.msra.gmra.mrb[20].mxu0 %vm2475_vm14, %v19007_v61  ;;  %v19011_v61 = vld [vmem:[%s22933_s3 + $0x28] sm:$0xff]  }
 0x68c   : > { %16969 = vmatpush3.bf16.msra.mxu0 %v2380_v24  ;;  %16970 = vmatprep.mubr.msk.bf16.mxu0 %vm2475_vm14, %v19008_v15 }
 0x68d   : > { %16986 = vmatprep.subr.bf16.mxu0 %v2670_v46 }
 0x692   : > { %v3035_v32 = vpop.f32.mrb[12].mxu1 }
 0x693   : > { %v17026_v53 = vpop.f32.mrb[13].mxu1 }
 0x694   : > { %v3038_v7 = vpop.f32.mrb[14].mxu1 }
 0x695   : > { %v3042_v6 = vpack.c.bf16 %v3038_v7, %v3035_v32  ;;  %v17027_v2 = vpop.f32.mrb[15].mxu1  ;;  %v19016_v7 = vld [vmem:[%s22933_s3 + $0x50] sm:$0xff]  }
 0x696   : > { %v19017_v2 = vld [vmem:[%s22933_s3 + $0x58] sm:$0xff]  }
 0x697   : > { %16971 = vmatmul.mubr.msk.bf16.vlgmr.msra.gmra.mrb[20].mxu0 %vm2475_vm14, %v19009_v33  ;;  %v19015_v33 = vld [vmem:[%s22933_s3 + $0x48] sm:$0xff]  }
 0x698   : > { %16987 = vmatpush3.bf16.msra.mxu0 %v2670_v46  ;;  %16988 = vmatprep.mubr.msk.bf16.mxu0 %vm2475_vm14, %v19010_v8  ;;  %v19013_v46 = vld [vmem:[%s22933_s3 + $0x38] sm:$0xff]   ;;  %v22934_v8 = vmov 0.0  }
 0x699   : > { %17004 = vmatprep.subr.bf16.mxu0 %v2819_v3 }
 0x6a2   : > { %v3333_v48 = vpop.f32.mrb[16].mxu1 }
 0x6a3   : > { %16989 = vmatmul.mubr.msk.bf16.vlgmr.msra.gmra.mrb[20].mxu0 %vm2475_vm14, %v19011_v61  ;;  %v17062_v24 = vpop.f32.mrb[17].mxu1  ;;  %v20831_v61 = vld [vmem:[%s22932_s15 + $0xc0] sm:$0xff]  }
 0x6a4   : > { %17005 = vmatpush3.bf16.msra.mxu0 %v2819_v3  ;;  %v3336_v41 = vpop.f32.mrb[18].mxu1  ;;  %17006 = vmatprep.mubr.msk.bf16.mxu0 %vm2475_vm14, %v19012_v44  ;;  %v20836_v44 = vld [vmem:[%s22932_s15 + $0xc8] sm:$0xff]   ;;  %v19022_v24 = vld [vmem:[%s22933_s3 + $0x60] sm:$0xff]  }
 0x6a5   : > { %17010 = vmatprep.subr.bf16.mxu0 %v20678_v50  ;;  %v3340_v43 = vpack.c.bf16 %v3336_v41, %v3333_v48  ;;  %v17063_v36 = vpop.f32.mrb[19].mxu1  ;;  %v20848_v48 = vld [vmem:[%s22932_s15 + $0xd8] sm:$0xff]  }
 0x6af   : > { %17007 = vmatmul.mubr.msk.bf16.vlgmr.msra.gmra.mrb[20].mxu0 %vm2475_vm14, %v19013_v46 }
 0x6b0   : > { %17011 = vmatpush3.bf16.msra.mxu0 %v20678_v50  ;;  %17012 = vmatprep.mubr.msk.bf16.mxu0 %vm2475_vm14, %v19014_v35 }
 0x6b1   : > { %17028 = vmatprep.subr.bf16.mxu0 %v3042_v6 }
 0x6b2   : > { %v3482_v3 = vpop.f32.mrb[20].mxu1 }
 0x6b3   : > { %v17080_v30 = vpop.f32.mrb[21].mxu1 }
 0x6b4   : > { %v3485_v15 = vpop.f32.mrb[22].mxu1  ;;  %v19023_v30 = vld [vmem:[%s22933_s3 + $0x68] sm:$0xff]  }
 0x6b5   : > { %v3489_v32 = vpack.c.bf16 %v3485_v15, %v3482_v3  ;;  %v17081_v53 = vpop.f32.mrb[23].mxu1  ;;  %v19024_v15 = vld [vmem:[%s22933_s3 + $0x70] sm:$0xff]  }
 0x6b6   : > { %v19026_v53 = vld [vmem:[%s22933_s3 + $0x80] sm:$0xff]  }
 0x6bb   : > { %17013 = vmatmul.mubr.msk.bf16.vlgmr.msra.gmra.mrb[20].mxu0 %vm2475_vm14, %v19015_v33  ;;  %v19027_v33 = vld [vmem:[%s22933_s3 + $0x88] sm:$0xff]  }
 0x6bc   : > { %17029 = vmatpush3.bf16.msra.mxu0 %v3042_v6  ;;  %17030 = vmatprep.mubr.msk.bf16.mxu0 %vm2475_vm14, %v19016_v7  ;;  %v20843_v6 = vld [vmem:[%s22932_s15 + $0xd0] sm:$0xff]  }
 0x6bd   : > { %17034 = vmatprep.subr.bf16.mxu0 %v22934_v8 }
 0x6c7   : > { %17031 = vmatmul.mubr.msk.bf16.vlgmr.msra.gmra.mrb[20].mxu0 %vm2475_vm14, %v19017_v2 }
 0x6c8   : > { %17035 = vmatpush3.bf16.msra.mxu0 %v20831_v61  ;;  %17042 = vmatprep.mubr.msk.bf16.mxu0 %vm19677_vm12, %v22934_v8 }
 0x6c9   : > { %17036 = vmatprep.subr.bf16.mxu0 %v22934_v8 }
 0x6cc   : > { %17037 = vmatpush3.bf16.msra.mxu0 %v20836_v44 }
 0x6cd   : > { %17038 = vmatprep.subr.bf16.mxu0 %v22934_v8 }
 0x6d0   : > { %17039 = vmatpush3.bf16.msra.mxu0 %v20843_v6 }
 0x6d1   : > { %17040 = vmatprep.subr.bf16.mxu0 %v22934_v8 }
 0x6d4   : > { %17041 = vmatpush3.bf16.msra.mxu0 %v20848_v48 }
 0x6d7   : > { %17043 = vmatmul.mubr.msk.bf16.vlgmr.msra.gmra.mrb[24].mxu0 %vm2335_vm13, %v20678_v50  ;;  %v19025_v50 = vld [vmem:[%s22933_s3 + $0x78] sm:$0xff]   ;;  %s22940_s3 = sld [smem:[#allocation41_spill]] }
 0x6d8   : > { %17048 = vmatprep.mubr.msk.bf16.mxu0 %vm2475_vm14, %v19022_v24 }
 0x7aa   : > { %v3184_v41 = vpop.f32.mrb[24].mxu0 }
 0x7ab   : > { %v17044_v36 = vpop.f32.mrb[25].mxu0 }
 0x7ac   : > { %v3187_v46 = vpop.f32.mrb[26].mxu0 }
 0x7ad   : > { %v3191_v35 = vpack.c.bf16 %v3187_v46, %v3184_v41  ;;  %v17045_v3 = vpop.f32.mrb[27].mxu0 }
 0x7af   : > { %17046 = vmatprep.subr.bf16.mxu0 %v3191_v35 }
 0x7b0   : > { %17047 = vmatpush3.bf16.msra.mxu0 %v3191_v35 }
 0x7b1   : > { %17064 = vmatprep.subr.bf16.mxu0 %v3340_v43 }
 0x7b3   : > { %17049 = vmatmul.mubr.msk.bf16.vlgmr.msra.gmra.mrb[20].mxu0 %vm2475_vm14, %v19023_v30 }
 0x7b4   : > { %17065 = vmatpush3.bf16.msra.mxu0 %v3340_v43  ;;  %17066 = vmatprep.mubr.msk.bf16.mxu0 %vm2475_vm14, %v19024_v15  ;;  %v3571_v43 = vpop.permute.xlu0 %3570 }
 0x7b5   : > { %17082 = vmatprep.subr.bf16.mxu0 %v3489_v32 }
 0x7bf   : > { %17067 = vmatmul.mubr.msk.bf16.vlgmr.msra.gmra.mrb[20].mxu0 %vm2475_vm14, %v19025_v50 }
 0x7c0   : > { %17083 = vmatpush3.bf16.msra.mxu0 %v3489_v32  ;;  %17084 = vmatprep.mubr.msk.bf16.mxu0 %vm2475_vm14, %v19026_v53  ;;  %v3586_v32 = vpop.permute.xlu0 %3585 }
 0x7c1   : > { %17100 = vmatprep.subr.bf16.mxu0 %v20673_v60 }
 0x7c4   : > { %v3602_v7 = vpop.permute.xlu0 %3601 }
 0x7c8   : > { %v3618_v41 = vpop.permute.xlu0 %3617 }
 0x7cb   : > { %17085 = vmatmul.mubr.msk.bf16.vlgmr.msra.gmra.mrb[20].mxu0 %vm2475_vm14, %v19027_v33 }
 0x7cc   : > { %17101 = vmatpush3.bf16.msra.mxu0 %v20673_v60  ;;  %v3630_v26 = vpop.permute.xlu0 %3629 }
 0x7cd   : > { %17102 = vmatprep.subr.bf16.mxu0 %v20687_v19 }
 0x7d0   : > { %17103 = vmatpush3.bf16.msra.mxu0 %v20687_v19 }
 0x7d1   : > { %17104 = vmatprep.subr.bf16.mxu0 %v20701_v20 }
 0x7d4   : > { %17105 = vmatpush3.bf16.msra.mxu0 %v20701_v20 }
 0x7d5   : > { %17106 = vmatprep.subr.bf16.mxu0 %v20711_v27 }
 0x7d8   : > { %17107 = vmatpush3.bf16.msra.mxu0 %v20711_v27 }
 0x7d9   : > { %17128 = vmatprep.subr.bf16.mxu0 %v20557_v34 }
 0x89e   : > { %v17086_v2 = vpop.f32.mrb[20].mxu0 }
 0x89f   : > { %v3590_v60 = vadd.f32 %v17086_v2, %v20584_v10  ;;  %v3545_v24 = vpop.f32.mrb[21].mxu0 }
 0x8a0   : > { %v3588_v36 = vadd.f32 %v3571_v43, %v3545_v24  ;;  %v17087_v19 = vpop.f32.mrb[22].mxu0 }
 0x8a1   : > { %v3594_v46 = vmax.f32 %v3590_v60, 0.0  ;;  %v3591_v35 = vadd.f32 %v17087_v19, %v3586_v32  ;;  %v3548_v3 = vpop.f32.mrb[23].mxu0 }
 0x8a2   : > { %v3592_v20 = vmax.f32 %v3588_v36, 0.0  ;;  %v3589_v30 = vadd.f32 %v20580_v39, %v3548_v3 }
 0x8a3   : > { %v3614_v27 = vmul.f32 %v20615_v62, %v3594_v46  ;;  %v3595_v15 = vmax.f32 %v3591_v35, 0.0  ;;  %v19033_v46 = vld [vmem:[%s22935_s9 + $0x28] sm:$0xff]  }
 0x8a4   : > { %v3612_v50 = vmul.f32 %v20604_v59, %v3592_v20  ;;  %v3593_v53 = vmax.f32 %v3589_v30, 0.0  ;;  %v19030_v59 = vld [vmem:[%s22935_s9] sm:$0xff]   ;;  %v19034_v20 = vld [vmem:[%s22935_s9 + $0x30] sm:$0xff]  }
 0x8a5   : > { %v3615_v33 = vmul.f32 %v20618_v63, %v3595_v15  ;;  %v3634_v2 = vadd.f32 %v20626_v4, %v3614_v27  ;;  %v19035_v27 = vld [vmem:[%s22935_s9 + $0x38] sm:$0xff]   ;;  %v19036_v15 = vld [vmem:[%s22935_s9 + $0x40] sm:$0xff]  }
 0x8a6   : > { %v3613_v10 = vmul.f32 %v3602_v7, %v3593_v53  ;;  %v3632_v24 = vadd.f32 %v3618_v41, %v3612_v50 }
 0x8a7   : > { %v3635_v43 = vadd.f32 %v3630_v26, %v3615_v33  ;;  %v19028_v26 = vld [vmem:[%s22935_s9 + $0x10] sm:$0xff]  }
 0x8a8   : > { %v3633_v32 = vadd.f32 %v20623_v1, %v3613_v10 }
 0x8a9   : > { %v20882_v60 = vpack.c.bf16 %v3635_v43, %v3634_v2 }
 0x8aa   : > { %v20884_v36 = vpack.c.bf16 %v3633_v32, %v3632_v24  ;;  %v19037_v24 = vld [vmem:[%s22935_s9 + $0x48] sm:$0xff]   ;;  %v19038_v32 = vld [vmem:[%s22935_s9 + $0x50] sm:$0xff]  }
 0x8ac   : > { %17096 = vmatprep.mubr.msk.bf16.mxu1 %vm2335_vm13, %v20884_v36  ;;  %17108 = vmatprep.mubr.msk.bf16.mxu0 %vm2335_vm13, %v20884_v36 }
 0x8ad   : > { %17097 = vmatmul.mubr.msk.bf16.vlgmr.msra.gmra.mrb[24].mxu1 %vm2335_vm13, %v20882_v60  ;;  %17109 = vmatmul.mubr.msk.bf16.vlgmr.msra.gmra.mrb[28].mxu0 %vm2335_vm13, %v20882_v60 }
 0x8ae   : > { %17129 = vmatpush3.bf16.msra.mxu0 %v20557_v34  ;;  %17136 = vmatprep.mubr.msk.bf16.mxu0 %vm2335_vm13, %v20884_v36 }
 0x8af   : > { %17130 = vmatprep.subr.bf16.mxu0 %v20571_v37  ;;  %17116 = vmatprep.mubr.msk.bf16.mxu1 %vm3765_vm15, %v19028_v26 }
 0x8b2   : > { %17131 = vmatpush3.bf16.msra.mxu0 %v20571_v37 }
 0x8b3   : > { %17132 = vmatprep.subr.bf16.mxu0 %v20590_v42 }
 0x8b6   : > { %17133 = vmatpush3.bf16.msra.mxu0 %v20590_v42 }
 0x8b7   : > { %17134 = vmatprep.subr.bf16.mxu0 %v20602_v57 }
 0x8ba   : > { %17135 = vmatpush3.bf16.msra.mxu0 %v20602_v57 }
 0x8bb   : > { %17148 = vmatprep.subr.bf16.mxu0 %v20676_v56 }
 0x8bd   : > { %17137 = vmatmul.mubr.msk.bf16.vlgmr.msra.gmra.mrb[32].mxu0 %vm2335_vm13, %v20882_v60 }
 0x8be   : > { %17149 = vmatpush3.bf16.msra.mxu0 %v20676_v56  ;;  %17156 = vmatprep.mubr.msk.bf16.mxu0 %vm2335_vm13, %v20884_v36 }
 0x8bf   : > { %17150 = vmatprep.subr.bf16.mxu0 %v20690_v28 }
 0x8c2   : > { %17151 = vmatpush3.bf16.msra.mxu0 %v20690_v28 }
 0x8c3   : > { %17152 = vmatprep.subr.bf16.mxu0 %v20704_v29 }
 0x8c6   : > { %17153 = vmatpush3.bf16.msra.mxu0 %v20704_v29  ;;  %v19031_v29 = vld [vmem:[%s22935_s9 + $0x8] sm:$0xff]  }
 0x8c7   : > { %17154 = vmatprep.subr.bf16.mxu0 %v20714_v31 }
 0x8ca   : > { %17155 = vmatpush3.bf16.msra.mxu0 %v20714_v31  ;;  %v19032_v31 = vld [vmem:[%s22935_s9 + $0x20] sm:$0xff]  }
 0x8cb   : > { %17176 = vmatprep.subr.bf16.mxu0 %v20721_v54 }
 0x8cd   : > { %17157 = vmatmul.mubr.msk.bf16.vlgmr.msra.gmra.mrb[36].mxu0 %vm2335_vm13, %v20882_v60 }
 0x8ce   : > { %17177 = vmatpush3.bf16.msra.mxu0 %v20721_v54  ;;  %17184 = vmatprep.mubr.msk.bf16.mxu0 %vm2335_vm13, %v20884_v36 }
 0x8cf   : > { %17178 = vmatprep.subr.bf16.mxu0 %v20730_v18 }
 0x8d2   : > { %17179 = vmatpush3.bf16.msra.mxu0 %v20730_v18 }
 0x8d3   : > { %17180 = vmatprep.subr.bf16.mxu0 %v20737_v17 }
 0x8d6   : > { %17181 = vmatpush3.bf16.msra.mxu0 %v20737_v17 }
 0x8d7   : > { %17182 = vmatprep.subr.bf16.mxu0 %v20742_v0 }
 0x8da   : > { %17183 = vmatpush3.bf16.msra.mxu0 %v20742_v0 }
 0x8db   : > { %17216 = vmatprep.subr.bf16.mxu0 %v20747_v11 }
 0x8dd   : > { %17185 = vmatmul.mubr.msk.bf16.vlgmr.msra.gmra.mrb[40].mxu0 %vm2335_vm13, %v20882_v60 }
 0x8de   : > { %17217 = vmatpush3.bf16.msra.mxu0 %v20747_v11  ;;  %17224 = vmatprep.mubr.msk.bf16.mxu0 %vm2335_vm13, %v20884_v36 }
 0x8df   : > { %17218 = vmatprep.subr.bf16.mxu0 %v20754_v5 }
 0x8e2   : > { %17219 = vmatpush3.bf16.msra.mxu0 %v20754_v5 }
 0x8e3   : > { %17220 = vmatprep.subr.bf16.mxu0 %v20761_v58 }
 0x8e6   : > { %17221 = vmatpush3.bf16.msra.mxu0 %v20761_v58 }
 0x8e7   : > { %17222 = vmatprep.subr.bf16.mxu0 %v20766_v52 }
 0x8ea   : > { %17223 = vmatpush3.bf16.msra.mxu0 %v20766_v52 }
 0x8eb   : > { %17236 = vmatprep.subr.bf16.mxu0 %v20771_v45 }
 0x8ed   : > { %17225 = vmatmul.mubr.msk.bf16.vlgmr.msra.gmra.mrb[44].mxu0 %vm2335_vm13, %v20882_v60 }
 0x8ee   : > { %17237 = vmatpush3.bf16.msra.mxu0 %v20771_v45  ;;  %17244 = vmatprep.mubr.msk.bf16.mxu0 %vm2335_vm13, %v20884_v36 }
 0x8ef   : > { %17238 = vmatprep.subr.bf16.mxu0 %v20778_v38 }
 0x8f2   : > { %17239 = vmatpush3.bf16.msra.mxu0 %v20778_v38 }
 0x8f3   : > { %17240 = vmatprep.subr.bf16.mxu0 %v20785_v47 }
 0x8f6   : > { %17241 = vmatpush3.bf16.msra.mxu0 %v20785_v47 }
 0x8f7   : > { %17242 = vmatprep.subr.bf16.mxu0 %v20790_v40 }
 0x8fa   : > { %17243 = vmatpush3.bf16.msra.mxu0 %v20790_v40 }
 0x8fb   : > { %17256 = vmatprep.subr.bf16.mxu0 %v20721_v54 }
 0x8fd   : > { %17245 = vmatmul.mubr.msk.bf16.vlgmr.msra.gmra.mrb[48].mxu0 %vm2335_vm13, %v20882_v60 }
 0x8fe   : > { %17257 = vmatpush3.bf16.msra.mxu0 %v20721_v54 }
 0x8ff   : > { %17258 = vmatprep.subr.bf16.mxu0 %v20730_v18 }
 0x902   : > { %17259 = vmatpush3.bf16.msra.mxu0 %v20730_v18 }
 0x903   : > { %17260 = vmatprep.subr.bf16.mxu0 %v20737_v17 }
 0x906   : > { %17261 = vmatpush3.bf16.msra.mxu0 %v20737_v17 }
 0x907   : > { %17262 = vmatprep.subr.bf16.mxu0 %v20742_v0 }
 0x90a   : > { %17263 = vmatpush3.bf16.msra.mxu0 %v20742_v0  ;;  %v19029_v0 = vld [vmem:[%s22935_s9 + $0x18] sm:$0xff]  }
 0x980   : > { %v17098_v40 = vpop.f32.mrb[24].mxu1  ;;  %v17110_v45 = vpop.f32.mrb[28].mxu0 }
 0x981   : > { %v3678_v38 = vpop.f32.mrb[25].mxu1  ;;  %v3733_v47 = vpop.f32.mrb[29].mxu0 }
 0x982   : > { %v17099_v54 = vpop.f32.mrb[26].mxu1  ;;  %v17111_v18 = vpop.f32.mrb[30].mxu0 }
 0x983   : > { %v3694_v34 = vpack.c.bf16 %v17099_v54, %v17098_v40  ;;  %v3749_v37 = vpack.c.bf16 %v17111_v18, %v17110_v45  ;;  %v3681_v39 = vpop.f32.mrb[27].mxu1  ;;  %v3736_v17 = vpop.f32.mrb[31].mxu0  ;;  %v19039_v18 = vld [vmem:[%s22935_s9 + $0x58] sm:$0xff]  }
 0x984   : > { %v3693_v42 = vpack.c.bf16 %v3681_v39, %v3678_v38  ;;  %v3748_v57 = vpack.c.bf16 %v3736_v17, %v3733_v47 }
 0x986   : > { %17112 = vmatprep.subr.bf16.mxu1 %v3748_v57 }
 0x987   : > { %17113 = vmatpush3.bf16.msra.mxu1 %v3748_v57 }
 0x988   : > { %17114 = vmatprep.subr.bf16.mxu1 %v3749_v37 }
 0x98b   : > { %17115 = vmatpush3.bf16.msra.mxu1 %v3749_v37 }
 0x98c   : > { %17120 = vmatprep.subr.bf16.mxu1 %v3693_v42 }
 0x98e   : > { %17117 = vmatmul.mubr.msk.bf16.vlgmr.msra.gmra.mrb[28].mxu1 %vm3765_vm15, %v19029_v0 }
 0x98f   : > { %17121 = vmatpush3.bf16.msra.mxu1 %v3693_v42  ;;  %17124 = vmatprep.mubr.msk.bf16.mxu1 %vm3765_vm15, %v19030_v59 }
 0x990   : > { %v17138_v62 = vpop.f32.mrb[32].mxu0  ;;  %17122 = vmatprep.subr.bf16.mxu1 %v3694_v34 }
 0x991   : > { %v3920_v63 = vpop.f32.mrb[33].mxu0 }
 0x992   : > { %v17139_v1 = vpop.f32.mrb[34].mxu0 }
 0x993   : > { %v3936_v4 = vpack.c.bf16 %v17139_v1, %v17138_v62  ;;  %v3923_v56 = vpop.f32.mrb[35].mxu0  ;;  %17123 = vmatpush3.bf16.msra.mxu1 %v3694_v34  ;;  %v19044_v1 = vld [vmem:[%s22935_s9 + $0x80] sm:$0xff]  }
 0x994   : > { %v3935_v28 = vpack.c.bf16 %v3923_v56, %v3920_v63  ;;  %v19041_v63 = vld [vmem:[%s22935_s9 + $0x68] sm:$0xff]   ;;  %v4722_v56 = vpop.permute.xlu0 %4721 }
 0x996   : > { %17140 = vmatprep.subr.bf16.mxu1 %v3935_v28 }
 0x99a   : > { %17125 = vmatmul.mubr.msk.bf16.vlgmr.msra.gmra.mrb[28].mxu1 %vm3765_vm15, %v19031_v29 }
 0x99b   : > { %17141 = vmatpush3.bf16.msra.mxu1 %v3935_v28  ;;  %17144 = vmatprep.mubr.msk.bf16.mxu1 %vm3765_vm15, %v19032_v31  ;;  %v4744_v28 = vpop.permute.xlu0 %4743 }
 0x99c   : > { %17142 = vmatprep.subr.bf16.mxu1 %v3936_v4 }
 0x99f   : > { %17143 = vmatpush3.bf16.msra.mxu1 %v3936_v4  ;;  %v19045_v4 = vld [vmem:[%s22935_s9 + $0x88] sm:$0xff]  }
 0x9a0   : > { %v17158_v7 = vpop.f32.mrb[36].mxu0 }
 0x9a1   : > { %v4045_v41 = vpop.f32.mrb[37].mxu0 }
 0x9a2   : > { %v17159_v19 = vpop.f32.mrb[38].mxu0 }
 0x9a3   : > { %v4061_v35 = vpack.c.bf16 %v17159_v19, %v17158_v7  ;;  %v4048_v3 = vpop.f32.mrb[39].mxu0  ;;  %v4756_v19 = vpop.permute.xlu0 %4755 }
 0x9a4   : > { %v4060_v30 = vpack.c.bf16 %v4048_v3, %v4045_v41 }
 0x9a6   : > { %17160 = vmatprep.subr.bf16.mxu1 %v4060_v30  ;;  %17145 = vmatmul.mubr.msk.bf16.vlgmr.msra.gmra.mrb[28].mxu1 %vm3765_vm15, %v19033_v46 }
 0x9a7   : > { %17161 = vmatpush3.bf16.msra.mxu1 %v4060_v30  ;;  %17164 = vmatprep.mubr.msk.bf16.mxu1 %vm3765_vm15, %v19034_v20 }
 0x9a8   : > { %17162 = vmatprep.subr.bf16.mxu1 %v4061_v35 }
 0x9ab   : > { %17163 = vmatpush3.bf16.msra.mxu1 %v4061_v35 }
 0x9ac   : > { %17168 = vmatprep.subr.bf16.mxu1 %v20884_v36 }
 0x9b0   : > { %v17186_v50 = vpop.f32.mrb[40].mxu0 }
 0x9b1   : > { %v4244_v53 = vpop.f32.mrb[41].mxu0 }
 0x9b2   : > { %v17187_v33 = vpop.f32.mrb[42].mxu0  ;;  %17165 = vmatmul.mubr.msk.bf16.vlgmr.msra.gmra.mrb[28].mxu1 %vm3765_vm15, %v19035_v27 }
 0x9b3   : > { %v4260_v10 = vpack.c.bf16 %v17187_v33, %v17186_v50  ;;  %17169 = vmatpush3.bf16.msra.mxu1 %v20884_v36  ;;  %v4247_v2 = vpop.f32.mrb[43].mxu0  ;;  %17172 = vmatprep.mubr.msk.bf16.mxu1 %vm3765_vm15, %v19036_v15  ;;  %v4768_v50 = vpop.permute.xlu0 %4767 }
 0x9b4   : > { %v4259_v43 = vpack.c.bf16 %v4247_v2, %v4244_v53  ;;  %17170 = vmatprep.subr.bf16.mxu1 %v20882_v60 }
 0x9b7   : > { %17171 = vmatpush3.bf16.msra.mxu1 %v20882_v60 }
 0x9b8   : > { %17188 = vmatprep.subr.bf16.mxu1 %v4259_v43 }
 0x9be   : > { %17173 = vmatmul.mubr.msk.bf16.vlgmr.msra.gmra.mrb[28].mxu1 %vm3765_vm15, %v19037_v24 }
 0x9bf   : > { %17189 = vmatpush3.bf16.msra.mxu1 %v4259_v43  ;;  %17192 = vmatprep.mubr.msk.bf16.mxu1 %vm3765_vm15, %v19038_v32 }
 0x9c0   : > { %17190 = vmatprep.subr.bf16.mxu1 %v4260_v10  ;;  %v17226_v26 = vpop.f32.mrb[44].mxu0 }
 0x9c1   : > { %v4494_v40 = vpop.f32.mrb[45].mxu0 }
 0x9c2   : > { %v17227_v45 = vpop.f32.mrb[46].mxu0 }
 0x9c3   : > { %v4510_v38 = vpack.c.bf16 %v17227_v45, %v17226_v26  ;;  %17191 = vmatpush3.bf16.msra.mxu1 %v4260_v10  ;;  %v4497_v47 = vpop.f32.mrb[47].mxu0 }
 0x9c4   : > { %v4509_v54 = vpack.c.bf16 %v4497_v47, %v4494_v40  ;;  %17196 = vmatprep.subr.bf16.mxu1 %v20831_v61 }
 0x9ca   : > { %17193 = vmatmul.mubr.msk.bf16.vlgmr.msra.gmra.mrb[28].mxu1 %vm3765_vm15, %v19039_v18  ;;  %v19048_v18 = vld [vmem:[%s22936_s13 + $0x10] sm:$0xff]  }
 0x9cb   : > { %17197 = vmatpush3.bf16.msra.mxu1 %v20831_v61  ;;  %17204 = vmatprep.mubr.msk.bf16.mxu1 %vm2335_vm13, %v20884_v36  ;;  %v19040_v61 = vld [vmem:[%s22935_s9 + $0x60] sm:$0xff]  }
 0x9cc   : > { %17198 = vmatprep.subr.bf16.mxu1 %v20836_v44 }
 0x9cf   : > { %17199 = vmatpush3.bf16.msra.mxu1 %v20836_v44 }
 0x9d0   : > { %v17246_v34 = vpop.f32.mrb[48].mxu0  ;;  %17200 = vmatprep.subr.bf16.mxu1 %v20843_v6 }
 0x9d1   : > { %v4619_v37 = vpop.f32.mrb[49].mxu0 }
 0x9d2   : > { %v17247_v39 = vpop.f32.mrb[50].mxu0 }
 0x9d3   : > { %v4635_v17 = vpack.c.bf16 %v17247_v39, %v17246_v34  ;;  %17201 = vmatpush3.bf16.msra.mxu1 %v20843_v6  ;;  %v4622_v42 = vpop.f32.mrb[51].mxu0  ;;  %v19049_v34 = vld [vmem:[%s22936_s13 + $0x18] sm:$0xff]  }
 0x9d4   : > { %v4634_v57 = vpack.c.bf16 %v4622_v42, %v4619_v37  ;;  %17202 = vmatprep.subr.bf16.mxu1 %v20848_v48 }
 0x9d7   : > { %17203 = vmatpush3.bf16.msra.mxu1 %v20848_v48  ;;  %v19042_v48 = vld [vmem:[%s22935_s9 + $0x70] sm:$0xff]  }
 0x9da   : > { %17205 = vmatmul.mubr.msk.bf16.vlgmr.msra.gmra.mrb[32].mxu1 %vm2335_vm13, %v20882_v60  ;;  %v19043_v60 = vld [vmem:[%s22935_s9 + $0x78] sm:$0xff]   ;;  %s22958_s9 = smov 113  }
 0x9db   : > { %17212 = vmatprep.mubr.msk.bf16.mxu1 %vm3765_vm15, %v19040_v61 }
 0xaad   : > { %v17206_v44 = vpop.f32.mrb[32].mxu1 }
 0xaae   : > { %v4369_v36 = vpop.f32.mrb[33].mxu1 }
 0xaaf   : > { %v17207_v0 = vpop.f32.mrb[34].mxu1 }
 0xab0   : > { %v4385_v59 = vpack.c.bf16 %v17207_v0, %v17206_v44  ;;  %v4372_v6 = vpop.f32.mrb[35].mxu1 }
 0xab1   : > { %v4384_v62 = vpack.c.bf16 %v4372_v6, %v4369_v36  ;;  %v19050_v6 = vld [vmem:[#allocation7] sm:$0xff]  }
 0xab3   : > { %17208 = vmatprep.subr.bf16.mxu1 %v4384_v62 }
 0xab4   : > { %17209 = vmatpush3.bf16.msra.mxu1 %v4384_v62  ;;  %v21049_v62 = vld [vmem:[#allocation7 + $0x8] sm:$0xff]  }
 0xab5   : > { %17210 = vmatprep.subr.bf16.mxu1 %v4385_v59 }
 0xab8   : > { %17211 = vmatpush3.bf16.msra.mxu1 %v4385_v59 }
 0xab9   : > { %17228 = vmatprep.subr.bf16.mxu1 %v4509_v54 }
 0xabb   : > { %17213 = vmatmul.mubr.msk.bf16.vlgmr.msra.gmra.mrb[28].mxu1 %vm3765_vm15, %v19041_v63 }
 0xabc   : > { %17229 = vmatpush3.bf16.msra.mxu1 %v4509_v54  ;;  %17232 = vmatprep.mubr.msk.bf16.mxu1 %vm3765_vm15, %v19042_v48 }
 0xabd   : > { %17230 = vmatprep.subr.bf16.mxu1 %v4510_v38 }
 0xac0   : > { %17231 = vmatpush3.bf16.msra.mxu1 %v4510_v38 }
 0xac1   : > { %17248 = vmatprep.subr.bf16.mxu1 %v4634_v57 }
 0xac7   : > { %17233 = vmatmul.mubr.msk.bf16.vlgmr.msra.gmra.mrb[28].mxu1 %vm3765_vm15, %v19043_v60 }
 0xac8   : > { %17249 = vmatpush3.bf16.msra.mxu1 %v4634_v57  ;;  %17252 = vmatprep.mubr.msk.bf16.mxu1 %vm3765_vm15, %v19044_v1 }
 0xac9   : > { %17250 = vmatprep.subr.bf16.mxu1 %v4635_v17 }
 0xacc   : > { %17251 = vmatpush3.bf16.msra.mxu1 %v4635_v17 }
 0xacd   : > { %17268 = vmatprep.subr.bf16.mxu1 %v20747_v11 }
 0xad3   : > { %17253 = vmatmul.mubr.msk.bf16.vlgmr.msra.gmra.mrb[28].mxu1 %vm3765_vm15, %v19045_v4 }
 0xad4   : > { %17269 = vmatpush3.bf16.msra.mxu1 %v20747_v11 }
 0xad5   : > { %17270 = vmatprep.subr.bf16.mxu1 %v20754_v5 }
 0xad8   : > { %17271 = vmatpush3.bf16.msra.mxu1 %v20754_v5 }
 0xad9   : > { %17272 = vmatprep.subr.bf16.mxu1 %v20761_v58 }
 0xadc   : > { %17273 = vmatpush3.bf16.msra.mxu1 %v20761_v58 }
 0xadd   : > { %17274 = vmatprep.subr.bf16.mxu1 %v20766_v52 }
 0xae0   : > { %17275 = vmatpush3.bf16.msra.mxu1 %v20766_v52 }
 0xae1   : > { %17292 = vmatprep.subr.bf16.mxu1 %v19050_v6 }
 0xba6   : > { %v17254_v29 = vpop.f32.mrb[28].mxu1 }
 0xba7   : > { %v4736_v31 = vadd.f32 %v17254_v29, %v20634_v12  ;;  %v4691_v7 = vpop.f32.mrb[29].mxu1  ;;  %v21066_v29 = vld [vmem:[#allocation7 + $0x18] sm:$0xff]  }
 0xba8   : > { %v4734_v11 = vadd.f32 %v20630_v9, %v4691_v7  ;;  %v17255_v41 = vpop.f32.mrb[30].mxu1  ;;  %v21082_v7 = vld [vmem:[#allocation7 + $0x30] sm:$0xff]  }
 0xba9   : > { %v4740_v46 = vmax.f32 %v4736_v31, 0.0  ;;  %v4737_v5 = vadd.f32 %v17255_v41, %v20638_v13  ;;  %v4694_v35 = vpop.f32.mrb[31].mxu1  ;;  %v21074_v31 = vld [vmem:[#allocation7 + $0x28] sm:$0xff]   ;;  %v21098_v41 = vld [vmem:[#allocation7 + $0x40] sm:$0xff]  }
 0xbaa   : > { %v4738_v3 = vmax.f32 %v4734_v11, 0.0  ;;  %v4735_v58 = vadd.f32 %v4722_v56, %v4694_v35  ;;  %v21090_v11 = vld [vmem:[#allocation7 + $0x38] sm:$0xff]  }
 0xbab   : > { %v4741_v20 = vmax.f32 %v4737_v5, 0.0  ;;  %v4760_v27 = vmul.f32 %v20647_v49, %v4740_v46  ;;  %v19046_v49 = vld [vmem:[%s22936_s13] sm:$0xff]  }
 0xbac   : > { %v4758_v52 = vmul.f32 %v4744_v28, %v4738_v3  ;;  %v4739_v30 = vmax.f32 %v4735_v58, 0.0  ;;  %17280 = vmatprep.subr.bf16.mxu0 %v19046_v49  ;;  %v21056_v28 = vld [vmem:[#allocation7 + $0x10] sm:$0xff]  }
 0xbad   : > { %v4761_v15 = vmul.f32 %v4756_v19, %v4741_v20  ;;  %v4780_v13 = vadd.f32 %v20654_v55, %v4760_v27  ;;  %v19058_v19 = vld [vmem:[%s22937_s0 + $0x20] sm:$0xff]  }
 0xbae   : > { %v4759_v12 = vmul.f32 %v20642_v23, %v4739_v30  ;;  %v4778_v53 = vadd.f32 %v20650_v51, %v4758_v52  ;;  %v19047_v23 = vld [vmem:[%s22936_s13 + $0x8] sm:$0xff]   ;;  %s22960_s13 = sld [smem:[#allocation49_spill]] }
 0xbaf   : > { %v4781_v9 = vadd.f32 %v20660_v14, %v4761_v15 }
 0xbb0   : > { %v4779_v33 = vadd.f32 %v4768_v50, %v4759_v12 }
 0xbb1   : > { %v21031_v2 = vpack.c.bf16 %v4781_v9, %v4780_v13 }
 0xbb2   : > { %v21029_v10 = vpack.c.bf16 %v4779_v33, %v4778_v53 }
 0xbb4   : > { %17264 = vmatprep.mubr.msk.bf16.mxu0 %vm2335_vm13, %v21029_v10 }
 0xbb5   : > { %17265 = vmatmul.mubr.msk.bf16.vlgmr.msra.gmra.mrb[52].mxu0 %vm2335_vm13, %v21031_v2 }
 0xbb6   : > { %17281 = vmatpush3.bf16.msra.mxu0 %v19046_v49 }
 0xbb7   : > { %17282 = vmatprep.subr.bf16.mxu0 %v19047_v23 }
 0xbba   : > { %17283 = vmatpush3.bf16.msra.mxu0 %v19047_v23 }
 0xbbb   : > { %17284 = vmatprep.subr.bf16.mxu0 %v19048_v18 }
 0xbbe   : > { %17285 = vmatpush3.bf16.msra.mxu0 %v19048_v18 }
 0xbbf   : > { %17286 = vmatprep.subr.bf16.mxu0 %v19049_v34 }
 0xbc2   : > { %17287 = vmatpush3.bf16.msra.mxu0 %v19049_v34 }
 0xc88   : > { %v17266_v51 = vpop.f32.mrb[52].mxu0 }
 0xc89   : > { %v4824_v14 = vpop.f32.mrb[53].mxu0  ;;  %v4841_v38 = vmax.f32 %v4780_v13, %v17266_v51  ;;  %v19059_v13 = vld [vmem:[%s22937_s0 + $0x28] sm:$0xff]  }
 0xc8a   : > { %v17267_v55 = vpop.f32.mrb[54].mxu0  ;;  %v4839_v26 = vmax.f32 %v4778_v53, %v4824_v14 }
 0xc8b   : > { %v4842_v43 = vmax.f32 %v4781_v9, %v17267_v55  ;;  %v21039_v24 = vpack.c.bf16 %v17267_v55, %v17266_v51  ;;  %v4827_v32 = vpop.f32.mrb[55].mxu0  ;;  %v19060_v51 = vld [vmem:[%s22937_s0 + $0x30] sm:$0xff]  }
 0xc8c   : > { %v4840_v40 = vmax.f32 %v4779_v33, %v4827_v32  ;;  %v21041_v45 = vpack.c.bf16 %v4827_v32, %v4824_v14 }
 0xc8d   : > { %v4844_v54 = vpack.c.bf16 %v4842_v43, %v4841_v38 }
 0xc8e   : > { %v4843_v47 = vpack.c.bf16 %v4840_v40, %v4839_v26 }
 0xc90   : > { %17276 = vmatprep.mubr.msk.bf16.mxu1 %vm2335_vm13, %v4843_v47  ;;  %v19062_v47 = vld [vmem:[%s22937_s0] sm:$0xff]  }
 0xc91   : > { %17277 = vmatmul.mubr.msk.bf16.vlgmr.msra.gmra.mrb[36].mxu1 %vm2335_vm13, %v4844_v54 }
 0xc92   : > { %17293 = vmatpush3.bf16.msra.mxu1 %v19050_v6 }
 0xc93   : > { %17298 = vmatprep.subr.bf16.mxu1 %v21049_v62 }
 0xd64   : > { %v17278_v37 = vpop.f32.mrb[36].mxu1 }
 0xd65   : > { %v4885_v39 = vpop.f32.mrb[37].mxu1  ;;  %v4902_v42 = vmax.f32 %v4841_v38, %v17278_v37 }
 0xd66   : > { %v17279_v17 = vpop.f32.mrb[38].mxu1  ;;  %v4900_v44 = vmax.f32 %v4839_v26, %v4885_v39  ;;  %v19061_v26 = vld [vmem:[%s22937_s0 + $0x38] sm:$0xff]   ;;  %v19063_v39 = vld [vmem:[%s22937_s0 + $0x8] sm:$0xff]  }
 0xd67   : > { %v4903_v57 = vmax.f32 %v4842_v43, %v17279_v17  ;;  %v4888_v61 = vpop.f32.mrb[39].mxu1 }
 0xd68   : > { %v4901_v36 = vmax.f32 %v4840_v40, %v4888_v61 }
 0xd69   : > { %v4905_v0 = vpack.c.bf16 %v4903_v57, %v4902_v42  ;;  %v19064_v57 = vld [vmem:[%s22937_s0 + $0x10] sm:$0xff]  }
 0xd6a   : > { %v4904_v59 = vpack.c.bf16 %v4901_v36, %v4900_v44 }
 0xd6c   : > { %17288 = vmatprep.mubr.msk.bf16.mxu0 %vm2335_vm13, %v4904_v59  ;;  %v19065_v59 = vld [vmem:[%s22937_s0 + $0x18] sm:$0xff]  }
 0xd6d   : > { %17289 = vmatmul.mubr.msk.bf16.vlgmr.msra.gmra.mrb[56].mxu0 %vm2335_vm13, %v4905_v0 }
 0xd6e   : > { %17308 = vmatprep.mubr.msk.bf16.mxu0 %vm3765_vm15, %v19058_v19 }
 0xe40   : > { %v17290_v63 = vpop.f32.mrb[56].mxu0 }
 0xe41   : > { %v4978_v48 = vpop.f32.mrb[57].mxu0 }
 0xe42   : > { %v17291_v60 = vpop.f32.mrb[58].mxu0 }
 0xe43   : > { %v21052_v1 = vpack.c.bf16 %v17291_v60, %v17290_v63  ;;  %v4981_v4 = vpop.f32.mrb[59].mxu0 }
 0xe44   : > { %v21054_v56 = vpack.c.bf16 %v4981_v4, %v4978_v48  ;;  %v19066_v48 = vld [vmem:[%s22937_s0 + $0x40] sm:$0xff]  }
 0xe46   : > { %17294 = vmatprep.mubr.msk.bf16.mxu1 %vm2475_vm14, %v21054_v56 }
 0xe47   : > { %17295 = vmatmul.mubr.msk.bf16.vlgmr.msra.gmra.mrb[40].mxu1 %vm2475_vm14, %v21052_v1 }
 0xe48   : > { %17300 = vmatprep.mubr.msk.bf16.mxu1 %vm2475_vm14, %v21054_v56  ;;  %17299 = vmatpush3.bf16.msra.mxu1 %v21049_v62 }
 0xe49   : > { %17328 = vmatprep.subr.bf16.mxu1 %v21056_v28 }
 0xe4f   : > { %17301 = vmatmul.mubr.msk.bf16.vlgmr.msra.gmra.mrb[44].mxu1 %vm2475_vm14, %v21052_v1 }
 0xe50   : > { %17330 = vmatprep.mubr.msk.bf16.mxu1 %vm2475_vm14, %v21054_v56  ;;  %17329 = vmatpush3.bf16.msra.mxu1 %v21056_v28 }
 0xe51   : > { %17346 = vmatprep.subr.bf16.mxu1 %v21066_v29 }
 0xe57   : > { %17331 = vmatmul.mubr.msk.bf16.vlgmr.msra.gmra.mrb[48].mxu1 %vm2475_vm14, %v21052_v1 }
 0xe58   : > { %17348 = vmatprep.mubr.msk.bf16.mxu1 %vm2475_vm14, %v21054_v56  ;;  %17347 = vmatpush3.bf16.msra.mxu1 %v21066_v29 }
 0xe59   : > { %17376 = vmatprep.subr.bf16.mxu1 %v21074_v31 }
 0xe5f   : > { %17349 = vmatmul.mubr.msk.bf16.vlgmr.msra.gmra.mrb[52].mxu1 %vm2475_vm14, %v21052_v1 }
 0xe60   : > { %17378 = vmatprep.mubr.msk.bf16.mxu1 %vm2475_vm14, %v21054_v56  ;;  %17377 = vmatpush3.bf16.msra.mxu1 %v21074_v31 }
 0xe61   : > { %17394 = vmatprep.subr.bf16.mxu1 %v21082_v7 }
 0xe67   : > { %17379 = vmatmul.mubr.msk.bf16.vlgmr.msra.gmra.mrb[56].mxu1 %vm2475_vm14, %v21052_v1 }
 0xe68   : > { %17396 = vmatprep.mubr.msk.bf16.mxu1 %vm2475_vm14, %v21054_v56  ;;  %17395 = vmatpush3.bf16.msra.mxu1 %v21082_v7 }
 0xe69   : > { %17412 = vmatprep.subr.bf16.mxu1 %v21090_v11 }
 0xe6f   : > { %17397 = vmatmul.mubr.msk.bf16.vlgmr.msra.gmra.mrb[60].mxu1 %vm2475_vm14, %v21052_v1 }
 0xe70   : > { %17414 = vmatprep.mubr.msk.bf16.mxu1 %vm2475_vm14, %v21054_v56  ;;  %17413 = vmatpush3.bf16.msra.mxu1 %v21090_v11 }
 0xe71   : > { %17430 = vmatprep.subr.bf16.mxu1 %v21098_v41 }
 0xe77   : > { %17415 = vmatmul.mubr.msk.bf16.vlgmr.msra.gmra.mrb[64].mxu1 %vm2475_vm14, %v21052_v1 }
 0xe78   : > { %17432 = vmatprep.mubr.msk.bf16.mxu1 %vm2475_vm14, %v21054_v56  ;;  %17431 = vmatpush3.bf16.msra.mxu1 %v21098_v41 }
 0xe79   : > { %17448 = vmatprep.subr.bf16.mxu1 %v19050_v6 }
 0xe7f   : > { %17433 = vmatmul.mubr.msk.bf16.vlgmr.msra.gmra.mrb[68].mxu1 %vm2475_vm14, %v21052_v1 }
 0xe80   : > { %17449 = vmatpush3.bf16.msra.mxu1 %v19050_v6 }
 0xe81   : > { %17458 = vmatprep.subr.bf16.mxu1 %v21049_v62 }
 0xf1a   : > { %v17296_v46 = vpop.f32.mrb[40].mxu1 }
 0xf1b   : > { %v5043_v5 = vpop.f32.mrb[41].mxu1 }
 0xf1c   : > { %v17297_v35 = vpop.f32.mrb[42].mxu1 }
 0xf1d   : > { %v5059_v3 = vpack.c.bf16 %v17297_v35, %v17296_v46  ;;  %v5046_v58 = vpop.f32.mrb[43].mxu1 }
 0xf1e   : > { %v5058_v20 = vpack.c.bf16 %v5046_v58, %v5043_v5  ;;  %v19067_v5 = vld [vmem:[%s22937_s0 + $0x48] sm:$0xff]   ;;  %v19068_v58 = vld [vmem:[%s22937_s0 + $0x50] sm:$0xff]  }
 0xf22   : > { %v17302_v52 = vpop.f32.mrb[44].mxu1 }
 0xf23   : > { %v5111_v30 = vpop.f32.mrb[45].mxu1 }
 0xf24   : > { %v17303_v27 = vpop.f32.mrb[46].mxu1 }
 0xf25   : > { %v5127_v15 = vpack.c.bf16 %v17303_v27, %v17302_v52  ;;  %v5114_v12 = vpop.f32.mrb[47].mxu1 }
 0xf26   : > { %v5126_v50 = vpack.c.bf16 %v5114_v12, %v5111_v30 }
 0xf28   : > { %17304 = vmatprep.subr.bf16.mxu0 %v5126_v50 }
 0xf29   : > { %17305 = vmatpush3.bf16.msra.mxu0 %v5126_v50 }
 0xf2a   : > { %17306 = vmatprep.subr.bf16.mxu0 %v5127_v15  ;;  %v17332_v9 = vpop.f32.mrb[48].mxu1 }
 0xf2b   : > { %v5374_v53 = vpop.f32.mrb[49].mxu1 }
 0xf2c   : > { %v17333_v33 = vpop.f32.mrb[50].mxu1 }
 0xf2d   : > { %v5390_v49 = vpack.c.bf16 %v17333_v33, %v17332_v9  ;;  %17307 = vmatpush3.bf16.msra.mxu0 %v5127_v15  ;;  %v5377_v23 = vpop.f32.mrb[51].mxu1  ;;  %v19069_v15 = vld [vmem:[%s22937_s0 + $0x58] sm:$0xff]   ;;  %v19070_v9 = vld [vmem:[%s22937_s0 + $0x60] sm:$0xff]   ;;  %v19071_v33 = vld [vmem:[%s22937_s0 + $0x68] sm:$0xff]  }
 0xf2e   : > { %v5389_v14 = vpack.c.bf16 %v5377_v23, %v5374_v53  ;;  %17316 = vmatprep.subr.bf16.mxu0 %v5058_v20  ;;  %v19074_v23 = vld [vmem:[%s22937_s0 + $0x80] sm:$0xff]  }
 0xf30   : > { %17309 = vmatmul.mubr.msk.bf16.vlgmr.msra.gmra.mrb[60].mxu0 %vm3765_vm15, %v19059_v13  ;;  %v19072_v13 = vld [vmem:[%s22937_s0 + $0x70] sm:$0xff]  }
 0xf31   : > { %17317 = vmatpush3.bf16.msra.mxu0 %v5058_v20  ;;  %17312 = vmatprep.mubr.msk.bf16.mxu0 %vm3765_vm15, %v19060_v51  ;;  %v19075_v51 = vld [vmem:[%s22937_s0 + $0x88] sm:$0xff]  }
 0xf32   : > { %17318 = vmatprep.subr.bf16.mxu0 %v5059_v3  ;;  %v17350_v55 = vpop.f32.mrb[52].mxu1 }
 0xf33   : > { %v5548_v43 = vpop.f32.mrb[53].mxu1 }
 0xf34   : > { %v17351_v32 = vpop.f32.mrb[54].mxu1 }
 0xf35   : > { %v5564_v40 = vpack.c.bf16 %v17351_v32, %v17350_v55  ;;  %17319 = vmatpush3.bf16.msra.mxu0 %v5059_v3  ;;  %v5551_v38 = vpop.f32.mrb[55].mxu1  ;;  %v19079_v55 = vld [vmem:[%s22937_s0 + $0xa8] sm:$0xff]   ;;  %v19081_v32 = vld [vmem:[%s22937_s0 + $0xb8] sm:$0xff]  }
 0xf36   : > { %v5563_v54 = vpack.c.bf16 %v5551_v38, %v5548_v43  ;;  %17334 = vmatprep.subr.bf16.mxu0 %v5389_v14  ;;  %v19080_v43 = vld [vmem:[%s22937_s0 + $0xb0] sm:$0xff]  }
 0xf37   : > { %v19084_v38 = vld [vmem:[%s22937_s0 + $0xd0] sm:$0xff]  }
 0xf38   : > { %17313 = vmatmul.mubr.msk.bf16.gmra.mrb[64].mxu0 %vm3765_vm15, %v19061_v26  ;;  %v19082_v26 = vld [vmem:[%s22937_s0 + $0xc0] sm:$0xff]  }
 0xf39   : > { %17320 = vmatprep.mubr.msk.bf16.mxu0 %vm3765_vm15, %v19062_v47  ;;  %v19085_v47 = vld [vmem:[%s22937_s0 + $0xd8] sm:$0xff]  }
 0xf3a   : > { %v17380_v18 = vpop.f32.mrb[56].mxu1 }
 0xf3b   : > { %v5836_v34 = vpop.f32.mrb[57].mxu1 }
 0xf3c   : > { %v17381_v37 = vpop.f32.mrb[58].mxu1 }
 0xf3d   : > { %v5852_v17 = vpack.c.bf16 %v17381_v37, %v17380_v18  ;;  %v5839_v42 = vpop.f32.mrb[59].mxu1  ;;  %v19087_v18 = vld [vmem:[%s22937_s0 + $0xe8] sm:$0xff]   ;;  %v19089_v37 = vld [vmem:[%s22937_s0 + $0xf8] sm:$0xff]  }
 0xf3e   : > { %v5851_v61 = vpack.c.bf16 %v5839_v42, %v5836_v34  ;;  %v19088_v34 = vld [vmem:[%s22937_s0 + $0xf0] sm:$0xff]  }
 0xf3f   : > { %v19092_v42 = vld [vmem:[%s22937_s0 + $0x110] sm:$0xff]  }
 0xf40   : > { %17321 = vmatmul.mubr.msk.bf16.vlgmr.msra.gmra.mrb[60].mxu0 %vm3765_vm15, %v19063_v39  ;;  %v19090_v39 = vld [vmem:[%s22937_s0 + $0x100] sm:$0xff]  }
 0xf41   : > { %17335 = vmatpush3.bf16.msra.mxu0 %v5389_v14  ;;  %17324 = vmatprep.mubr.msk.bf16.mxu0 %vm3765_vm15, %v19064_v57  ;;  %v19076_v14 = vld [vmem:[%s22937_s0 + $0x90] sm:$0xff]   ;;  %v19093_v57 = vld [vmem:[%s22937_s0 + $0x118] sm:$0xff]  }
 0xf42   : > { %17336 = vmatprep.subr.bf16.mxu0 %v5390_v49  ;;  %v17398_v44 = vpop.f32.mrb[60].mxu1 }
 0xf43   : > { %v6010_v36 = vpop.f32.mrb[61].mxu1 }
 0xf44   : > { %v17399_v0 = vpop.f32.mrb[62].mxu1 }
 0xf45   : > { %17337 = vmatpush3.bf16.msra.mxu0 %v5390_v49  ;;  %v6026_v6 = vpack.c.bf16 %v17399_v0, %v17398_v44  ;;  %v6013_v63 = vpop.f32.mrb[63].mxu1  ;;  %v19073_v49 = vld [vmem:[%s22937_s0 + $0x78] sm:$0xff]  }
 0xf46   : > { %17352 = vmatprep.subr.bf16.mxu0 %v5563_v54  ;;  %v6025_v60 = vpack.c.bf16 %v6013_v63, %v6010_v36 }
 0xf48   : > { %17325 = vmatmul.mubr.msk.bf16.gmra.mrb[64].mxu0 %vm3765_vm15, %v19065_v59 }
 0xf49   : > { %17338 = vmatprep.mubr.msk.bf16.mxu0 %vm3765_vm15, %v19066_v48 }
 0xf4a   : > { %v17416_v4 = vpop.f32.mrb[64].mxu1 }
 0xf4b   : > { %v6184_v19 = vpop.f32.mrb[65].mxu1 }
 0xf4c   : > { %v17417_v46 = vpop.f32.mrb[66].mxu1 }
 0xf4d   : > { %v6200_v35 = vpack.c.bf16 %v17417_v46, %v17416_v4  ;;  %v6187_v3 = vpop.f32.mrb[67].mxu1 }
 0xf4e   : > { %v6199_v20 = vpack.c.bf16 %v6187_v3, %v6184_v19 }
 0xf50   : > { %17339 = vmatmul.mubr.msk.bf16.vlgmr.msra.gmra.mrb[60].mxu0 %vm3765_vm15, %v19067_v5 }
 0xf51   : > { %17353 = vmatpush3.bf16.msra.mxu0 %v5563_v54  ;;  %17342 = vmatprep.mubr.msk.bf16.mxu0 %vm3765_vm15, %v19068_v58  ;;  %v19086_v54 = vld [vmem:[%s22937_s0 + $0xe0] sm:$0xff]  }
 0xf52   : > { %17354 = vmatprep.subr.bf16.mxu0 %v5564_v40  ;;  %v17434_v52 = vpop.f32.mrb[68].mxu1 }
 0xf53   : > { %v6358_v30 = vpop.f32.mrb[69].mxu1 }
 0xf54   : > { %v17435_v27 = vpop.f32.mrb[70].mxu1 }
 0xf55   : > { %17355 = vmatpush3.bf16.msra.mxu0 %v5564_v40  ;;  %v6374_v12 = vpack.c.bf16 %v17435_v27, %v17434_v52  ;;  %v6361_v50 = vpop.f32.mrb[71].mxu1  ;;  %v19083_v40 = vld [vmem:[%s22937_s0 + $0xc8] sm:$0xff]  }
 0xf56   : > { %17364 = vmatprep.subr.bf16.mxu0 %v21054_v56  ;;  %v6373_v53 = vpack.c.bf16 %v6361_v50, %v6358_v30 }
 0xf58   : > { %17343 = vmatmul.mubr.msk.bf16.gmra.mrb[64].mxu0 %vm3765_vm15, %v19069_v15 }
 0xf59   : > { %17356 = vmatprep.mubr.msk.bf16.mxu0 %vm3765_vm15, %v19070_v9 }
 0xf60   : > { %17357 = vmatmul.mubr.msk.bf16.vlgmr.msra.gmra.mrb[60].mxu0 %vm3765_vm15, %v19071_v33 }
 0xf61   : > { %17365 = vmatpush3.bf16.msra.mxu0 %v21054_v56  ;;  %17360 = vmatprep.mubr.msk.bf16.mxu0 %vm3765_vm15, %v19072_v13  ;;  %v19077_v56 = vld [vmem:[%s22937_s0 + $0x98] sm:$0xff]  }
 0xf62   : > { %17366 = vmatprep.subr.bf16.mxu0 %v21052_v1 }
 0xf65   : > { %17367 = vmatpush3.bf16.msra.mxu0 %v21052_v1  ;;  %v19078_v1 = vld [vmem:[%s22937_s0 + $0xa0] sm:$0xff]  }
 0xf66   : > { %17382 = vmatprep.subr.bf16.mxu0 %v5851_v61 }
 0xf68   : > { %17361 = vmatmul.mubr.msk.bf16.gmra.mrb[64].mxu0 %vm3765_vm15, %v19073_v49 }
 0xf69   : > { %17368 = vmatprep.mubr.msk.bf16.mxu0 %vm3765_vm15, %v19074_v23 }
 0xf70   : > { %17369 = vmatmul.mubr.msk.bf16.vlgmr.msra.gmra.mrb[60].mxu0 %vm3765_vm15, %v19075_v51 }
 0xf71   : > { %17383 = vmatpush3.bf16.msra.mxu0 %v5851_v61  ;;  %17372 = vmatprep.mubr.msk.bf16.mxu0 %vm3765_vm15, %v19076_v14  ;;  %v6555_v61 = vpop.permute.xlu1 %6554 }
 0xf72   : > { %17384 = vmatprep.subr.bf16.mxu0 %v5852_v17 }
 0xf75   : > { %17385 = vmatpush3.bf16.msra.mxu0 %v5852_v17  ;;  %v19091_v17 = vld [vmem:[%s22937_s0 + $0x108] sm:$0xff]   ;;  %v6563_v44 = vpop.permute.xlu1 %6562  ;;  %s22938_s0 = sld [smem:[#allocation38_spill]] }
 0xf76   : > { %17400 = vmatprep.subr.bf16.mxu0 %v6025_v60 }
 0xf78   : > { %17373 = vmatmul.mubr.msk.bf16.gmra.mrb[64].mxu0 %vm3765_vm15, %v19077_v56 }
 0xf79   : > { %17386 = vmatprep.mubr.msk.bf16.mxu0 %vm3765_vm15, %v19078_v1  ;;  %v6567_v36 = vpop.permute.xlu1 %6566 }
 0xf7d   : > { %v6599_v0 = vpop.permute.xlu1 %6598 }
 0xf80   : > { %17387 = vmatmul.mubr.msk.bf16.vlgmr.msra.gmra.mrb[60].mxu0 %vm3765_vm15, %v19079_v55 }
 0xf81   : > { %17401 = vmatpush3.bf16.msra.mxu0 %v6025_v60  ;;  %17390 = vmatprep.mubr.msk.bf16.mxu0 %vm3765_vm15, %v19080_v43  ;;  %v6603_v59 = vpop.permute.xlu1 %6602 }
 0xf82   : > { %17402 = vmatprep.subr.bf16.mxu0 %v6026_v6 }
 0xf85   : > { %17403 = vmatpush3.bf16.msra.mxu0 %v6026_v6  ;;  %v6595_v6 = vpop.permute.xlu0 %6594  ;;  %v6520_v63 = vpop.permute.xlu1 %6519 }
 0xf86   : > { %17418 = vmatprep.subr.bf16.mxu0 %v6199_v20 }
 0xf88   : > { %17391 = vmatmul.mubr.msk.bf16.gmra.mrb[64].mxu0 %vm3765_vm15, %v19081_v32 }
 0xf89   : > { %17404 = vmatprep.mubr.msk.bf16.mxu0 %vm3765_vm15, %v19082_v26  ;;  %v6607_v48 = vpop.permute.xlu0 %6606  ;;  %v6530_v60 = vpop.permute.xlu1 %6529 }
 0xf8d   : > { %v6500_v4 = vpop.permute.xlu0 %6499  ;;  %v6535_v19 = vpop.permute.xlu1 %6534 }
 0xf90   : > { %17405 = vmatmul.mubr.msk.bf16.vlgmr.msra.gmra.mrb[60].mxu0 %vm3765_vm15, %v19083_v40 }
 0xf91   : > { %17419 = vmatpush3.bf16.msra.mxu0 %v6199_v20  ;;  %17408 = vmatprep.mubr.msk.bf16.mxu0 %vm3765_vm15, %v19084_v38  ;;  %v6515_v46 = vpop.permute.xlu0 %6514  ;;  %v6575_v5 = vpop.permute.xlu1 %6574 }
 0xf92   : > { %17420 = vmatprep.subr.bf16.mxu0 %v6200_v35 }
 0xf95   : > { %17421 = vmatpush3.bf16.msra.mxu0 %v6200_v35  ;;  %v6525_v35 = vpop.permute.xlu0 %6524 }
 0xf96   : > { %17436 = vmatprep.subr.bf16.mxu0 %v6373_v53 }
 0xf98   : > { %17409 = vmatmul.mubr.msk.bf16.gmra.mrb[64].mxu0 %vm3765_vm15, %v19085_v47 }
 0xf99   : > { %17422 = vmatprep.mubr.msk.bf16.mxu0 %vm3765_vm15, %v19086_v54  ;;  %v6559_v3 = vpop.permute.xlu0 %6558 }
 0xf9d   : > { %v6571_v13 = vpop.permute.xlu0 %6570 }
 0xfa0   : > { %17423 = vmatmul.mubr.msk.bf16.vlgmr.msra.gmra.mrb[60].mxu0 %vm3765_vm15, %v19087_v18 }
 0xfa1   : > { %17437 = vmatpush3.bf16.msra.mxu0 %v6373_v53  ;;  %17426 = vmatprep.mubr.msk.bf16.mxu0 %vm3765_vm15, %v19088_v34  ;;  %v6583_v34 = vpop.permute.xlu0 %6582 }
 0xfa2   : > { %17438 = vmatprep.subr.bf16.mxu0 %v6374_v12 }
 0xfa5   : > { %17439 = vmatpush3.bf16.msra.mxu0 %v6374_v12 }
 0xfa6   : > { %17526 = vmatprep.subr.bf16.mxu0 %v21066_v29 }
 0xfa8   : > { %17427 = vmatmul.mubr.msk.bf16.gmra.mrb[64].mxu0 %vm3765_vm15, %v19089_v37 }
 0xfa9   : > { %17440 = vmatprep.mubr.msk.bf16.mxu0 %vm3765_vm15, %v19090_v39 }
 0xfb0   : > { %17441 = vmatmul.mubr.msk.bf16.vlgmr.msra.gmra.mrb[60].mxu0 %vm3765_vm15, %v19091_v17 }
 0xfb1   : > { %17444 = vmatprep.mubr.msk.bf16.mxu0 %vm3765_vm15, %v19092_v42  ;;  %17527 = vmatpush3.bf16.msra.mxu0 %v21066_v29  ;;  %v6579_v29 = vpop.permute.xlu1 %6578 }
 0xfb2   : > { %17568 = vmatprep.subr.bf16.mxu0 %v21074_v31 }
 0xfb5   : > { %v6611_v9 = vpop.permute.xlu1 %6610 }
 0xfb8   : > { %17445 = vmatmul.mubr.msk.bf16.gmra.mrb[64].mxu0 %vm3765_vm15, %v19093_v57 }
 0xfb9   : > { %v6619_v40 = vpop.permute.xlu1 %6618 }
0x1083   : > { %v17442_v58 = vpop.f32.mrb[60].mxu0 }
0x1084   : > { %v6539_v20 = vadd.f32 %v17442_v58, %v20668_v22  ;;  %v6450_v52 = vpop.f32.mrb[61].mxu0 }
0x1085   : > { %v6537_v30 = vadd.f32 %v6500_v4, %v6450_v52  ;;  %v17443_v27 = vpop.f32.mrb[62].mxu0 }
0x1086   : > { %v6547_v15 = vmax.f32 %v6539_v20, 0.0  ;;  %v6540_v12 = vadd.f32 %v17443_v27, %v6515_v46  ;;  %v6453_v50 = vpop.f32.mrb[63].mxu0 }
0x1087   : > { %v6545_v53 = vmax.f32 %v6537_v30, 0.0  ;;  %v6538_v33 = vadd.f32 %v20664_v16, %v6453_v50 }
0x1088   : > { %v6587_v49 = vmul.f32 %v6563_v44, %v6547_v15  ;;  %v6548_v23 = vmax.f32 %v6540_v12, 0.0 }
0x1089   : > { %v6585_v51 = vmul.f32 %v6555_v61, %v6545_v53  ;;  %v6546_v14 = vmax.f32 %v6538_v33, 0.0 }
0x108a   : > { %v6588_v56 = vmul.f32 %v6567_v36, %v6548_v23  ;;  %v6627_v43 = vadd.f32 %v6603_v59, %v6587_v49 }
0x108b   : > { %v6586_v1 = vmul.f32 %v6559_v3, %v6546_v14  ;;  %v17446_v55 = vpop.f32.mrb[64].mxu0  ;;  %v6625_v38 = vadd.f32 %v6595_v6, %v6585_v51  ;;  %v6623_v6 = vpop.permute.xlu1 %6622 }
0x108c   : > { %v6628_v22 = vadd.f32 %v6607_v48, %v6588_v56  ;;  %v6543_v32 = vadd.f32 %v17446_v55, %v6530_v60  ;;  %v6466_v26 = vpop.f32.mrb[65].mxu0  ;;  %v6615_v60 = vpop.permute.xlu0 %6614 }
0x108d   : > { %v6626_v47 = vadd.f32 %v6599_v0, %v6586_v1  ;;  %v6541_v54 = vadd.f32 %v6520_v63, %v6466_v26  ;;  %v17447_v18 = vpop.f32.mrb[66].mxu0 }
0x108e   : > { %v21195_v37 = vpack.c.bf16 %v6628_v22, %v6627_v43  ;;  %v6551_v16 = vmax.f32 %v6543_v32, 0.0  ;;  %v6544_v39 = vadd.f32 %v17447_v18, %v6535_v19  ;;  %v6469_v17 = vpop.f32.mrb[67].mxu0 }
0x108f   : > { %v21197_v42 = vpack.c.bf16 %v6626_v47, %v6625_v38  ;;  %v6549_v57 = vmax.f32 %v6541_v54, 0.0  ;;  %v6542_v61 = vadd.f32 %v6525_v35, %v6469_v17 }
0x1090   : > { %v6591_v44 = vmul.f32 %v6579_v29, %v6551_v16  ;;  %v6552_v36 = vmax.f32 %v6544_v39, 0.0 }
0x1091   : > { %v6589_v59 = vmul.f32 %v6571_v13, %v6549_v57  ;;  %v6550_v48 = vmax.f32 %v6542_v61, 0.0  ;;  %17450 = vmatprep.mubr.msk.bf16.mxu1 %vm2475_vm14, %v21197_v42  ;;  %17528 = vmatprep.mubr.msk.bf16.mxu0 %vm2475_vm14, %v21197_v42 }
0x1092   : > { %v6592_v0 = vmul.f32 %v6583_v34, %v6552_v36  ;;  %17451 = vmatmul.mubr.msk.bf16.vlgmr.msra.gmra.mrb[72].mxu1 %vm2475_vm14, %v21195_v37  ;;  %17529 = vmatmul.mubr.msk.bf16.vlgmr.msra.gmra.mrb[68].mxu0 %vm2475_vm14, %v21195_v37  ;;  %v6631_v4 = vadd.f32 %v6619_v40, %v6591_v44 }
0x1093   : > { %v6590_v63 = vmul.f32 %v6575_v5, %v6550_v48  ;;  %17459 = vmatpush3.bf16.msra.mxu1 %v21049_v62  ;;  %17569 = vmatpush3.bf16.msra.mxu0 %v21074_v31  ;;  %v6629_v46 = vadd.f32 %v6611_v9, %v6589_v59  ;;  %v19094_v62 = vld [vmem:[%s22938_s0 + $0x20] sm:$0xff]  }
0x1094   : > { %v6632_v19 = vadd.f32 %v6623_v6, %v6592_v0  ;;  %17594 = vmatprep.subr.bf16.mxu0 %v21082_v7 }
0x1095   : > { %v6630_v35 = vadd.f32 %v6615_v60, %v6590_v63 }
0x1096   : > { %v21210_v29 = vpack.c.bf16 %v6632_v19, %v6631_v4 }
0x1097   : > { %v21212_v3 = vpack.c.bf16 %v6630_v35, %v6629_v46 }
0x1099   : > { %17454 = vmatprep.mubr.msk.bf16.mxu1 %vm2475_vm14, %v21212_v3  ;;  %17532 = vmatprep.mubr.msk.bf16.mxu0 %vm2475_vm14, %v21212_v3 }
0x109a   : > { %17455 = vmatmul.mubr.msk.bf16.gmra.mrb[76].mxu1 %vm2475_vm14, %v21210_v29  ;;  %17533 = vmatmul.mubr.msk.bf16.gmra.mrb[72].mxu0 %vm2475_vm14, %v21210_v29 }
0x109b   : > { %17460 = vmatprep.mubr.msk.bf16.mxu1 %vm2475_vm14, %v21197_v42  ;;  %17570 = vmatprep.mubr.msk.bf16.mxu0 %vm2475_vm14, %v21197_v42 }
0x10a2   : > { %17461 = vmatmul.mubr.msk.bf16.vlgmr.msra.gmra.mrb[80].mxu1 %vm2475_vm14, %v21195_v37  ;;  %17571 = vmatmul.mubr.msk.bf16.vlgmr.msra.gmra.mrb[76].mxu0 %vm2475_vm14, %v21195_v37 }
0x10a3   : > { %17464 = vmatprep.mubr.msk.bf16.mxu1 %vm2475_vm14, %v21212_v3  ;;  %17574 = vmatprep.mubr.msk.bf16.mxu0 %vm2475_vm14, %v21212_v3 }
0x10a4   : > { %17595 = vmatpush3.bf16.msra.mxu0 %v21082_v7 }
0x10a5   : > { %17620 = vmatprep.subr.bf16.mxu0 %v21090_v11 }
0x10aa   : > { %17465 = vmatmul.mubr.msk.bf16.gmra.mrb[84].mxu1 %vm2475_vm14, %v21210_v29  ;;  %17575 = vmatmul.mubr.msk.bf16.gmra.mrb[80].mxu0 %vm2475_vm14, %v21210_v29 }
0x10ab   : > { %17596 = vmatprep.mubr.msk.bf16.mxu0 %vm2475_vm14, %v21197_v42  ;;  %17476 = vmatprep.mubr.msk.bf16.mxu1 %vm2335_vm13, %v19094_v62  ;;  %v19095_v62 = vld [vmem:[%s22938_s0 + $0x28] sm:$0xff]  }
0x10b2   : > { %17597 = vmatmul.mubr.msk.bf16.vlgmr.msra.gmra.mrb[84].mxu0 %vm2475_vm14, %v21195_v37 }
0x10b3   : > { %17600 = vmatprep.mubr.msk.bf16.mxu0 %vm2475_vm14, %v21212_v3  ;;  %17621 = vmatpush3.bf16.msra.mxu0 %v21090_v11 }
0x10b4   : > { %17646 = vmatprep.subr.bf16.mxu0 %v21098_v41 }
0x10ba   : > { %17601 = vmatmul.mubr.msk.bf16.gmra.mrb[88].mxu0 %vm2475_vm14, %v21210_v29 }
0x10bb   : > { %17622 = vmatprep.mubr.msk.bf16.mxu0 %vm2475_vm14, %v21197_v42 }
0x10c2   : > { %17623 = vmatmul.mubr.msk.bf16.vlgmr.msra.gmra.mrb[92].mxu0 %vm2475_vm14, %v21195_v37 }
0x10c3   : > { %17626 = vmatprep.mubr.msk.bf16.mxu0 %vm2475_vm14, %v21212_v3  ;;  %17647 = vmatpush3.bf16.msra.mxu0 %v21098_v41 }
0x10ca   : > { %17627 = vmatmul.mubr.msk.bf16.gmra.mrb[96].mxu0 %vm2475_vm14, %v21210_v29 }
0x10cb   : > { %17648 = vmatprep.mubr.msk.bf16.mxu0 %vm2475_vm14, %v21197_v42 }
0x10d2   : > { %17649 = vmatmul.mubr.msk.bf16.vlgmr.msra.gmra.mrb[100].mxu0 %vm2475_vm14, %v21195_v37 }
0x10d3   : > { %17652 = vmatprep.mubr.msk.bf16.mxu0 %vm2475_vm14, %v21212_v3 }
0x10da   : > { %17653 = vmatmul.mubr.msk.bf16.gmra.mrb[104].mxu0 %vm2475_vm14, %v21210_v29 }
0x1165   : > { %v17452_v31 = vpop.f32.mrb[72].mxu1  ;;  %v17530_v7 = vpop.f32.mrb[68].mxu0 }
0x1166   : > { %v6683_v11 = vpop.f32.mrb[73].mxu1  ;;  %v7215_v41 = vpop.f32.mrb[69].mxu0 }
0x1167   : > { %v17453_v5 = vpop.f32.mrb[74].mxu1  ;;  %v17531_v58 = vpop.f32.mrb[70].mxu0 }
0x1168   : > { %v21269_v20 = vpack.c.bf16 %v17453_v5, %v17452_v31  ;;  %v21271_v52 = vpack.c.bf16 %v17531_v58, %v17530_v7  ;;  %v6686_v30 = vpop.f32.mrb[75].mxu1  ;;  %v7218_v27 = vpop.f32.mrb[71].mxu0 }
0x1169   : > { %v6714_v15 = vpack.c.bf16 %v6686_v30, %v6683_v11  ;;  %v21273_v12 = vpack.c.bf16 %v7218_v27, %v7215_v41  ;;  %v19096_v11 = vld [vmem:[%s22938_s0 + $0x30] sm:$0xff]   ;;  %v19097_v27 = vld [vmem:[%s22938_s0 + $0x38] sm:$0xff]  }
0x116d   : > { %v17456_v50 = vpop.f32.mrb[76].mxu1  ;;  %v17534_v9 = vpop.f32.mrb[72].mxu0 }
0x116e   : > { %v6699_v53 = vpop.f32.mrb[77].mxu1  ;;  %v7231_v33 = vpop.f32.mrb[73].mxu0 }
0x116f   : > { %v17457_v13 = vpop.f32.mrb[78].mxu1  ;;  %v17535_v49 = vpop.f32.mrb[74].mxu0 }
0x1170   : > { %v21275_v23 = vpack.c.bf16 %v17457_v13, %v17456_v50  ;;  %v21277_v51 = vpack.c.bf16 %v17535_v49, %v17534_v9  ;;  %v6702_v14 = vpop.f32.mrb[79].mxu1  ;;  %v7234_v56 = vpop.f32.mrb[75].mxu0 }
0x1171   : > { %v6716_v1 = vpack.c.bf16 %v6702_v14, %v6699_v53  ;;  %v21279_v55 = vpack.c.bf16 %v7234_v56, %v7231_v33  ;;  %v19098_v53 = vld [vmem:[%s22938_s0] sm:$0xff]   ;;  %v19099_v14 = vld [vmem:[%s22938_s0 + $0x8] sm:$0xff]  }
0x1175   : > { %v17462_v43 = vpop.f32.mrb[80].mxu1  ;;  %v17572_v22 = vpop.f32.mrb[76].mxu0 }
0x1176   : > { %v6760_v32 = vpop.f32.mrb[81].mxu1  ;;  %v7512_v26 = vpop.f32.mrb[77].mxu0 }
0x1177   : > { %v17463_v40 = vpop.f32.mrb[82].mxu1  ;;  %v17573_v38 = vpop.f32.mrb[78].mxu0 }
0x1178   : > { %v6792_v47 = vpack.c.bf16 %v17463_v40, %v17462_v43  ;;  %v21281_v54 = vpack.c.bf16 %v17573_v38, %v17572_v22  ;;  %v6763_v18 = vpop.f32.mrb[83].mxu1  ;;  %v7515_v34 = vpop.f32.mrb[79].mxu0  ;;  %v19100_v43 = vld [vmem:[%s22938_s0 + $0x10] sm:$0xff]   ;;  %v19101_v40 = vld [vmem:[%s22938_s0 + $0x18] sm:$0xff]  }
0x1179   : > { %v6791_v16 = vpack.c.bf16 %v6763_v18, %v6760_v32  ;;  %v21283_v39 = vpack.c.bf16 %v7515_v34, %v7512_v26 }
0x117b   : > { %17468 = vmatprep.subr.bf16.mxu1 %v6791_v16 }
0x117c   : > { %17469 = vmatpush3.bf16.msra.mxu1 %v6791_v16 }
0x117d   : > { %v17466_v17 = vpop.f32.mrb[84].mxu1  ;;  %17470 = vmatprep.subr.bf16.mxu1 %v6792_v47  ;;  %v17576_v57 = vpop.f32.mrb[80].mxu0 }
0x117e   : > { %v6776_v61 = vpop.f32.mrb[85].mxu1  ;;  %v7528_v44 = vpop.f32.mrb[81].mxu0 }
0x117f   : > { %v17467_v36 = vpop.f32.mrb[86].mxu1  ;;  %v17577_v59 = vpop.f32.mrb[82].mxu0 }
0x1180   : > { %v6794_v48 = vpack.c.bf16 %v17467_v36, %v17466_v17  ;;  %v21285_v0 = vpack.c.bf16 %v17577_v59, %v17576_v57  ;;  %v6779_v6 = vpop.f32.mrb[87].mxu1  ;;  %17471 = vmatpush3.bf16.msra.mxu1 %v6792_v47  ;;  %v7531_v63 = vpop.f32.mrb[83].mxu0 }
0x1181   : > { %v6793_v60 = vpack.c.bf16 %v6779_v6, %v6776_v61  ;;  %v21287_v4 = vpack.c.bf16 %v7531_v63, %v7528_v44  ;;  %v19102_v63 = vld [vmem:[%s22938_s0 + $0x40] sm:$0xff]  }
0x1183   : > { %17472 = vmatprep.subr.bf16.mxu1 %v6793_v60 }
0x1184   : > { %17473 = vmatpush3.bf16.msra.mxu1 %v6793_v60 }
0x1185   : > { %17474 = vmatprep.subr.bf16.mxu1 %v6794_v48  ;;  %v17598_v19 = vpop.f32.mrb[84].mxu0 }
0x1186   : > { %v7695_v46 = vpop.f32.mrb[85].mxu0 }
0x1187   : > { %v17599_v35 = vpop.f32.mrb[86].mxu0 }
0x1188   : > { %v21290_v31 = vpack.c.bf16 %v17599_v35, %v17598_v19  ;;  %17475 = vmatpush3.bf16.msra.mxu1 %v6794_v48  ;;  %v7698_v7 = vpop.f32.mrb[87].mxu0 }
0x1189   : > { %v21293_v41 = vpack.c.bf16 %v7698_v7, %v7695_v46  ;;  %17484 = vmatprep.subr.bf16.mxu1 %v6714_v15 }
0x118b   : > { %17477 = vmatmul.mubr.msk.bf16.vlgmr.msra.gmra.mrb[88].mxu1 %vm2335_vm13, %v19095_v62 }
0x118c   : > { %17485 = vmatpush3.bf16.msra.mxu1 %v6714_v15  ;;  %17480 = vmatprep.mubr.msk.bf16.mxu1 %vm2335_vm13, %v19096_v11 }
0x118d   : > { %17486 = vmatprep.subr.bf16.mxu1 %v21269_v20  ;;  %v17602_v5 = vpop.f32.mrb[88].mxu0 }
0x118e   : > { %v7711_v58 = vpop.f32.mrb[89].mxu0 }
0x118f   : > { %v17603_v30 = vpop.f32.mrb[90].mxu0 }
0x1190   : > { %v21299_v50 = vpack.c.bf16 %v17603_v30, %v17602_v5  ;;  %17487 = vmatpush3.bf16.msra.mxu1 %v21269_v20  ;;  %v7714_v9 = vpop.f32.mrb[91].mxu0 }
0x1191   : > { %v21303_v33 = vpack.c.bf16 %v7714_v9, %v7711_v58  ;;  %17488 = vmatprep.subr.bf16.mxu1 %v6716_v1 }
0x1193   : > { %17481 = vmatmul.mubr.msk.bf16.gmra.mrb[92].mxu1 %vm2335_vm13, %v19097_v27 }
0x1194   : > { %17489 = vmatpush3.bf16.msra.mxu1 %v6716_v1  ;;  %17492 = vmatprep.mubr.msk.bf16.mxu1 %vm2335_vm13, %v19098_v53  ;;  %v19103_v53 = vld [vmem:[%s22938_s0 + $0x48] sm:$0xff]  }
0x1195   : > { %17490 = vmatprep.subr.bf16.mxu1 %v21275_v23  ;;  %v17624_v15 = vpop.f32.mrb[92].mxu0 }
0x1196   : > { %v7878_v13 = vpop.f32.mrb[93].mxu0 }
0x1197   : > { %v17625_v49 = vpop.f32.mrb[94].mxu0 }
0x1198   : > { %v21309_v56 = vpack.c.bf16 %v17625_v49, %v17624_v15  ;;  %17491 = vmatpush3.bf16.msra.mxu1 %v21275_v23  ;;  %v7881_v20 = vpop.f32.mrb[95].mxu0  ;;  %v19104_v15 = vld [vmem:[%s22938_s0 + $0x50] sm:$0xff]   ;;  %v19106_v49 = vld [vmem:[%s22938_s0 + $0x60] sm:$0xff]  }
0x1199   : > { %v21313_v22 = vpack.c.bf16 %v7881_v20, %v7878_v13  ;;  %17500 = vmatprep.subr.bf16.mxu1 %v21056_v28  ;;  %v19105_v13 = vld [vmem:[%s22938_s0 + $0x58] sm:$0xff]   ;;  %v19124_v20 = vld [vmem:[%s22938_s0 + $0xf0] sm:$0xff]  }
0x119b   : > { %17493 = vmatmul.mubr.msk.bf16.vlgmr.msra.gmra.mrb[88].mxu1 %vm2335_vm13, %v19099_v14  ;;  %v19108_v14 = vld [vmem:[%s22938_s0 + $0x70] sm:$0xff]  }
0x119c   : > { %17496 = vmatprep.mubr.msk.bf16.mxu1 %vm2335_vm13, %v19100_v43  ;;  %17501 = vmatpush3.bf16.msra.mxu1 %v21056_v28  ;;  %v19126_v43 = vld [vmem:[%s22938_s0 + $0x100] sm:$0xff]  }
0x119d   : > { %v17628_v1 = vpop.f32.mrb[96].mxu0 }
0x119e   : > { %v7894_v32 = vpop.f32.mrb[97].mxu0 }
0x119f   : > { %v17629_v26 = vpop.f32.mrb[98].mxu0 }
0x11a0   : > { %v21320_v38 = vpack.c.bf16 %v17629_v26, %v17628_v1  ;;  %v7897_v47 = vpop.f32.mrb[99].mxu0  ;;  %v19128_v1 = vld [vmem:[%s22938_s0 + $0x110] sm:$0xff]  }
0x11a1   : > { %v21322_v23 = vpack.c.bf16 %v7897_v47, %v7894_v32  ;;  %v19129_v32 = vld [vmem:[%s22938_s0 + $0x118] sm:$0xff]   ;;  %v19130_v26 = vld [vmem:[#allocation10] sm:$0xff]  }
0x11a2   : > { %17680 = vmatprep.mubr.msk.bf16.mxu0 %vm2335_vm13, %v19130_v26 }
0x11a3   : > { %17497 = vmatmul.mubr.msk.bf16.gmra.mrb[92].mxu1 %vm2335_vm13, %v19101_v40  ;;  %v8226_v40 = vpop.permute.xlu1 %8225 }
0x11a4   : > { %17502 = vmatprep.mubr.msk.bf16.mxu1 %vm2475_vm14, %v21197_v42 }
0x11a5   : > { %v17650_v18 = vpop.f32.mrb[100].mxu0 }
0x11a6   : > { %v8061_v34 = vpop.f32.mrb[101].mxu0 }
0x11a7   : > { %v17651_v16 = vpop.f32.mrb[102].mxu0 }
0x11a8   : > { %v21327_v17 = vpack.c.bf16 %v17651_v16, %v17650_v18  ;;  %v8064_v28 = vpop.f32.mrb[103].mxu0  ;;  %v8221_v16 = vpop.permute.xlu0 %8220 }
0x11a9   : > { %v21329_v57 = vpack.c.bf16 %v8064_v28, %v8061_v34 }
0x11ab   : > { %17503 = vmatmul.mubr.msk.bf16.vlgmr.msra.gmra.mrb[96].mxu1 %vm2475_vm14, %v21195_v37 }
0x11ac   : > { %17506 = vmatprep.mubr.msk.bf16.mxu1 %vm2475_vm14, %v21212_v3  ;;  %v8236_v28 = vpop.permute.xlu0 %8235 }
0x11ad   : > { %v17654_v61 = vpop.f32.mrb[104].mxu0 }
0x11ae   : > { %v8077_v44 = vpop.f32.mrb[105].mxu0 }
0x11af   : > { %v17655_v36 = vpop.f32.mrb[106].mxu0 }
0x11b0   : > { %v21335_v59 = vpack.c.bf16 %v17655_v36, %v17654_v61  ;;  %v8080_v48 = vpop.f32.mrb[107].mxu0  ;;  %v8241_v61 = vpop.permute.xlu0 %8240 }
0x11b1   : > { %v21337_v6 = vpack.c.bf16 %v8080_v48, %v8077_v44 }
0x11b3   : > { %17507 = vmatmul.mubr.msk.bf16.gmra.mrb[100].mxu1 %vm2475_vm14, %v21210_v29 }
0x11b4   : > { %17518 = vmatprep.mubr.msk.bf16.mxu1 %vm2335_vm13, %v19102_v63  ;;  %v8251_v36 = vpop.permute.xlu0 %8250 }
0x11b8   : > { %v8280_v48 = vpop.permute.xlu0 %8279 }
0x11bc   : > { %v8288_v63 = vpop.permute.xlu0 %8287 }
0x127e   : > { %v17504_v60 = vpop.f32.mrb[96].mxu1 }
0x127f   : > { %v7032_v19 = vpop.f32.mrb[97].mxu1 }
0x1280   : > { %v17505_v46 = vpop.f32.mrb[98].mxu1 }
0x1281   : > { %v7064_v35 = vpack.c.bf16 %v17505_v46, %v17504_v60  ;;  %v7035_v62 = vpop.f32.mrb[99].mxu1 }
0x1282   : > { %v7063_v7 = vpack.c.bf16 %v7035_v62, %v7032_v19 }
0x1284   : > { %17510 = vmatprep.subr.bf16.mxu1 %v7063_v7 }
0x1285   : > { %17511 = vmatpush3.bf16.msra.mxu1 %v7063_v7 }
0x1286   : > { %v17508_v11 = vpop.f32.mrb[100].mxu1  ;;  %17512 = vmatprep.subr.bf16.mxu1 %v7064_v35 }
0x1287   : > { %v7048_v5 = vpop.f32.mrb[101].mxu1 }
0x1288   : > { %v17509_v58 = vpop.f32.mrb[102].mxu1 }
0x1289   : > { %v7066_v30 = vpack.c.bf16 %v17509_v58, %v17508_v11  ;;  %v7051_v27 = vpop.f32.mrb[103].mxu1  ;;  %17513 = vmatpush3.bf16.msra.mxu1 %v7064_v35  ;;  %v8296_v11 = vpop.permute.xlu0 %8295 }
0x128a   : > { %v7065_v9 = vpack.c.bf16 %v7051_v27, %v7048_v5 }
0x128c   : > { %17514 = vmatprep.subr.bf16.mxu1 %v7065_v9 }
0x128d   : > { %17515 = vmatpush3.bf16.msra.mxu1 %v7065_v9 }
0x128e   : > { %17516 = vmatprep.subr.bf16.mxu1 %v7066_v30 }
0x1291   : > { %17517 = vmatpush3.bf16.msra.mxu1 %v7066_v30 }
0x1292   : > { %17536 = vmatprep.subr.bf16.mxu1 %v21273_v12 }
0x1294   : > { %17519 = vmatmul.mubr.msk.bf16.vlgmr.msra.gmra.mrb[88].mxu1 %vm2335_vm13, %v19103_v53 }
0x1295   : > { %17537 = vmatpush3.bf16.msra.mxu1 %v21273_v12  ;;  %17522 = vmatprep.mubr.msk.bf16.mxu1 %vm2335_vm13, %v19104_v15  ;;  %v19107_v12 = vld [vmem:[%s22938_s0 + $0x68] sm:$0xff]  }
0x1296   : > { %17538 = vmatprep.subr.bf16.mxu1 %v21271_v52 }
0x1299   : > { %17539 = vmatpush3.bf16.msra.mxu1 %v21271_v52  ;;  %v19109_v52 = vld [vmem:[%s22938_s0 + $0x78] sm:$0xff]  }
0x129a   : > { %17540 = vmatprep.subr.bf16.mxu1 %v21279_v55 }
0x129c   : > { %17523 = vmatmul.mubr.msk.bf16.gmra.mrb[92].mxu1 %vm2335_vm13, %v19105_v13 }
0x129d   : > { %17541 = vmatpush3.bf16.msra.mxu1 %v21279_v55  ;;  %17544 = vmatprep.mubr.msk.bf16.mxu1 %vm2335_vm13, %v19106_v49  ;;  %v19110_v55 = vld [vmem:[%s22938_s0 + $0x80] sm:$0xff]  }
0x129e   : > { %17542 = vmatprep.subr.bf16.mxu1 %v21277_v51 }
0x12a1   : > { %17543 = vmatpush3.bf16.msra.mxu1 %v21277_v51  ;;  %v19112_v51 = vld [vmem:[%s22938_s0 + $0x90] sm:$0xff]  }
0x12a2   : > { %17552 = vmatprep.subr.bf16.mxu1 %v21197_v42 }
0x12a4   : > { %17545 = vmatmul.mubr.msk.bf16.vlgmr.msra.gmra.mrb[88].mxu1 %vm2335_vm13, %v19107_v12 }
0x12a5   : > { %17553 = vmatpush3.bf16.msra.mxu1 %v21197_v42  ;;  %17548 = vmatprep.mubr.msk.bf16.mxu1 %vm2335_vm13, %v19108_v14  ;;  %v19111_v42 = vld [vmem:[%s22938_s0 + $0x88] sm:$0xff]  }
0x12a6   : > { %17554 = vmatprep.subr.bf16.mxu1 %v21195_v37 }
0x12a9   : > { %17555 = vmatpush3.bf16.msra.mxu1 %v21195_v37  ;;  %v19113_v37 = vld [vmem:[%s22938_s0 + $0x98] sm:$0xff]  }
0x12aa   : > { %17556 = vmatprep.subr.bf16.mxu1 %v21212_v3 }
0x12ac   : > { %17549 = vmatmul.mubr.msk.bf16.gmra.mrb[92].mxu1 %vm2335_vm13, %v19109_v52 }
0x12ad   : > { %17557 = vmatpush3.bf16.msra.mxu1 %v21212_v3  ;;  %17560 = vmatprep.mubr.msk.bf16.mxu1 %vm2335_vm13, %v19110_v55  ;;  %v19114_v3 = vld [vmem:[%s22938_s0 + $0xa0] sm:$0xff]  }
0x12ae   : > { %17558 = vmatprep.subr.bf16.mxu1 %v21210_v29 }
0x12b1   : > { %17559 = vmatpush3.bf16.msra.mxu1 %v21210_v29  ;;  %v19115_v29 = vld [vmem:[%s22938_s0 + $0xa8] sm:$0xff]  }
0x12b2   : > { %17578 = vmatprep.subr.bf16.mxu1 %v21283_v39 }
0x12b4   : > { %17561 = vmatmul.mubr.msk.bf16.vlgmr.msra.gmra.mrb[88].mxu1 %vm2335_vm13, %v19111_v42  ;;  %v8300_v42 = vpop.permute.xlu0 %8299 }
0x12b5   : > { %17579 = vmatpush3.bf16.msra.mxu1 %v21283_v39  ;;  %17564 = vmatprep.mubr.msk.bf16.mxu1 %vm2335_vm13, %v19112_v51  ;;  %v19116_v39 = vld [vmem:[%s22938_s0 + $0xb0] sm:$0xff]  }
0x12b6   : > { %17580 = vmatprep.subr.bf16.mxu1 %v21281_v54 }
0x12b9   : > { %17581 = vmatpush3.bf16.msra.mxu1 %v21281_v54  ;;  %v19117_v54 = vld [vmem:[%s22938_s0 + $0xb8] sm:$0xff]  }
0x12ba   : > { %17582 = vmatprep.subr.bf16.mxu1 %v21287_v4 }
0x12bc   : > { %17565 = vmatmul.mubr.msk.bf16.gmra.mrb[92].mxu1 %vm2335_vm13, %v19113_v37 }
0x12bd   : > { %17583 = vmatpush3.bf16.msra.mxu1 %v21287_v4  ;;  %17586 = vmatprep.mubr.msk.bf16.mxu1 %vm2335_vm13, %v19114_v3  ;;  %v19118_v4 = vld [vmem:[%s22938_s0 + $0xc0] sm:$0xff]  }
0x12be   : > { %17584 = vmatprep.subr.bf16.mxu1 %v21285_v0 }
0x12c1   : > { %17585 = vmatpush3.bf16.msra.mxu1 %v21285_v0  ;;  %v19119_v0 = vld [vmem:[%s22938_s0 + $0xc8] sm:$0xff]  }
0x12c2   : > { %17604 = vmatprep.subr.bf16.mxu1 %v21293_v41 }
0x12c4   : > { %17587 = vmatmul.mubr.msk.bf16.vlgmr.msra.gmra.mrb[88].mxu1 %vm2335_vm13, %v19115_v29 }
0x12c5   : > { %17605 = vmatpush3.bf16.msra.mxu1 %v21293_v41  ;;  %17590 = vmatprep.mubr.msk.bf16.mxu1 %vm2335_vm13, %v19116_v39  ;;  %v19120_v41 = vld [vmem:[%s22938_s0 + $0xd0] sm:$0xff]  }
0x12c6   : > { %17606 = vmatprep.subr.bf16.mxu1 %v21290_v31 }
0x12c9   : > { %17607 = vmatpush3.bf16.msra.mxu1 %v21290_v31  ;;  %v19121_v31 = vld [vmem:[%s22938_s0 + $0xd8] sm:$0xff]  }
0x12ca   : > { %17608 = vmatprep.subr.bf16.mxu1 %v21303_v33 }
0x12cc   : > { %17591 = vmatmul.mubr.msk.bf16.gmra.mrb[92].mxu1 %vm2335_vm13, %v19117_v54 }
0x12cd   : > { %17609 = vmatpush3.bf16.msra.mxu1 %v21303_v33  ;;  %17612 = vmatprep.mubr.msk.bf16.mxu1 %vm2335_vm13, %v19118_v4  ;;  %v19122_v33 = vld [vmem:[%s22938_s0 + $0xe0] sm:$0xff]  }
0x12ce   : > { %17610 = vmatprep.subr.bf16.mxu1 %v21299_v50 }
0x12d1   : > { %17611 = vmatpush3.bf16.msra.mxu1 %v21299_v50  ;;  %v19123_v50 = vld [vmem:[%s22938_s0 + $0xe8] sm:$0xff]  }
0x12d2   : > { %17630 = vmatprep.subr.bf16.mxu1 %v21313_v22 }
0x12d4   : > { %17613 = vmatmul.mubr.msk.bf16.vlgmr.msra.gmra.mrb[88].mxu1 %vm2335_vm13, %v19119_v0 }
0x12d5   : > { %17631 = vmatpush3.bf16.msra.mxu1 %v21313_v22  ;;  %17616 = vmatprep.mubr.msk.bf16.mxu1 %vm2335_vm13, %v19120_v41  ;;  %v19127_v22 = vld [vmem:[%s22938_s0 + $0x108] sm:$0xff]  }
0x12d6   : > { %17632 = vmatprep.subr.bf16.mxu1 %v21309_v56 }
0x12d9   : > { %17633 = vmatpush3.bf16.msra.mxu1 %v21309_v56  ;;  %v19125_v56 = vld [vmem:[%s22938_s0 + $0xf8] sm:$0xff]   ;;  %s22939_s0 = sld [smem:[#allocation42_spill]] }
0x12da   : > { %17634 = vmatprep.subr.bf16.mxu1 %v21322_v23 }
0x12dc   : > { %17617 = vmatmul.mubr.msk.bf16.gmra.mrb[92].mxu1 %vm2335_vm13, %v19121_v31 }
0x12dd   : > { %17635 = vmatpush3.bf16.msra.mxu1 %v21322_v23  ;;  %17638 = vmatprep.mubr.msk.bf16.mxu1 %vm2335_vm13, %v19122_v33 }
0x12de   : > { %17636 = vmatprep.subr.bf16.mxu1 %v21320_v38 }
0x12e1   : > { %17637 = vmatpush3.bf16.msra.mxu1 %v21320_v38  ;;  %v8231_v38 = vpop.permute.xlu1 %8230 }
0x12e2   : > { %17656 = vmatprep.subr.bf16.mxu1 %v21329_v57 }
0x12e4   : > { %17639 = vmatmul.mubr.msk.bf16.vlgmr.msra.gmra.mrb[88].mxu1 %vm2335_vm13, %v19123_v50 }
0x12e5   : > { %17657 = vmatpush3.bf16.msra.mxu1 %v21329_v57  ;;  %17642 = vmatprep.mubr.msk.bf16.mxu1 %vm2335_vm13, %v19124_v20  ;;  %v8276_v47 = vpop.permute.xlu1 %8275 }
0x12e6   : > { %17658 = vmatprep.subr.bf16.mxu1 %v21327_v17 }
0x12e9   : > { %17659 = vmatpush3.bf16.msra.mxu1 %v21327_v17  ;;  %v8316_v23 = vpop.permute.xlu1 %8315 }
0x12ea   : > { %17660 = vmatprep.subr.bf16.mxu1 %v21337_v6 }
0x12ec   : > { %17643 = vmatmul.mubr.msk.bf16.gmra.mrb[92].mxu1 %vm2335_vm13, %v19125_v56 }
0x12ed   : > { %17661 = vmatpush3.bf16.msra.mxu1 %v21337_v6  ;;  %17664 = vmatprep.mubr.msk.bf16.mxu1 %vm2335_vm13, %v19126_v43  ;;  %v8320_v18 = vpop.permute.xlu1 %8319 }
0x12ee   : > { %17662 = vmatprep.subr.bf16.mxu1 %v21335_v59 }
0x12f1   : > { %17663 = vmatpush3.bf16.msra.mxu1 %v21335_v59  ;;  %v8246_v34 = vpop.permute.xlu1 %8245 }
0x12f4   : > { %17665 = vmatmul.mubr.msk.bf16.vlgmr.msra.gmra.mrb[88].mxu1 %vm2335_vm13, %v19127_v22 }
0x12f5   : > { %17668 = vmatprep.mubr.msk.bf16.mxu1 %vm2335_vm13, %v19128_v1  ;;  %v8284_v17 = vpop.permute.xlu1 %8283 }
0x12f9   : > { %v8324_v57 = vpop.permute.xlu1 %8323 }
0x12fc   : > { %17669 = vmatmul.mubr.msk.bf16.gmra.mrb[92].mxu1 %vm2335_vm13, %v19129_v32 }
0x12fd   : > { %v8328_v44 = vpop.permute.xlu1 %8327 }
0x1301   : > { %v8256_v59 = vpop.permute.xlu1 %8255 }
0x1305   : > { %v8292_v6 = vpop.permute.xlu1 %8291 }
0x1309   : > { %v8332_v60 = vpop.permute.xlu1 %8331 }
0x130d   : > { %v8336_v27 = vpop.permute.xlu1 %8335 }
0x1311   : > { %v8304_v39 = vpop.permute.xlu1 %8303 }
0x13c7   : > { %v17666_v19 = vpop.f32.mrb[88].mxu1 }
0x13c8   : > { %v8260_v46 = vadd.f32 %v17666_v19, %v8231_v38  ;;  %v8171_v35 = vpop.f32.mrb[89].mxu1  ;;  %v21453_v19 = vld [vmem:[%s22932_s15] sm:$0xff]  }
0x13c9   : > { %v8258_v62 = vadd.f32 %v8221_v16, %v8171_v35  ;;  %v17667_v7 = vpop.f32.mrb[90].mxu1  ;;  %v8344_v16 = vpop.permute.xlu1 %8343  ;;  %v21466_v35 = vld [vmem:[%s22932_s15 + $0x10] sm:$0xff]  }
0x13ca   : > { %v8268_v5 = vmax.f32 %v8260_v46, 0.0  ;;  %v8261_v58 = vadd.f32 %v17667_v7, %v8236_v28  ;;  %v8174_v30 = vpop.f32.mrb[91].mxu1  ;;  %v21461_v46 = vld [vmem:[%s22932_s15 + $0x8] sm:$0xff]   ;;  %v21476_v7 = vld [vmem:[%s22932_s15 + $0x20] sm:$0xff]  }
0x13cb   : > { %v8266_v9 = vmax.f32 %v8258_v62, 0.0  ;;  %v8259_v53 = vadd.f32 %v8226_v40, %v8174_v30  ;;  %v21471_v62 = vld [vmem:[%s22932_s15 + $0x18] sm:$0xff]  }
0x13cc   : > { %v8308_v15 = vmul.f32 %v8284_v17, %v8268_v5  ;;  %v8269_v13 = vmax.f32 %v8261_v58, 0.0  ;;  %v21488_v5 = vld [vmem:[%s22932_s15 + $0x30] sm:$0xff]   ;;  %v21493_v58 = vld [vmem:[%s22932_s15 + $0x38] sm:$0xff]  }
0x13cd   : > { %v8306_v49 = vmul.f32 %v8276_v47, %v8266_v9  ;;  %v8267_v12 = vmax.f32 %v8259_v53, 0.0  ;;  %v8340_v47 = vpop.permute.xlu0 %8339  ;;  %v19138_v30 = vld [vmem:[#allocation8 + $0x8] sm:$0xff]  }
0x13ce   : > { %v8309_v14 = vmul.f32 %v8288_v63, %v8269_v13  ;;  %v8348_v51 = vadd.f32 %v8324_v57, %v8308_v15  ;;  %v19136_v63 = vld [vmem:[#allocation10 + $0x30] sm:$0xff]   ;;  %17696 = vmatprep.subr.bf16.mxu1 %v19138_v30 }
0x13cf   : > { %v8307_v52 = vmul.f32 %v8280_v48, %v8267_v12  ;;  %v17670_v55 = vpop.f32.mrb[92].mxu1  ;;  %v8346_v54 = vadd.f32 %v8316_v23, %v8306_v49  ;;  %v19134_v48 = vld [vmem:[#allocation10 + $0x20] sm:$0xff]   ;;  %17697 = vmatpush3.bf16.msra.mxu1 %v19138_v30 }
0x13d0   : > { %v8349_v37 = vadd.f32 %v8328_v44, %v8309_v14  ;;  %v8264_v3 = vadd.f32 %v17670_v55, %v8251_v36  ;;  %v8187_v29 = vpop.f32.mrb[93].mxu1  ;;  %v19132_v36 = vld [vmem:[#allocation10 + $0x10] sm:$0xff]   ;;  %v21545_v30 = vld [vmem:[%s22932_s15 + $0x48] sm:$0xff]  }
0x13d1   : > { %v8347_v4 = vadd.f32 %v8320_v18, %v8307_v52  ;;  %v8262_v0 = vadd.f32 %v8241_v61, %v8187_v29  ;;  %v17671_v41 = vpop.f32.mrb[94].mxu1 }
0x13d2   : > { %v8355_v31 = vpack.c.bf16 %v8349_v37, %v8348_v51  ;;  %v8272_v33 = vmax.f32 %v8264_v3, 0.0  ;;  %v8265_v50 = vadd.f32 %v17671_v41, %v8256_v59  ;;  %v8190_v20 = vpop.f32.mrb[95].mxu1  ;;  %v19133_v59 = vld [vmem:[#allocation10 + $0x18] sm:$0xff]   ;;  %v19140_v3 = vld [vmem:[#allocation8 + $0x10] sm:$0xff]  }
0x13d3   : > { %v8354_v56 = vpack.c.bf16 %v8347_v4, %v8346_v54  ;;  %v8270_v43 = vmax.f32 %v8262_v0, 0.0  ;;  %v8263_v22 = vadd.f32 %v8246_v34, %v8190_v20  ;;  %v19131_v34 = vld [vmem:[#allocation10 + $0x8] sm:$0xff]   ;;  %v19141_v54 = vld [vmem:[#allocation8 + $0x18] sm:$0xff]  }
0x13d4   : > { %v8312_v1 = vmul.f32 %v8300_v42, %v8272_v33  ;;  %v8273_v32 = vmax.f32 %v8265_v50, 0.0 }
0x13d5   : > { %v8310_v26 = vmul.f32 %v8292_v6, %v8270_v43  ;;  %v8271_v40 = vmax.f32 %v8263_v22, 0.0  ;;  %17672 = vmatprep.subr.bf16.mxu0 %v8354_v56  ;;  %v19135_v6 = vld [vmem:[#allocation10 + $0x28] sm:$0xff]  }
0x13d6   : > { %v8313_v38 = vmul.f32 %v8304_v39, %v8273_v32  ;;  %17673 = vmatpush3.bf16.msra.mxu0 %v8354_v56  ;;  %v8352_v18 = vadd.f32 %v8340_v47, %v8312_v1 }
0x13d7   : > { %v8311_v23 = vmul.f32 %v8296_v11, %v8271_v40  ;;  %17674 = vmatprep.subr.bf16.mxu0 %v8355_v31  ;;  %v8350_v28 = vadd.f32 %v8332_v60, %v8310_v26  ;;  %v19137_v60 = vld [vmem:[#allocation10 + $0x38] sm:$0xff]  }
0x13d8   : > { %v8353_v17 = vadd.f32 %v8344_v16, %v8313_v38  ;;  %v21483_v11 = vld [vmem:[%s22932_s15 + $0x28] sm:$0xff]   ;;  %v8915_v16 = vpop.permute.xlu1 %8914 }
0x13d9   : > { %v8351_v57 = vadd.f32 %v8336_v27, %v8311_v23  ;;  %v19139_v27 = vld [vmem:[#allocation8] sm:$0xff]  }
0x13da   : > { %v8357_v61 = vpack.c.bf16 %v8353_v17, %v8352_v18  ;;  %17675 = vmatpush3.bf16.msra.mxu0 %v8355_v31  ;;  %17702 = vmatprep.subr.bf16.mxu1 %v19139_v27 }
0x13db   : > { %v8356_v44 = vpack.c.bf16 %v8351_v57, %v8350_v28 }
0x13dc   : > { %v8925_v23 = vpop.permute.xlu1 %8924 }
0x13dd   : > { %17676 = vmatprep.subr.bf16.mxu0 %v8356_v44 }
0x13de   : > { %17677 = vmatpush3.bf16.msra.mxu0 %v8356_v44 }
0x13df   : > { %17678 = vmatprep.subr.bf16.mxu0 %v8357_v61 }
0x13e0   : > { %v8930_v28 = vpop.permute.xlu1 %8929 }
0x13e2   : > { %17679 = vmatpush3.bf16.msra.mxu0 %v8357_v61 }
0x13e3   : > { %17684 = vmatprep.subr.bf16.mxu0 %v8354_v56 }
0x13e5   : > { %17681 = vmatmul.mubr.msk.bf16.vlgmr.msra.gmra.mrb[108].mxu0 %vm2335_vm13, %v19131_v34 }
0x13e6   : > { %17685 = vmatpush3.bf16.msra.mxu0 %v8354_v56  ;;  %17692 = vmatprep.mubr.msk.bf16.mxu0 %vm2335_vm13, %v19132_v36 }
0x13e7   : > { %17686 = vmatprep.subr.bf16.mxu0 %v8355_v31 }
0x13ea   : > { %17687 = vmatpush3.bf16.msra.mxu0 %v8355_v31 }
0x13eb   : > { %17688 = vmatprep.subr.bf16.mxu0 %v8356_v44 }
0x13ee   : > { %17689 = vmatpush3.bf16.msra.mxu0 %v8356_v44 }
0x13ef   : > { %17690 = vmatprep.subr.bf16.mxu0 %v8357_v61 }
0x13f2   : > { %17691 = vmatpush3.bf16.msra.mxu0 %v8357_v61 }
0x13f3   : > { %17708 = vmatprep.subr.bf16.mxu0 %v8354_v56 }
0x13f5   : > { %17693 = vmatmul.mubr.msk.bf16.vlgmr.msra.gmra.mrb[112].mxu0 %vm2335_vm13, %v19133_v59 }
0x13f6   : > { %17709 = vmatpush3.bf16.msra.mxu0 %v8354_v56  ;;  %17716 = vmatprep.mubr.msk.bf16.mxu0 %vm2335_vm13, %v19134_v48 }
0x13f7   : > { %17710 = vmatprep.subr.bf16.mxu0 %v8355_v31 }
0x13fa   : > { %17711 = vmatpush3.bf16.msra.mxu0 %v8355_v31 }
0x13fb   : > { %17712 = vmatprep.subr.bf16.mxu0 %v8356_v44 }
0x13fe   : > { %17713 = vmatpush3.bf16.msra.mxu0 %v8356_v44 }
0x13ff   : > { %17714 = vmatprep.subr.bf16.mxu0 %v8357_v61 }
0x1402   : > { %17715 = vmatpush3.bf16.msra.mxu0 %v8357_v61 }
0x1403   : > { %17726 = vmatprep.subr.bf16.mxu0 %v8354_v56 }
0x1405   : > { %17717 = vmatmul.mubr.msk.bf16.vlgmr.msra.gmra.mrb[116].mxu0 %vm2335_vm13, %v19135_v6 }
0x1406   : > { %17727 = vmatpush3.bf16.msra.mxu0 %v8354_v56  ;;  %17734 = vmatprep.mubr.msk.bf16.mxu0 %vm2335_vm13, %v19136_v63 }
0x1407   : > { %17728 = vmatprep.subr.bf16.mxu0 %v8355_v31 }
0x140a   : > { %17729 = vmatpush3.bf16.msra.mxu0 %v8355_v31 }
0x140b   : > { %17730 = vmatprep.subr.bf16.mxu0 %v8356_v44 }
0x140e   : > { %17731 = vmatpush3.bf16.msra.mxu0 %v8356_v44 }
0x140f   : > { %17732 = vmatprep.subr.bf16.mxu0 %v8357_v61 }
0x1412   : > { %17733 = vmatpush3.bf16.msra.mxu0 %v8357_v61  ;;  %v8920_v61 = vpop.permute.xlu0 %8919 }
0x1413   : > { %17756 = vmatprep.subr.bf16.mxu0 %v21453_v19 }
0x1415   : > { %17735 = vmatmul.mubr.msk.bf16.vlgmr.msra.gmra.mrb[120].mxu0 %vm2335_vm13, %v19137_v60  ;;  %v21536_v60 = vld [vmem:[%s22932_s15 + $0x40] sm:$0xff]  }
0x1416   : > { %17757 = vmatpush3.bf16.msra.mxu0 %v21453_v19  ;;  %17764 = vmatprep.mubr.msk.bf16.mxu0 %vm2335_vm13, %v21029_v10 }
0x1417   : > { %17758 = vmatprep.subr.bf16.mxu0 %v21461_v46 }
0x141a   : > { %17759 = vmatpush3.bf16.msra.mxu0 %v21461_v46 }
0x141b   : > { %17760 = vmatprep.subr.bf16.mxu0 %v21466_v35 }
0x141e   : > { %17761 = vmatpush3.bf16.msra.mxu0 %v21466_v35 }
0x141f   : > { %17762 = vmatprep.subr.bf16.mxu0 %v21471_v62 }
0x1422   : > { %17763 = vmatpush3.bf16.msra.mxu0 %v21471_v62 }
0x1423   : > { %17784 = vmatprep.subr.bf16.mxu0 %v21476_v7 }
0x1425   : > { %17765 = vmatmul.mubr.msk.bf16.vlgmr.msra.gmra.mrb[124].mxu0 %vm2335_vm13, %v21031_v2 }
0x1426   : > { %17785 = vmatpush3.bf16.msra.mxu0 %v21476_v7 }
0x1427   : > { %17786 = vmatprep.subr.bf16.mxu0 %v21483_v11 }
0x142a   : > { %17787 = vmatpush3.bf16.msra.mxu0 %v21483_v11 }
0x142b   : > { %17788 = vmatprep.subr.bf16.mxu0 %v21488_v5 }
0x142e   : > { %17789 = vmatpush3.bf16.msra.mxu0 %v21488_v5 }
0x142f   : > { %17790 = vmatprep.subr.bf16.mxu0 %v21493_v58 }
0x1432   : > { %17791 = vmatpush3.bf16.msra.mxu0 %v21493_v58 }
0x1433   : > { %17804 = vmatprep.subr.bf16.mxu0 %v21476_v7 }
0x14b8   : > { %v17682_v9 = vpop.f32.mrb[108].mxu0 }
0x14b9   : > { %v8412_v53 = vpop.f32.mrb[109].mxu0 }
0x14ba   : > { %v17683_v15 = vpop.f32.mrb[110].mxu0 }
0x14bb   : > { %v8428_v13 = vpack.c.bf16 %v17683_v15, %v17682_v9  ;;  %v8415_v49 = vpop.f32.mrb[111].mxu0  ;;  %v21555_v9 = vld [vmem:[%s22932_s15 + $0x58] sm:$0xff]   ;;  %v21569_v15 = vld [vmem:[%s22932_s15 + $0x68] sm:$0xff]  }
0x14bc   : > { %v8427_v12 = vpack.c.bf16 %v8415_v49, %v8412_v53  ;;  %v21560_v53 = vld [vmem:[%s22932_s15 + $0x60] sm:$0xff]   ;;  %v21579_v49 = vld [vmem:[%s22932_s15 + $0x78] sm:$0xff]  }
0x14c8   : > { %v17694_v14 = vpop.f32.mrb[112].mxu0 }
0x14c9   : > { %v8486_v52 = vpop.f32.mrb[113].mxu0 }
0x14ca   : > { %v17695_v55 = vpop.f32.mrb[114].mxu0 }
0x14cb   : > { %v8502_v42 = vpack.c.bf16 %v17695_v55, %v17694_v14  ;;  %v8489_v51 = vpop.f32.mrb[115].mxu0  ;;  %v21605_v14 = vld [vmem:[%s22932_s15 + $0xa8] sm:$0xff]   ;;  %v21615_v55 = vld [vmem:[%s22932_s15 + $0xb8] sm:$0xff]  }
0x14cc   : > { %v8501_v37 = vpack.c.bf16 %v8489_v51, %v8486_v52  ;;  %v21610_v52 = vld [vmem:[%s22932_s15 + $0xb0] sm:$0xff]   ;;  %v21629_v51 = vld [vmem:[%s22932_s15 + $0xc8] sm:$0xff]  }
0x14ce   : > { %17698 = vmatprep.mubr.msk.bf16.mxu1 %vm2475_vm14, %v8501_v37  ;;  %v19142_v37 = vld [vmem:[%s22939_s0] sm:$0xff]  }
0x14cf   : > { %17699 = vmatmul.mubr.msk.bf16.vlgmr.msra.gmra.mrb[104].mxu1 %vm2475_vm14, %v8502_v42  ;;  %v21620_v42 = vld [vmem:[%s22932_s15 + $0xc0] sm:$0xff]  }
0x14d0   : > { %17704 = vmatprep.mubr.msk.bf16.mxu1 %vm2475_vm14, %v8427_v12  ;;  %17703 = vmatpush3.bf16.msra.mxu1 %v19139_v27  ;;  %v21550_v27 = vld [vmem:[%s22932_s15 + $0x50] sm:$0xff]   ;;  %v21596_v12 = vld [vmem:[%s22932_s15 + $0xa0] sm:$0xff]  }
0x14d1   : > { %17720 = vmatprep.subr.bf16.mxu1 %v19140_v3 }
0x14d8   : > { %v17718_v29 = vpop.f32.mrb[116].mxu0 }
0x14d9   : > { %v8683_v39 = vpop.f32.mrb[117].mxu0 }
0x14da   : > { %v17719_v4 = vpop.f32.mrb[118].mxu0 }
0x14db   : > { %17705 = vmatmul.mubr.msk.bf16.vlgmr.msra.gmra.mrb[104].mxu1 %vm2475_vm14, %v8428_v13  ;;  %v8699_v0 = vpack.c.bf16 %v17719_v4, %v17718_v29  ;;  %v8686_v41 = vpop.f32.mrb[119].mxu0  ;;  %v21574_v13 = vld [vmem:[%s22932_s15 + $0x70] sm:$0xff]   ;;  %v21662_v4 = vld [vmem:[%s22932_s15 + $0xe0] sm:$0xff]  }
0x14dc   : > { %v8698_v31 = vpack.c.bf16 %v8686_v41, %v8683_v39  ;;  %17721 = vmatpush3.bf16.msra.mxu1 %v19140_v3  ;;  %v19143_v3 = vld [vmem:[%s22939_s0 + $0x8] sm:$0xff]   ;;  %v21637_v29 = vld [vmem:[%s22932_s15 + $0xd0] sm:$0xff]   ;;  %v21643_v39 = vld [vmem:[%s22932_s15 + $0xd8] sm:$0xff]  }
0x14dd   : > { %17738 = vmatprep.subr.bf16.mxu1 %v19141_v54  ;;  %22941 = vst [vmem:[#allocation79_spill] sm:$0xff] %v21643_v39  ;;  %v21676_v41 = vld [vmem:[%s22932_s15 + $0xf0] sm:$0xff]  }
0x14de   : > { %17722 = vmatprep.mubr.msk.bf16.mxu1 %vm2475_vm14, %v8698_v31  ;;  %v21681_v31 = vld [vmem:[%s22932_s15 + $0xf8] sm:$0xff]  }
0x14e7   : > { %17723 = vmatmul.mubr.msk.bf16.vlgmr.msra.gmra.mrb[104].mxu1 %vm2475_vm14, %v8699_v0  ;;  %v21671_v0 = vld [vmem:[%s22932_s15 + $0xe8] sm:$0xff]  }
0x14e8   : > { %v17736_v33 = vpop.f32.mrb[120].mxu0  ;;  %17739 = vmatpush3.bf16.msra.mxu1 %v19141_v54  ;;  %v19144_v54 = vld [vmem:[%s22940_s3] sm:$0xff]  }
0x14e9   : > { %v8823_v50 = vpop.f32.mrb[121].mxu0  ;;  %17744 = vmatprep.subr.bf16.mxu1 %v21453_v19 }
0x14ea   : > { %v17737_v20 = vpop.f32.mrb[122].mxu0 }
0x14eb   : > { %v8839_v56 = vpack.c.bf16 %v17737_v20, %v17736_v33  ;;  %v8826_v43 = vpop.f32.mrb[123].mxu0  ;;  %v21686_v33 = vld [vmem:[%s22932_s15 + $0x100] sm:$0xff]   ;;  %v21700_v20 = vld [vmem:[%s22932_s15 + $0x110] sm:$0xff]  }
0x14ec   : > { %v8838_v22 = vpack.c.bf16 %v8826_v43, %v8823_v50  ;;  %v21695_v50 = vld [vmem:[%s22932_s15 + $0x108] sm:$0xff]  }
0x14ee   : > { %17740 = vmatprep.mubr.msk.bf16.mxu1 %vm2475_vm14, %v8838_v22 }
0x14f3   : > { %17741 = vmatmul.mubr.msk.bf16.vlgmr.msra.gmra.mrb[104].mxu1 %vm2475_vm14, %v8839_v56  ;;  %v21705_v56 = vld [vmem:[%s22932_s15 + $0x118] sm:$0xff]  }
0x14f4   : > { %17745 = vmatpush3.bf16.msra.mxu1 %v21453_v19 }
0x14f5   : > { %17746 = vmatprep.subr.bf16.mxu1 %v21461_v46 }
0x14f8   : > { %17747 = vmatpush3.bf16.msra.mxu1 %v21461_v46  ;;  %v17766_v1 = vpop.f32.mrb[124].mxu0 }
0x14f9   : > { %v9033_v32 = vpop.f32.mrb[125].mxu0  ;;  %17748 = vmatprep.subr.bf16.mxu1 %v21466_v35 }
0x14fa   : > { %v17767_v26 = vpop.f32.mrb[126].mxu0 }
0x14fb   : > { %v9049_v40 = vpack.c.bf16 %v17767_v26, %v17766_v1  ;;  %v9036_v38 = vpop.f32.mrb[127].mxu0 }
0x14fc   : > { %17749 = vmatpush3.bf16.msra.mxu1 %v21466_v35  ;;  %v9048_v47 = vpack.c.bf16 %v9036_v38, %v9033_v32 }
0x14fd   : > { %17750 = vmatprep.subr.bf16.mxu1 %v21471_v62 }
0x1500   : > { %17751 = vmatpush3.bf16.msra.mxu1 %v21471_v62 }
0x1501   : > { %17768 = vmatprep.subr.bf16.mxu1 %v9048_v47 }
0x15c6   : > { %v17742_v18 = vpop.f32.mrb[104].mxu1 }
0x15c7   : > { %v8889_v17 = vpop.f32.mrb[105].mxu1  ;;  %v8934_v44 = vadd.f32 %v17742_v18, %v8925_v23  ;;  %v19146_v23 = vld [vmem:[%s22940_s3 + $0x10] sm:$0xff]  }
0x15c8   : > { %v17743_v57 = vpop.f32.mrb[106].mxu1  ;;  %v8932_v59 = vadd.f32 %v8915_v16, %v8889_v17 }
0x15c9   : > { %v8935_v34 = vadd.f32 %v17743_v57, %v8930_v28  ;;  %v8892_v36 = vpop.f32.mrb[107].mxu1 }
0x15ca   : > { %v8933_v48 = vadd.f32 %v8920_v61, %v8892_v36  ;;  %v19148_v36 = vld [vmem:[%s22939_s0 + $0x10] sm:$0xff]  }
0x15cb   : > { %v21514_v6 = vpack.c.bf16 %v8935_v34, %v8934_v44  ;;  %v19147_v34 = vld [vmem:[%s22940_s3 + $0x18] sm:$0xff]  }
0x15cc   : > { %v21516_v63 = vpack.c.bf16 %v8933_v48, %v8932_v59 }
0x15ce   : > { %17752 = vmatprep.mubr.msk.bf16.mxu1 %vm2335_vm13, %v21516_v63  ;;  %17792 = vmatprep.mubr.msk.bf16.mxu0 %vm2335_vm13, %v21516_v63 }
0x15cf   : > { %17753 = vmatmul.mubr.msk.bf16.vlgmr.msra.gmra.mrb[108].mxu1 %vm2335_vm13, %v21514_v6  ;;  %17793 = vmatmul.mubr.msk.bf16.vlgmr.msra.gmra.mrb[128].mxu0 %vm2335_vm13, %v21514_v6 }
0x15d0   : > { %17769 = vmatpush3.bf16.msra.mxu1 %v9048_v47  ;;  %17805 = vmatpush3.bf16.msra.mxu0 %v21476_v7 }
0x15d1   : > { %17770 = vmatprep.subr.bf16.mxu1 %v9049_v40  ;;  %17812 = vmatprep.mubr.msk.bf16.mxu0 %vm2335_vm13, %v21029_v10 }
0x15d2   : > { %17806 = vmatprep.subr.bf16.mxu0 %v21483_v11  ;;  %17772 = vmatprep.mubr.msk.bf16.mxu1 %vm3765_vm15, %v19142_v37 }
0x15d4   : > { %17771 = vmatpush3.bf16.msra.mxu1 %v9049_v40  ;;  %17807 = vmatpush3.bf16.msra.mxu0 %v21483_v11 }
0x15d5   : > { %17808 = vmatprep.subr.bf16.mxu0 %v21488_v5 }
0x15d7   : > { %17773 = vmatmul.mubr.msk.bf16.vlgmr.msra.gmra.mrb[112].mxu1 %vm3765_vm15, %v19143_v3  ;;  %v19149_v3 = vld [vmem:[%s22939_s0 + $0x18] sm:$0xff]  }
0x15d8   : > { %17809 = vmatpush3.bf16.msra.mxu0 %v21488_v5  ;;  %17780 = vmatprep.mubr.msk.bf16.mxu1 %vm3765_vm15, %v19144_v54 }
0x15d9   : > { %17810 = vmatprep.subr.bf16.mxu0 %v21493_v58 }
0x15dc   : > { %17811 = vmatpush3.bf16.msra.mxu0 %v21493_v58 }
0x15dd   : > { %17844 = vmatprep.subr.bf16.mxu0 %v21536_v60 }
0x15df   : > { %17813 = vmatmul.mubr.msk.bf16.vlgmr.msra.gmra.mrb[132].mxu0 %vm2335_vm13, %v21031_v2 }
0x15e0   : > { %17845 = vmatpush3.bf16.msra.mxu0 %v21536_v60  ;;  %17852 = vmatprep.mubr.msk.bf16.mxu0 %vm2335_vm13, %v21029_v10 }
0x15e1   : > { %17846 = vmatprep.subr.bf16.mxu0 %v21545_v30 }
0x15e4   : > { %17847 = vmatpush3.bf16.msra.mxu0 %v21545_v30 }
0x15e5   : > { %17848 = vmatprep.subr.bf16.mxu0 %v21550_v27 }
0x15e8   : > { %17849 = vmatpush3.bf16.msra.mxu0 %v21550_v27 }
0x15e9   : > { %17850 = vmatprep.subr.bf16.mxu0 %v21555_v9 }
0x15ec   : > { %17851 = vmatpush3.bf16.msra.mxu0 %v21555_v9 }
0x15ed   : > { %17864 = vmatprep.subr.bf16.mxu0 %v21560_v53 }
0x15ef   : > { %17853 = vmatmul.mubr.msk.bf16.vlgmr.msra.gmra.mrb[136].mxu0 %vm2335_vm13, %v21031_v2 }
0x15f0   : > { %17865 = vmatpush3.bf16.msra.mxu0 %v21560_v53  ;;  %17872 = vmatprep.mubr.msk.bf16.mxu0 %vm2335_vm13, %v21516_v63 }
0x15f1   : > { %17866 = vmatprep.subr.bf16.mxu0 %v21569_v15 }
0x15f4   : > { %17867 = vmatpush3.bf16.msra.mxu0 %v21569_v15 }
0x15f5   : > { %17868 = vmatprep.subr.bf16.mxu0 %v21574_v13 }
0x15f8   : > { %17869 = vmatpush3.bf16.msra.mxu0 %v21574_v13 }
0x15f9   : > { %17870 = vmatprep.subr.bf16.mxu0 %v21579_v49 }
0x15fc   : > { %17871 = vmatpush3.bf16.msra.mxu0 %v21579_v49 }
0x15fd   : > { %17884 = vmatprep.subr.bf16.mxu0 %v21560_v53 }
0x15ff   : > { %17873 = vmatmul.mubr.msk.bf16.vlgmr.msra.gmra.mrb[140].mxu0 %vm2335_vm13, %v21514_v6 }
0x1600   : > { %17885 = vmatpush3.bf16.msra.mxu0 %v21560_v53  ;;  %17892 = vmatprep.mubr.msk.bf16.mxu0 %vm2335_vm13, %v21029_v10 }
0x1601   : > { %17886 = vmatprep.subr.bf16.mxu0 %v21569_v15 }
0x1604   : > { %17887 = vmatpush3.bf16.msra.mxu0 %v21569_v15 }
0x1605   : > { %17888 = vmatprep.subr.bf16.mxu0 %v21574_v13 }
0x1608   : > { %17889 = vmatpush3.bf16.msra.mxu0 %v21574_v13 }
0x1609   : > { %17890 = vmatprep.subr.bf16.mxu0 %v21579_v49 }
0x160c   : > { %17891 = vmatpush3.bf16.msra.mxu0 %v21579_v49 }
0x160d   : > { %17920 = vmatprep.subr.bf16.mxu0 %v21596_v12 }
0x160f   : > { %17893 = vmatmul.mubr.msk.bf16.vlgmr.msra.gmra.mrb[144].mxu0 %vm2335_vm13, %v21031_v2 }
0x1610   : > { %17921 = vmatpush3.bf16.msra.mxu0 %v21596_v12  ;;  %17928 = vmatprep.mubr.msk.bf16.mxu0 %vm2335_vm13, %v21516_v63 }
0x1611   : > { %17922 = vmatprep.subr.bf16.mxu0 %v21605_v14 }
0x1614   : > { %17923 = vmatpush3.bf16.msra.mxu0 %v21605_v14 }
0x1615   : > { %17924 = vmatprep.subr.bf16.mxu0 %v21610_v52 }
0x1618   : > { %17925 = vmatpush3.bf16.msra.mxu0 %v21610_v52 }
0x1619   : > { %17926 = vmatprep.subr.bf16.mxu0 %v21615_v55 }
0x161c   : > { %17927 = vmatpush3.bf16.msra.mxu0 %v21615_v55 }
0x161d   : > { %17948 = vmatprep.subr.bf16.mxu0 %v21620_v42 }
0x161f   : > { %17929 = vmatmul.mubr.msk.bf16.vlgmr.msra.gmra.mrb[148].mxu0 %vm2335_vm13, %v21514_v6 }
0x1620   : > { %17949 = vmatpush3.bf16.msra.mxu0 %v21620_v42  ;;  %17956 = vmatprep.mubr.msk.bf16.mxu0 %vm2335_vm13, %v21516_v63 }
0x1621   : > { %17950 = vmatprep.subr.bf16.mxu0 %v21629_v51 }
0x1624   : > { %17951 = vmatpush3.bf16.msra.mxu0 %v21629_v51 }
0x1625   : > { %17952 = vmatprep.subr.bf16.mxu0 %v21637_v29 }
0x1628   : > { %17953 = vmatpush3.bf16.msra.mxu0 %v21637_v29 }
0x1629   : > { %17954 = vmatprep.subr.bf16.mxu0 %v21643_v39 }
0x162c   : > { %17955 = vmatpush3.bf16.msra.mxu0 %v21643_v39 }
0x162d   : > { %17968 = vmatprep.subr.bf16.mxu0 %v21620_v42 }
0x162f   : > { %17957 = vmatmul.mubr.msk.bf16.vlgmr.msra.gmra.mrb[152].mxu0 %vm2335_vm13, %v21514_v6 }
0x1630   : > { %17969 = vmatpush3.bf16.msra.mxu0 %v21620_v42  ;;  %17976 = vmatprep.mubr.msk.bf16.mxu0 %vm2335_vm13, %v21029_v10 }
0x1631   : > { %17970 = vmatprep.subr.bf16.mxu0 %v21629_v51 }
0x1634   : > { %17971 = vmatpush3.bf16.msra.mxu0 %v21629_v51 }
0x1635   : > { %17972 = vmatprep.subr.bf16.mxu0 %v21637_v29 }
0x1638   : > { %17973 = vmatpush3.bf16.msra.mxu0 %v21637_v29 }
0x1639   : > { %17974 = vmatprep.subr.bf16.mxu0 %v21643_v39 }
0x163c   : > { %17975 = vmatpush3.bf16.msra.mxu0 %v21643_v39  ;;  %v19152_v39 = vld [vmem:[%s22939_s0 + $0x20] sm:$0xff]  }
0x163d   : > { %18008 = vmatprep.subr.bf16.mxu0 %v21662_v4 }
0x163f   : > { %17977 = vmatmul.mubr.msk.bf16.vlgmr.msra.gmra.mrb[156].mxu0 %vm2335_vm13, %v21031_v2 }
0x1640   : > { %18009 = vmatpush3.bf16.msra.mxu0 %v21662_v4  ;;  %18016 = vmatprep.mubr.msk.bf16.mxu0 %vm2335_vm13, %v21029_v10 }
0x1641   : > { %18010 = vmatprep.subr.bf16.mxu0 %v21671_v0 }
0x1644   : > { %18011 = vmatpush3.bf16.msra.mxu0 %v21671_v0 }
0x1645   : > { %18012 = vmatprep.subr.bf16.mxu0 %v21676_v41 }
0x1648   : > { %18013 = vmatpush3.bf16.msra.mxu0 %v21676_v41 }
0x1649   : > { %18014 = vmatprep.subr.bf16.mxu0 %v21681_v31 }
0x164c   : > { %18015 = vmatpush3.bf16.msra.mxu0 %v21681_v31 }
0x164d   : > { %18028 = vmatprep.subr.bf16.mxu0 %v21686_v33 }
0x164f   : > { %18017 = vmatmul.mubr.msk.bf16.vlgmr.msra.gmra.mrb[160].mxu0 %vm2335_vm13, %v21031_v2 }
0x1650   : > { %18029 = vmatpush3.bf16.msra.mxu0 %v21686_v33  ;;  %18036 = vmatprep.mubr.msk.bf16.mxu0 %vm2335_vm13, %v21516_v63 }
0x1651   : > { %18030 = vmatprep.subr.bf16.mxu0 %v21695_v50 }
0x1654   : > { %18031 = vmatpush3.bf16.msra.mxu0 %v21695_v50 }
0x1655   : > { %18032 = vmatprep.subr.bf16.mxu0 %v21700_v20 }
0x1658   : > { %18033 = vmatpush3.bf16.msra.mxu0 %v21700_v20 }
0x1659   : > { %18034 = vmatprep.subr.bf16.mxu0 %v21705_v56 }
0x165c   : > { %18035 = vmatpush3.bf16.msra.mxu0 %v21705_v56 }
0x165d   : > { %18048 = vmatprep.subr.bf16.mxu0 %v21686_v33 }
0x165f   : > { %18037 = vmatmul.mubr.msk.bf16.vlgmr.msra.gmra.mrb[164].mxu0 %vm2335_vm13, %v21514_v6 }
0x1660   : > { %18049 = vmatpush3.bf16.msra.mxu0 %v21686_v33  ;;  %18056 = vmatprep.mubr.msk.bf16.mxu0 %vm2335_vm13, %v21029_v10 }
0x1661   : > { %18050 = vmatprep.subr.bf16.mxu0 %v21695_v50 }
0x1664   : > { %18051 = vmatpush3.bf16.msra.mxu0 %v21695_v50 }
0x1665   : > { %18052 = vmatprep.subr.bf16.mxu0 %v21700_v20 }
0x1668   : > { %18053 = vmatpush3.bf16.msra.mxu0 %v21700_v20 }
0x1669   : > { %18054 = vmatprep.subr.bf16.mxu0 %v21705_v56 }
0x166c   : > { %18055 = vmatpush3.bf16.msra.mxu0 %v21705_v56 }
0x166d   : > { %18080 = vmatprep.subr.bf16.mxu0 %v21476_v7 }
0x166f   : > { %18057 = vmatmul.mubr.msk.bf16.vlgmr.msra.gmra.mrb[168].mxu0 %vm2335_vm13, %v21031_v2 }
0x1670   : > { %18081 = vmatpush3.bf16.msra.mxu0 %v21476_v7 }
0x1671   : > { %18082 = vmatprep.subr.bf16.mxu0 %v21483_v11 }
0x1674   : > { %18083 = vmatpush3.bf16.msra.mxu0 %v21483_v11 }
0x1675   : > { %18084 = vmatprep.subr.bf16.mxu0 %v21488_v5 }
0x1678   : > { %18085 = vmatpush3.bf16.msra.mxu0 %v21488_v5 }
0x1679   : > { %18086 = vmatprep.subr.bf16.mxu0 %v21493_v58 }
0x167c   : > { %18087 = vmatpush3.bf16.msra.mxu0 %v21493_v58  ;;  %v19145_v58 = vld [vmem:[%s22940_s3 + $0x8] sm:$0xff]  }
0x167d   : > { %18108 = vmatprep.subr.bf16.mxu0 %v21536_v60 }
0x16a2   : > { %v17754_v43 = vpop.f32.mrb[108].mxu1  ;;  %v17794_v22 = vpop.f32.mrb[128].mxu0 }
0x16a3   : > { %v8978_v1 = vpop.f32.mrb[109].mxu1  ;;  %v9218_v7 = vpop.f32.mrb[129].mxu0 }
0x16a4   : > { %v17755_v32 = vpop.f32.mrb[110].mxu1  ;;  %v17795_v26 = vpop.f32.mrb[130].mxu0 }
0x16a5   : > { %v8994_v40 = vpack.c.bf16 %v17755_v32, %v17754_v43  ;;  %v9234_v11 = vpack.c.bf16 %v17795_v26, %v17794_v22  ;;  %v8981_v38 = vpop.f32.mrb[111].mxu1  ;;  %v9221_v47 = vpop.f32.mrb[131].mxu0 }
0x16a6   : > { %v8993_v16 = vpack.c.bf16 %v8981_v38, %v8978_v1  ;;  %v9233_v5 = vpack.c.bf16 %v9221_v47, %v9218_v7 }
0x16a8   : > { %17776 = vmatprep.subr.bf16.mxu1 %v8993_v16 }
0x16a9   : > { %17777 = vmatpush3.bf16.msra.mxu1 %v8993_v16 }
0x16aa   : > { %17778 = vmatprep.subr.bf16.mxu1 %v8994_v40 }
0x16ad   : > { %17779 = vmatpush3.bf16.msra.mxu1 %v8994_v40 }
0x16ae   : > { %17796 = vmatprep.subr.bf16.mxu1 %v9233_v5 }
0x16b0   : > { %17781 = vmatmul.mubr.msk.bf16.vlgmr.msra.gmra.mrb[112].mxu1 %vm3765_vm15, %v19145_v58 }
0x16b1   : > { %17797 = vmatpush3.bf16.msra.mxu1 %v9233_v5  ;;  %17800 = vmatprep.mubr.msk.bf16.mxu1 %vm3765_vm15, %v19146_v23 }
0x16b2   : > { %v17814_v18 = vpop.f32.mrb[132].mxu0  ;;  %17798 = vmatprep.subr.bf16.mxu1 %v9234_v11 }
0x16b3   : > { %v9343_v17 = vpop.f32.mrb[133].mxu0 }
0x16b4   : > { %v17815_v28 = vpop.f32.mrb[134].mxu0 }
0x16b5   : > { %v9359_v57 = vpack.c.bf16 %v17815_v28, %v17814_v18  ;;  %v9346_v61 = vpop.f32.mrb[135].mxu0  ;;  %17799 = vmatpush3.bf16.msra.mxu1 %v9234_v11 }
0x16b6   : > { %v9358_v44 = vpack.c.bf16 %v9346_v61, %v9343_v17 }
0x16b8   : > { %17816 = vmatprep.subr.bf16.mxu1 %v9358_v44 }
0x16bc   : > { %17801 = vmatmul.mubr.msk.bf16.vlgmr.msra.gmra.mrb[112].mxu1 %vm3765_vm15, %v19147_v34 }
0x16bd   : > { %17817 = vmatpush3.bf16.msra.mxu1 %v9358_v44  ;;  %17820 = vmatprep.mubr.msk.bf16.mxu1 %vm3765_vm15, %v19148_v36 }
0x16be   : > { %17818 = vmatprep.subr.bf16.mxu1 %v9359_v57 }
0x16c1   : > { %17819 = vmatpush3.bf16.msra.mxu1 %v9359_v57 }
0x16c2   : > { %v17854_v59 = vpop.f32.mrb[136].mxu0  ;;  %17824 = vmatprep.subr.bf16.mxu1 %v21536_v60 }
0x16c3   : > { %v9593_v48 = vpop.f32.mrb[137].mxu0 }
0x16c4   : > { %v17855_v37 = vpop.f32.mrb[138].mxu0 }
0x16c5   : > { %v21742_v54 = vpack.c.bf16 %v17855_v37, %v17854_v59  ;;  %v9596_v43 = vpop.f32.mrb[139].mxu0 }
0x16c6   : > { %v21744_v22 = vpack.c.bf16 %v9596_v43, %v9593_v48 }
0x16c8   : > { %17821 = vmatmul.mubr.msk.bf16.vlgmr.msra.gmra.mrb[112].mxu1 %vm3765_vm15, %v19149_v3 }
0x16c9   : > { %17825 = vmatpush3.bf16.msra.mxu1 %v21536_v60  ;;  %17832 = vmatprep.mubr.msk.bf16.mxu1 %vm2335_vm13, %v21516_v63 }
0x16ca   : > { %17826 = vmatprep.subr.bf16.mxu1 %v21545_v30 }
0x16cd   : > { %17827 = vmatpush3.bf16.msra.mxu1 %v21545_v30 }
0x16ce   : > { %17828 = vmatprep.subr.bf16.mxu1 %v21550_v27 }
0x16d1   : > { %17829 = vmatpush3.bf16.msra.mxu1 %v21550_v27 }
0x16d2   : > { %v17874_v1 = vpop.f32.mrb[140].mxu0  ;;  %17830 = vmatprep.subr.bf16.mxu1 %v21555_v9 }
0x16d3   : > { %v9718_v7 = vpop.f32.mrb[141].mxu0 }
0x16d4   : > { %v17875_v32 = vpop.f32.mrb[142].mxu0 }
0x16d5   : > { %v21755_v26 = vpack.c.bf16 %v17875_v32, %v17874_v1  ;;  %17831 = vmatpush3.bf16.msra.mxu1 %v21555_v9  ;;  %v9721_v40 = vpop.f32.mrb[143].mxu0 }
0x16d6   : > { %v21758_v11 = vpack.c.bf16 %v9721_v40, %v9718_v7 }
0x16d8   : > { %17833 = vmatmul.mubr.msk.bf16.vlgmr.msra.gmra.mrb[116].mxu1 %vm2335_vm13, %v21514_v6 }
0x16e2   : > { %v17894_v38 = vpop.f32.mrb[144].mxu0 }
0x16e3   : > { %v9843_v47 = vpop.f32.mrb[145].mxu0 }
0x16e4   : > { %v17895_v16 = vpop.f32.mrb[146].mxu0 }
0x16e5   : > { %v21762_v5 = vpack.c.bf16 %v17895_v16, %v17894_v38  ;;  %v9846_v58 = vpop.f32.mrb[147].mxu0 }
0x16e6   : > { %v21764_v23 = vpack.c.bf16 %v9846_v58, %v9843_v47 }
0x16f2   : > { %v17930_v18 = vpop.f32.mrb[148].mxu0 }
0x16f3   : > { %v10116_v17 = vpop.f32.mrb[149].mxu0 }
0x16f4   : > { %v17931_v28 = vpop.f32.mrb[150].mxu0 }
0x16f5   : > { %v21766_v57 = vpack.c.bf16 %v17931_v28, %v17930_v18  ;;  %v10119_v61 = vpop.f32.mrb[151].mxu0 }
0x16f6   : > { %v21768_v44 = vpack.c.bf16 %v10119_v61, %v10116_v17 }
0x1702   : > { %v17958_v34 = vpop.f32.mrb[152].mxu0 }
0x1703   : > { %v10317_v36 = vpop.f32.mrb[153].mxu0 }
0x1704   : > { %v17959_v59 = vpop.f32.mrb[154].mxu0 }
0x1705   : > { %v21770_v48 = vpack.c.bf16 %v17959_v59, %v17958_v34  ;;  %v10320_v37 = vpop.f32.mrb[155].mxu0 }
0x1706   : > { %v21772_v3 = vpack.c.bf16 %v10320_v37, %v10317_v36 }
0x1712   : > { %v17978_v43 = vpop.f32.mrb[156].mxu0 }
0x1713   : > { %v10442_v1 = vpop.f32.mrb[157].mxu0 }
0x1714   : > { %v17979_v7 = vpop.f32.mrb[158].mxu0 }
0x1715   : > { %v21774_v32 = vpack.c.bf16 %v17979_v7, %v17978_v43  ;;  %v10445_v40 = vpop.f32.mrb[159].mxu0  ;;  %v19150_v43 = vld [vmem:[%s22940_s3 + $0x20] sm:$0xff]  }
0x1716   : > { %v21776_v38 = vpack.c.bf16 %v10445_v40, %v10442_v1  ;;  %17840 = vmatprep.mubr.msk.bf16.mxu1 %vm3765_vm15, %v19150_v43  ;;  %v19151_v43 = vld [vmem:[%s22940_s3 + $0x28] sm:$0xff]  }
0x1722   : > { %v18018_v47 = vpop.f32.mrb[160].mxu0 }
0x1723   : > { %v10692_v16 = vpop.f32.mrb[161].mxu0 }
0x1724   : > { %v18019_v58 = vpop.f32.mrb[162].mxu0 }
0x1725   : > { %v21778_v18 = vpack.c.bf16 %v18019_v58, %v18018_v47  ;;  %v10695_v17 = vpop.f32.mrb[163].mxu0 }
0x1726   : > { %v21780_v28 = vpack.c.bf16 %v10695_v17, %v10692_v16 }
0x1732   : > { %v18038_v61 = vpop.f32.mrb[164].mxu0 }
0x1733   : > { %v10817_v34 = vpop.f32.mrb[165].mxu0 }
0x1734   : > { %v18039_v36 = vpop.f32.mrb[166].mxu0 }
0x1735   : > { %v21782_v59 = vpack.c.bf16 %v18039_v36, %v18038_v61  ;;  %v10820_v37 = vpop.f32.mrb[167].mxu0 }
0x1736   : > { %v21784_v25 = vpack.c.bf16 %v10820_v37, %v10817_v34 }
0x1742   : > { %v18058_v1 = vpop.f32.mrb[168].mxu0 }
0x1743   : > { %v10942_v7 = vpop.f32.mrb[169].mxu0 }
0x1744   : > { %v18059_v40 = vpop.f32.mrb[170].mxu0 }
0x1745   : > { %v21788_v47 = vpack.c.bf16 %v18059_v40, %v18058_v1  ;;  %v10945_v16 = vpop.f32.mrb[171].mxu0  ;;  %v19154_v1 = vld [vmem:[%s22940_s3 + $0x30] sm:$0xff]   ;;  %v19168_v40 = vld [vmem:[%s22939_s0 + $0x60] sm:$0xff]  }
0x1746   : > { %v21790_v58 = vpack.c.bf16 %v10945_v16, %v10942_v7  ;;  %v19162_v7 = vld [vmem:[%s22940_s3 + $0x50] sm:$0xff]  }
0x17ab   : > { %v17834_v17 = vpop.f32.mrb[116].mxu1 }
0x17ac   : > { %v9468_v21 = vpop.f32.mrb[117].mxu1 }
0x17ad   : > { %v17835_v61 = vpop.f32.mrb[118].mxu1 }
0x17ae   : > { %v9484_v36 = vpack.c.bf16 %v17835_v61, %v17834_v17  ;;  %v9471_v34 = vpop.f32.mrb[119].mxu1  ;;  %v19171_v61 = vld [vmem:[%s22940_s3 + $0x78] sm:$0xff]  }
0x17af   : > { %v9483_v37 = vpack.c.bf16 %v9471_v34, %v9468_v21  ;;  %v19153_v21 = vld [vmem:[%s22939_s0 + $0x28] sm:$0xff]   ;;  %v19174_v34 = vld [vmem:[%s22940_s3 + $0x80] sm:$0xff]  }
0x17b1   : > { %17836 = vmatprep.subr.bf16.mxu1 %v9483_v37 }
0x17b2   : > { %17837 = vmatpush3.bf16.msra.mxu1 %v9483_v37  ;;  %v19176_v37 = vld [vmem:[%s22939_s0 + $0x80] sm:$0xff]  }
0x17b3   : > { %17838 = vmatprep.subr.bf16.mxu1 %v9484_v36 }
0x17b6   : > { %17839 = vmatpush3.bf16.msra.mxu1 %v9484_v36  ;;  %v19172_v36 = vld [vmem:[%s22939_s0 + $0x70] sm:$0xff]  }
0x17b7   : > { %17856 = vmatprep.subr.bf16.mxu1 %v21744_v22 }
0x17b9   : > { %17841 = vmatmul.mubr.msk.bf16.vlgmr.msra.gmra.mrb[112].mxu1 %vm3765_vm15, %v19151_v43 }
0x17ba   : > { %17857 = vmatpush3.bf16.msra.mxu1 %v21744_v22  ;;  %17860 = vmatprep.mubr.msk.bf16.mxu1 %vm3765_vm15, %v19152_v39  ;;  %v19155_v39 = vld [vmem:[%s22940_s3 + $0x38] sm:$0xff]  }
0x17bb   : > { %17858 = vmatprep.subr.bf16.mxu1 %v21742_v54  ;;  %v19157_v22 = vld [vmem:[%s22939_s0 + $0x38] sm:$0xff]  }
0x17be   : > { %17859 = vmatpush3.bf16.msra.mxu1 %v21742_v54  ;;  %v19156_v54 = vld [vmem:[%s22939_s0 + $0x30] sm:$0xff]  }
0x17bf   : > { %17876 = vmatprep.subr.bf16.mxu1 %v21758_v11 }
0x17c5   : > { %17861 = vmatmul.mubr.msk.bf16.vlgmr.msra.gmra.mrb[112].mxu1 %vm3765_vm15, %v19153_v21 }
0x17c6   : > { %17877 = vmatpush3.bf16.msra.mxu1 %v21758_v11  ;;  %17880 = vmatprep.mubr.msk.bf16.mxu1 %vm3765_vm15, %v19154_v1  ;;  %v19159_v11 = vld [vmem:[%s22940_s3 + $0x48] sm:$0xff]  }
0x17c7   : > { %17878 = vmatprep.subr.bf16.mxu1 %v21755_v26 }
0x17ca   : > { %17879 = vmatpush3.bf16.msra.mxu1 %v21755_v26  ;;  %v19158_v26 = vld [vmem:[%s22940_s3 + $0x40] sm:$0xff]  }
0x17cb   : > { %17896 = vmatprep.subr.bf16.mxu1 %v21764_v23 }
0x17d1   : > { %17881 = vmatmul.mubr.msk.bf16.vlgmr.msra.gmra.mrb[112].mxu1 %vm3765_vm15, %v19155_v39 }
0x17d2   : > { %17897 = vmatpush3.bf16.msra.mxu1 %v21764_v23  ;;  %17900 = vmatprep.mubr.msk.bf16.mxu1 %vm3765_vm15, %v19156_v54  ;;  %v19161_v23 = vld [vmem:[%s22939_s0 + $0x48] sm:$0xff]  }
0x17d3   : > { %17898 = vmatprep.subr.bf16.mxu1 %v21762_v5 }
0x17d6   : > { %17899 = vmatpush3.bf16.msra.mxu1 %v21762_v5  ;;  %v19160_v5 = vld [vmem:[%s22939_s0 + $0x40] sm:$0xff]  }
0x17d7   : > { %17904 = vmatprep.subr.bf16.mxu1 %v21516_v63 }
0x17dd   : > { %17901 = vmatmul.mubr.msk.bf16.vlgmr.msra.gmra.mrb[112].mxu1 %vm3765_vm15, %v19157_v22 }
0x17de   : > { %17905 = vmatpush3.bf16.msra.mxu1 %v21516_v63  ;;  %17908 = vmatprep.mubr.msk.bf16.mxu1 %vm3765_vm15, %v19158_v26 }
0x17df   : > { %17906 = vmatprep.subr.bf16.mxu1 %v21514_v6 }
0x17e2   : > { %17907 = vmatpush3.bf16.msra.mxu1 %v21514_v6 }
0x17e3   : > { %17912 = vmatprep.subr.bf16.mxu1 %v21029_v10 }
0x17e9   : > { %17909 = vmatmul.mubr.msk.bf16.vlgmr.msra.gmra.mrb[112].mxu1 %vm3765_vm15, %v19159_v11 }
0x17ea   : > { %17913 = vmatpush3.bf16.msra.mxu1 %v21029_v10  ;;  %17916 = vmatprep.mubr.msk.bf16.mxu1 %vm3765_vm15, %v19160_v5  ;;  %v19163_v10 = vld [vmem:[%s22940_s3 + $0x58] sm:$0xff]  }
0x17eb   : > { %17914 = vmatprep.subr.bf16.mxu1 %v21031_v2 }
0x17ee   : > { %17915 = vmatpush3.bf16.msra.mxu1 %v21031_v2  ;;  %v19164_v2 = vld [vmem:[%s22939_s0 + $0x50] sm:$0xff]  }
0x17ef   : > { %17932 = vmatprep.subr.bf16.mxu1 %v21768_v44 }
0x17f5   : > { %17917 = vmatmul.mubr.msk.bf16.vlgmr.msra.gmra.mrb[112].mxu1 %vm3765_vm15, %v19161_v23 }
0x17f6   : > { %17933 = vmatpush3.bf16.msra.mxu1 %v21768_v44  ;;  %17936 = vmatprep.mubr.msk.bf16.mxu1 %vm3765_vm15, %v19162_v7  ;;  %v19165_v44 = vld [vmem:[%s22939_s0 + $0x58] sm:$0xff]  }
0x17f7   : > { %17934 = vmatprep.subr.bf16.mxu1 %v21766_v57 }
0x17fa   : > { %17935 = vmatpush3.bf16.msra.mxu1 %v21766_v57  ;;  %v19166_v57 = vld [vmem:[%s22940_s3 + $0x60] sm:$0xff]  }
0x17fb   : > { %17940 = vmatprep.subr.bf16.mxu1 %v21041_v45 }
0x1801   : > { %17937 = vmatmul.mubr.msk.bf16.vlgmr.msra.gmra.mrb[112].mxu1 %vm3765_vm15, %v19163_v10 }
0x1802   : > { %17941 = vmatpush3.bf16.msra.mxu1 %v21041_v45  ;;  %17944 = vmatprep.mubr.msk.bf16.mxu1 %vm3765_vm15, %v19164_v2  ;;  %v19167_v45 = vld [vmem:[%s22940_s3 + $0x68] sm:$0xff]  }
0x1803   : > { %17942 = vmatprep.subr.bf16.mxu1 %v21039_v24 }
0x1806   : > { %17943 = vmatpush3.bf16.msra.mxu1 %v21039_v24  ;;  %v19169_v24 = vld [vmem:[%s22939_s0 + $0x68] sm:$0xff]  }
0x1807   : > { %17960 = vmatprep.subr.bf16.mxu1 %v21772_v3 }
0x180d   : > { %17945 = vmatmul.mubr.msk.bf16.vlgmr.msra.gmra.mrb[112].mxu1 %vm3765_vm15, %v19165_v44 }
0x180e   : > { %17961 = vmatpush3.bf16.msra.mxu1 %v21772_v3  ;;  %17964 = vmatprep.mubr.msk.bf16.mxu1 %vm3765_vm15, %v19166_v57 }
0x180f   : > { %17962 = vmatprep.subr.bf16.mxu1 %v21770_v48 }
0x1812   : > { %17963 = vmatpush3.bf16.msra.mxu1 %v21770_v48  ;;  %v19170_v48 = vld [vmem:[%s22940_s3 + $0x70] sm:$0xff]  }
0x1813   : > { %17980 = vmatprep.subr.bf16.mxu1 %v21776_v38 }
0x1819   : > { %17965 = vmatmul.mubr.msk.bf16.vlgmr.msra.gmra.mrb[112].mxu1 %vm3765_vm15, %v19167_v45 }
0x181a   : > { %17981 = vmatpush3.bf16.msra.mxu1 %v21776_v38  ;;  %17984 = vmatprep.mubr.msk.bf16.mxu1 %vm3765_vm15, %v19168_v40 }
0x181b   : > { %17982 = vmatprep.subr.bf16.mxu1 %v21774_v32 }
0x181e   : > { %17983 = vmatpush3.bf16.msra.mxu1 %v21774_v32 }
0x181f   : > { %17988 = vmatprep.subr.bf16.mxu1 %v21662_v4 }
0x1825   : > { %17985 = vmatmul.mubr.msk.bf16.vlgmr.msra.gmra.mrb[112].mxu1 %vm3765_vm15, %v19169_v24 }
0x1826   : > { %17989 = vmatpush3.bf16.msra.mxu1 %v21662_v4  ;;  %17996 = vmatprep.mubr.msk.bf16.mxu1 %vm2335_vm13, %v21516_v63 }
0x1827   : > { %17990 = vmatprep.subr.bf16.mxu1 %v21671_v0 }
0x182a   : > { %17991 = vmatpush3.bf16.msra.mxu1 %v21671_v0 }
0x182b   : > { %17992 = vmatprep.subr.bf16.mxu1 %v21676_v41 }
0x182e   : > { %17993 = vmatpush3.bf16.msra.mxu1 %v21676_v41 }
0x182f   : > { %17994 = vmatprep.subr.bf16.mxu1 %v21681_v31 }
0x1832   : > { %17995 = vmatpush3.bf16.msra.mxu1 %v21681_v31 }
0x1835   : > { %17997 = vmatmul.mubr.msk.bf16.vlgmr.msra.gmra.mrb[120].mxu1 %vm2335_vm13, %v21514_v6  ;;  %v19173_v6 = vld [vmem:[%s22939_s0 + $0x78] sm:$0xff]  }
0x1836   : > { %18004 = vmatprep.mubr.msk.bf16.mxu1 %vm3765_vm15, %v19170_v48 }
0x1908   : > { %v17998_v63 = vpop.f32.mrb[120].mxu1 }
0x1909   : > { %v10567_v3 = vpop.f32.mrb[121].mxu1 }
0x190a   : > { %v17999_v32 = vpop.f32.mrb[122].mxu1 }
0x190b   : > { %v10583_v38 = vpack.c.bf16 %v17999_v32, %v17998_v63  ;;  %v10570_v16 = vpop.f32.mrb[123].mxu1 }
0x190c   : > { %v10582_v17 = vpack.c.bf16 %v10570_v16, %v10567_v3 }
0x190e   : > { %18000 = vmatprep.subr.bf16.mxu1 %v10582_v17 }
0x190f   : > { %18001 = vmatpush3.bf16.msra.mxu1 %v10582_v17 }
0x1910   : > { %18002 = vmatprep.subr.bf16.mxu1 %v10583_v38 }
0x1913   : > { %18003 = vmatpush3.bf16.msra.mxu1 %v10583_v38 }
0x1914   : > { %18020 = vmatprep.subr.bf16.mxu1 %v21780_v28 }
0x1916   : > { %18005 = vmatmul.mubr.msk.bf16.vlgmr.msra.gmra.mrb[112].mxu1 %vm3765_vm15, %v19171_v61 }
0x1917   : > { %18021 = vmatpush3.bf16.msra.mxu1 %v21780_v28  ;;  %18024 = vmatprep.mubr.msk.bf16.mxu1 %vm3765_vm15, %v19172_v36  ;;  %v19175_v28 = vld [vmem:[%s22940_s3 + $0x88] sm:$0xff]   ;;  %s22950_s3 = smov 16  }
0x1918   : > { %18022 = vmatprep.subr.bf16.mxu1 %v21778_v18 }
0x191b   : > { %18023 = vmatpush3.bf16.msra.mxu1 %v21778_v18  ;;  %v11045_v18 = vpop.permute.xlu1 %11044 }
0x191c   : > { %18040 = vmatprep.subr.bf16.mxu1 %v21784_v25 }
0x1922   : > { %18025 = vmatmul.mubr.msk.bf16.vlgmr.msra.gmra.mrb[112].mxu1 %vm3765_vm15, %v19173_v6 }
0x1923   : > { %18041 = vmatpush3.bf16.msra.mxu1 %v21784_v25  ;;  %18044 = vmatprep.mubr.msk.bf16.mxu1 %vm3765_vm15, %v19174_v34  ;;  %v19177_v25 = vld [vmem:[%s22939_s0 + $0x88] sm:$0xff]   ;;  %s22942_s0 = sld [smem:[#allocation44_spill]] }
0x1924   : > { %18042 = vmatprep.subr.bf16.mxu1 %v21782_v59 }
0x1927   : > { %18043 = vmatpush3.bf16.msra.mxu1 %v21782_v59  ;;  %v11055_v59 = vpop.permute.xlu1 %11054 }
0x1928   : > { %18060 = vmatprep.subr.bf16.mxu1 %v21790_v58 }
0x1929   : > { %v19181_v6 = vld [vmem:[%s22942_s0 + $0x8] sm:$0xff]   ;;  %v19182_v34 = vld [vmem:[%s22942_s0 + $0x20] sm:$0xff]  }
0x192e   : > { %18045 = vmatmul.mubr.msk.bf16.vlgmr.msra.gmra.mrb[112].mxu1 %vm3765_vm15, %v19175_v28 }
0x192f   : > { %18061 = vmatpush3.bf16.msra.mxu1 %v21790_v58  ;;  %18064 = vmatprep.mubr.msk.bf16.mxu1 %vm3765_vm15, %v19176_v37  ;;  %v11040_v58 = vpop.permute.xlu0 %11039 }
0x1930   : > { %18062 = vmatprep.subr.bf16.mxu1 %v21788_v47 }
0x1933   : > { %18063 = vmatpush3.bf16.msra.mxu1 %v21788_v47  ;;  %v11071_v47 = vpop.permute.xlu1 %11070  ;;  %v11050_v21 = vpop.permute.xlu0 %11049 }
0x1934   : > { %18068 = vmatprep.subr.bf16.mxu1 %v21453_v19 }
0x1937   : > { %v11075_v43 = vpop.permute.xlu1 %11074 }
0x193a   : > { %18065 = vmatmul.mubr.msk.bf16.vlgmr.msra.gmra.mrb[112].mxu1 %vm3765_vm15, %v19177_v25 }
0x193b   : > { %18069 = vmatpush3.bf16.msra.mxu1 %v21453_v19  ;;  %v11087_v1 = vpop.permute.xlu1 %11086  ;;  %v11067_v19 = vpop.permute.xlu0 %11066 }
0x193c   : > { %18070 = vmatprep.subr.bf16.mxu1 %v21461_v46 }
0x193f   : > { %18071 = vmatpush3.bf16.msra.mxu1 %v21461_v46  ;;  %v11095_v46 = vpop.permute.xlu1 %11094  ;;  %v11079_v5 = vpop.permute.xlu0 %11078 }
0x1940   : > { %18072 = vmatprep.subr.bf16.mxu1 %v21466_v35 }
0x1943   : > { %18073 = vmatpush3.bf16.msra.mxu1 %v21466_v35  ;;  %v11099_v24 = vpop.permute.xlu1 %11098  ;;  %v11091_v63 = vpop.permute.xlu0 %11090 }
0x1944   : > { %18074 = vmatprep.subr.bf16.mxu1 %v21471_v62 }
0x1947   : > { %18075 = vmatpush3.bf16.msra.mxu1 %v21471_v62 }
0x1a0d   : > { %v18066_v39 = vpop.f32.mrb[112].mxu1 }
0x1a0e   : > { %v11059_v54 = vadd.f32 %v18066_v39, %v11050_v21  ;;  %v11014_v22 = vpop.f32.mrb[113].mxu1  ;;  %v19185_v21 = vld [vmem:[%s22942_s0 + $0x38] sm:$0xff]  }
0x1a0f   : > { %v11057_v26 = vadd.f32 %v11040_v58, %v11014_v22  ;;  %v18067_v11 = vpop.f32.mrb[114].mxu1  ;;  %v19184_v58 = vld [vmem:[%s22942_s0 + $0x30] sm:$0xff]  }
0x1a10   : > { %v11063_v35 = vmax.f32 %v11059_v54, 0.0  ;;  %v11060_v23 = vadd.f32 %v18067_v11, %v11055_v59  ;;  %v11017_v7 = vpop.f32.mrb[115].mxu1  ;;  %v19187_v11 = vld [vmem:[%s22942_s0 + $0x48] sm:$0xff]  }
0x1a11   : > { %v11061_v10 = vmax.f32 %v11057_v26, 0.0  ;;  %v11058_v62 = vadd.f32 %v11045_v18, %v11017_v7  ;;  %v19183_v18 = vld [vmem:[%s22942_s0 + $0x28] sm:$0xff]  }
0x1a12   : > { %v11083_v2 = vmul.f32 %v11075_v43, %v11063_v35  ;;  %v11064_v44 = vmax.f32 %v11060_v23, 0.0 }
0x1a13   : > { %v11081_v57 = vmul.f32 %v11067_v19, %v11061_v10  ;;  %v11062_v45 = vmax.f32 %v11058_v62, 0.0 }
0x1a14   : > { %v11084_v40 = vmul.f32 %v11079_v5, %v11064_v44  ;;  %v11103_v3 = vadd.f32 %v11095_v46, %v11083_v2  ;;  %v19188_v5 = vld [vmem:[%s22942_s0 + $0x50] sm:$0xff]   ;;  %v19189_v44 = vld [vmem:[%s22942_s0 + $0x58] sm:$0xff]  }
0x1a15   : > { %v11082_v48 = vmul.f32 %v11071_v47, %v11062_v45  ;;  %v11101_v38 = vadd.f32 %v11087_v1, %v11081_v57  ;;  %v19186_v1 = vld [vmem:[%s22942_s0 + $0x40] sm:$0xff]  }
0x1a16   : > { %v11104_v32 = vadd.f32 %v11099_v24, %v11084_v40 }
0x1a17   : > { %v11102_v16 = vadd.f32 %v11091_v63, %v11082_v48 }
0x1a18   : > { %v21914_v17 = vpack.c.bf16 %v11104_v32, %v11103_v3  ;;  %v22943_v3 = vld [vmem:[#allocation79_spill] sm:$0xff] }
0x1a19   : > { %v21916_v61 = vpack.c.bf16 %v11102_v16, %v11101_v38 }
0x1a1b   : > { %18076 = vmatprep.mubr.msk.bf16.mxu1 %vm2335_vm13, %v21916_v61  ;;  %18088 = vmatprep.mubr.msk.bf16.mxu0 %vm2335_vm13, %v21916_v61 }
0x1a1c   : > { %18077 = vmatmul.mubr.msk.bf16.vlgmr.msra.gmra.mrb[124].mxu1 %vm2335_vm13, %v21914_v17  ;;  %18089 = vmatmul.mubr.msk.bf16.vlgmr.msra.gmra.mrb[172].mxu0 %vm2335_vm13, %v21914_v17 }
0x1a1d   : > { %18109 = vmatpush3.bf16.msra.mxu0 %v21536_v60  ;;  %18116 = vmatprep.mubr.msk.bf16.mxu0 %vm2335_vm13, %v21916_v61  ;;  %v19178_v60 = vld [vmem:[%s22942_s0 + $0x10] sm:$0xff]  }
0x1a1e   : > { %18110 = vmatprep.subr.bf16.mxu0 %v21545_v30  ;;  %18096 = vmatprep.mubr.msk.bf16.mxu1 %vm3765_vm15, %v19178_v60  ;;  %v19191_v60 = vld [vmem:[%s22942_s0 + $0x68] sm:$0xff]  }
0x1a21   : > { %18111 = vmatpush3.bf16.msra.mxu0 %v21545_v30 }
0x1a22   : > { %18112 = vmatprep.subr.bf16.mxu0 %v21550_v27 }
0x1a25   : > { %18113 = vmatpush3.bf16.msra.mxu0 %v21550_v27 }
0x1a26   : > { %18114 = vmatprep.subr.bf16.mxu0 %v21555_v9 }
0x1a29   : > { %18115 = vmatpush3.bf16.msra.mxu0 %v21555_v9 }
0x1a2a   : > { %18128 = vmatprep.subr.bf16.mxu0 %v21560_v53 }
0x1a2c   : > { %18117 = vmatmul.mubr.msk.bf16.vlgmr.msra.gmra.mrb[176].mxu0 %vm2335_vm13, %v21914_v17 }
0x1a2d   : > { %18129 = vmatpush3.bf16.msra.mxu0 %v21560_v53  ;;  %18136 = vmatprep.mubr.msk.bf16.mxu0 %vm2335_vm13, %v21916_v61 }
0x1a2e   : > { %18130 = vmatprep.subr.bf16.mxu0 %v21569_v15 }
0x1a31   : > { %18131 = vmatpush3.bf16.msra.mxu0 %v21569_v15 }
0x1a32   : > { %18132 = vmatprep.subr.bf16.mxu0 %v21574_v13 }
0x1a35   : > { %18133 = vmatpush3.bf16.msra.mxu0 %v21574_v13 }
0x1a36   : > { %18134 = vmatprep.subr.bf16.mxu0 %v21579_v49 }
0x1a39   : > { %18135 = vmatpush3.bf16.msra.mxu0 %v21579_v49 }
0x1a3a   : > { %18156 = vmatprep.subr.bf16.mxu0 %v21596_v12 }
0x1a3c   : > { %18137 = vmatmul.mubr.msk.bf16.vlgmr.msra.gmra.mrb[180].mxu0 %vm2335_vm13, %v21914_v17 }
0x1a3d   : > { %18157 = vmatpush3.bf16.msra.mxu0 %v21596_v12  ;;  %18164 = vmatprep.mubr.msk.bf16.mxu0 %vm2335_vm13, %v21916_v61 }
0x1a3e   : > { %18158 = vmatprep.subr.bf16.mxu0 %v21605_v14 }
0x1a41   : > { %18159 = vmatpush3.bf16.msra.mxu0 %v21605_v14 }
0x1a42   : > { %18160 = vmatprep.subr.bf16.mxu0 %v21610_v52 }
0x1a45   : > { %18161 = vmatpush3.bf16.msra.mxu0 %v21610_v52 }
0x1a46   : > { %18162 = vmatprep.subr.bf16.mxu0 %v21615_v55 }
0x1a49   : > { %18163 = vmatpush3.bf16.msra.mxu0 %v21615_v55 }
0x1a4a   : > { %18196 = vmatprep.subr.bf16.mxu0 %v21662_v4 }
0x1a4c   : > { %18165 = vmatmul.mubr.msk.bf16.vlgmr.msra.gmra.mrb[184].mxu0 %vm2335_vm13, %v21914_v17 }
0x1a4d   : > { %18197 = vmatpush3.bf16.msra.mxu0 %v21662_v4  ;;  %18204 = vmatprep.mubr.msk.bf16.mxu0 %vm2335_vm13, %v21916_v61 }
0x1a4e   : > { %18198 = vmatprep.subr.bf16.mxu0 %v21671_v0 }
0x1a51   : > { %18199 = vmatpush3.bf16.msra.mxu0 %v21671_v0  ;;  %v19179_v0 = vld [vmem:[%s22942_s0 + $0x18] sm:$0xff]  }
0x1a52   : > { %18200 = vmatprep.subr.bf16.mxu0 %v21676_v41 }
0x1a55   : > { %18201 = vmatpush3.bf16.msra.mxu0 %v21676_v41  ;;  %v19180_v41 = vld [vmem:[%s22942_s0] sm:$0xff]  }
0x1a56   : > { %18202 = vmatprep.subr.bf16.mxu0 %v21681_v31 }
0x1a59   : > { %18203 = vmatpush3.bf16.msra.mxu0 %v21681_v31 }
0x1a5a   : > { %18216 = vmatprep.subr.bf16.mxu0 %v21686_v33 }
0x1a5c   : > { %18205 = vmatmul.mubr.msk.bf16.vlgmr.msra.gmra.mrb[188].mxu0 %vm2335_vm13, %v21914_v17 }
0x1a5d   : > { %18217 = vmatpush3.bf16.msra.mxu0 %v21686_v33  ;;  %18224 = vmatprep.mubr.msk.bf16.mxu0 %vm2335_vm13, %v21916_v61 }
0x1a5e   : > { %18218 = vmatprep.subr.bf16.mxu0 %v21695_v50 }
0x1a61   : > { %18219 = vmatpush3.bf16.msra.mxu0 %v21695_v50 }
0x1a62   : > { %18220 = vmatprep.subr.bf16.mxu0 %v21700_v20 }
0x1a65   : > { %18221 = vmatpush3.bf16.msra.mxu0 %v21700_v20 }
0x1a66   : > { %18222 = vmatprep.subr.bf16.mxu0 %v21705_v56 }
0x1a69   : > { %18223 = vmatpush3.bf16.msra.mxu0 %v21705_v56 }
0x1a6a   : > { %18236 = vmatprep.subr.bf16.mxu0 %v22934_v8 }
0x1a6c   : > { %18225 = vmatmul.mubr.msk.bf16.vlgmr.msra.gmra.mrb[192].mxu0 %vm2335_vm13, %v21914_v17 }
0x1a6d   : > { %18240 = vmatprep.mubr.msk.bf16.mxu0 %vm19677_vm12, %v22934_v8 }
0x1aef   : > { %v18078_v30 = vpop.f32.mrb[124].mxu1  ;;  %v18090_v27 = vpop.f32.mrb[172].mxu0 }
0x1af0   : > { %v11147_v9 = vpop.f32.mrb[125].mxu1  ;;  %v11202_v53 = vpop.f32.mrb[173].mxu0 }
0x1af1   : > { %v18079_v15 = vpop.f32.mrb[126].mxu1  ;;  %v18091_v13 = vpop.f32.mrb[174].mxu0 }
0x1af2   : > { %v11163_v49 = vpack.c.bf16 %v18079_v15, %v18078_v30  ;;  %v11218_v12 = vpack.c.bf16 %v18091_v13, %v18090_v27  ;;  %v11150_v14 = vpop.f32.mrb[127].mxu1  ;;  %v11205_v52 = vpop.f32.mrb[175].mxu0  ;;  %v19192_v30 = vld [vmem:[%s22942_s0 + $0x70] sm:$0xff]   ;;  %v19194_v27 = vld [vmem:[%s22942_s0 + $0x80] sm:$0xff]  }
0x1af3   : > { %v11162_v55 = vpack.c.bf16 %v11150_v14, %v11147_v9  ;;  %v11217_v4 = vpack.c.bf16 %v11205_v52, %v11202_v53  ;;  %v19195_v9 = vld [vmem:[%s22942_s0 + $0x88] sm:$0xff]   ;;  %v12190_v53 = vpop.permute.xlu1 %12189 }
0x1af5   : > { %18092 = vmatprep.subr.bf16.mxu1 %v11217_v4 }
0x1af6   : > { %18093 = vmatpush3.bf16.msra.mxu1 %v11217_v4 }
0x1af7   : > { %18094 = vmatprep.subr.bf16.mxu1 %v11218_v12  ;;  %v12195_v15 = vpop.permute.xlu1 %12194 }
0x1afa   : > { %18095 = vmatpush3.bf16.msra.mxu1 %v11218_v12  ;;  %v12185_v12 = vpop.permute.xlu0 %12184 }
0x1afb   : > { %18100 = vmatprep.subr.bf16.mxu1 %v11162_v55  ;;  %v12212_v13 = vpop.permute.xlu1 %12211 }
0x1afd   : > { %18097 = vmatmul.mubr.msk.bf16.vlgmr.msra.gmra.mrb[128].mxu1 %vm3765_vm15, %v19179_v0 }
0x1afe   : > { %18101 = vmatpush3.bf16.msra.mxu1 %v11162_v55  ;;  %18104 = vmatprep.mubr.msk.bf16.mxu1 %vm3765_vm15, %v19180_v41  ;;  %v12200_v52 = vpop.permute.xlu0 %12199 }
0x1aff   : > { %v18118_v31 = vpop.f32.mrb[176].mxu0  ;;  %18102 = vmatprep.subr.bf16.mxu1 %v11163_v49 }
0x1b00   : > { %v11388_v33 = vpop.f32.mrb[177].mxu0 }
0x1b01   : > { %v18119_v50 = vpop.f32.mrb[178].mxu0 }
0x1b02   : > { %v11404_v20 = vpack.c.bf16 %v18119_v50, %v18118_v31  ;;  %v11391_v56 = vpop.f32.mrb[179].mxu0  ;;  %18103 = vmatpush3.bf16.msra.mxu1 %v11163_v49  ;;  %v12232_v49 = vpop.permute.xlu1 %12231 }
0x1b03   : > { %v11403_v36 = vpack.c.bf16 %v11391_v56, %v11388_v33  ;;  %v12216_v4 = vpop.permute.xlu0 %12215 }
0x1b05   : > { %18120 = vmatprep.subr.bf16.mxu1 %v11403_v36 }
0x1b06   : > { %v12236_v14 = vpop.permute.xlu1 %12235 }
0x1b07   : > { %v12220_v50 = vpop.permute.xlu0 %12219 }
0x1b09   : > { %18105 = vmatmul.mubr.msk.bf16.vlgmr.msra.gmra.mrb[128].mxu1 %vm3765_vm15, %v19181_v6 }
0x1b0a   : > { %18121 = vmatpush3.bf16.msra.mxu1 %v11403_v36  ;;  %18124 = vmatprep.mubr.msk.bf16.mxu1 %vm3765_vm15, %v19182_v34  ;;  %v12224_v55 = vpop.permute.xlu1 %12223 }
0x1b0b   : > { %18122 = vmatprep.subr.bf16.mxu1 %v11404_v20 }
0x1b0e   : > { %18123 = vmatpush3.bf16.msra.mxu1 %v11404_v20  ;;  %v12244_v0 = vpop.permute.xlu1 %12243 }
0x1b0f   : > { %v18138_v28 = vpop.f32.mrb[180].mxu0 }
0x1b10   : > { %v11513_v37 = vpop.f32.mrb[181].mxu0 }
0x1b11   : > { %v18139_v25 = vpop.f32.mrb[182].mxu0 }
0x1b12   : > { %v11529_v59 = vpack.c.bf16 %v18139_v25, %v18138_v28  ;;  %v11516_v47 = vpop.f32.mrb[183].mxu0  ;;  %v22043_v25 = vpop.permute.xlu1 %12854 }
0x1b13   : > { %v11528_v43 = vpack.c.bf16 %v11516_v47, %v11513_v37 }
0x1b15   : > { %18140 = vmatprep.subr.bf16.mxu1 %v11528_v43  ;;  %18125 = vmatmul.mubr.msk.bf16.vlgmr.msra.gmra.mrb[128].mxu1 %vm3765_vm15, %v19183_v18 }
0x1b16   : > { %18141 = vmatpush3.bf16.msra.mxu1 %v11528_v43  ;;  %18144 = vmatprep.mubr.msk.bf16.mxu1 %vm3765_vm15, %v19184_v58 }
0x1b17   : > { %18142 = vmatprep.subr.bf16.mxu1 %v11529_v59 }
0x1b1a   : > { %18143 = vmatpush3.bf16.msra.mxu1 %v11529_v59 }
0x1b1b   : > { %18148 = vmatprep.subr.bf16.mxu1 %v21916_v61 }
0x1b1f   : > { %v18166_v19 = vpop.f32.mrb[184].mxu0 }
0x1b20   : > { %v11712_v39 = vpop.f32.mrb[185].mxu0 }
0x1b21   : > { %v18167_v54 = vpop.f32.mrb[186].mxu0  ;;  %18145 = vmatmul.mubr.msk.bf16.vlgmr.msra.gmra.mrb[128].mxu1 %vm3765_vm15, %v19185_v21  ;;  %v12240_v21 = vpop.permute.xlu0 %12239 }
0x1b22   : > { %v11728_v22 = vpack.c.bf16 %v18167_v54, %v18166_v19  ;;  %18149 = vmatpush3.bf16.msra.mxu1 %v21916_v61  ;;  %v11715_v46 = vpop.f32.mrb[187].mxu0  ;;  %18152 = vmatprep.mubr.msk.bf16.mxu1 %vm3765_vm15, %v19186_v1 }
0x1b23   : > { %v11727_v26 = vpack.c.bf16 %v11715_v46, %v11712_v39  ;;  %18150 = vmatprep.subr.bf16.mxu1 %v21914_v17  ;;  %v12887_v46 = vpop.permute.xlu1 %12886 }
0x1b26   : > { %18151 = vmatpush3.bf16.msra.mxu1 %v21914_v17 }
0x1b27   : > { %18168 = vmatprep.subr.bf16.mxu1 %v11727_v26 }
0x1b2d   : > { %18153 = vmatmul.mubr.msk.bf16.vlgmr.msra.gmra.mrb[128].mxu1 %vm3765_vm15, %v19187_v11 }
0x1b2e   : > { %18169 = vmatpush3.bf16.msra.mxu1 %v11727_v26  ;;  %18172 = vmatprep.mubr.msk.bf16.mxu1 %vm3765_vm15, %v19188_v5 }
0x1b2f   : > { %18170 = vmatprep.subr.bf16.mxu1 %v11728_v22  ;;  %v18206_v35 = vpop.f32.mrb[188].mxu0 }
0x1b30   : > { %v11962_v23 = vpop.f32.mrb[189].mxu0 }
0x1b31   : > { %v18207_v7 = vpop.f32.mrb[190].mxu0 }
0x1b32   : > { %v11978_v10 = vpack.c.bf16 %v18207_v7, %v18206_v35  ;;  %18171 = vmatpush3.bf16.msra.mxu1 %v11728_v22  ;;  %v11965_v62 = vpop.f32.mrb[191].mxu0  ;;  %v12889_v35 = vpop.permute.xlu1 %12888  ;;  %v19198_v7 = vld [vmem:[#allocation11] sm:$0xff]  }
0x1b33   : > { %v11977_v2 = vpack.c.bf16 %v11965_v62, %v11962_v23  ;;  %18176 = vmatprep.subr.bf16.mxu1 %v21620_v42  ;;  %v19196_v23 = vld [vmem:[#allocation11 + $0x8] sm:$0xff]  }
0x1b39   : > { %18173 = vmatmul.mubr.msk.bf16.vlgmr.msra.gmra.mrb[128].mxu1 %vm3765_vm15, %v19189_v44  ;;  %v12893_v44 = vpop.permute.xlu1 %12892 }
0x1b3a   : > { %18177 = vmatpush3.bf16.msra.mxu1 %v21620_v42  ;;  %18184 = vmatprep.mubr.msk.bf16.mxu1 %vm2335_vm13, %v21916_v61  ;;  %v19190_v42 = vld [vmem:[%s22942_s0 + $0x60] sm:$0xff]  }
0x1b3b   : > { %18178 = vmatprep.subr.bf16.mxu1 %v21629_v51 }
0x1b3e   : > { %18179 = vmatpush3.bf16.msra.mxu1 %v21629_v51 }
0x1b3f   : > { %v18226_v57 = vpop.f32.mrb[192].mxu0  ;;  %18180 = vmatprep.subr.bf16.mxu1 %v21637_v29 }
0x1b40   : > { %v12087_v45 = vpop.f32.mrb[193].mxu0 }
0x1b41   : > { %v18227_v40 = vpop.f32.mrb[194].mxu0 }
0x1b42   : > { %v12103_v24 = vpack.c.bf16 %v18227_v40, %v18226_v57  ;;  %18181 = vmatpush3.bf16.msra.mxu1 %v21637_v29  ;;  %v12090_v48 = vpop.f32.mrb[195].mxu0  ;;  %v22945_v40 = vmov 0  }
0x1b43   : > { %v12102_v63 = vpack.c.bf16 %v12090_v48, %v12087_v45  ;;  %18182 = vmatprep.subr.bf16.mxu1 %v22943_v3 }
0x1b46   : > { %18183 = vmatpush3.bf16.msra.mxu1 %v22943_v3 }
0x1b49   : > { %18185 = vmatmul.mubr.msk.bf16.vlgmr.msra.gmra.mrb[132].mxu1 %vm2335_vm13, %v21914_v17  ;;  %v19193_v17 = vld [vmem:[%s22942_s0 + $0x78] sm:$0xff]   ;;  %s22944_s0 = sld [smem:[#allocation29_spill]] }
0x1b4a   : > { %18192 = vmatprep.mubr.msk.bf16.mxu1 %vm3765_vm15, %v19190_v42 }
0x1b4f   : > { %v19202_v5 = vld [vmem:[%s22944_s0 + $0x44] ss:$8 sps:$4 sm:$0xff]   ;;  %v19205_v62 = vld [vmem:[%s22944_s0 + $0x54] ss:$8 sps:$4 sm:$0xff]   ;;  %v19203_v57 = vld [vmem:[%s22944_s0 + $0x50] ss:$8 sps:$4 sm:$0xff]  }
0x1b50   : > { %v19208_v45 = vld [vmem:[%s22944_s0 + $0x64] ss:$8 sps:$4 sm:$0xff]   ;;  %v19206_v42 = vld [vmem:[%s22944_s0 + $0x60] ss:$8 sps:$4 sm:$0xff]  }
0x1c1c   : > { %v18186_v51 = vpop.f32.mrb[132].mxu1 }
0x1c1d   : > { %v11837_v32 = vpop.f32.mrb[133].mxu1 }
0x1c1e   : > { %v18187_v38 = vpop.f32.mrb[134].mxu1 }
0x1c1f   : > { %v11853_v16 = vpack.c.bf16 %v18187_v38, %v18186_v51  ;;  %v11840_v29 = vpop.f32.mrb[135].mxu1  ;;  %v22947_v38 = vld [vmem:[#allocation55_spill] sm:$0xff] }
0x1c20   : > { %v11852_v61 = vpack.c.bf16 %v11840_v29, %v11837_v32  ;;  %v12897_v32 = vsel %vm1289_vm2, %v12893_v44, %v12889_v35 }
0x1c22   : > { %18188 = vmatprep.subr.bf16.mxu1 %v11852_v61 }
0x1c23   : > { %18189 = vmatpush3.bf16.msra.mxu1 %v11852_v61 }
0x1c24   : > { %18190 = vmatprep.subr.bf16.mxu1 %v11853_v16 }
0x1c27   : > { %18191 = vmatpush3.bf16.msra.mxu1 %v11853_v16 }
0x1c28   : > { %18208 = vmatprep.subr.bf16.mxu1 %v11977_v2 }
0x1c2a   : > { %18193 = vmatmul.mubr.msk.bf16.vlgmr.msra.gmra.mrb[128].mxu1 %vm3765_vm15, %v19191_v60  ;;  %v22948_v60 = vld [vmem:[#allocation56_spill] sm:$0xff] }
0x1c2b   : > { %18209 = vmatpush3.bf16.msra.mxu1 %v11977_v2  ;;  %18212 = vmatprep.mubr.msk.bf16.mxu1 %vm3765_vm15, %v19192_v30  ;;  %v22051_v2 = vpop.permute.xlu0 %12859  ;;  %v12900_v30 = vmul.f32 %v12897_v32, %v22948_v60 }
0x1c2c   : > { %18210 = vmatprep.subr.bf16.mxu1 %v11978_v10 }
0x1c2f   : > { %18211 = vmatpush3.bf16.msra.mxu1 %v11978_v10  ;;  %v19200_v10 = vld [vmem:[%s22944_s0 + $0x40] ss:$8 sps:$4 sm:$0xff]   ;;  %v12891_v3 = vpop.permute.xlu0 %12890 }
0x1c30   : > { %18228 = vmatprep.subr.bf16.mxu1 %v12102_v63  ;;  %v12894_v51 = vsel %vm1289_vm2, %v12887_v46, %v12891_v3  ;;  %v12896_v29 = vsel %vm1289_vm2, %v12891_v3, %v12887_v46  ;;  %v19248_v3 = vld [vmem:[#allocation13] sm:$0xff]  }
0x1c31   : > { %v12899_v61 = vmul.f32 %v12894_v51, %v22947_v38 }
0x1c36   : > { %18213 = vmatmul.mubr.msk.bf16.vlgmr.msra.gmra.mrb[128].mxu1 %vm3765_vm15, %v19193_v17 }
0x1c37   : > { %18229 = vmatpush3.bf16.msra.mxu1 %v12102_v63  ;;  %18232 = vmatprep.mubr.msk.bf16.mxu1 %vm3765_vm15, %v19194_v27  ;;  %v12895_v63 = vsel %vm1289_vm2, %v12889_v35, %v12893_v44  ;;  %v19199_v27 = vld [vmem:[#allocation11 + $0x18] sm:$0xff]   ;;  %v19235_v35 = vld [vmem:[%s22944_s0 + $0xb4] ss:$8 sps:$4 sm:$0xff]   ;;  %v19239_v44 = vld [vmem:[%s22944_s0 + $0xd0] ss:$8 sps:$4 sm:$0xff]  }
0x1c38   : > { %18230 = vmatprep.subr.bf16.mxu1 %v12103_v24  ;;  %v12901_v16 = vmul.f32 %v12895_v63, %v22947_v38  ;;  %v19245_v63 = vld [vmem:[%s22944_s0 + $0xf0] ss:$8 sps:$4 sm:$0xff]  }
0x1c3a   : > { %v12903_v17 = vpack.c.bf16 %v12901_v16, %v12899_v61 }
0x1c3b   : > { %18231 = vmatpush3.bf16.msra.mxu1 %v12103_v24  ;;  %v19197_v24 = vld [vmem:[#allocation11 + $0x10] sm:$0xff]  }
0x1c3c   : > { %18244 = vmatprep.subr.bf16.mxu1 %v22934_v8 }
0x1c42   : > { %18233 = vmatmul.mubr.msk.bf16.vlgmr.msra.gmra.mrb[128].mxu1 %vm3765_vm15, %v19195_v9  ;;  %v12898_v9 = vmul.f32 %v12896_v29, %v22948_v60 }
0x1c43   : > { %18248 = vmatprep.mubr.msk.bf16.mxu1 %vm19677_vm12, %v22934_v8 }
0x1d15   : > { %v18234_v41 = vpop.f32.mrb[128].mxu1 }
0x1d16   : > { %v12204_v31 = vadd.f32 %v18234_v41, %v12195_v15  ;;  %v12159_v33 = vpop.f32.mrb[129].mxu1  ;;  %v19211_v15 = vld [vmem:[%s22944_s0 + $0x74] ss:$8 sps:$4 sm:$0xff]  }
0x1d17   : > { %v12202_v20 = vadd.f32 %v12185_v12, %v12159_v33  ;;  %v18235_v56 = vpop.f32.mrb[130].mxu1  ;;  %v19217_v33 = vld [vmem:[%s22944_s0 + $0x14] ss:$8 sps:$4 sm:$0xff]  }
0x1d18   : > { %v12208_v36 = vmax.f32 %v12204_v31, 0.0  ;;  %v12205_v6 = vadd.f32 %v18235_v56, %v12200_v52  ;;  %v12162_v34 = vpop.f32.mrb[131].mxu1  ;;  %v19215_v56 = vld [vmem:[%s22944_s0 + $0x10] ss:$8 sps:$4 sm:$0xff]  }
0x1d19   : > { %v12206_v28 = vmax.f32 %v12202_v20, 0.0  ;;  %v12203_v37 = vadd.f32 %v12190_v53, %v12162_v34  ;;  %v12902_v53 = vpack.c.bf16 %v12900_v30, %v12898_v9  ;;  %v22954_v9 = vld [vmem:[#allocation74_spill] sm:$0xff] }
0x1d1a   : > { %v12228_v18 = vmul.f32 %v12220_v50, %v12208_v36  ;;  %v12209_v59 = vmax.f32 %v12205_v6, 0.0  ;;  %v19220_v36 = vld [vmem:[%s22944_s0 + $0x24] ss:$8 sps:$4 sm:$0xff]  }
0x1d1b   : > { %v12226_v47 = vmul.f32 %v12212_v13, %v12206_v28  ;;  %v12207_v58 = vmax.f32 %v12203_v37, 0.0  ;;  %v19214_v13 = vld [vmem:[%s22944_s0 + $0x4] ss:$8 sps:$4 sm:$0xff]   ;;  %v19218_v28 = vld [vmem:[%s22944_s0 + $0x20] ss:$8 sps:$4 sm:$0xff]  }
0x1d1c   : > { %v12229_v43 = vmul.f32 %v12224_v55, %v12209_v59  ;;  %v12248_v19 = vadd.f32 %v12240_v21, %v12228_v18  ;;  %v19223_v18 = vld [vmem:[%s22944_s0 + $0x34] ss:$8 sps:$4 sm:$0xff]  }
0x1d1d   : > { %v12227_v1 = vmul.f32 %v12216_v4, %v12207_v58  ;;  %v12246_v54 = vadd.f32 %v12232_v49, %v12226_v47  ;;  %v19212_v4 = vld [vmem:[%s22944_s0] ss:$8 sps:$4 sm:$0xff]   ;;  %v19221_v58 = vld [vmem:[%s22944_s0 + $0x30] ss:$8 sps:$4 sm:$0xff]  }
0x1d1e   : > { %v12249_v39 = vadd.f32 %v12244_v0, %v12229_v43  ;;  %v19226_v43 = vld [vmem:[%s22944_s0 + $0x84] ss:$8 sps:$4 sm:$0xff]  }
0x1d1f   : > { %v12247_v22 = vadd.f32 %v12236_v14, %v12227_v1 }
0x1d20   : > { %v12251_v26 = vpack.c.bf16 %v12249_v39, %v12248_v19  ;;  %v19224_v19 = vld [vmem:[%s22944_s0 + $0x80] ss:$8 sps:$4 sm:$0xff]  }
0x1d21   : > { %v12250_v11 = vpack.c.bf16 %v12247_v22, %v12246_v54  ;;  %v19229_v54 = vld [vmem:[%s22944_s0 + $0x94] ss:$8 sps:$4 sm:$0xff]  }
0x1d23   : > { %18237 = vmatpush3.bf16.msra.mxu0 %v12250_v11  ;;  %18245 = vmatpush3.bf16.msra.mxu1 %v12250_v11 }
0x1d24   : > { %18238 = vmatprep.subr.bf16.mxu0 %v22934_v8  ;;  %18246 = vmatprep.subr.bf16.mxu1 %v22934_v8 }
0x1d27   : > { %18239 = vmatpush3.bf16.msra.mxu0 %v12251_v26  ;;  %18247 = vmatpush3.bf16.msra.mxu1 %v12251_v26 }
0x1d28   : > { %18252 = vmatprep.subr.bf16.mxu1 %v22934_v8  ;;  %12417 = vmatprep.subr.bf16.mxu0 %v19202_v5  ;;  %v19230_v5 = vld [vmem:[%s22944_s0 + $0xa0] ss:$8 sps:$4 sm:$0xff]  }
0x1d2a   : > { %18249 = vmatmul.mubr.msk.bf16.vlgmr.msra.gmra.mrb[136].mxu1 %vm3765_vm15, %v19196_v23  ;;  %18241 = vmatmul.mubr.msk.bf16.vlgmr.msra.gmra.mrb[196].mxu0 %vm3765_vm15, %v19198_v7  ;;  %v19233_v23 = vld [vmem:[%s22944_s0 + $0xb0] ss:$8 sps:$4 sm:$0xff]   ;;  %v19238_v7 = vld [vmem:[%s22944_s0 + $0xc4] ss:$8 sps:$4 sm:$0xff]  }
0x1d2b   : > { %18253 = vmatpush3.bf16.msra.mxu1 %v12250_v11  ;;  %18256 = vmatprep.mubr.msk.bf16.mxu1 %vm19677_vm12, %v22934_v8 }
0x1d2c   : > { %18254 = vmatprep.subr.bf16.mxu1 %v22934_v8  ;;  %12418 = vmatpush1.bf16.msra.mxu0 %v19200_v10  ;;  %v19236_v10 = vld [vmem:[%s22944_s0 + $0xc0] ss:$8 sps:$4 sm:$0xff]  }
0x1d2d   : > { %12419 = vmatprep.subr.bf16.mxu0 %v19205_v62  ;;  %12449 = vmatprep.mubr.bf16.mxu0 %v22945_v40  ;;  %v19241_v62 = vld [vmem:[%s22944_s0 + $0xd4] ss:$8 sps:$4 sm:$0xff]  }
0x1d2f   : > { %18255 = vmatpush3.bf16.msra.mxu1 %v12251_v26 }
0x1d30   : > { %18260 = vmatprep.subr.bf16.mxu1 %v22934_v8  ;;  %12420 = vmatpush1.bf16.msra.mxu0 %v19203_v57  ;;  %v19244_v57 = vld [vmem:[%s22944_s0 + $0xe4] ss:$8 sps:$4 sm:$0xff]  }
0x1d31   : > { %12421 = vmatprep.subr.bf16.mxu0 %v19208_v45  ;;  %v19242_v45 = vld [vmem:[%s22944_s0 + $0xe0] ss:$8 sps:$4 sm:$0xff]  }
0x1d32   : > { %18257 = vmatmul.mubr.msk.bf16.vlgmr.msra.gmra.mrb[140].mxu1 %vm3765_vm15, %v19197_v24  ;;  %v19247_v24 = vld [vmem:[%s22944_s0 + $0xf4] ss:$8 sps:$4 sm:$0xff]  }
0x1d33   : > { %18261 = vmatpush3.bf16.msra.mxu1 %v12250_v11  ;;  %18264 = vmatprep.mubr.msk.bf16.mxu1 %vm19677_vm12, %v22934_v8  ;;  %v19232_v11 = vld [vmem:[%s22944_s0 + $0xa4] ss:$8 sps:$4 sm:$0xff]  }
0x1d34   : > { %18262 = vmatprep.subr.bf16.mxu1 %v22934_v8  ;;  %12422 = vmatpush1.bf16.msra.mxu0 %v19206_v42  ;;  %v19209_v8 = vld [vmem:[%s22944_s0 + $0x70] ss:$8 sps:$4 sm:$0xff]  }
0x1d35   : > { %12423 = vmatprep.subr.bf16.mxu0 %v19211_v15  ;;  %v14177_v15 = vld [vmem:[%s22960_s13 + $0x8] sm:$0xff] }
0x1d37   : > { %18263 = vmatpush3.bf16.msra.mxu1 %v12251_v26  ;;  %v19227_v26 = vld [vmem:[%s22944_s0 + $0x90] ss:$8 sps:$4 sm:$0xff]   ;;  %s22949_s0 = smov 17  }
0x1d38   : > { %12914 = vmatprep.subr.bf16.mxu1 %v12903_v17  ;;  %12424 = vmatpush1.bf16.msra.mxu0 %v19209_v8 }
0x1d39   : > { %12503 = vmatprep.subr.bf16.mxu0 %v19214_v13 }
0x1d3a   : > { %18265 = vmatmul.mubr.msk.bf16.vlgmr.msra.gmra.mrb[144].mxu1 %vm3765_vm15, %v19199_v27  ;;  %v22953_v27 = vld [vmem:[#allocation73_spill] sm:$0xff] }
0x1d3b   : > { %12915 = vmatpush1.bf16.msra.mxu1 %v12902_v53  ;;  %12946 = vmatprep.mubr.bf16.mxu1 %v22945_v40  ;;  %v14176_v53 = vld [vmem:[%s22960_s13] sm:$0xff]  ;;  %s22963_s13 = sld [smem:[#allocation47_spill]] }
0x1d42   : > { %16186 = vmatmul.mubr.msk.bf16.vlgmr.msra.gmra.mrb[148].mxu1 %vm2475_vm14, %v19248_v3 }
0x1d43   : > { %12997 = vmatprep.mubr.bf16.mxu1 %v22945_v40 }
0x1dfd   : > { %v12357_v49 = vpop.f32.mrb[136].mxu1  ;;  %v12296_v12 = vpop.f32.mrb[196].mxu0 }
0x1dfe   : > { %v18250_v14 = vpop.f32.mrb[137].mxu1  ;;  %v18242_v52 = vpop.f32.mrb[197].mxu0 }
0x1dff   : > { %v12360_v55 = vpop.f32.mrb[138].mxu1  ;;  %v12299_v0 = vpop.f32.mrb[198].mxu0 }
0x1e00   : > { %v12364_v41 = vpack.c.bf16 %v12360_v55, %v12357_v49  ;;  %v18251_v31 = vpop.f32.mrb[139].mxu1  ;;  %v12303_v50 = vpack.c.bf16 %v12299_v0, %v12296_v12  ;;  %v18243_v20 = vpop.f32.mrb[199].mxu0  ;;  %v22962_v49 = vmov 1  }
0x1e02   : > { %16137 = vmatmul.mubr.msk.bf16.vlgmr.msra.gmra.mrb[200].mxu0 %vm2335_vm13, %v12364_v41  ;;  %v22964_v41 = vmov 2  }
0x1e03   : > { %12504 = vmatpush1.bf16.msra.mxu0 %v19212_v4  ;;  %12535 = vmatprep.mubr.bf16.mxu0 %v22945_v40 }
0x1e04   : > { %12505 = vmatprep.subr.bf16.mxu0 %v19217_v33 }
0x1e05   : > { %v12591_v6 = vpop.f32.mrb[140].mxu1 }
0x1e06   : > { %v18258_v34 = vpop.f32.mrb[141].mxu1 }
0x1e07   : > { %12506 = vmatpush1.bf16.msra.mxu0 %v19215_v56  ;;  %v12594_v37 = vpop.f32.mrb[142].mxu1 }
0x1e08   : > { %12507 = vmatprep.subr.bf16.mxu0 %v19220_v36  ;;  %v12598_v59 = vpack.c.bf16 %v12594_v37, %v12591_v6  ;;  %v18259_v47 = vpop.f32.mrb[143].mxu1  ;;  %v19249_v37 = vld [vmem:[%s22963_s13] sm:$0xff]  }
0x1e0b   : > { %12508 = vmatpush1.bf16.msra.mxu0 %v19218_v28 }
0x1e0c   : > { %12509 = vmatprep.subr.bf16.mxu0 %v19223_v18 }
0x1e0d   : > { %v12743_v21 = vpop.f32.mrb[144].mxu1 }
0x1e0e   : > { %v18266_v1 = vpop.f32.mrb[145].mxu1 }
0x1e0f   : > { %12510 = vmatpush1.bf16.msra.mxu0 %v19221_v58  ;;  %v12746_v39 = vpop.f32.mrb[146].mxu1 }
0x1e10   : > { %12651 = vmatprep.subr.bf16.mxu0 %v19226_v43  ;;  %v12750_v22 = vpack.c.bf16 %v12746_v39, %v12743_v21  ;;  %v18267_v46 = vpop.f32.mrb[147].mxu1  ;;  %v22965_v21 = vld [vmem:[#allocation61_spill] sm:$0xff] }
0x1e12   : > { %16146 = vmatmul.mubr.msk.bf16.vlgmr.msra.gmra.mrb[200].mxu0 %vm2335_vm13, %v12303_v50 }
0x1e13   : > { %12652 = vmatpush1.bf16.msra.mxu0 %v19224_v19  ;;  %12683 = vmatprep.mubr.bf16.mxu0 %v22945_v40  ;;  %v22966_v19 = vld [vmem:[#allocation62_spill] sm:$0xff] }
0x1e14   : > { %12653 = vmatprep.subr.bf16.mxu0 %v19229_v54 }
0x1e17   : > { %12654 = vmatpush1.bf16.msra.mxu0 %v19227_v26 }
0x1e18   : > { %12655 = vmatprep.subr.bf16.mxu0 %v19232_v11 }
0x1e1b   : > { %12656 = vmatpush1.bf16.msra.mxu0 %v19230_v5 }
0x1e1c   : > { %12657 = vmatprep.subr.bf16.mxu0 %v19235_v35 }
0x1e1f   : > { %12658 = vmatpush1.bf16.msra.mxu0 %v19233_v23 }
0x1e20   : > { %12803 = vmatprep.subr.bf16.mxu0 %v19238_v7 }
0x1e22   : > { %16165 = vmatmul.mubr.msk.bf16.vlgmr.msra.gmra.mrb[200].mxu0 %vm2335_vm13, %v12598_v59 }
0x1e23   : > { %12804 = vmatpush1.bf16.msra.mxu0 %v19236_v10  ;;  %12835 = vmatprep.mubr.bf16.mxu0 %v22945_v40 }
0x1e24   : > { %12805 = vmatprep.subr.bf16.mxu0 %v19241_v62 }
0x1e27   : > { %12806 = vmatpush1.bf16.msra.mxu0 %v19239_v44 }
0x1e28   : > { %12807 = vmatprep.subr.bf16.mxu0 %v19244_v57 }
0x1e2b   : > { %12808 = vmatpush1.bf16.msra.mxu0 %v19242_v45 }
0x1e2c   : > { %12809 = vmatprep.subr.bf16.mxu0 %v19247_v24 }
0x1e2f   : > { %12810 = vmatpush1.bf16.msra.mxu0 %v19245_v63 }
0x1e32   : > { %16184 = vmatmul.mubr.msk.bf16.vlgmr.msra.gmra.mrb[200].mxu0 %vm2335_vm13, %v12750_v22 }
0x1e33   : > { %14301 = vmatprep.mubr.bf16.mxu0 %v22945_v40 }
0x1f05   : > { %v12837_v42 = vpop.f32.mrb[200].mxu0 }
0x1f06   : > { %v22118_v51 = vadd.f32 %v22043_v25, %v12837_v42  ;;  %v12839_v32 = vpop.f32.mrb[201].mxu0  ;;  %v19250_v42 = vld [vmem:[%s22963_s13 + $0x8] sm:$0xff]  }
0x1f07   : > { %v12841_v16 = vpop.f32.mrb[202].mxu0  ;;  %v22126_v30 = vadd.f32 %v22043_v25, %v12839_v32  ;;  %v22951_v25 = vld [vmem:[#allocation71_spill] sm:$0xff] }
0x1f08   : > { %v22121_v29 = vadd.f32 %v22051_v2, %v12841_v16  ;;  %v12843_v61 = vpop.f32.mrb[203].mxu0  ;;  %12866 = vrot.lane.b32.xlu0 %v22118_v51, %s22949_s0 }
0x1f09   : > { %v22131_v17 = vadd.f32 %v22051_v2, %v12843_v61  ;;  %v22952_v2 = vld [vmem:[#allocation72_spill] sm:$0xff] }
0x1f0a   : > { %12868 = vrot.lane.b32.xlu1 %v22121_v29, %s22949_s0 }
0x1f0c   : > { %12870 = vrot.lane.b32.xlu0 %v22126_v30, %s22949_s0 }
0x1f0e   : > { %12872 = vrot.lane.b32.xlu1 %v22131_v17, %s22949_s0 }
0x1f10   : > { %13008 = vrot.lane.b32.xlu0 %v22118_v51, %s22950_s3 }
0x1f12   : > { %13010 = vrot.lane.b32.xlu1 %v22121_v29, %s22950_s3 }
0x1f14   : > { %13012 = vrot.lane.b32.xlu0 %v22126_v30, %s22950_s3 }
0x1f16   : > { %13014 = vrot.lane.b32.xlu1 %v22131_v17, %s22950_s3 }
0x1f18   : > { %13084 = vrot.lane.b32.xlu0 %v22951_v25, %s22950_s3 }
0x1f1a   : > { %13086 = vrot.lane.b32.xlu1 %v22952_v2, %s22950_s3 }
0x1f1c   : > { %13088 = vrot.lane.b32.xlu0 %v22953_v27, %s22950_s3 }
0x1f1e   : > { %13090 = vrot.lane.b32.xlu1 %v22954_v9, %s22950_s3 }
0x1f20   : > { %13160 = vrot.lane.b32.xlu0 %v22118_v51, %s22955_s5 }
0x1f22   : > { %13162 = vrot.lane.b32.xlu1 %v22121_v29, %s22955_s5 }
0x1f24   : > { %13164 = vrot.lane.b32.xlu0 %v22126_v30, %s22955_s5 }
0x1f26   : > { %13166 = vrot.lane.b32.xlu1 %v22131_v17, %s22955_s5 }
0x1f28   : > { %13236 = vrot.lane.b32.xlu0 %v22951_v25, %s22955_s5 }
0x1f2a   : > { %13238 = vrot.lane.b32.xlu1 %v22952_v2, %s22955_s5 }
0x1f2c   : > { %13240 = vrot.lane.b32.xlu0 %v22953_v27, %s22955_s5 }
0x1f2e   : > { %13242 = vrot.lane.b32.xlu1 %v22954_v9, %s22955_s5 }
0x1f30   : > { %13312 = vrot.lane.b32.xlu0 %v22118_v51, %s22956_s6 }
0x1f32   : > { %13314 = vrot.lane.b32.xlu1 %v22121_v29, %s22956_s6 }
0x1f34   : > { %13316 = vrot.lane.b32.xlu0 %v22126_v30, %s22956_s6 }
0x1f36   : > { %13318 = vrot.lane.b32.xlu1 %v22131_v17, %s22956_s6 }
0x1f38   : > { %13388 = vrot.lane.b32.xlu0 %v22951_v25, %s22956_s6 }
0x1f3a   : > { %13390 = vrot.lane.b32.xlu1 %v22952_v2, %s22956_s6 }
0x1f3c   : > { %13392 = vrot.lane.b32.xlu0 %v22953_v27, %s22956_s6 }
0x1f3e   : > { %13394 = vrot.lane.b32.xlu1 %v22954_v9, %s22956_s6 }
0x1f40   : > { %13584 = vrot.lane.b32.xlu0 %v22118_v51, %s22957_s8 }
0x1f42   : > { %13586 = vrot.lane.b32.xlu1 %v22121_v29, %s22957_s8 }
0x1f44   : > { %13588 = vrot.lane.b32.xlu0 %v22126_v30, %s22957_s8 }
0x1f46   : > { %13590 = vrot.lane.b32.xlu1 %v22131_v17, %s22957_s8 }
0x1f48   : > { %13720 = vrot.lane.b32.xlu0 %v22118_v51, %s22958_s9 }
0x1f4a   : > { %13722 = vrot.lane.b32.xlu1 %v22121_v29, %s22958_s9 }
0x1f4c   : > { %13724 = vrot.lane.b32.xlu0 %v22126_v30, %s22958_s9 }
0x1f4e   : > { %13726 = vrot.lane.b32.xlu1 %v22131_v17, %s22958_s9 }
0x1f50   : > { %13796 = vrot.lane.b32.xlu0 %v22951_v25, %s22958_s9 }
0x1f52   : > { %13798 = vrot.lane.b32.xlu1 %v22952_v2, %s22958_s9 }
0x1f54   : > { %13800 = vrot.lane.b32.xlu0 %v22953_v27, %s22958_s9 }
0x1f56   : > { %13802 = vrot.lane.b32.xlu1 %v22954_v9, %s22958_s9 }
0x1f58   : > { %13872 = vrot.lane.b32.xlu0 %v22118_v51, %s22959_s10 }
0x1f5a   : > { %13874 = vrot.lane.b32.xlu1 %v22121_v29, %s22959_s10 }
0x1f5c   : > { %13876 = vrot.lane.b32.xlu0 %v22126_v30, %s22959_s10 }
0x1f5e   : > { %13878 = vrot.lane.b32.xlu1 %v22131_v17, %s22959_s10 }
0x1f60   : > { %13948 = vrot.lane.b32.xlu0 %v22951_v25, %s22959_s10 }
0x1f62   : > { %13950 = vrot.lane.b32.xlu1 %v22952_v2, %s22959_s10 }
0x1f64   : > { %13952 = vrot.lane.b32.xlu0 %v22953_v27, %s22959_s10 }
0x1f66   : > { %13954 = vrot.lane.b32.xlu1 %v22954_v9, %s22959_s10 }
0x1f68   : > { %14024 = vrot.lane.b32.xlu0 %v22118_v51, %s22961_s14 }
0x1f6a   : > { %14026 = vrot.lane.b32.xlu1 %v22121_v29, %s22961_s14 }
0x1f6c   : > { %14028 = vrot.lane.b32.xlu0 %v22126_v30, %s22961_s14 }
0x1f6e   : > { %14030 = vrot.lane.b32.xlu1 %v22131_v17, %s22961_s14 }
0x1f70   : > { %14100 = vrot.lane.b32.xlu0 %v22951_v25, %s22961_s14 }
0x1f72   : > { %14102 = vrot.lane.b32.xlu1 %v22952_v2, %s22961_s14 }
0x1f74   : > { %14104 = vrot.lane.b32.xlu0 %v22953_v27, %s22961_s14 }
0x1f76   : > { %14106 = vrot.lane.b32.xlu1 %v22954_v9, %s22961_s14 }
0x1f78   : > { %14180 = vperm.xlu0 %18941, %v14176_v53  }
0x1f7a   : > { %14185 = vperm.xlu1 %18940, %v14177_v15   ;;  %v12867_v8 = vpop.permute.xlu0 %12866 }
0x1f7c   : > { %v12869_v13 = vpop.permute.xlu1 %12868  ;;  %18942 = vset.pattern.permute.xlu0 %v22962_v49 }
0x1f7d   : > { %14197 = vperm.xlu0 %18942, %v14176_v53  }
0x1f7e   : > { %v12871_v12 = vpop.permute.xlu0 %12870  ;;  %18943 = vset.pattern.permute.xlu1 %v22962_v49 }
0x1f7f   : > { %v12874_v14 = vsel %vm1289_vm2, %v12867_v8, %v12871_v12  ;;  %v12876_v52 = vsel %vm1289_vm2, %v12871_v12, %v12867_v8  ;;  %14201 = vperm.xlu1 %18943, %v14177_v15   ;;  %v22967_v12 = vld [vmem:[#allocation58_spill] sm:$0xff] }
0x1f80   : > { %v12873_v55 = vpop.permute.xlu1 %12872  ;;  %v12878_v31 = vmul.f32 %v12876_v52, %v22948_v60  ;;  %v12879_v33 = vmul.f32 %v12874_v14, %v22947_v38 }
0x1f81   : > { %v12875_v4 = vsel %vm1289_vm2, %v12869_v13, %v12873_v55  ;;  %v12877_v0 = vsel %vm1289_vm2, %v12873_v55, %v12869_v13  ;;  %18945 = vset.pattern.permute.xlu0 %v22964_v41 }
0x1f82   : > { %v12880_v50 = vmul.f32 %v12877_v0, %v22948_v60  ;;  %v12881_v20 = vmul.f32 %v12875_v4, %v22947_v38  ;;  %v13009_v56 = vpop.permute.xlu0 %13008  ;;  %14213 = vperm.xlu0 %18945, %v14177_v15  }
0x1f83   : > { %18944 = vset.pattern.permute.xlu1 %v22964_v41 }
0x1f84   : > { %v12882_v36 = vpack.c.bf16 %v12880_v50, %v12878_v31  ;;  %v13011_v6 = vpop.permute.xlu1 %13010  ;;  %v12883_v34 = vpack.c.bf16 %v12881_v20, %v12879_v33  ;;  %14209 = vperm.xlu1 %18944, %v14176_v53   ;;  %v22968_v50 = vld [vmem:[#allocation57_spill] sm:$0xff] }
0x1f86   : > { %v13013_v28 = vpop.permute.xlu0 %13012  ;;  %12965 = vmatprep.subr.bf16.mxu1 %v12883_v34  ;;  %18946 = vset.pattern.permute.xlu0 %v22945_v40 }
0x1f87   : > { %v13016_v18 = vsel %vm1314_vm7, %v13009_v56, %v13013_v28  ;;  %v13018_v59 = vsel %vm1314_vm7, %v13013_v28, %v13009_v56  ;;  %12966 = vmatpush1.bf16.msra.mxu1 %v12882_v36  ;;  %v19251_v36 = vld [vmem:[#allocation13 + $0x8] sm:$0xff]  }
0x1f88   : > { %v13015_v47 = vpop.permute.xlu1 %13014  ;;  %18947 = vset.pattern.permute.xlu1 %v22945_v40  ;;  %v13020_v1 = vmul.f32 %v13018_v59, %v22965_v21  ;;  %v13021_v39 = vmul.f32 %v13016_v18, %v22966_v19 }
0x1f89   : > { %v13017_v58 = vsel %vm1314_vm7, %v13011_v6, %v13015_v47  ;;  %v13019_v43 = vsel %vm1314_vm7, %v13015_v47, %v13011_v6 }
0x1f8a   : > { %v13022_v54 = vmul.f32 %v13019_v43, %v22965_v21  ;;  %v13023_v22 = vmul.f32 %v13017_v58, %v22966_v19  ;;  %v13085_v46 = vpop.permute.xlu0 %13084  ;;  %16188 = vmatmul.mubr.msk.bf16.vlgmr.msra.gmra.mrb[148].mxu1 %vm2475_vm14, %v19249_v37 }
0x1f8b   : > { %13069 = vmatprep.mubr.bf16.mxu1 %v22945_v40 }
0x1f8c   : > { %v13024_v26 = vpack.c.bf16 %v13022_v54, %v13020_v1  ;;  %v13087_v11 = vpop.permute.xlu1 %13086  ;;  %v13025_v5 = vpack.c.bf16 %v13023_v22, %v13021_v39 }
0x1f8e   : > { %v13089_v35 = vpop.permute.xlu0 %13088  ;;  %13037 = vmatprep.subr.bf16.mxu1 %v13025_v5 }
0x1f8f   : > { %v13092_v23 = vsel %vm1314_vm7, %v13085_v46, %v13089_v35  ;;  %v13094_v7 = vsel %vm1314_vm7, %v13089_v35, %v13085_v46  ;;  %13038 = vmatpush1.bf16.msra.mxu1 %v13024_v26  ;;  %v22969_v35 = vld [vmem:[#allocation59_spill] sm:$0xff] }
0x1f90   : > { %v13091_v10 = vpop.permute.xlu1 %13090  ;;  %v13096_v57 = vmul.f32 %v13094_v7, %v22965_v21  ;;  %v13097_v45 = vmul.f32 %v13092_v23, %v22966_v19 }
0x1f91   : > { %v13093_v62 = vsel %vm1314_vm7, %v13087_v11, %v13091_v10  ;;  %v13095_v44 = vsel %vm1314_vm7, %v13091_v10, %v13087_v11  ;;  %v19252_v10 = vld [vmem:[%s22963_s13 + $0x10] sm:$0xff]  }
0x1f92   : > { %v13098_v24 = vmul.f32 %v13095_v44, %v22965_v21  ;;  %v13099_v63 = vmul.f32 %v13093_v62, %v22966_v19  ;;  %v13161_v3 = vpop.permute.xlu0 %13160 }
0x1f94   : > { %v13100_v32 = vpack.c.bf16 %v13098_v24, %v13096_v57  ;;  %v13163_v16 = vpop.permute.xlu1 %13162  ;;  %v13101_v61 = vpack.c.bf16 %v13099_v63, %v13097_v45 }
0x1f96   : > { %v13165_v53 = vpop.permute.xlu0 %13164  ;;  %16192 = vmatmul.mubr.msk.bf16.vlgmr.msra.gmra.mrb[148].mxu1 %vm2475_vm14, %v19250_v42  ;;  %13113 = vmatprep.subr.bf16.mxu1 %v13101_v61  ;;  %v22970_v61 = vld [vmem:[#allocation60_spill] sm:$0xff] }
0x1f97   : > { %v13168_v15 = vsel %vm1457_vm3, %v13161_v3, %v13165_v53  ;;  %13114 = vmatpush1.bf16.msra.mxu1 %v13100_v32  ;;  %13145 = vmatprep.mubr.bf16.mxu1 %v22945_v40  ;;  %v13170_v0 = vsel %vm1457_vm3, %v13165_v53, %v13161_v3 }
0x1f98   : > { %v13167_v8 = vpop.permute.xlu1 %13166  ;;  %v13173_v14 = vmul.f32 %v13168_v15, %v22967_v12  ;;  %v13172_v6 = vmul.f32 %v13170_v0, %v22968_v50 }
0x1f99   : > { %v13169_v13 = vsel %vm1457_vm3, %v13163_v16, %v13167_v8  ;;  %v13171_v52 = vsel %vm1457_vm3, %v13167_v8, %v13163_v16 }
0x1f9a   : > { %v13175_v55 = vmul.f32 %v13169_v13, %v22967_v12  ;;  %v13237_v4 = vpop.permute.xlu0 %13236  ;;  %v13174_v20 = vmul.f32 %v13171_v52, %v22968_v50  ;;  %v19253_v13 = vld [vmem:[#allocation13 + $0x10] sm:$0xff]  }
0x1f9c   : > { %v13239_v31 = vpop.permute.xlu1 %13238  ;;  %v13177_v33 = vpack.c.bf16 %v13175_v55, %v13173_v14  ;;  %v13176_v37 = vpack.c.bf16 %v13174_v20, %v13172_v6  ;;  %v19254_v20 = vld [vmem:[%s22963_s13 + $0x18] sm:$0xff]   ;;  %v13465_v6 = vpack.c.bf16 %v22131_v17, %v22126_v30 }
0x1f9e   : > { %v13241_v56 = vpop.permute.xlu0 %13240  ;;  %13189 = vmatprep.subr.bf16.mxu1 %v13177_v33 }
0x1f9f   : > { %v13244_v34 = vsel %vm1457_vm3, %v13237_v4, %v13241_v56  ;;  %v13246_v46 = vsel %vm1457_vm3, %v13241_v56, %v13237_v4 }
0x1fa0   : > { %v13243_v28 = vpop.permute.xlu1 %13242  ;;  %v13249_v59 = vmul.f32 %v13244_v34, %v22967_v12  ;;  %v13248_v62 = vmul.f32 %v13246_v46, %v22968_v50 }
0x1fa1   : > { %v13245_v18 = vsel %vm1457_vm3, %v13239_v31, %v13243_v28  ;;  %v13247_v39 = vsel %vm1457_vm3, %v13243_v28, %v13239_v31  ;;  %v19255_v28 = vld [vmem:[#allocation13 + $0x18] sm:$0xff]  }
0x1fa2   : > { %v13251_v47 = vmul.f32 %v13245_v18, %v22967_v12  ;;  %v13313_v58 = vpop.permute.xlu0 %13312  ;;  %16194 = vmatmul.mubr.msk.bf16.vlgmr.msra.gmra.mrb[148].mxu1 %vm2475_vm14, %v19251_v36  ;;  %v13250_v11 = vmul.f32 %v13247_v39, %v22968_v50  ;;  %v13464_v18 = vpack.c.bf16 %v22121_v29, %v22118_v51  ;;  %v19256_v51 = vld [vmem:[%s22963_s13 + $0x20] sm:$0xff]  }
0x1fa3   : > { %13190 = vmatpush1.bf16.msra.mxu1 %v13176_v37  ;;  %13221 = vmatprep.mubr.bf16.mxu1 %v22945_v40 }
0x1fa4   : > { %v13315_v43 = vpop.permute.xlu1 %13314  ;;  %v13253_v1 = vpack.c.bf16 %v13251_v47, %v13249_v59  ;;  %v13252_v24 = vpack.c.bf16 %v13250_v11, %v13248_v62  ;;  %v13525_v59 = vpack.c.bf16 %v22954_v9, %v22953_v27  ;;  %v13524_v27 = vpack.c.bf16 %v22952_v2, %v22951_v25  ;;  %v19257_v11 = vld [vmem:[#allocation13 + $0x20] sm:$0xff]  }
0x1fa6   : > { %v13317_v54 = vpop.permute.xlu0 %13316  ;;  %13265 = vmatprep.subr.bf16.mxu1 %v13253_v1 }
0x1fa7   : > { %v13320_v22 = vsel %vm1545_vm5, %v13313_v58, %v13317_v54  ;;  %v13322_v16 = vsel %vm1545_vm5, %v13317_v54, %v13313_v58 }
0x1fa8   : > { %v13319_v26 = vpop.permute.xlu1 %13318  ;;  %v13325_v23 = vmul.f32 %v13320_v22, %v22969_v35  ;;  %v13324_v14 = vmul.f32 %v13322_v16, %v22970_v61  ;;  %v22972_v22 = vld [vmem:[#allocation64_spill] sm:$0xff] }
0x1fa9   : > { %v13321_v5 = vsel %vm1545_vm5, %v13315_v43, %v13319_v26  ;;  %v13323_v3 = vsel %vm1545_vm5, %v13319_v26, %v13315_v43  ;;  %v22971_v43 = vld [vmem:[#allocation63_spill] sm:$0xff] }
0x1faa   : > { %v13327_v7 = vmul.f32 %v13321_v5, %v22969_v35  ;;  %v13389_v44 = vpop.permute.xlu0 %13388  ;;  %v13326_v53 = vmul.f32 %v13323_v3, %v22970_v61 }
0x1fac   : > { %v13391_v57 = vpop.permute.xlu1 %13390  ;;  %v13329_v45 = vpack.c.bf16 %v13327_v7, %v13325_v23  ;;  %v13328_v55 = vpack.c.bf16 %v13326_v53, %v13324_v14  ;;  %v22973_v7 = vld [vmem:[#allocation78_spill] sm:$0xff] }
0x1fae   : > { %16198 = vmatmul.mubr.msk.bf16.vlgmr.msra.gmra.mrb[148].mxu1 %vm2475_vm14, %v19252_v10  ;;  %v13393_v42 = vpop.permute.xlu0 %13392  ;;  %v22974_v10 = vld [vmem:[#allocation76_spill] sm:$0xff] }
0x1faf   : > { %13266 = vmatpush1.bf16.msra.mxu1 %v13252_v24  ;;  %13297 = vmatprep.mubr.bf16.mxu1 %v22945_v40  ;;  %v13396_v15 = vsel %vm1545_vm5, %v13389_v44, %v13393_v42  ;;  %v13398_v31 = vsel %vm1545_vm5, %v13393_v42, %v13389_v44  ;;  %v22975_v62 = vpack.c.bf16 %v22973_v7, %v22974_v10  ;;  %v22976_v24 = vld [vmem:[#allocation65_spill] sm:$0xff] }
0x1fb0   : > { %13341 = vmatprep.subr.bf16.mxu1 %v13329_v45  ;;  %v13395_v63 = vpop.permute.xlu1 %13394  ;;  %v13401_v52 = vmul.f32 %v13396_v15, %v22969_v35  ;;  %v13400_v56 = vmul.f32 %v13398_v31, %v22970_v61  ;;  %v19258_v42 = vld [vmem:[%s22963_s13 + $0x28] sm:$0xff]  }
0x1fb1   : > { %v13397_v32 = vsel %vm1545_vm5, %v13391_v57, %v13395_v63  ;;  %v13399_v0 = vsel %vm1545_vm5, %v13395_v63, %v13391_v57  ;;  %v22977_v15 = vld [vmem:[#allocation77_spill] sm:$0xff]  ;;  %v22980_v31 = vld [vmem:[#allocation66_spill] sm:$0xff] }
0x1fb2   : > { %v13403_v8 = vmul.f32 %v13397_v32, %v22969_v35  ;;  %v13402_v33 = vmul.f32 %v13399_v0, %v22970_v61  ;;  %v13585_v37 = vpop.permute.xlu0 %13584 }
0x1fb4   : > { %v13405_v4 = vpack.c.bf16 %v13403_v8, %v13401_v52  ;;  %v13404_v36 = vpack.c.bf16 %v13402_v33, %v13400_v56  ;;  %v13587_v34 = vpop.permute.xlu1 %13586  ;;  %v22978_v8 = vld [vmem:[#allocation75_spill] sm:$0xff] }
0x1fb6   : > { %v13589_v17 = vpop.permute.xlu0 %13588 }
0x1fb7   : > { %v13594_v58 = vsel %vm1699_vm8, %v13589_v17, %v13585_v37  ;;  %v13592_v54 = vsel %vm1699_vm8, %v13585_v37, %v13589_v17 }
0x1fb8   : > { %v13591_v30 = vpop.permute.xlu1 %13590  ;;  %v13597_v29 = vmul.f32 %v13594_v58, %v22971_v43  ;;  %v13596_v25 = vmul.f32 %v13592_v54, %v22972_v22  ;;  %v19260_v54 = vld [vmem:[%s22963_s13 + $0x30] sm:$0xff]  }
0x1fb9   : > { %v13595_v47 = vsel %vm1699_vm8, %v13591_v30, %v13587_v34  ;;  %v13593_v39 = vsel %vm1699_vm8, %v13587_v34, %v13591_v30 }
0x1fba   : > { %16200 = vmatmul.mubr.msk.bf16.vlgmr.msra.gmra.mrb[148].mxu1 %vm2475_vm14, %v19253_v13  ;;  %v13599_v1 = vmul.f32 %v13595_v47, %v22971_v43  ;;  %v13598_v46 = vmul.f32 %v13593_v39, %v22972_v22  ;;  %v13721_v2 = vpop.permute.xlu0 %13720  ;;  %v22979_v13 = vpack.c.bf16 %v22977_v15, %v22978_v8 }
0x1fbb   : > { %13342 = vmatpush1.bf16.msra.mxu1 %v13328_v55  ;;  %13373 = vmatprep.mubr.bf16.mxu1 %v22945_v40 }
0x1fbc   : > { %13417 = vmatprep.subr.bf16.mxu1 %v13405_v4  ;;  %v13601_v9 = vpack.c.bf16 %v13599_v1, %v13597_v29  ;;  %v13723_v26 = vpop.permute.xlu1 %13722  ;;  %v13600_v5 = vpack.c.bf16 %v13598_v46, %v13596_v25 }
0x1fbe   : > { %v13725_v44 = vpop.permute.xlu0 %13724 }
0x1fbf   : > { %v13730_v45 = vsel %vm1787_vm9, %v13725_v44, %v13721_v2  ;;  %v13728_v0 = vsel %vm1787_vm9, %v13721_v2, %v13725_v44  ;;  %v22982_v44 = vld [vmem:[#allocation68_spill] sm:$0xff] }
0x1fc0   : > { %v13727_v23 = vpop.permute.xlu1 %13726  ;;  %v13733_v32 = vmul.f32 %v13730_v45, %v22976_v24  ;;  %v13732_v34 = vmul.f32 %v13728_v0, %v22980_v31 }
0x1fc1   : > { %v13731_v57 = vsel %vm1787_vm9, %v13727_v23, %v13723_v26  ;;  %v13729_v52 = vsel %vm1787_vm9, %v13723_v26, %v13727_v23 }
0x1fc2   : > { %v13735_v63 = vmul.f32 %v13731_v57, %v22976_v24  ;;  %v13797_v16 = vpop.permute.xlu0 %13796  ;;  %v13734_v33 = vmul.f32 %v13729_v52, %v22980_v31 }
0x1fc4   : > { %v13799_v3 = vpop.permute.xlu1 %13798  ;;  %v13737_v53 = vpack.c.bf16 %v13735_v63, %v13733_v32 }
0x1fc6   : > { %16204 = vmatmul.mubr.msk.bf16.vlgmr.msra.gmra.mrb[148].mxu1 %vm2475_vm14, %v19254_v20  ;;  %v13801_v55 = vpop.permute.xlu0 %13800 }
0x1fc7   : > { %13418 = vmatpush1.bf16.msra.mxu1 %v13404_v36  ;;  %13449 = vmatprep.mubr.bf16.mxu1 %v22945_v40  ;;  %v13806_v20 = vsel %vm1787_vm9, %v13801_v55, %v13797_v16  ;;  %v13804_v1 = vsel %vm1787_vm9, %v13797_v16, %v13801_v55 }
0x1fc8   : > { %13477 = vmatprep.subr.bf16.mxu1 %v13465_v6  ;;  %v13803_v14 = vpop.permute.xlu1 %13802  ;;  %v19259_v6 = vld [vmem:[#allocation13 + $0x28] sm:$0xff]   ;;  %v13808_v46 = vmul.f32 %v13804_v1, %v22980_v31 }
0x1fc9   : > { %v13807_v4 = vsel %vm1787_vm9, %v13803_v14, %v13799_v3  ;;  %v13805_v17 = vsel %vm1787_vm9, %v13799_v3, %v13803_v14 }
0x1fca   : > { %v13811_v56 = vmul.f32 %v13807_v4, %v22976_v24  ;;  %v13873_v37 = vpop.permute.xlu0 %13872 }
0x1fcc   : > { %v13875_v36 = vpop.permute.xlu1 %13874 }
0x1fce   : > { %v13877_v47 = vpop.permute.xlu0 %13876 }
0x1fcf   : > { %v13882_v29 = vsel %vm1875_vm10, %v13877_v47, %v13873_v37 }
0x1fd0   : > { %v13879_v30 = vpop.permute.xlu1 %13878 }
0x1fd1   : > { %v13883_v58 = vsel %vm1875_vm10, %v13879_v30, %v13875_v36  ;;  %v13881_v23 = vsel %vm1875_vm10, %v13875_v36, %v13879_v30 }
0x1fd2   : > { %16206 = vmatmul.mubr.msk.bf16.vlgmr.msra.gmra.mrb[148].mxu1 %vm2475_vm14, %v19255_v28  ;;  %v13809_v28 = vmul.f32 %v13806_v20, %v22976_v24  ;;  %v13886_v57 = vmul.f32 %v13881_v23, %v22982_v44  ;;  %v22983_v20 = vld [vmem:[#allocation69_spill] sm:$0xff] }
0x1fd3   : > { %13478 = vmatpush1.bf16.msra.mxu1 %v13464_v18  ;;  %13509 = vmatprep.mubr.bf16.mxu1 %v22945_v40  ;;  %v13736_v18 = vpack.c.bf16 %v13734_v33, %v13732_v34 }
0x1fd4   : > { %13537 = vmatprep.subr.bf16.mxu1 %v13525_v59  ;;  %v13813_v59 = vpack.c.bf16 %v13811_v56, %v13809_v28  ;;  %v13951_v39 = vpop.permute.xlu1 %13950 }
0x1fde   : > { %16210 = vmatmul.mubr.msk.bf16.vlgmr.msra.gmra.mrb[148].mxu1 %vm2475_vm14, %v19256_v51  ;;  %v13810_v51 = vmul.f32 %v13805_v17, %v22980_v31 }
0x1fdf   : > { %13538 = vmatpush1.bf16.msra.mxu1 %v13524_v27  ;;  %13569 = vmatprep.mubr.bf16.mxu1 %v22945_v40  ;;  %v22981_v27 = vld [vmem:[#allocation67_spill] sm:$0xff] }
0x1fe0   : > { %13613 = vmatprep.subr.bf16.mxu1 %v13601_v9  ;;  %v13887_v9 = vmul.f32 %v13883_v58, %v22981_v27  ;;  %v13885_v26 = vmul.f32 %v13882_v29, %v22981_v27  ;;  %v13812_v25 = vpack.c.bf16 %v13810_v51, %v13808_v46  ;;  %v22984_v51 = vld [vmem:[#allocation70_spill] sm:$0xff] }
0x1fe2   : > { %v13889_v2 = vpack.c.bf16 %v13887_v9, %v13885_v26 }
0x1fea   : > { %16212 = vmatmul.mubr.msk.bf16.vlgmr.msra.gmra.mrb[148].mxu1 %vm2475_vm14, %v19257_v11  ;;  %v13949_v11 = vpop.permute.xlu0 %13948 }
0x1feb   : > { %13614 = vmatpush1.bf16.msra.mxu1 %v13600_v5  ;;  %13645 = vmatprep.mubr.bf16.mxu1 %v22945_v40  ;;  %v13955_v5 = vpop.permute.xlu1 %13954 }
0x1fec   : > { %13673 = vmatprep.subr.bf16.mxu1 %v22975_v62  ;;  %v13959_v10 = vsel %vm1875_vm10, %v13955_v5, %v13951_v39  ;;  %v13880_v62 = vsel %vm1875_vm10, %v13873_v37, %v13877_v47  ;;  %v13957_v14 = vsel %vm1875_vm10, %v13951_v39, %v13955_v5 }
0x1fed   : > { %v13963_v63 = vmul.f32 %v13959_v10, %v22981_v27  ;;  %v13884_v32 = vmul.f32 %v13880_v62, %v22982_v44  ;;  %v13962_v0 = vmul.f32 %v13957_v14, %v22982_v44 }
0x1fee   : > { %v13953_v7 = vpop.permute.xlu0 %13952 }
0x1fef   : > { %v13958_v45 = vsel %vm1875_vm10, %v13953_v7, %v13949_v11  ;;  %v14027_v3 = vpop.permute.xlu1 %14026  ;;  %v13888_v15 = vpack.c.bf16 %v13886_v57, %v13884_v32  ;;  %v13956_v4 = vsel %vm1875_vm10, %v13949_v11, %v13953_v7  ;;  %v19264_v7 = vld [vmem:[%s22963_s13 + $0x40] sm:$0xff]   ;;  %v19265_v57 = vld [vmem:[#allocation13 + $0x40] sm:$0xff]  }
0x1ff0   : > { %v13961_v16 = vmul.f32 %v13958_v45, %v22981_v27  ;;  %v13960_v34 = vmul.f32 %v13956_v4, %v22982_v44 }
0x1ff2   : > { %v13965_v8 = vpack.c.bf16 %v13963_v63, %v13961_v16 }
0x1ff6   : > { %16216 = vmatmul.mubr.msk.bf16.vlgmr.msra.gmra.mrb[148].mxu1 %vm2475_vm14, %v19258_v42  ;;  %v19261_v42 = vld [vmem:[#allocation13 + $0x30] sm:$0xff]  }
0x1ff7   : > { %13674 = vmatpush1.bf16.msra.mxu1 %v22979_v13  ;;  %13705 = vmatprep.mubr.bf16.mxu1 %v22945_v40  ;;  %v14031_v13 = vpop.permute.xlu1 %14030 }
0x1ff8   : > { %13749 = vmatprep.subr.bf16.mxu1 %v13737_v53  ;;  %v14025_v53 = vpop.permute.xlu0 %14024  ;;  %v14035_v55 = vsel %vm1963_vm11, %v14031_v13, %v14027_v3  ;;  %v14033_v17 = vsel %vm1963_vm11, %v14027_v3, %v14031_v13 }
0x1ff9   : > { %v14039_v56 = vmul.f32 %v14035_v55, %v22983_v20  ;;  %v14038_v29 = vmul.f32 %v14033_v17, %v22984_v51 }
0x1ffb   : > { %v14103_v36 = vpop.permute.xlu1 %14102 }
0x1ffc   : > { %v14029_v52 = vpop.permute.xlu0 %14028 }
0x1ffd   : > { %v14034_v33 = vsel %vm1963_vm11, %v14029_v52, %v14025_v53  ;;  %v14032_v1 = vsel %vm1963_vm11, %v14025_v53, %v14029_v52 }
0x1ffe   : > { %v14037_v28 = vmul.f32 %v14034_v33, %v22983_v20  ;;  %v14036_v46 = vmul.f32 %v14032_v1, %v22984_v51  ;;  %v14880_v1 = vld [vmem:[%s22872_s12 + $0x8] sm:$0xff] }
0x1fff   : > { %v14107_v30 = vpop.permute.xlu1 %14106 }
0x2000   : > { %v14101_v37 = vpop.permute.xlu0 %14100  ;;  %v14111_v58 = vsel %vm1963_vm11, %v14107_v30, %v14103_v36  ;;  %v14040_v11 = vpack.c.bf16 %v14038_v29, %v14036_v46  ;;  %v14879_v29 = vld [vmem:[%s22872_s12] sm:$0xff] }
0x2001   : > { %v14115_v39 = vmul.f32 %v14111_v58, %v22983_v20 }
0x2002   : > { %16218 = vmatmul.mubr.msk.bf16.vlgmr.msra.gmra.mrb[148].mxu1 %vm2475_vm14, %v19259_v6  ;;  %v19262_v6 = vld [vmem:[%s22963_s13 + $0x38] sm:$0xff]  }
0x2003   : > { %13750 = vmatpush1.bf16.msra.mxu1 %v13736_v18  ;;  %13781 = vmatprep.mubr.bf16.mxu1 %v22945_v40  ;;  %v13964_v18 = vpack.c.bf16 %v13962_v0, %v13960_v34  ;;  %v14186_v45 = vpop.permute.xlu1 %14185 }
0x2004   : > { %13825 = vmatprep.subr.bf16.mxu1 %v13813_v59  ;;  %v14041_v59 = vpack.c.bf16 %v14039_v56, %v14037_v28  ;;  %v14105_v47 = vpop.permute.xlu0 %14104 }
0x2005   : > { %v14110_v9 = vsel %vm1963_vm11, %v14105_v47, %v14101_v37  ;;  %v14108_v5 = vsel %vm1963_vm11, %v14101_v37, %v14105_v47 }
0x2006   : > { %v14113_v26 = vmul.f32 %v14110_v9, %v22983_v20  ;;  %v14112_v10 = vmul.f32 %v14108_v5, %v22984_v51 }
0x2007   : > { %v14202_v3 = vpop.permute.xlu1 %14201 }
0x2008   : > { %v14181_v63 = vpop.permute.xlu0 %14180 }
0x200b   : > { %v14210_v0 = vpop.permute.xlu1 %14209 }
0x200c   : > { %v14198_v32 = vpop.permute.xlu0 %14197 }
0x200e   : > { %16222 = vmatmul.mubr.msk.bf16.vlgmr.msra.gmra.mrb[148].mxu1 %vm2475_vm14, %v19260_v54  ;;  %v19263_v54 = vld [vmem:[#allocation13 + $0x38] sm:$0xff]  }
0x200f   : > { %13826 = vmatpush1.bf16.msra.mxu1 %v13812_v25  ;;  %13857 = vmatprep.mubr.bf16.mxu1 %v22945_v40  ;;  %v14117_v25 = vpack.c.bf16 %v14115_v39, %v14113_v26 }
0x2010   : > { %13901 = vmatprep.subr.bf16.mxu1 %v13889_v2  ;;  %v14109_v2 = vsel %vm1963_vm11, %v14103_v36, %v14107_v30  ;;  %v14214_v34 = vpop.permute.xlu0 %14213 }
0x2011   : > { %v14114_v23 = vmul.f32 %v14109_v2, %v22984_v51 }
0x2013   : > { %v14116_v62 = vpack.c.bf16 %v14114_v23, %v14112_v10 }
0x201a   : > { %16224 = vmatmul.mubr.msk.bf16.vlgmr.msra.gmra.mrb[148].mxu1 %vm2475_vm14, %v19261_v42 }
0x201b   : > { %13902 = vmatpush1.bf16.msra.mxu1 %v13888_v15  ;;  %13933 = vmatprep.mubr.bf16.mxu1 %v22945_v40 }
0x201c   : > { %13977 = vmatprep.subr.bf16.mxu1 %v13965_v8 }
0x2026   : > { %16228 = vmatmul.mubr.msk.bf16.vlgmr.msra.gmra.mrb[148].mxu1 %vm2475_vm14, %v19262_v6 }
0x2027   : > { %13978 = vmatpush1.bf16.msra.mxu1 %v13964_v18  ;;  %14009 = vmatprep.mubr.bf16.mxu1 %v22945_v40 }
0x2028   : > { %14053 = vmatprep.subr.bf16.mxu1 %v14041_v59 }
0x2032   : > { %16230 = vmatmul.mubr.msk.bf16.vlgmr.msra.gmra.mrb[148].mxu1 %vm2475_vm14, %v19263_v54 }
0x2033   : > { %14054 = vmatpush1.bf16.msra.mxu1 %v14040_v11  ;;  %14085 = vmatprep.mubr.bf16.mxu1 %v22945_v40 }
0x2034   : > { %14129 = vmatprep.subr.bf16.mxu1 %v14117_v25 }
0x203e   : > { %16234 = vmatmul.mubr.msk.bf16.vlgmr.msra.gmra.mrb[148].mxu1 %vm2475_vm14, %v19264_v7 }
0x203f   : > { %14130 = vmatpush1.bf16.msra.mxu1 %v14116_v62  ;;  %14161 = vmatprep.mubr.bf16.mxu1 %v22945_v40 }
0x204a   : > { %16236 = vmatmul.mubr.msk.bf16.vlgmr.msra.gmra.mrb[148].mxu1 %vm2475_vm14, %v19265_v57 }
0x211d   : > { %v14163_v42 = vpop.f32.mrb[148].mxu1 }
0x211e   : > { %v14188_v16 = vadd.f32 %v14181_v63, %v14163_v42  ;;  %v14165_v53 = vpop.f32.mrb[149].mxu1 }
0x211f   : > { %v14189_v15 = vadd.f32 %v14181_v63, %v14165_v53  ;;  %v14167_v8 = vpop.f32.mrb[150].mxu1 }
0x2120   : > { %v14192_v13 = vmax.f32 %v14188_v16, 0.0  ;;  %v14190_v14 = vadd.f32 %v14186_v45, %v14167_v8  ;;  %v14169_v52 = vpop.f32.mrb[151].mxu1 }
0x2121   : > { %v14193_v55 = vmax.f32 %v14189_v15, 0.0  ;;  %v14191_v4 = vadd.f32 %v14186_v45, %v14169_v52 }
0x2122   : > { %v14194_v33 = vmax.f32 %v14190_v14, 0.0  ;;  %v14204_v56 = vmul.f32 %v14198_v32, %v14192_v13 }
0x2123   : > { %v14195_v36 = vmax.f32 %v14191_v4, 0.0  ;;  %v14205_v6 = vmul.f32 %v14198_v32, %v14193_v55 }
0x2124   : > { %v14206_v28 = vmul.f32 %v14202_v3, %v14194_v33  ;;  %v22473_v37 = vadd.f32 %v14210_v0, %v14204_v56 }
0x2125   : > { %v14207_v18 = vmul.f32 %v14202_v3, %v14195_v36  ;;  %v22475_v59 = vadd.f32 %v14210_v0, %v14205_v6  ;;  %v19266_v3 = vld [vmem:[#allocation14 + $0x8] sm:$0xff]  }
0x2126   : > { %v22477_v30 = vadd.f32 %v14214_v34, %v14206_v28  ;;  %14240 = vrot.lane.b32.xlu1 %v22473_v37, %s22950_s3 }
0x2127   : > { %v22481_v17 = vadd.f32 %v14214_v34, %v14207_v18  ;;  %14244 = vrot.lane.b32.xlu0 %v22475_v59, %s22950_s3 }
0x2128   : > { %v14515_v47 = vpack.c.bf16 %v22477_v30, %v22473_v37 }
0x2129   : > { %v14516_v58 = vpack.c.bf16 %v22481_v17, %v22475_v59 }
0x212a   : > { %14242 = vrot.lane.b32.xlu1 %v22477_v30, %s22950_s3 }
0x212b   : > { %14220 = vrot.lane.b32.xlu0 %v22473_v37, %s22949_s0 }
0x212e   : > { %14246 = vrot.lane.b32.xlu1 %v22481_v17, %s22950_s3  ;;  %s22987_s3 = sshll.u32 %s20085_s17, 3 }
0x212f   : > { %14224 = vrot.lane.b32.xlu0 %v22475_v59, %s22949_s0 }
0x2132   : > { %14222 = vrot.lane.b32.xlu1 %v22477_v30, %s22949_s0 }
0x2133   : > { %14363 = vrot.lane.b32.xlu0 %v22473_v37, %s22955_s5 }
0x2136   : > { %14226 = vrot.lane.b32.xlu1 %v22481_v17, %s22949_s0  ;;  %s14982_s0 = scalar_lea.sflag [#allocation4], %s20085_s17 }
0x2137   : > { %14367 = vrot.lane.b32.xlu0 %v22475_v59, %s22955_s5 }
0x213a   : > { %14365 = vrot.lane.b32.xlu1 %v22477_v30, %s22955_s5 }
0x213b   : > { %14439 = vrot.lane.b32.xlu0 %v22473_v37, %s22956_s6 }
0x213e   : > { %14369 = vrot.lane.b32.xlu1 %v22481_v17, %s22955_s5 }
0x213f   : > { %14443 = vrot.lane.b32.xlu0 %v22475_v59, %s22956_s6 }
0x2142   : > { %14441 = vrot.lane.b32.xlu1 %v22477_v30, %s22956_s6 }
0x2143   : > { %14575 = vrot.lane.b32.xlu0 %v22473_v37, %s22957_s8 }
0x2146   : > { %14445 = vrot.lane.b32.xlu1 %v22481_v17, %s22956_s6  ;;  %s16262_s6 = sshll.u32 %s19890_s11, 7  ;;  %s19678_s11 = smov [#allocation16]  }
0x2147   : > { %14579 = vrot.lane.b32.xlu0 %v22475_v59, %s22957_s8 }
0x214a   : > { %14577 = vrot.lane.b32.xlu1 %v22477_v30, %s22957_s8 }
0x214b   : > { %14651 = vrot.lane.b32.xlu0 %v22473_v37, %s22958_s9 }
0x214e   : > { %14581 = vrot.lane.b32.xlu1 %v22481_v17, %s22957_s8  ;;  %s22985_s8 = sld [smem:[#allocation52_spill]] }
0x214f   : > { %14655 = vrot.lane.b32.xlu0 %v22475_v59, %s22958_s9 }
0x2152   : > { %14653 = vrot.lane.b32.xlu1 %v22477_v30, %s22958_s9 }
0x2153   : > { %14727 = vrot.lane.b32.xlu0 %v22473_v37, %s22959_s10 }
0x2156   : > { %14657 = vrot.lane.b32.xlu1 %v22481_v17, %s22958_s9 }
0x2157   : > { %14731 = vrot.lane.b32.xlu0 %v22475_v59, %s22959_s10 }
0x215a   : > { %14729 = vrot.lane.b32.xlu1 %v22477_v30, %s22959_s10 }
0x215b   : > { %14803 = vrot.lane.b32.xlu0 %v22473_v37, %s22961_s14 }
0x215e   : > { %14733 = vrot.lane.b32.xlu1 %v22481_v17, %s22959_s10  ;;  %s1216_s10 = scalar_lea.vmem [#allocation16], %s22987_s3  ;;  %s19537_s3 = sshll.u32 %s19678_s11, 4  ;;  %s19538_s3 = int_to_ptr.vmem [resolvable:$false] %s19537_s3 }
0x215f   : > { %14807 = vrot.lane.b32.xlu0 %v22475_v59, %s22961_s14  ;;  %s14996_s9 = sshll.u32 %s1216_s10, 4  ;;  %s19539_s12 = scalar_lea.vmem %s19538_s3, 256  ;;  %s22684_s9 = int_to_ptr.vmem [resolvable:$true] %s14996_s9 }
0x2160   : > { %p19540_p9 = scmp.lt.s32.totalorder %s22684_s9, %s19538_s3 }
0x2162   : > { %14805 = vrot.lane.b32.xlu1 %v22477_v30, %s22961_s14 }
0x2163   : > { %14883 = vperm.xlu0 %18946, %v14879_v29  }
0x2166   : > { %14809 = vrot.lane.b32.xlu1 %v22481_v17, %s22961_s14  ;;  %s22986_s14 = sld [smem:[#allocation53_spill]] }
0x2167   : > { %18949 = vset.pattern.permute.xlu0 %v22962_v49 }
0x2168   : > { %14904 = vperm.xlu0 %18949, %v14880_v1  }
0x216a   : > { %14888 = vperm.xlu1 %18947, %v14880_v1  }
0x216c   : > { %18951 = vset.pattern.permute.xlu0 %v22945_v40  ;;  %s22682_s5 = scalar_lea.hbm %s22986_s14, %s16262_s6 }
0x216e   : > { %18948 = vset.pattern.permute.xlu1 %v22962_v49 }
0x216f   : > { %14900 = vperm.xlu1 %18948, %v14879_v29  }
0x2173   : > { %18950 = vset.pattern.permute.xlu1 %v22964_v41 }
0x2174   : > { %14912 = vperm.xlu1 %18950, %v14879_v29  }
0x2178   : > { %14916 = vperm.xlu1 %18950, %v14880_v1   ;;  %v19267_v1 = vld [vmem:[#allocation14] sm:$0xff]  }
0x2198   : > { %v14241_v9 = vpop.permute.xlu1 %14240 }
0x2199   : > { %v14245_v39 = vpop.permute.xlu0 %14244 }
0x219a   : > { %v14248_v26 = vsel %vm1314_vm7, %v14241_v9, %v14245_v39  ;;  %v14250_v11 = vsel %vm1314_vm7, %v14245_v39, %v14241_v9 }
0x219b   : > { %v14252_v5 = vmul.f32 %v14250_v11, %v22965_v21  ;;  %v14253_v23 = vmul.f32 %v14248_v26, %v22966_v19 }
0x219c   : > { %v14243_v54 = vpop.permute.xlu1 %14242 }
0x219d   : > { %v14221_v46 = vpop.permute.xlu0 %14220 }
0x21a0   : > { %v14247_v25 = vpop.permute.xlu1 %14246 }
0x21a1   : > { %v14249_v49 = vsel %vm1314_vm7, %v14243_v54, %v14247_v25  ;;  %v14251_v41 = vsel %vm1314_vm7, %v14247_v25, %v14243_v54  ;;  %v14225_v2 = vpop.permute.xlu0 %14224 }
0x21a2   : > { %v14254_v7 = vmul.f32 %v14251_v41, %v22965_v21  ;;  %v14255_v10 = vmul.f32 %v14249_v49, %v22966_v19  ;;  %v14228_v42 = vsel %vm1289_vm2, %v14221_v46, %v14225_v2  ;;  %v14230_v32 = vsel %vm1289_vm2, %v14225_v2, %v14221_v46 }
0x21a3   : > { %v14232_v15 = vmul.f32 %v14230_v32, %v22948_v60  ;;  %v14233_v8 = vmul.f32 %v14228_v42, %v22947_v38  ;;  %v19269_v42 = vld [vmem:[#allocation14 + $0x18] sm:$0xff]  }
0x21a4   : > { %v14256_v62 = vpack.c.bf16 %v14254_v7, %v14252_v5  ;;  %v14223_v57 = vpop.permute.xlu1 %14222  ;;  %v14257_v45 = vpack.c.bf16 %v14255_v10, %v14253_v23  ;;  %v19268_v23 = vld [vmem:[#allocation14 + $0x10] sm:$0xff]  }
0x21a5   : > { %v14364_v63 = vpop.permute.xlu0 %14363 }
0x21a6   : > { %14269 = vmatprep.subr.bf16.mxu0 %v14257_v45 }
0x21a7   : > { %14270 = vmatpush1.bf16.msra.mxu0 %v14256_v62 }
0x21a8   : > { %v14227_v16 = vpop.permute.xlu1 %14226 }
0x21a9   : > { %v14229_v53 = vsel %vm1289_vm2, %v14223_v57, %v14227_v16  ;;  %v14231_v21 = vsel %vm1289_vm2, %v14227_v16, %v14223_v57  ;;  %v14368_v19 = vpop.permute.xlu0 %14367 }
0x21aa   : > { %v14234_v13 = vmul.f32 %v14231_v21, %v22948_v60  ;;  %v14235_v14 = vmul.f32 %v14229_v53, %v22947_v38  ;;  %16238 = vmatmul.mubr.msk.bf16.vlgmr.msra.gmra.mrb[204].mxu0 %vm2475_vm14, %v19266_v3  ;;  %v14371_v33 = vsel %vm1457_vm3, %v14364_v63, %v14368_v19  ;;  %v14373_v56 = vsel %vm1457_vm3, %v14368_v19, %v14364_v63 }
0x21ab   : > { %14352 = vmatprep.mubr.bf16.mxu0 %v22945_v40  ;;  %v14375_v6 = vmul.f32 %v14373_v56, %v22968_v50  ;;  %v14376_v34 = vmul.f32 %v14371_v33, %v22967_v12 }
0x21ac   : > { %v14236_v52 = vpack.c.bf16 %v14234_v13, %v14232_v15  ;;  %v14366_v55 = vpop.permute.xlu1 %14365  ;;  %v14237_v4 = vpack.c.bf16 %v14235_v14, %v14233_v8  ;;  %v19270_v15 = vld [vmem:[#allocation14 + $0x20] sm:$0xff]  }
0x21ad   : > { %v14440_v0 = vpop.permute.xlu0 %14439 }
0x21ae   : > { %14320 = vmatprep.subr.bf16.mxu0 %v14237_v4 }
0x21af   : > { %14321 = vmatpush1.bf16.msra.mxu0 %v14236_v52 }
0x21b0   : > { %v14370_v36 = vpop.permute.xlu1 %14369 }
0x21b1   : > { %v14372_v38 = vsel %vm1457_vm3, %v14366_v55, %v14370_v36  ;;  %v14374_v60 = vsel %vm1457_vm3, %v14370_v36, %v14366_v55  ;;  %v14444_v9 = vpop.permute.xlu0 %14443 }
0x21b2   : > { %v14377_v28 = vmul.f32 %v14374_v60, %v22968_v50  ;;  %v14378_v18 = vmul.f32 %v14372_v38, %v22967_v12  ;;  %v14447_v46 = vsel %vm1545_vm5, %v14440_v0, %v14444_v9  ;;  %v14449_v49 = vsel %vm1545_vm5, %v14444_v9, %v14440_v0 }
0x21b3   : > { %v14452_v12 = vmul.f32 %v14447_v46, %v22969_v35  ;;  %v14451_v7 = vmul.f32 %v14449_v49, %v22970_v61 }
0x21b4   : > { %v14379_v29 = vpack.c.bf16 %v14377_v28, %v14375_v6  ;;  %v14442_v39 = vpop.permute.xlu1 %14441  ;;  %v14380_v54 = vpack.c.bf16 %v14378_v18, %v14376_v34  ;;  %v19271_v6 = vld [vmem:[#allocation14 + $0x28] sm:$0xff]  }
0x21b5   : > { %v14576_v10 = vpop.permute.xlu0 %14575 }
0x21b6   : > { %16240 = vmatmul.mubr.msk.bf16.vlgmr.msra.gmra.mrb[204].mxu0 %vm2475_vm14, %v19267_v1  ;;  %14392 = vmatprep.subr.bf16.mxu0 %v14380_v54 }
0x21b7   : > { %14393 = vmatpush1.bf16.msra.mxu0 %v14379_v29  ;;  %14424 = vmatprep.mubr.bf16.mxu0 %v22945_v40 }
0x21b8   : > { %v14446_v26 = vpop.permute.xlu1 %14445 }
0x21b9   : > { %v14448_v50 = vsel %vm1545_vm5, %v14442_v39, %v14446_v26  ;;  %v14450_v11 = vsel %vm1545_vm5, %v14446_v26, %v14442_v39 }
0x21ba   : > { %v14454_v25 = vmul.f32 %v14448_v50, %v22969_v35  ;;  %v14453_v2 = vmul.f32 %v14450_v11, %v22970_v61  ;;  %v14580_v35 = vpop.permute.xlu0 %14579 }
0x21bb   : > { %v14585_v63 = vsel %vm1699_vm8, %v14580_v35, %v14576_v10 }
0x21bc   : > { %v14456_v41 = vpack.c.bf16 %v14454_v25, %v14452_v12  ;;  %v14578_v5 = vpop.permute.xlu1 %14577  ;;  %v14455_v62 = vpack.c.bf16 %v14453_v2, %v14451_v7  ;;  %v14588_v32 = vmul.f32 %v14585_v63, %v22971_v43  ;;  %v19272_v12 = vld [vmem:[#allocation14 + $0x30] sm:$0xff]  }
0x21be   : > { %14468 = vmatprep.subr.bf16.mxu0 %v14456_v41  ;;  %v14652_v16 = vpop.permute.xlu0 %14651 }
0x21c0   : > { %v14582_v57 = vpop.permute.xlu1 %14581 }
0x21c1   : > { %v14586_v45 = vsel %vm1699_vm8, %v14582_v57, %v14578_v5  ;;  %v14584_v17 = vsel %vm1699_vm8, %v14578_v5, %v14582_v57 }
0x21c2   : > { %16242 = vmatmul.mubr.msk.bf16.vlgmr.msra.gmra.mrb[204].mxu0 %vm2475_vm14, %v19268_v23  ;;  %v14590_v61 = vmul.f32 %v14586_v45, %v22971_v43  ;;  %v14583_v43 = vsel %vm1699_vm8, %v14576_v10, %v14580_v35  ;;  %v14589_v19 = vmul.f32 %v14584_v17, %v22972_v22  ;;  %v19274_v10 = vld [vmem:[#allocation14 + $0x40] sm:$0xff]  }
0x21c3   : > { %14469 = vmatpush1.bf16.msra.mxu0 %v14455_v62  ;;  %14500 = vmatprep.mubr.bf16.mxu0 %v22945_v40  ;;  %v14587_v8 = vmul.f32 %v14583_v43, %v22972_v22  ;;  %v14926_v62 = vld [vmem:[%s19862_s25] sm:$0xf] }
0x21c4   : > { %14528 = vmatprep.subr.bf16.mxu0 %v14516_v58  ;;  %v14654_v3 = vpop.permute.xlu1 %14653  ;;  %v14592_v53 = vpack.c.bf16 %v14590_v61, %v14588_v32  ;;  %v14656_v58 = vpop.permute.xlu0 %14655  ;;  %14929 = vperm.xlu0 %18951, %v14926_v62  }
0x21c5   : > { %v14661_v37 = vsel %vm1787_vm9, %v14656_v58, %v14652_v16  ;;  %v14591_v52 = vpack.c.bf16 %v14589_v19, %v14587_v8  ;;  %v14659_v22 = vsel %vm1787_vm9, %v14652_v16, %v14656_v58 }
0x21c6   : > { %v14664_v13 = vmul.f32 %v14661_v37, %v22976_v24  ;;  %v14663_v34 = vmul.f32 %v14659_v22, %v22980_v31 }
0x21c8   : > { %v14658_v59 = vpop.permute.xlu1 %14657  ;;  %v14728_v14 = vpop.permute.xlu0 %14727 }
0x21c9   : > { %v14662_v21 = vsel %vm1787_vm9, %v14658_v59, %v14654_v3  ;;  %v14660_v0 = vsel %vm1787_vm9, %v14654_v3, %v14658_v59 }
0x21ca   : > { %v14666_v30 = vmul.f32 %v14662_v21, %v22976_v24  ;;  %v14665_v24 = vmul.f32 %v14660_v0, %v22980_v31 }
0x21cc   : > { %v14668_v55 = vpack.c.bf16 %v14666_v30, %v14664_v13  ;;  %v14732_v33 = vpop.permute.xlu0 %14731  ;;  %v14667_v1 = vpack.c.bf16 %v14665_v24, %v14663_v34 }
0x21cd   : > { %v14737_v36 = vsel %vm1875_vm10, %v14732_v33, %v14728_v14  ;;  %v14735_v31 = vsel %vm1875_vm10, %v14728_v14, %v14732_v33 }
0x21ce   : > { %16244 = vmatmul.mubr.msk.bf16.vlgmr.msra.gmra.mrb[204].mxu0 %vm2475_vm14, %v19269_v42  ;;  %v14740_v28 = vmul.f32 %v14737_v36, %v22981_v27  ;;  %v14739_v11 = vmul.f32 %v14735_v31, %v22982_v44 }
0x21cf   : > { %14529 = vmatpush1.bf16.msra.mxu0 %v14515_v47  ;;  %14560 = vmatprep.mubr.bf16.mxu0 %v22945_v40  ;;  %v14730_v47 = vpop.permute.xlu1 %14729 }
0x21d0   : > { %14604 = vmatprep.subr.bf16.mxu0 %v14592_v53  ;;  %v14804_v18 = vpop.permute.xlu0 %14803 }
0x21d3   : > { %v14734_v4 = vpop.permute.xlu1 %14733 }
0x21d4   : > { %v14738_v56 = vsel %vm1875_vm10, %v14734_v4, %v14730_v47  ;;  %v14736_v39 = vsel %vm1875_vm10, %v14730_v47, %v14734_v4  ;;  %v14808_v54 = vpop.permute.xlu0 %14807  ;;  %v14923_v4 = vld [vmem:[%s22985_s8] sm:$0x3]  ;;  %s19533_s8 = scalar_lea.vmem %s22684_s9, 128 }
0x21d5   : > { %v14742_v38 = vmul.f32 %v14738_v56, %v22981_v27  ;;  %v14741_v27 = vmul.f32 %v14736_v39, %v22982_v44  ;;  %v14813_v26 = vsel %vm1963_vm11, %v14808_v54, %v14804_v18  ;;  %v14811_v5 = vsel %vm1963_vm11, %v14804_v18, %v14808_v54  ;;  %v19273_v44 = vld [vmem:[#allocation14 + $0x38] sm:$0xff]   ;;  %p19534_p5 = scmp.ne.s32.totalorder %s22684_s9, %s19533_s8  ;;  %p19541_p3 = scmp.lt.s32.totalorder %s19539_s12, %s19533_s8 }
0x21d6   : > { %v14816_v25 = vmul.f32 %v14813_v26, %v22983_v20 }
0x21d7   : > { %v14806_v60 = vpop.permute.xlu1 %14805  ;;  %v14744_v29 = vpack.c.bf16 %v14742_v38, %v14740_v28  ;;  %v14743_v49 = vpack.c.bf16 %v14741_v27, %v14739_v11  ;;  %p19535_p10 = pnand %p19534_p5, %p22988_p7  ;;  %p19542_p6 = por %p19541_p3, %p19540_p9 }
0x21d9   : > { %p19536_p11 = pneg %p19535_p10 }
0x21da   : > { %16246 = vmatmul.mubr.msk.bf16.vlgmr.msra.gmra.mrb[204].mxu0 %vm2475_vm14, %v19270_v15 }
0x21db   : > { %14605 = vmatpush1.bf16.msra.mxu0 %v14591_v52  ;;  %14636 = vmatprep.mubr.bf16.mxu0 %v22945_v40  ;;  %v14810_v9 = vpop.permute.xlu1 %14809  ;;  %p19543_p0 = pnand %p19542_p6, %p19536_p11 }
0x21dc   : > { %14680 = vmatprep.subr.bf16.mxu0 %v14668_v55  ;;  %v14814_v46 = vsel %vm1963_vm11, %v14810_v9, %v14806_v60  ;;  %v14812_v2 = vsel %vm1963_vm11, %v14806_v60, %v14810_v9 }
0x21dd   : > { %v14818_v50 = vmul.f32 %v14814_v46, %v22983_v20  ;;  %v14817_v23 = vmul.f32 %v14812_v2, %v22984_v51  ;;  %v14815_v20 = vmul.f32 %v14811_v5, %v22984_v51 }
0x21df   : > { %v14820_v41 = vpack.c.bf16 %v14818_v50, %v14816_v25  ;;  %v14819_v7 = vpack.c.bf16 %v14817_v23, %v14815_v20 }
0x21e2   : > { %v14884_v35 = vpop.permute.xlu0 %14883 }
0x21e6   : > { %16248 = vmatmul.mubr.msk.bf16.vlgmr.msra.gmra.mrb[204].mxu0 %vm2475_vm14, %v19271_v6 }
0x21e7   : > { %14681 = vmatpush1.bf16.msra.mxu0 %v14667_v1  ;;  %14712 = vmatprep.mubr.bf16.mxu0 %v22945_v40  ;;  %v14905_v58 = vpop.permute.xlu0 %14904 }
0x21e8   : > { %14756 = vmatprep.subr.bf16.mxu0 %v14744_v29 }
0x21e9   : > { %v14889_v48 = vpop.permute.xlu1 %14888 }
0x21ee   : > { %v14901_v57 = vpop.permute.xlu1 %14900 }
0x21f2   : > { %16250 = vmatmul.mubr.msk.bf16.vlgmr.msra.gmra.mrb[204].mxu0 %vm2475_vm14, %v19272_v12 }
0x21f3   : > { %14757 = vmatpush1.bf16.msra.mxu0 %v14743_v49  ;;  %14788 = vmatprep.mubr.bf16.mxu0 %v22945_v40  ;;  %v14913_v42 = vpop.permute.xlu1 %14912 }
0x21f4   : > { %14832 = vmatprep.subr.bf16.mxu0 %v14820_v41 }
0x21f7   : > { %v14917_v47 = vpop.permute.xlu1 %14916 }
0x21fe   : > { %16252 = vmatmul.mubr.msk.bf16.vlgmr.msra.gmra.mrb[204].mxu0 %vm2475_vm14, %v19273_v44 }
0x21ff   : > { %14833 = vmatpush1.bf16.msra.mxu0 %v14819_v7  ;;  %14864 = vmatprep.mubr.bf16.mxu0 %v22945_v40 }
0x220a   : > { %16254 = vmatmul.mubr.msk.bf16.vlgmr.msra.gmra.mrb[204].mxu0 %vm2475_vm14, %v19274_v10 }
0x220b   : > { %14967 = vmatprep.mubr.bf16.mxu0 %v22945_v40 }
0x2243   : > { %v14930_v0 = vpop.permute.xlu0 %14929 }
0x22dd   : > { %v14866_v45 = vpop.f32.mrb[204].mxu0 }
0x22de   : > { %v14891_v63 = vadd.f32 %v14884_v35, %v14866_v45  ;;  %v14868_v61 = vpop.f32.mrb[205].mxu0 }
0x22df   : > { %v14892_v51 = vadd.f32 %v14884_v35, %v14868_v61  ;;  %v14870_v3 = vpop.f32.mrb[206].mxu0 }
0x22e0   : > { %v14895_v32 = vmax.f32 %v14891_v63, 0.0  ;;  %v14893_v16 = vadd.f32 %v14889_v48, %v14870_v3  ;;  %v14872_v53 = vpop.f32.mrb[207].mxu0 }
0x22e1   : > { %v14896_v59 = vmax.f32 %v14892_v51, 0.0  ;;  %v14894_v17 = vadd.f32 %v14889_v48, %v14872_v53 }
0x22e2   : > { %v14907_v21 = vmul.f32 %v14901_v57, %v14895_v32  ;;  %v14897_v40 = vmax.f32 %v14893_v16, 0.0 }
0x22e3   : > { %v14908_v43 = vmul.f32 %v14901_v57, %v14896_v59  ;;  %v14898_v19 = vmax.f32 %v14894_v17, 0.0 }
0x22e4   : > { %v14909_v37 = vmul.f32 %v14905_v58, %v14897_v40  ;;  %v14919_v15 = vadd.f32 %v14913_v42, %v14907_v21 }
0x22e5   : > { %v14910_v30 = vmul.f32 %v14905_v58, %v14898_v19  ;;  %v14920_v13 = vadd.f32 %v14913_v42, %v14908_v43 }
0x22e6   : > { %v14921_v8 = vadd.f32 %v14917_v47, %v14909_v37 }
0x22e7   : > { %v14922_v14 = vadd.f32 %v14917_v47, %v14910_v30 }
0x22e8   : > { %v14924_v52 = vpack.c.bf16 %v14921_v8, %v14919_v15 }
0x22e9   : > { %v14925_v55 = vpack.c.bf16 %v14922_v14, %v14920_v13 }
0x22eb   : > { %14935 = vmatprep.subr.bf16.mxu0 %v14925_v55 }
0x22ec   : > { %14936 = vmatpush1.bf16.msra.mxu0 %v14924_v52 }
0x22ef   : > { %16255 = vmatmul.mubr.msk.bf16.vlgmr.msra.gmra.mrb[208].mxu0 %vm2475_vm14, %v14923_v4 }
0x23c2   : > { %v14969_v33 = vpop.f32.mrb[208].mxu0 }
0x23c3   : > { %v14971_v56 = vpop.f32.mrb[209].mxu0  ;;  %v14970_v22 = vadd.f32 %v14969_v33, %v14930_v0 }
0x23c4   : > { %v14973_v24 = vpop.f32.mrb[210].mxu0  ;;  %v14972_v36 = vadd.f32 %v14971_v56, %v14930_v0 }
0x23c5   : > { %v14974_v38 = vpop.f32.mrb[211].mxu0 }
0x23c6   : > { %v14978_v60 = vcombine.low %v14970_v22, %v14972_v36 }
0x23c8   : > { %14980 = vst [vmem:[%s1216_s10] sm:$0xff] %v14978_v60 }
0x23c9   : > { %19546 = shalt.err (!%p19543_p0)
}
0x23ca   : > { %s19547_s17 = scalar_lea.hbm %s22682_s5, 128  ;;  %s19551_s6 = scalar_lea.hbm %s22986_s14, 256 }
0x23cb   : > { %p19548_p2 = scmp.ne.s32.totalorder %s22682_s5, %s19547_s17  ;;  %p19552_p1 = scmp.lt.u32.totalorder %s22682_s5, %s22986_s14 }
0x23cc   : > { %p19553_p12 = scmp.lt.u32.totalorder %s19551_s6, %s19547_s17  ;;  %p19555_p5 = scmp.lt.u32.totalorder %s19547_s17, %s22682_s5 }
0x23cd   : > { %p19549_p8 = pnand %p19548_p2, %p22988_p7 }
0x23ce   : > { %p19554_p13 = por %p19553_p12, %p19552_p1 }
0x23cf   : > { %p19550_p4 = pneg %p19549_p8 }
0x23d0   : > { %p19556_p10 = por %p19555_p5, %p19554_p13 }
0x23d2   : > { %p19557_p11 = pnand %p19556_p10, %p19550_p4 }
0x23d4   : > { %19560 = shalt.err (!%p19557_p11)
}
0x23d5   : > { %18746 = dma.vmem_to_hbm [thread:$0]  (%p22988_p7), %s22684_s9, 128, %s22682_s5, %s14982_s0  }
0x23d6 PF: > { %s15008_s12 = sand.u32 1, %s19603_s28   ;;  %p22989_p9 = scmp.ne.s32.totalorder %s22886_s29, 0 }
0x23d7   : > { %p22990_p3 = scmp.ge.s32.totalorder %s19615_s7, 2  ;;  %s15009_s10 = scalar_lea.sflag [#allocation4], %s15008_s12 }
0x23d9   : > { %p18775_p6 = pnand %p22990_p3, %p22989_p9 }
0x23db   : > { %19598 = dma.done.wait (!%p18775_p6), %s15009_s10, 128  }
0x23dc   : > { %19600 = vsyncadd (!%p18775_p6), %s15009_s10, 4294967168  ;;  %p90_p0 = scmp.ge.s32.totalorder %s20021_s16, 4   ;;  %s22991_s28 = smov %s19607_s1 }
0x23dd   : > { %s22992_s1 = smov %s19611_s2  ;;  %s22993_s2 = smov %s20033_s26 }
0x23de   : > { %s22994_s7 = smov %s20021_s16  ;;  %92 = sbr.rel (!%p90_p0) target bundleno = 81 (0x51), region = 394 }
0x23e5   :  { %15014 = vsyncpa [#allocation3], 1 }
0x23e6   :  { %15016 = vsyncpa [#allocation3 + $0x1], 1 }
0x23e7   :  { %15017 = vsyncpa [#allocation6], 1 }
0x23e8   :  { %15018 = vsyncpa [#allocation9], 1 }
0x23e9   :  { %15019 = vsyncpa [#allocation12], 1 }
0x23ea   :  { %15020 = vsyncpa [#allocation15], 1 }
0x23eb   :  { %15021 = vsyncpa [#allocation4], 1 }
0x23ec   :  { %15023 = vsyncpa [#allocation4 + $0x1], 1 }

</bundles_post_ra>
